<compile_context>
chip_gen: v7x
topology: tpu7x:2x2x1
jax: 0.10.0
libtpu: 0.0.40
codegen_flags: <defaults>
</compile_context>

<pallas_src>
import functools

import jax
import jax.numpy as jnp
from jax.experimental import pallas as pl
from jax.experimental.pallas import tpu as pltpu

# ---------------- small synthetic Wav2Vec2 config (same architecture, tiny sizes) -------------
HIDDEN = 32
N_LAYERS = 2
N_HEADS = 4
HEAD_DIM = HIDDEN // N_HEADS
INTERMEDIATE = 64
CONV_DIM = (16, 16)
CONV_KERNEL = (5, 3)
CONV_STRIDE = (2, 2)
POS_CONV_KERNEL = 8          # even -> SamePadLayer drops the trailing frame
POS_CONV_GROUPS = 4
LN_EPS = 1e-5

# MXU input dtype: bf16 inputs, f32 accumulation (preferred_element_type).  ~1e-3 deviation vs
# the f32 PyTorch reference (same order as the tanh-GELU approximation); set to jnp.float32 for
# strict parity checks.
MATMUL_DTYPE = jnp.bfloat16

# conv1 tap -> (phase, shift) decomposition (stride-2 conv on stride-2 phase-split frames)
_EVEN_TAPS = tuple(k for k in range(CONV_KERNEL[1]) if k % 2 == 0)
_ODD_TAPS = tuple(k for k in range(CONV_KERNEL[1]) if k % 2 == 1)
_POS_PAD_OFF = 8             # sublane-aligned row where the real frames start in the pad scratch


# ---------------- in-kernel math helpers ------------------------------------------------------
def _mm(a, b):
    # (M, K) x (K, N) contraction on the MXU; bf16 inputs, f32 accumulation.
    return jnp.dot(a.astype(MATMUL_DTYPE), b.astype(MATMUL_DTYPE),
                   preferred_element_type=jnp.float32)


def _mm_t(a, b):
    # a @ b.T without materializing the transpose (contract the last dim of both operands).
    return jax.lax.dot_general(a.astype(MATMUL_DTYPE), b.astype(MATMUL_DTYPE),
                               (((1,), (1,)), ((), ())),
                               preferred_element_type=jnp.float32)


def _gelu(x):
    # tanh-approximation GELU: tanh runs on the EUP slot, keeping VALU slots free.
    # TODO(synk): HF "gelu" is the exact erf form; the tanh approximation differs by ~1e-3.
    return 0.5 * x * (1.0 + jnp.tanh(0.7978845608028654 * (x + 0.044715 * x * x * x)))


def _ln(x, g, b, eps=LN_EPS):
    mu = jnp.mean(x, axis=-1, keepdims=True)
    d = x - mu
    var = jnp.mean(d * d, axis=-1, keepdims=True)
    return d * jax.lax.rsqrt(var + eps) * g + b


# ---------------- fully fused forward kernel ---------------------------------------------------
def _fused_forward_kernel(
        ph_ref, w0_ref, gng_ref, gnb_ref, w1e_ref, w1o_ref,
        fplng_ref, fplnb_ref, fpw_ref, fpb_ref,
        posw_ref, posb_ref, elng_ref, elnb_ref,
        wproj_ref, bproj_ref, battn_ref, lng_ref, lnb_ref,
        ffw1_ref, ffb1_ref, ffw2_ref, ffb2_ref, flng_ref, flnb_ref,
        clsw_ref, clsb_ref,
        o_ref, x_ref, hpad_ref, *, batch, half0, t1):
    """Whole TriggerWordWav2Vec2 forward for the full batch in one kernel invocation."""
    H = HIDDEN
    nc0, nc1 = CONV_DIM

    ph_all = ph_ref[...]                         # (B, T_audio/(2*s0), 2*s0)
    w0 = w0_ref[...]                             # (K0, C0)
    gng, gnb = gng_ref[...], gnb_ref[...]
    w1e, w1o = w1e_ref[...], w1o_ref[...]        # (C0, n_even*C1), (C0, n_odd*C1)
    fplng, fplnb = fplng_ref[...], fplnb_ref[...]
    fpw, fpb = fpw_ref[...], fpb_ref[...]
    posw, posb = posw_ref[...], posb_ref[...]    # (H, Kp*H), (1, H)
    elng, elnb = elng_ref[...], elnb_ref[...]

    k0 = w0.shape[0]
    ph_per = ph_all.shape[2]

    # conv0 taps merged into contiguous column blocks of the phase-split audio (trace-time plan)
    def _conv0_pieces(base):
        pieces, k = [], 0
        while k < k0:
            idx = base + k
            m, q = idx // ph_per, idx % ph_per
            width = min(k0 - k, ph_per - q)
            pieces.append((k, m, q, width))
            k += width
        return pieces

    phase_pieces = (_conv0_pieces(0), _conv0_pieces(CONV_STRIDE[0]))

    # zero the pos-conv padding scratch ONCE; only its interior rows are overwritten per batch.
    hpad_ref[...] = jnp.zeros(hpad_ref.shape, jnp.float32)

    # ---------------- frontend (per batch element), writing the flattened (B*T, H) state -------
    for b in range(batch):
        ph = ph_all[b]                                            # (T_audio/4, 4)

        # conv0 (stride 2, C_in=1, no bias), phase-split so every tap block is a static slice
        def conv0_phase(pieces):
            acc = jnp.zeros((half0, nc0), jnp.float32)
            for (k, m, q, width) in pieces:
                blk = ph[m:m + half0, q:q + width]
                if width == 1:
                    acc = acc + blk * w0[k:k + 1, :]              # rank-1 tap on the VPU
                else:
                    acc = acc + _mm(blk, w0[k:k + width, :])      # contiguous taps on the MXU
            return acc

        ce = conv0_phase(phase_pieces[0])                         # even conv0 frames (half0, C0)
        co = conv0_phase(phase_pieces[1])                         # odd  conv0 frames (half0, C0)

        # GroupNorm(num_groups == channels): per-channel stats over all 2*half0 frames, then GELU
        n = 2.0 * half0
        mu = (jnp.sum(ce, axis=0, keepdims=True) + jnp.sum(co, axis=0, keepdims=True)) / n
        de, do = ce - mu, co - mu
        var = (jnp.sum(de * de, axis=0, keepdims=True)
               + jnp.sum(do * do, axis=0, keepdims=True)) / n
        inv = jax.lax.rsqrt(var + LN_EPS)
        ge = _gelu(de * inv * gng + gnb)
        go = _gelu(do * inv * gng + gnb)

        # conv1 (stride 2, no bias): project each phase against all of its taps at once,
        # then shift-add the per-tap lane blocks; + GELU.
        ye = _mm(ge, w1e)                                         # (half0, n_even*C1)
        yo = _mm(go, w1o)                                         # (half0, n_odd*C1)
        c1 = jnp.zeros((t1, nc1), jnp.float32)
        for i, k in enumerate(_EVEN_TAPS):
            c1 = c1 + ye[k // 2:k // 2 + t1, i * nc1:(i + 1) * nc1]
        for i, k in enumerate(_ODD_TAPS):
            c1 = c1 + yo[k // 2:k // 2 + t1, i * nc1:(i + 1) * nc1]
        c1 = _gelu(c1)

        # feature projection: LayerNorm -> Linear
        h0 = _mm(_ln(c1, fplng, fplnb), fpw) + fpb                # (t1, H)

        # grouped positional conv (SamePad drops the trailing frame): project the zero-padded
        # frames against all Kp tap weights at once, then shift-add the per-tap lane blocks.
        hpad_ref[_POS_PAD_OFF:_POS_PAD_OFF + t1, :] = h0          # sublane-aligned store
        y = _mm(hpad_ref[...], posw)                              # (pad_rows, Kp*H)
        shift0 = _POS_PAD_OFF - POS_CONV_KERNEL // 2
        pos = jnp.zeros((t1, H), jnp.float32)
        for k in range(POS_CONV_KERNEL):
            pos = pos + y[shift0 + k:shift0 + k + t1, k * H:(k + 1) * H]
        pos = _gelu(pos + posb)

        # residual + encoder-input LayerNorm, written into the flattened hidden-state scratch
        x_ref[b * t1:(b + 1) * t1, :] = _ln(h0 + pos, elng, elnb)

    x = x_ref[...]                                                # (B*t1, H)

    # ---------------- transformer encoder layers (weights stacked over the layer axis) ---------
    wproj_all, bproj_all, battn_all = wproj_ref[...], bproj_ref[...], battn_ref[...]
    lng_all, lnb_all = lng_ref[...], lnb_ref[...]
    ffw1_all, ffb1_all = ffw1_ref[...], ffb1_ref[...]
    ffw2_all, ffb2_all = ffw2_ref[...], ffb2_ref[...]
    flng_all, flnb_all = flng_ref[...], flnb_ref[...]

    for l in range(N_LAYERS):
        # fused projection: [Wq*scale | Wk | per-head Wv_h @ Wo_h] -> (B*t1, 2H + NH*H)
        proj = _mm(x, wproj_all[l]) + bproj_all[l]
        for b in range(batch):
            r = b * t1
            attn = battn_all[l]                                   # (1, H): bv@Wo + bo, prefolded
            for hd in range(N_HEADS):
                c = hd * HEAD_DIM
                q = proj[r:r + t1, c:c + HEAD_DIM]                # softmax scale pre-folded
                k = proj[r:r + t1, H + c:H + c + HEAD_DIM]
                s = _mm_t(q, k)                                   # (t1, t1)
                s = s - jnp.max(s, axis=-1, keepdims=True)
                p = jnp.exp(s)
                p = p * pl.reciprocal(jnp.sum(p, axis=-1, keepdims=True), approx=True)
                vo = proj[r:r + t1, 2 * H + hd * H:2 * H + (hd + 1) * H]
                attn = attn + _mm(p, vo)                          # context @ Wo fused per head
            # residual + LayerNorm, re-flattened through the hidden-state scratch
            x_ref[r:r + t1, :] = _ln(x[r:r + t1, :] + attn, lng_all[l], lnb_all[l])
        x = x_ref[...]
        ff = _gelu(_mm(x, ffw1_all[l]) + ffb1_all[l])
        x = _ln(x + _mm(ff, ffw2_all[l]) + ffb2_all[l], flng_all[l], flnb_all[l])

    # ---------------- mean-pool over time + classifier (VPU lane reduction) + sigmoid ----------
    clsw, clsb = clsw_ref[...], clsb_ref[...]                     # (1, H), (1, 1)
    for b in range(batch):
        pooled = jnp.mean(x[b * t1:(b + 1) * t1, :], axis=0, keepdims=True)   # (1, H)
        logit = jnp.sum(pooled * clsw, axis=-1, keepdims=True) + clsb         # (1, 1)
        o_ref[b:b + 1, :] = 1.0 / (1.0 + jnp.exp(-logit))


# ---------------- model forward -----------------------------------------------------------------
@jax.jit
def trigger_word_wav2vec2(input_values, fw):
    B, ta = input_values.shape
    ph_per = 2 * CONV_STRIDE[0]
    t0 = (ta - CONV_KERNEL[0]) // CONV_STRIDE[0] + 1
    t1 = (t0 - CONV_KERNEL[1]) // CONV_STRIDE[1] + 1
    # static (trace-time) checks that the phase-split convs cover the input exactly
    assert ta % ph_per == 0 and t0 % 2 == 0
    assert (CONV_STRIDE[0] + CONV_KERNEL[0] - 1) // ph_per + t0 // 2 <= ta // ph_per
    assert t0 // 2 >= (CONV_KERNEL[1] - 1) // 2 + t1
    phases = input_values.reshape(B, ta // ph_per, ph_per)     # phases[b, m, q] = x[b, 4m + q]

    weight_keys = ('w0', 'gn_g', 'gn_b', 'w1e', 'w1o', 'fp_ln_g', 'fp_ln_b', 'fp_w', 'fp_b',
                   'pos_w', 'pos_b', 'enc_ln_g', 'enc_ln_b',
                   'l_wproj', 'l_bproj', 'l_battn', 'l_ln_g', 'l_ln_b',
                   'l_ff_w1', 'l_ff_b1', 'l_ff_w2', 'l_ff_b2', 'l_fln_g', 'l_fln_b',
                   'cls_w', 'cls_b')
    pad_rows = _POS_PAD_OFF + t1 + POS_CONV_KERNEL

    # Single fused invocation (no grid): whole batch, all layers, weights VMEM-resident.
    probs = pl.pallas_call(
        functools.partial(_fused_forward_kernel, batch=B, half0=t0 // 2, t1=t1),
        out_shape=jax.ShapeDtypeStruct((B, 1), jnp.float32),
        scratch_shapes=[pltpu.VMEM((B * t1, HIDDEN), jnp.float32),      # flattened hidden state
                        pltpu.VMEM((pad_rows, HIDDEN), jnp.float32)],   # pos-conv zero padding
    )(phases, *[fw[k] for k in weight_keys])
    return probs


# ---------------- parameter preparation (one-time, outside the kernel) --------------------------
def prep_params(p):
    """Convert PyTorch-layout weights into the fused / pre-transposed layouts the kernel uses."""
    hg, kp = HIDDEN // POS_CONV_GROUPS, POS_CONV_KERNEL
    scale = 1.0 / (HEAD_DIM ** 0.5)
    row = lambda a: a.reshape(1, -1)
    T = jnp.transpose

    # block-diagonal grouped pos-conv weight, all taps concatenated along lanes: (H, Kp*H)
    wbd = jnp.zeros((kp, HIDDEN, HIDDEN), jnp.float32)
    for g in range(POS_CONV_GROUPS):
        blk = p['pos_conv_w'][g * hg:(g + 1) * hg]               # (Hg, Hg, Kp): [co, ci, k]
        wbd = wbd.at[:, g * hg:(g + 1) * hg, g * hg:(g + 1) * hg].set(T(blk, (2, 1, 0)))
    pos_w = T(wbd, (1, 0, 2)).reshape(HIDDEN, kp * HIDDEN)       # column block k holds tap k

    # conv1 weights grouped by phase, taps concatenated along lanes
    w1_t = T(p['conv1_w'], (2, 1, 0))                            # (K1, C_in, C_out)
    pick = lambda taps: T(w1_t[jnp.array(taps)], (1, 0, 2)).reshape(CONV_DIM[0], -1)

    fw = {
        'w0': T(p['conv0_w'][:, 0, :]),                          # (K0, C0)
        'gn_g': row(p['gn_g']), 'gn_b': row(p['gn_b']),
        'w1e': pick(_EVEN_TAPS), 'w1o': pick(_ODD_TAPS),
        'fp_ln_g': row(p['fp_ln_g']), 'fp_ln_b': row(p['fp_ln_b']),
        'fp_w': T(p['fp_w']), 'fp_b': row(p['fp_b']),
        'pos_w': pos_w, 'pos_b': row(p['pos_conv_b']),
        'enc_ln_g': row(p['enc_ln_g']), 'enc_ln_b': row(p['enc_ln_b']),
        'cls_w': p['cls_w'].reshape(1, HIDDEN), 'cls_b': p['cls_b'].reshape(1, 1),
    }

    # encoder layers: fold softmax scale into Wq/bq, fold Wv_h @ Wo_h per head, fold the V/O
    # biases into one attention-bias row (softmax rows sum to 1), stack everything over L.
    def proj_w(lp):
        wq, wk = T(lp['q_w']) * scale, T(lp['k_w'])
        wv, wo = T(lp['v_w']), T(lp['o_w'])
        wvo = [wv[:, h * HEAD_DIM:(h + 1) * HEAD_DIM] @ wo[h * HEAD_DIM:(h + 1) * HEAD_DIM, :]
               for h in range(N_HEADS)]
        return jnp.concatenate([wq, wk] + wvo, axis=1)           # (H, 2H + NH*H)

    def proj_b(lp):
        return jnp.concatenate([lp['q_b'] * scale, lp['k_b'],
                                jnp.zeros((N_HEADS * HIDDEN,), jnp.float32)]).reshape(1, -1)

    def attn_b(lp):
        return row(lp['v_b']) @ T(lp['o_w']) + row(lp['o_b'])    # (1, H)

    stack = lambda f: jnp.stack([f(lp) for lp in p['layers']], axis=0)
    fw.update({
        'l_wproj': stack(proj_w), 'l_bproj': stack(proj_b), 'l_battn': stack(attn_b),
        'l_ln_g': stack(lambda lp: row(lp['ln_g'])), 'l_ln_b': stack(lambda lp: row(lp['ln_b'])),
        'l_ff_w1': stack(lambda lp: T(lp['ff1_w'])), 'l_ff_b1': stack(lambda lp: row(lp['ff1_b'])),
        'l_ff_w2': stack(lambda lp: T(lp['ff2_w'])), 'l_ff_b2': stack(lambda lp: row(lp['ff2_b'])),
        'l_fln_g': stack(lambda lp: row(lp['fln_g'])),
        'l_fln_b': stack(lambda lp: row(lp['fln_b'])),
    })
    return fw


# ---------------- deterministic parameter init (PyTorch layouts) --------------------------------
def init_params(key):
    keys = iter(jax.random.split(key, 128))

    def w(shape, scale=0.02):
        return scale * jax.random.normal(next(keys), shape, jnp.float32)

    p = {
        'conv0_w': w((CONV_DIM[0], 1, CONV_KERNEL[0]), 0.5),
        'gn_g': 1.0 + w((CONV_DIM[0],), 0.1), 'gn_b': w((CONV_DIM[0],), 0.1),
        'conv1_w': w((CONV_DIM[1], CONV_DIM[0], CONV_KERNEL[1]), 0.2),
        'fp_ln_g': 1.0 + w((CONV_DIM[1],), 0.1), 'fp_ln_b': w((CONV_DIM[1],), 0.1),
        'fp_w': w((HIDDEN, CONV_DIM[1])), 'fp_b': w((HIDDEN,)),
        'pos_conv_w': w((HIDDEN, HIDDEN // POS_CONV_GROUPS, POS_CONV_KERNEL)),
        'pos_conv_b': w((HIDDEN,)),
        'enc_ln_g': 1.0 + w((HIDDEN,), 0.1), 'enc_ln_b': w((HIDDEN,), 0.1),
        'cls_w': w((1, HIDDEN)), 'cls_b': w((1,)),
        'layers': [],
    }
    for _ in range(N_LAYERS):
        p['layers'].append({
            'q_w': w((HIDDEN, HIDDEN)), 'q_b': w((HIDDEN,)),
            'k_w': w((HIDDEN, HIDDEN)), 'k_b': w((HIDDEN,)),
            'v_w': w((HIDDEN, HIDDEN)), 'v_b': w((HIDDEN,)),
            'o_w': w((HIDDEN, HIDDEN)), 'o_b': w((HIDDEN,)),
            'ln_g': 1.0 + w((HIDDEN,), 0.1), 'ln_b': w((HIDDEN,), 0.1),
            'ff1_w': w((INTERMEDIATE, HIDDEN)), 'ff1_b': w((INTERMEDIATE,)),
            'ff2_w': w((HIDDEN, INTERMEDIATE)), 'ff2_b': w((HIDDEN,)),
            'fln_g': 1.0 + w((HIDDEN,), 0.1), 'fln_b': w((HIDDEN,), 0.1),
        })
    return p


if __name__ == "__main__":
    key = jax.random.PRNGKey(0)
    pkey, xkey = jax.random.split(key)
    params = prep_params(init_params(pkey))
    # raw waveform batch (B=2, T_audio=64) -> conv stack gives T'=14 frames of width H=32
    input_values = jax.random.normal(xkey, (2, 64), jnp.float32)

    out = trigger_word_wav2vec2(input_values, params)
    out = jax.block_until_ready(out)

    assert out.shape == (2, 1), out.shape
    assert bool(jnp.all(jnp.isfinite(out)))
    assert bool(jnp.all((out >= 0.0) & (out <= 1.0)))
    print("KERNEL_OK")
</pallas_src>

<mosaic_0001>
module attributes {stable_mosaic.version = 11 : i64} {
  func.func @_fused_forward_kernel(%arg0: memref<2x16x4xf32, #tpu.memory_space<vmem>>, %arg1: memref<5x16xf32, #tpu.memory_space<vmem>>, %arg2: memref<1x16xf32, #tpu.memory_space<vmem>>, %arg3: memref<1x16xf32, #tpu.memory_space<vmem>>, %arg4: memref<16x32xf32, #tpu.memory_space<vmem>>, %arg5: memref<16x16xf32, #tpu.memory_space<vmem>>, %arg6: memref<1x16xf32, #tpu.memory_space<vmem>>, %arg7: memref<1x16xf32, #tpu.memory_space<vmem>>, %arg8: memref<16x32xf32, #tpu.memory_space<vmem>>, %arg9: memref<1x32xf32, #tpu.memory_space<vmem>>, %arg10: memref<32x256xf32, #tpu.memory_space<vmem>>, %arg11: memref<1x32xf32, #tpu.memory_space<vmem>>, %arg12: memref<1x32xf32, #tpu.memory_space<vmem>>, %arg13: memref<1x32xf32, #tpu.memory_space<vmem>>, %arg14: memref<2x32x192xf32, #tpu.memory_space<vmem>>, %arg15: memref<2x1x192xf32, #tpu.memory_space<vmem>>, %arg16: memref<2x1x32xf32, #tpu.memory_space<vmem>>, %arg17: memref<2x1x32xf32, #tpu.memory_space<vmem>>, %arg18: memref<2x1x32xf32, #tpu.memory_space<vmem>>, %arg19: memref<2x32x64xf32, #tpu.memory_space<vmem>>, %arg20: memref<2x1x64xf32, #tpu.memory_space<vmem>>, %arg21: memref<2x64x32xf32, #tpu.memory_space<vmem>>, %arg22: memref<2x1x32xf32, #tpu.memory_space<vmem>>, %arg23: memref<2x1x32xf32, #tpu.memory_space<vmem>>, %arg24: memref<2x1x32xf32, #tpu.memory_space<vmem>>, %arg25: memref<1x32xf32, #tpu.memory_space<vmem>>, %arg26: memref<1x1xf32, #tpu.memory_space<vmem>>, %arg27: memref<2x1xf32, #tpu.memory_space<vmem>>, %arg28: memref<28x32xf32, #tpu.memory_space<vmem>>, %arg29: memref<30x32xf32, #tpu.memory_space<vmem>>) attributes {dimension_semantics = [], scalar_prefetch = 0 : i64, scratch_operands = 2 : i64, tpu.core_type = #tpu.core_type<tc>} {
    %c0 = arith.constant 0 : index
    %c0_0 = arith.constant 0 : index
    %c0_1 = arith.constant 0 : index
    %0 = vector.load %arg0[%c0, %c0_0, %c0_1] : memref<2x16x4xf32, #tpu.memory_space<vmem>>, vector<2x16x4xf32>
    %c0_2 = arith.constant 0 : index
    %c0_3 = arith.constant 0 : index
    %1 = vector.load %arg1[%c0_2, %c0_3] : memref<5x16xf32, #tpu.memory_space<vmem>>, vector<5x16xf32>
    %c0_4 = arith.constant 0 : index
    %c0_5 = arith.constant 0 : index
    %2 = vector.load %arg2[%c0_4, %c0_5] : memref<1x16xf32, #tpu.memory_space<vmem>>, vector<1x16xf32>
    %c0_6 = arith.constant 0 : index
    %c0_7 = arith.constant 0 : index
    %3 = vector.load %arg3[%c0_6, %c0_7] : memref<1x16xf32, #tpu.memory_space<vmem>>, vector<1x16xf32>
    %c0_8 = arith.constant 0 : index
    %c0_9 = arith.constant 0 : index
    %4 = vector.load %arg4[%c0_8, %c0_9] : memref<16x32xf32, #tpu.memory_space<vmem>>, vector<16x32xf32>
    %c0_10 = arith.constant 0 : index
    %c0_11 = arith.constant 0 : index
    %5 = vector.load %arg5[%c0_10, %c0_11] : memref<16x16xf32, #tpu.memory_space<vmem>>, vector<16x16xf32>
    %c0_12 = arith.constant 0 : index
    %c0_13 = arith.constant 0 : index
    %6 = vector.load %arg6[%c0_12, %c0_13] : memref<1x16xf32, #tpu.memory_space<vmem>>, vector<1x16xf32>
    %c0_14 = arith.constant 0 : index
    %c0_15 = arith.constant 0 : index
    %7 = vector.load %arg7[%c0_14, %c0_15] : memref<1x16xf32, #tpu.memory_space<vmem>>, vector<1x16xf32>
    %c0_16 = arith.constant 0 : index
    %c0_17 = arith.constant 0 : index
    %8 = vector.load %arg8[%c0_16, %c0_17] : memref<16x32xf32, #tpu.memory_space<vmem>>, vector<16x32xf32>
    %c0_18 = arith.constant 0 : index
    %c0_19 = arith.constant 0 : index
    %9 = vector.load %arg9[%c0_18, %c0_19] : memref<1x32xf32, #tpu.memory_space<vmem>>, vector<1x32xf32>
    %c0_20 = arith.constant 0 : index
    %c0_21 = arith.constant 0 : index
    %10 = vector.load %arg10[%c0_20, %c0_21] : memref<32x256xf32, #tpu.memory_space<vmem>>, vector<32x256xf32>
    %c0_22 = arith.constant 0 : index
    %c0_23 = arith.constant 0 : index
    %11 = vector.load %arg11[%c0_22, %c0_23] : memref<1x32xf32, #tpu.memory_space<vmem>>, vector<1x32xf32>
    %c0_24 = arith.constant 0 : index
    %c0_25 = arith.constant 0 : index
    %12 = vector.load %arg12[%c0_24, %c0_25] : memref<1x32xf32, #tpu.memory_space<vmem>>, vector<1x32xf32>
    %c0_26 = arith.constant 0 : index
    %c0_27 = arith.constant 0 : index
    %13 = vector.load %arg13[%c0_26, %c0_27] : memref<1x32xf32, #tpu.memory_space<vmem>>, vector<1x32xf32>
    %cst = arith.constant 0.000000e+00 : f32
    %14 = vector.broadcast %cst : f32 to vector<30x32xf32>
    %c0_28 = arith.constant 0 : index
    %c0_29 = arith.constant 0 : index
    %15 = vector.load %arg29[%c0_28, %c0_29] : memref<30x32xf32, #tpu.memory_space<vmem>>, vector<30x32xf32>
    tpu.vector_store %arg29[%c0_28, %c0_29], %14 {strides = array<i32>} : memref<30x32xf32, #tpu.memory_space<vmem>>, vector<30x32xf32>,
    %16 = vector.extract_strided_slice %0 {offsets = [0, 0, 0], sizes = [1, 16, 4], strides = [1, 1, 1]} : vector<2x16x4xf32> to vector<1x16x4xf32>
    %17 = vector.shape_cast %16 : vector<1x16x4xf32> to vector<16x4xf32>
    %cst_30 = arith.constant 0.000000e+00 : f32
    %18 = vector.broadcast %cst_30 : f32 to vector<15x16xf32>
    %19 = vector.extract_strided_slice %17 {offsets = [0, 0], sizes = [15, 4], strides = [1, 1]} : vector<16x4xf32> to vector<15x4xf32>
    %20 = vector.extract_strided_slice %1 {offsets = [0, 0], sizes = [4, 16], strides = [1, 1]} : vector<5x16xf32> to vector<4x16xf32>
    %21 = arith.truncf %19 : vector<15x4xf32> to vector<15x4xbf16>
    %22 = arith.truncf %20 : vector<4x16xf32> to vector<4x16xbf16>
    %cst_31 = arith.constant dense<0.000000e+00> : vector<15x16xf32>
    %23 = tpu.matmul %21, %22, %cst_31 {dimension_numbers = #tpu.dot_dimension_numbers<[1], [0], [0], [1], [0, 0, 1, 1], [], []>} : vector<15x4xbf16>, vector<4x16xbf16>, vector<15x16xf32> -> vector<15x16xf32>
    %24 = arith.addf %18, %23 : vector<15x16xf32>
    %25 = vector.extract_strided_slice %17 {offsets = [1, 0], sizes = [15, 1], strides = [1, 1]} : vector<16x4xf32> to vector<15x1xf32>
    %26 = vector.extract_strided_slice %1 {offsets = [4, 0], sizes = [1, 16], strides = [1, 1]} : vector<5x16xf32> to vector<1x16xf32>
    %27 = vector.broadcast %25 : vector<15x1xf32> to vector<15x16xf32>
    %28 = vector.broadcast %26 : vector<1x16xf32> to vector<15x16xf32>
    %29 = arith.mulf %27, %28 : vector<15x16xf32>
    %30 = arith.addf %24, %29 : vector<15x16xf32>
    %cst_32 = arith.constant 0.000000e+00 : f32
    %31 = vector.broadcast %cst_32 : f32 to vector<15x16xf32>
    %32 = vector.extract_strided_slice %17 {offsets = [0, 2], sizes = [15, 2], strides = [1, 1]} : vector<16x4xf32> to vector<15x2xf32>
    %33 = vector.extract_strided_slice %1 {offsets = [0, 0], sizes = [2, 16], strides = [1, 1]} : vector<5x16xf32> to vector<2x16xf32>
    %34 = arith.truncf %32 : vector<15x2xf32> to vector<15x2xbf16>
    %35 = arith.truncf %33 : vector<2x16xf32> to vector<2x16xbf16>
    %cst_33 = arith.constant dense<0.000000e+00> : vector<15x16xf32>
    %36 = tpu.matmul %34, %35, %cst_33 {dimension_numbers = #tpu.dot_dimension_numbers<[1], [0], [0], [1], [0, 0, 1, 1], [], []>} : vector<15x2xbf16>, vector<2x16xbf16>, vector<15x16xf32> -> vector<15x16xf32>
    %37 = arith.addf %31, %36 : vector<15x16xf32>
    %38 = vector.extract_strided_slice %17 {offsets = [1, 0], sizes = [15, 3], strides = [1, 1]} : vector<16x4xf32> to vector<15x3xf32>
    %39 = vector.extract_strided_slice %1 {offsets = [2, 0], sizes = [3, 16], strides = [1, 1]} : vector<5x16xf32> to vector<3x16xf32>
    %40 = arith.truncf %38 : vector<15x3xf32> to vector<15x3xbf16>
    %41 = arith.truncf %39 : vector<3x16xf32> to vector<3x16xbf16>
    %cst_34 = arith.constant dense<0.000000e+00> : vector<15x16xf32>
    %42 = tpu.matmul %40, %41, %cst_34 {dimension_numbers = #tpu.dot_dimension_numbers<[1], [0], [0], [1], [0, 0, 1, 1], [], []>} : vector<15x3xbf16>, vector<3x16xbf16>, vector<15x16xf32> -> vector<15x16xf32>
    %43 = arith.addf %37, %42 : vector<15x16xf32>
    %cst_35 = arith.constant dense<0.000000e+00> : vector<16xf32>
    %44 = vector.multi_reduction <add>, %30, %cst_35 [0] : vector<15x16xf32> to vector<16xf32>
    %45 = vector.shape_cast %44 : vector<16xf32> to vector<1x16xf32>
    %cst_36 = arith.constant dense<0.000000e+00> : vector<16xf32>
    %46 = vector.multi_reduction <add>, %43, %cst_36 [0] : vector<15x16xf32> to vector<16xf32>
    %47 = vector.shape_cast %46 : vector<16xf32> to vector<1x16xf32>
    %48 = arith.addf %45, %47 : vector<1x16xf32>
    %cst_37 = arith.constant 3.000000e+01 : f32
    %49 = vector.broadcast %cst_37 : f32 to vector<1x16xf32>
    %50 = arith.divf %48, %49 : vector<1x16xf32>
    %51 = vector.broadcast %50 : vector<1x16xf32> to vector<15x16xf32>
    %52 = arith.subf %30, %51 : vector<15x16xf32>
    %53 = vector.broadcast %50 : vector<1x16xf32> to vector<15x16xf32>
    %54 = arith.subf %43, %53 : vector<15x16xf32>
    %55 = arith.mulf %52, %52 : vector<15x16xf32>
    %cst_38 = arith.constant dense<0.000000e+00> : vector<16xf32>
    %56 = vector.multi_reduction <add>, %55, %cst_38 [0] : vector<15x16xf32> to vector<16xf32>
    %57 = vector.shape_cast %56 : vector<16xf32> to vector<1x16xf32>
    %58 = arith.mulf %54, %54 : vector<15x16xf32>
    %cst_39 = arith.constant dense<0.000000e+00> : vector<16xf32>
    %59 = vector.multi_reduction <add>, %58, %cst_39 [0] : vector<15x16xf32> to vector<16xf32>
    %60 = vector.shape_cast %59 : vector<16xf32> to vector<1x16xf32>
    %61 = arith.addf %57, %60 : vector<1x16xf32>
    %cst_40 = arith.constant 3.000000e+01 : f32
    %62 = vector.broadcast %cst_40 : f32 to vector<1x16xf32>
    %63 = arith.divf %61, %62 : vector<1x16xf32>
    %cst_41 = arith.constant 9.99999974E-6 : f32
    %64 = vector.broadcast %cst_41 : f32 to vector<1x16xf32>
    %65 = arith.addf %63, %64 : vector<1x16xf32>
    %66 = math.rsqrt %65 : vector<1x16xf32>
    %67 = vector.broadcast %66 : vector<1x16xf32> to vector<15x16xf32>
    %68 = arith.mulf %52, %67 : vector<15x16xf32>
    %69 = vector.broadcast %2 : vector<1x16xf32> to vector<15x16xf32>
    %70 = arith.mulf %68, %69 : vector<15x16xf32>
    %71 = vector.broadcast %3 : vector<1x16xf32> to vector<15x16xf32>
    %72 = arith.addf %70, %71 : vector<15x16xf32>
    %cst_42 = arith.constant 5.000000e-01 : f32
    %73 = vector.broadcast %cst_42 : f32 to vector<15x16xf32>
    %74 = arith.mulf %73, %72 : vector<15x16xf32>
    %cst_43 = arith.constant 4.471500e-02 : f32
    %75 = vector.broadcast %cst_43 : f32 to vector<15x16xf32>
    %76 = arith.mulf %75, %72 : vector<15x16xf32>
    %77 = arith.mulf %76, %72 : vector<15x16xf32>
    %78 = arith.mulf %77, %72 : vector<15x16xf32>
    %79 = arith.addf %72, %78 : vector<15x16xf32>
    %cst_44 = arith.constant 0.797884583 : f32
    %80 = vector.broadcast %cst_44 : f32 to vector<15x16xf32>
    %81 = arith.mulf %80, %79 : vector<15x16xf32>
    %82 = math.tanh %81 : vector<15x16xf32>
    %cst_45 = arith.constant 1.000000e+00 : f32
    %83 = vector.broadcast %cst_45 : f32 to vector<15x16xf32>
    %84 = arith.addf %83, %82 : vector<15x16xf32>
    %85 = arith.mulf %74, %84 : vector<15x16xf32>
    %86 = vector.broadcast %66 : vector<1x16xf32> to vector<15x16xf32>
    %87 = arith.mulf %54, %86 : vector<15x16xf32>
    %88 = vector.broadcast %2 : vector<1x16xf32> to vector<15x16xf32>
    %89 = arith.mulf %87, %88 : vector<15x16xf32>
    %90 = vector.broadcast %3 : vector<1x16xf32> to vector<15x16xf32>
    %91 = arith.addf %89, %90 : vector<15x16xf32>
    %cst_46 = arith.constant 5.000000e-01 : f32
    %92 = vector.broadcast %cst_46 : f32 to vector<15x16xf32>
    %93 = arith.mulf %92, %91 : vector<15x16xf32>
    %cst_47 = arith.constant 4.471500e-02 : f32
    %94 = vector.broadcast %cst_47 : f32 to vector<15x16xf32>
    %95 = arith.mulf %94, %91 : vector<15x16xf32>
    %96 = arith.mulf %95, %91 : vector<15x16xf32>
    %97 = arith.mulf %96, %91 : vector<15x16xf32>
    %98 = arith.addf %91, %97 : vector<15x16xf32>
    %cst_48 = arith.constant 0.797884583 : f32
    %99 = vector.broadcast %cst_48 : f32 to vector<15x16xf32>
    %100 = arith.mulf %99, %98 : vector<15x16xf32>
    %101 = math.tanh %100 : vector<15x16xf32>
    %cst_49 = arith.constant 1.000000e+00 : f32
    %102 = vector.broadcast %cst_49 : f32 to vector<15x16xf32>
    %103 = arith.addf %102, %101 : vector<15x16xf32>
    %104 = arith.mulf %93, %103 : vector<15x16xf32>
    %105 = arith.truncf %85 : vector<15x16xf32> to vector<15x16xbf16>
    %106 = arith.truncf %4 : vector<16x32xf32> to vector<16x32xbf16>
    %cst_50 = arith.constant dense<0.000000e+00> : vector<15x32xf32>
    %107 = tpu.matmul %105, %106, %cst_50 {dimension_numbers = #tpu.dot_dimension_numbers<[1], [0], [0], [1], [0, 0, 1, 1], [], []>} : vector<15x16xbf16>, vector<16x32xbf16>, vector<15x32xf32> -> vector<15x32xf32>
    %108 = arith.truncf %104 : vector<15x16xf32> to vector<15x16xbf16>
    %109 = arith.truncf %5 : vector<16x16xf32> to vector<16x16xbf16>
    %cst_51 = arith.constant dense<0.000000e+00> : vector<15x16xf32>
    %110 = tpu.matmul %108, %109, %cst_51 {dimension_numbers = #tpu.dot_dimension_numbers<[1], [0], [0], [1], [0, 0, 1, 1], [], []>} : vector<15x16xbf16>, vector<16x16xbf16>, vector<15x16xf32> -> vector<15x16xf32>
    %cst_52 = arith.constant 0.000000e+00 : f32
    %111 = vector.broadcast %cst_52 : f32 to vector<14x16xf32>
    %112 = vector.extract_strided_slice %107 {offsets = [0, 0], sizes = [14, 16], strides = [1, 1]} : vector<15x32xf32> to vector<14x16xf32>
    %113 = arith.addf %111, %112 : vector<14x16xf32>
    %114 = vector.extract_strided_slice %107 {offsets = [1, 16], sizes = [14, 16], strides = [1, 1]} : vector<15x32xf32> to vector<14x16xf32>
    %115 = arith.addf %113, %114 : vector<14x16xf32>
    %116 = vector.extract_strided_slice %110 {offsets = [0, 0], sizes = [14, 16], strides = [1, 1]} : vector<15x16xf32> to vector<14x16xf32>
    %117 = arith.addf %115, %116 : vector<14x16xf32>
    %cst_53 = arith.constant 5.000000e-01 : f32
    %118 = vector.broadcast %cst_53 : f32 to vector<14x16xf32>
    %119 = arith.mulf %118, %117 : vector<14x16xf32>
    %cst_54 = arith.constant 4.471500e-02 : f32
    %120 = vector.broadcast %cst_54 : f32 to vector<14x16xf32>
    %121 = arith.mulf %120, %117 : vector<14x16xf32>
    %122 = arith.mulf %121, %117 : vector<14x16xf32>
    %123 = arith.mulf %122, %117 : vector<14x16xf32>
    %124 = arith.addf %117, %123 : vector<14x16xf32>
    %cst_55 = arith.constant 0.797884583 : f32
    %125 = vector.broadcast %cst_55 : f32 to vector<14x16xf32>
    %126 = arith.mulf %125, %124 : vector<14x16xf32>
    %127 = math.tanh %126 : vector<14x16xf32>
    %cst_56 = arith.constant 1.000000e+00 : f32
    %128 = vector.broadcast %cst_56 : f32 to vector<14x16xf32>
    %129 = arith.addf %128, %127 : vector<14x16xf32>
    %130 = arith.mulf %119, %129 : vector<14x16xf32>
    %cst_57 = arith.constant dense<0.000000e+00> : vector<14xf32>
    %131 = vector.multi_reduction <add>, %130, %cst_57 [1] : vector<14x16xf32> to vector<14xf32>
    %132 = vector.shape_cast %131 : vector<14xf32> to vector<14x1xf32>
    %cst_58 = arith.constant 1.600000e+01 : f32
    %133 = vector.broadcast %cst_58 : f32 to vector<14x1xf32>
    %134 = arith.divf %132, %133 : vector<14x1xf32>
    %135 = vector.broadcast %134 : vector<14x1xf32> to vector<14x16xf32>
    %136 = arith.subf %130, %135 : vector<14x16xf32>
    %137 = arith.mulf %136, %136 : vector<14x16xf32>
    %cst_59 = arith.constant dense<0.000000e+00> : vector<14xf32>
    %138 = vector.multi_reduction <add>, %137, %cst_59 [1] : vector<14x16xf32> to vector<14xf32>
    %139 = vector.shape_cast %138 : vector<14xf32> to vector<14x1xf32>
    %cst_60 = arith.constant 1.600000e+01 : f32
    %140 = vector.broadcast %cst_60 : f32 to vector<14x1xf32>
    %141 = arith.divf %139, %140 : vector<14x1xf32>
    %cst_61 = arith.constant 9.99999974E-6 : f32
    %142 = vector.broadcast %cst_61 : f32 to vector<14x1xf32>
    %143 = arith.addf %141, %142 : vector<14x1xf32>
    %144 = math.rsqrt %143 : vector<14x1xf32>
    %145 = vector.broadcast %144 : vector<14x1xf32> to vector<14x16xf32>
    %146 = arith.mulf %136, %145 : vector<14x16xf32>
    %147 = vector.broadcast %6 : vector<1x16xf32> to vector<14x16xf32>
    %148 = arith.mulf %146, %147 : vector<14x16xf32>
    %149 = vector.broadcast %7 : vector<1x16xf32> to vector<14x16xf32>
    %150 = arith.addf %148, %149 : vector<14x16xf32>
    %151 = arith.truncf %150 : vector<14x16xf32> to vector<14x16xbf16>
    %152 = arith.truncf %8 : vector<16x32xf32> to vector<16x32xbf16>
    %cst_62 = arith.constant dense<0.000000e+00> : vector<14x32xf32>
    %153 = tpu.matmul %151, %152, %cst_62 {dimension_numbers = #tpu.dot_dimension_numbers<[1], [0], [0], [1], [0, 0, 1, 1], [], []>} : vector<14x16xbf16>, vector<16x32xbf16>, vector<14x32xf32> -> vector<14x32xf32>
    %154 = vector.broadcast %9 : vector<1x32xf32> to vector<14x32xf32>
    %155 = arith.addf %153, %154 : vector<14x32xf32>
    %c8 = arith.constant 8 : index
    %c0_63 = arith.constant 0 : index
    %156 = vector.load %arg29[%c8, %c0_63] : memref<30x32xf32, #tpu.memory_space<vmem>>, vector<14x32xf32>
    tpu.vector_store %arg29[%c8, %c0_63], %155 {strides = array<i32>} : memref<30x32xf32, #tpu.memory_space<vmem>>, vector<14x32xf32>,
    %c0_64 = arith.constant 0 : index
    %c0_65 = arith.constant 0 : index
    %157 = vector.load %arg29[%c0_64, %c0_65] : memref<30x32xf32, #tpu.memory_space<vmem>>, vector<30x32xf32>
    %158 = arith.truncf %157 : vector<30x32xf32> to vector<30x32xbf16>
    %159 = arith.truncf %10 : vector<32x256xf32> to vector<32x256xbf16>
    %cst_66 = arith.constant dense<0.000000e+00> : vector<30x256xf32>
    %160 = tpu.matmul %158, %159, %cst_66 {dimension_numbers = #tpu.dot_dimension_numbers<[1], [0], [0], [1], [0, 0, 1, 1], [], []>} : vector<30x32xbf16>, vector<32x256xbf16>, vector<30x256xf32> -> vector<30x256xf32>
    %cst_67 = arith.constant 0.000000e+00 : f32
    %161 = vector.broadcast %cst_67 : f32 to vector<14x32xf32>
    %162 = vector.extract_strided_slice %160 {offsets = [4, 0], sizes = [14, 32], strides = [1, 1]} : vector<30x256xf32> to vector<14x32xf32>
    %163 = arith.addf %161, %162 : vector<14x32xf32>
    %164 = vector.extract_strided_slice %160 {offsets = [5, 32], sizes = [14, 32], strides = [1, 1]} : vector<30x256xf32> to vector<14x32xf32>
    %165 = arith.addf %163, %164 : vector<14x32xf32>
    %166 = vector.extract_strided_slice %160 {offsets = [6, 64], sizes = [14, 32], strides = [1, 1]} : vector<30x256xf32> to vector<14x32xf32>
    %167 = arith.addf %165, %166 : vector<14x32xf32>
    %168 = vector.extract_strided_slice %160 {offsets = [7, 96], sizes = [14, 32], strides = [1, 1]} : vector<30x256xf32> to vector<14x32xf32>
    %169 = arith.addf %167, %168 : vector<14x32xf32>
    %170 = vector.extract_strided_slice %160 {offsets = [8, 128], sizes = [14, 32], strides = [1, 1]} : vector<30x256xf32> to vector<14x32xf32>
    %171 = arith.addf %169, %170 : vector<14x32xf32>
    %172 = vector.extract_strided_slice %160 {offsets = [9, 160], sizes = [14, 32], strides = [1, 1]} : vector<30x256xf32> to vector<14x32xf32>
    %173 = arith.addf %171, %172 : vector<14x32xf32>
    %174 = vector.extract_strided_slice %160 {offsets = [10, 192], sizes = [14, 32], strides = [1, 1]} : vector<30x256xf32> to vector<14x32xf32>
    %175 = arith.addf %173, %174 : vector<14x32xf32>
    %176 = vector.extract_strided_slice %160 {offsets = [11, 224], sizes = [14, 32], strides = [1, 1]} : vector<30x256xf32> to vector<14x32xf32>
    %177 = arith.addf %175, %176 : vector<14x32xf32>
    %178 = vector.broadcast %11 : vector<1x32xf32> to vector<14x32xf32>
    %179 = arith.addf %177, %178 : vector<14x32xf32>
    %cst_68 = arith.constant 5.000000e-01 : f32
    %180 = vector.broadcast %cst_68 : f32 to vector<14x32xf32>
    %181 = arith.mulf %180, %179 : vector<14x32xf32>
    %cst_69 = arith.constant 4.471500e-02 : f32
    %182 = vector.broadcast %cst_69 : f32 to vector<14x32xf32>
    %183 = arith.mulf %182, %179 : vector<14x32xf32>
    %184 = arith.mulf %183, %179 : vector<14x32xf32>
    %185 = arith.mulf %184, %179 : vector<14x32xf32>
    %186 = arith.addf %179, %185 : vector<14x32xf32>
    %cst_70 = arith.constant 0.797884583 : f32
    %187 = vector.broadcast %cst_70 : f32 to vector<14x32xf32>
    %188 = arith.mulf %187, %186 : vector<14x32xf32>
    %189 = math.tanh %188 : vector<14x32xf32>
    %cst_71 = arith.constant 1.000000e+00 : f32
    %190 = vector.broadcast %cst_71 : f32 to vector<14x32xf32>
    %191 = arith.addf %190, %189 : vector<14x32xf32>
    %192 = arith.mulf %181, %191 : vector<14x32xf32>
    %193 = arith.addf %155, %192 : vector<14x32xf32>
    %cst_72 = arith.constant dense<0.000000e+00> : vector<14xf32>
    %194 = vector.multi_reduction <add>, %193, %cst_72 [1] : vector<14x32xf32> to vector<14xf32>
    %195 = vector.shape_cast %194 : vector<14xf32> to vector<14x1xf32>
    %cst_73 = arith.constant 3.200000e+01 : f32
    %196 = vector.broadcast %cst_73 : f32 to vector<14x1xf32>
    %197 = arith.divf %195, %196 : vector<14x1xf32>
    %198 = vector.broadcast %197 : vector<14x1xf32> to vector<14x32xf32>
    %199 = arith.subf %193, %198 : vector<14x32xf32>
    %200 = arith.mulf %199, %199 : vector<14x32xf32>
    %cst_74 = arith.constant dense<0.000000e+00> : vector<14xf32>
    %201 = vector.multi_reduction <add>, %200, %cst_74 [1] : vector<14x32xf32> to vector<14xf32>
    %202 = vector.shape_cast %201 : vector<14xf32> to vector<14x1xf32>
    %cst_75 = arith.constant 3.200000e+01 : f32
    %203 = vector.broadcast %cst_75 : f32 to vector<14x1xf32>
    %204 = arith.divf %202, %203 : vector<14x1xf32>
    %cst_76 = arith.constant 9.99999974E-6 : f32
    %205 = vector.broadcast %cst_76 : f32 to vector<14x1xf32>
    %206 = arith.addf %204, %205 : vector<14x1xf32>
    %207 = math.rsqrt %206 : vector<14x1xf32>
    %208 = vector.broadcast %207 : vector<14x1xf32> to vector<14x32xf32>
    %209 = arith.mulf %199, %208 : vector<14x32xf32>
    %210 = vector.broadcast %12 : vector<1x32xf32> to vector<14x32xf32>
    %211 = arith.mulf %209, %210 : vector<14x32xf32>
    %212 = vector.broadcast %13 : vector<1x32xf32> to vector<14x32xf32>
    %213 = arith.addf %211, %212 : vector<14x32xf32>
    %c0_77 = arith.constant 0 : index
    %c0_78 = arith.constant 0 : index
    %214 = vector.load %arg28[%c0_77, %c0_78] : memref<28x32xf32, #tpu.memory_space<vmem>>, vector<14x32xf32>
    tpu.vector_store %arg28[%c0_77, %c0_78], %213 {strides = array<i32>} : memref<28x32xf32, #tpu.memory_space<vmem>>, vector<14x32xf32>,
    %215 = vector.extract_strided_slice %0 {offsets = [1, 0, 0], sizes = [1, 16, 4], strides = [1, 1, 1]} : vector<2x16x4xf32> to vector<1x16x4xf32>
    %216 = vector.shape_cast %215 : vector<1x16x4xf32> to vector<16x4xf32>
    %cst_79 = arith.constant 0.000000e+00 : f32
    %217 = vector.broadcast %cst_79 : f32 to vector<15x16xf32>
    %218 = vector.extract_strided_slice %216 {offsets = [0, 0], sizes = [15, 4], strides = [1, 1]} : vector<16x4xf32> to vector<15x4xf32>
    %219 = vector.extract_strided_slice %1 {offsets = [0, 0], sizes = [4, 16], strides = [1, 1]} : vector<5x16xf32> to vector<4x16xf32>
    %220 = arith.truncf %218 : vector<15x4xf32> to vector<15x4xbf16>
    %221 = arith.truncf %219 : vector<4x16xf32> to vector<4x16xbf16>
    %cst_80 = arith.constant dense<0.000000e+00> : vector<15x16xf32>
    %222 = tpu.matmul %220, %221, %cst_80 {dimension_numbers = #tpu.dot_dimension_numbers<[1], [0], [0], [1], [0, 0, 1, 1], [], []>} : vector<15x4xbf16>, vector<4x16xbf16>, vector<15x16xf32> -> vector<15x16xf32>
    %223 = arith.addf %217, %222 : vector<15x16xf32>
    %224 = vector.extract_strided_slice %216 {offsets = [1, 0], sizes = [15, 1], strides = [1, 1]} : vector<16x4xf32> to vector<15x1xf32>
    %225 = vector.extract_strided_slice %1 {offsets = [4, 0], sizes = [1, 16], strides = [1, 1]} : vector<5x16xf32> to vector<1x16xf32>
    %226 = vector.broadcast %224 : vector<15x1xf32> to vector<15x16xf32>
    %227 = vector.broadcast %225 : vector<1x16xf32> to vector<15x16xf32>
    %228 = arith.mulf %226, %227 : vector<15x16xf32>
    %229 = arith.addf %223, %228 : vector<15x16xf32>
    %cst_81 = arith.constant 0.000000e+00 : f32
    %230 = vector.broadcast %cst_81 : f32 to vector<15x16xf32>
    %231 = vector.extract_strided_slice %216 {offsets = [0, 2], sizes = [15, 2], strides = [1, 1]} : vector<16x4xf32> to vector<15x2xf32>
    %232 = vector.extract_strided_slice %1 {offsets = [0, 0], sizes = [2, 16], strides = [1, 1]} : vector<5x16xf32> to vector<2x16xf32>
    %233 = arith.truncf %231 : vector<15x2xf32> to vector<15x2xbf16>
    %234 = arith.truncf %232 : vector<2x16xf32> to vector<2x16xbf16>
    %cst_82 = arith.constant dense<0.000000e+00> : vector<15x16xf32>
    %235 = tpu.matmul %233, %234, %cst_82 {dimension_numbers = #tpu.dot_dimension_numbers<[1], [0], [0], [1], [0, 0, 1, 1], [], []>} : vector<15x2xbf16>, vector<2x16xbf16>, vector<15x16xf32> -> vector<15x16xf32>
    %236 = arith.addf %230, %235 : vector<15x16xf32>
    %237 = vector.extract_strided_slice %216 {offsets = [1, 0], sizes = [15, 3], strides = [1, 1]} : vector<16x4xf32> to vector<15x3xf32>
    %238 = vector.extract_strided_slice %1 {offsets = [2, 0], sizes = [3, 16], strides = [1, 1]} : vector<5x16xf32> to vector<3x16xf32>
    %239 = arith.truncf %237 : vector<15x3xf32> to vector<15x3xbf16>
    %240 = arith.truncf %238 : vector<3x16xf32> to vector<3x16xbf16>
    %cst_83 = arith.constant dense<0.000000e+00> : vector<15x16xf32>
    %241 = tpu.matmul %239, %240, %cst_83 {dimension_numbers = #tpu.dot_dimension_numbers<[1], [0], [0], [1], [0, 0, 1, 1], [], []>} : vector<15x3xbf16>, vector<3x16xbf16>, vector<15x16xf32> -> vector<15x16xf32>
    %242 = arith.addf %236, %241 : vector<15x16xf32>
    %cst_84 = arith.constant dense<0.000000e+00> : vector<16xf32>
    %243 = vector.multi_reduction <add>, %229, %cst_84 [0] : vector<15x16xf32> to vector<16xf32>
    %244 = vector.shape_cast %243 : vector<16xf32> to vector<1x16xf32>
    %cst_85 = arith.constant dense<0.000000e+00> : vector<16xf32>
    %245 = vector.multi_reduction <add>, %242, %cst_85 [0] : vector<15x16xf32> to vector<16xf32>
    %246 = vector.shape_cast %245 : vector<16xf32> to vector<1x16xf32>
    %247 = arith.addf %244, %246 : vector<1x16xf32>
    %cst_86 = arith.constant 3.000000e+01 : f32
    %248 = vector.broadcast %cst_86 : f32 to vector<1x16xf32>
    %249 = arith.divf %247, %248 : vector<1x16xf32>
    %250 = vector.broadcast %249 : vector<1x16xf32> to vector<15x16xf32>
    %251 = arith.subf %229, %250 : vector<15x16xf32>
    %252 = vector.broadcast %249 : vector<1x16xf32> to vector<15x16xf32>
    %253 = arith.subf %242, %252 : vector<15x16xf32>
    %254 = arith.mulf %251, %251 : vector<15x16xf32>
    %cst_87 = arith.constant dense<0.000000e+00> : vector<16xf32>
    %255 = vector.multi_reduction <add>, %254, %cst_87 [0] : vector<15x16xf32> to vector<16xf32>
    %256 = vector.shape_cast %255 : vector<16xf32> to vector<1x16xf32>
    %257 = arith.mulf %253, %253 : vector<15x16xf32>
    %cst_88 = arith.constant dense<0.000000e+00> : vector<16xf32>
    %258 = vector.multi_reduction <add>, %257, %cst_88 [0] : vector<15x16xf32> to vector<16xf32>
    %259 = vector.shape_cast %258 : vector<16xf32> to vector<1x16xf32>
    %260 = arith.addf %256, %259 : vector<1x16xf32>
    %cst_89 = arith.constant 3.000000e+01 : f32
    %261 = vector.broadcast %cst_89 : f32 to vector<1x16xf32>
    %262 = arith.divf %260, %261 : vector<1x16xf32>
    %cst_90 = arith.constant 9.99999974E-6 : f32
    %263 = vector.broadcast %cst_90 : f32 to vector<1x16xf32>
    %264 = arith.addf %262, %263 : vector<1x16xf32>
    %265 = math.rsqrt %264 : vector<1x16xf32>
    %266 = vector.broadcast %265 : vector<1x16xf32> to vector<15x16xf32>
    %267 = arith.mulf %251, %266 : vector<15x16xf32>
    %268 = vector.broadcast %2 : vector<1x16xf32> to vector<15x16xf32>
    %269 = arith.mulf %267, %268 : vector<15x16xf32>
    %270 = vector.broadcast %3 : vector<1x16xf32> to vector<15x16xf32>
    %271 = arith.addf %269, %270 : vector<15x16xf32>
    %cst_91 = arith.constant 5.000000e-01 : f32
    %272 = vector.broadcast %cst_91 : f32 to vector<15x16xf32>
    %273 = arith.mulf %272, %271 : vector<15x16xf32>
    %cst_92 = arith.constant 4.471500e-02 : f32
    %274 = vector.broadcast %cst_92 : f32 to vector<15x16xf32>
    %275 = arith.mulf %274, %271 : vector<15x16xf32>
    %276 = arith.mulf %275, %271 : vector<15x16xf32>
    %277 = arith.mulf %276, %271 : vector<15x16xf32>
    %278 = arith.addf %271, %277 : vector<15x16xf32>
    %cst_93 = arith.constant 0.797884583 : f32
    %279 = vector.broadcast %cst_93 : f32 to vector<15x16xf32>
    %280 = arith.mulf %279, %278 : vector<15x16xf32>
    %281 = math.tanh %280 : vector<15x16xf32>
    %cst_94 = arith.constant 1.000000e+00 : f32
    %282 = vector.broadcast %cst_94 : f32 to vector<15x16xf32>
    %283 = arith.addf %282, %281 : vector<15x16xf32>
    %284 = arith.mulf %273, %283 : vector<15x16xf32>
    %285 = vector.broadcast %265 : vector<1x16xf32> to vector<15x16xf32>
    %286 = arith.mulf %253, %285 : vector<15x16xf32>
    %287 = vector.broadcast %2 : vector<1x16xf32> to vector<15x16xf32>
    %288 = arith.mulf %286, %287 : vector<15x16xf32>
    %289 = vector.broadcast %3 : vector<1x16xf32> to vector<15x16xf32>
    %290 = arith.addf %288, %289 : vector<15x16xf32>
    %cst_95 = arith.constant 5.000000e-01 : f32
    %291 = vector.broadcast %cst_95 : f32 to vector<15x16xf32>
    %292 = arith.mulf %291, %290 : vector<15x16xf32>
    %cst_96 = arith.constant 4.471500e-02 : f32
    %293 = vector.broadcast %cst_96 : f32 to vector<15x16xf32>
    %294 = arith.mulf %293, %290 : vector<15x16xf32>
    %295 = arith.mulf %294, %290 : vector<15x16xf32>
    %296 = arith.mulf %295, %290 : vector<15x16xf32>
    %297 = arith.addf %290, %296 : vector<15x16xf32>
    %cst_97 = arith.constant 0.797884583 : f32
    %298 = vector.broadcast %cst_97 : f32 to vector<15x16xf32>
    %299 = arith.mulf %298, %297 : vector<15x16xf32>
    %300 = math.tanh %299 : vector<15x16xf32>
    %cst_98 = arith.constant 1.000000e+00 : f32
    %301 = vector.broadcast %cst_98 : f32 to vector<15x16xf32>
    %302 = arith.addf %301, %300 : vector<15x16xf32>
    %303 = arith.mulf %292, %302 : vector<15x16xf32>
    %304 = arith.truncf %284 : vector<15x16xf32> to vector<15x16xbf16>
    %305 = arith.truncf %4 : vector<16x32xf32> to vector<16x32xbf16>
    %cst_99 = arith.constant dense<0.000000e+00> : vector<15x32xf32>
    %306 = tpu.matmul %304, %305, %cst_99 {dimension_numbers = #tpu.dot_dimension_numbers<[1], [0], [0], [1], [0, 0, 1, 1], [], []>} : vector<15x16xbf16>, vector<16x32xbf16>, vector<15x32xf32> -> vector<15x32xf32>
    %307 = arith.truncf %303 : vector<15x16xf32> to vector<15x16xbf16>
    %308 = arith.truncf %5 : vector<16x16xf32> to vector<16x16xbf16>
    %cst_100 = arith.constant dense<0.000000e+00> : vector<15x16xf32>
    %309 = tpu.matmul %307, %308, %cst_100 {dimension_numbers = #tpu.dot_dimension_numbers<[1], [0], [0], [1], [0, 0, 1, 1], [], []>} : vector<15x16xbf16>, vector<16x16xbf16>, vector<15x16xf32> -> vector<15x16xf32>
    %cst_101 = arith.constant 0.000000e+00 : f32
    %310 = vector.broadcast %cst_101 : f32 to vector<14x16xf32>
    %311 = vector.extract_strided_slice %306 {offsets = [0, 0], sizes = [14, 16], strides = [1, 1]} : vector<15x32xf32> to vector<14x16xf32>
    %312 = arith.addf %310, %311 : vector<14x16xf32>
    %313 = vector.extract_strided_slice %306 {offsets = [1, 16], sizes = [14, 16], strides = [1, 1]} : vector<15x32xf32> to vector<14x16xf32>
    %314 = arith.addf %312, %313 : vector<14x16xf32>
    %315 = vector.extract_strided_slice %309 {offsets = [0, 0], sizes = [14, 16], strides = [1, 1]} : vector<15x16xf32> to vector<14x16xf32>
    %316 = arith.addf %314, %315 : vector<14x16xf32>
    %cst_102 = arith.constant 5.000000e-01 : f32
    %317 = vector.broadcast %cst_102 : f32 to vector<14x16xf32>
    %318 = arith.mulf %317, %316 : vector<14x16xf32>
    %cst_103 = arith.constant 4.471500e-02 : f32
    %319 = vector.broadcast %cst_103 : f32 to vector<14x16xf32>
    %320 = arith.mulf %319, %316 : vector<14x16xf32>
    %321 = arith.mulf %320, %316 : vector<14x16xf32>
    %322 = arith.mulf %321, %316 : vector<14x16xf32>
    %323 = arith.addf %316, %322 : vector<14x16xf32>
    %cst_104 = arith.constant 0.797884583 : f32
    %324 = vector.broadcast %cst_104 : f32 to vector<14x16xf32>
    %325 = arith.mulf %324, %323 : vector<14x16xf32>
    %326 = math.tanh %325 : vector<14x16xf32>
    %cst_105 = arith.constant 1.000000e+00 : f32
    %327 = vector.broadcast %cst_105 : f32 to vector<14x16xf32>
    %328 = arith.addf %327, %326 : vector<14x16xf32>
    %329 = arith.mulf %318, %328 : vector<14x16xf32>
    %cst_106 = arith.constant dense<0.000000e+00> : vector<14xf32>
    %330 = vector.multi_reduction <add>, %329, %cst_106 [1] : vector<14x16xf32> to vector<14xf32>
    %331 = vector.shape_cast %330 : vector<14xf32> to vector<14x1xf32>
    %cst_107 = arith.constant 1.600000e+01 : f32
    %332 = vector.broadcast %cst_107 : f32 to vector<14x1xf32>
    %333 = arith.divf %331, %332 : vector<14x1xf32>
    %334 = vector.broadcast %333 : vector<14x1xf32> to vector<14x16xf32>
    %335 = arith.subf %329, %334 : vector<14x16xf32>
    %336 = arith.mulf %335, %335 : vector<14x16xf32>
    %cst_108 = arith.constant dense<0.000000e+00> : vector<14xf32>
    %337 = vector.multi_reduction <add>, %336, %cst_108 [1] : vector<14x16xf32> to vector<14xf32>
    %338 = vector.shape_cast %337 : vector<14xf32> to vector<14x1xf32>
    %cst_109 = arith.constant 1.600000e+01 : f32
    %339 = vector.broadcast %cst_109 : f32 to vector<14x1xf32>
    %340 = arith.divf %338, %339 : vector<14x1xf32>
    %cst_110 = arith.constant 9.99999974E-6 : f32
    %341 = vector.broadcast %cst_110 : f32 to vector<14x1xf32>
    %342 = arith.addf %340, %341 : vector<14x1xf32>
    %343 = math.rsqrt %342 : vector<14x1xf32>
    %344 = vector.broadcast %343 : vector<14x1xf32> to vector<14x16xf32>
    %345 = arith.mulf %335, %344 : vector<14x16xf32>
    %346 = vector.broadcast %6 : vector<1x16xf32> to vector<14x16xf32>
    %347 = arith.mulf %345, %346 : vector<14x16xf32>
    %348 = vector.broadcast %7 : vector<1x16xf32> to vector<14x16xf32>
    %349 = arith.addf %347, %348 : vector<14x16xf32>
    %350 = arith.truncf %349 : vector<14x16xf32> to vector<14x16xbf16>
    %351 = arith.truncf %8 : vector<16x32xf32> to vector<16x32xbf16>
    %cst_111 = arith.constant dense<0.000000e+00> : vector<14x32xf32>
    %352 = tpu.matmul %350, %351, %cst_111 {dimension_numbers = #tpu.dot_dimension_numbers<[1], [0], [0], [1], [0, 0, 1, 1], [], []>} : vector<14x16xbf16>, vector<16x32xbf16>, vector<14x32xf32> -> vector<14x32xf32>
    %353 = vector.broadcast %9 : vector<1x32xf32> to vector<14x32xf32>
    %354 = arith.addf %352, %353 : vector<14x32xf32>
    %c8_112 = arith.constant 8 : index
    %c0_113 = arith.constant 0 : index
    %355 = vector.load %arg29[%c8_112, %c0_113] : memref<30x32xf32, #tpu.memory_space<vmem>>, vector<14x32xf32>
    tpu.vector_store %arg29[%c8_112, %c0_113], %354 {strides = array<i32>} : memref<30x32xf32, #tpu.memory_space<vmem>>, vector<14x32xf32>,
    %c0_114 = arith.constant 0 : index
    %c0_115 = arith.constant 0 : index
    %356 = vector.load %arg29[%c0_114, %c0_115] : memref<30x32xf32, #tpu.memory_space<vmem>>, vector<30x32xf32>
    %357 = arith.truncf %356 : vector<30x32xf32> to vector<30x32xbf16>
    %358 = arith.truncf %10 : vector<32x256xf32> to vector<32x256xbf16>
    %cst_116 = arith.constant dense<0.000000e+00> : vector<30x256xf32>
    %359 = tpu.matmul %357, %358, %cst_116 {dimension_numbers = #tpu.dot_dimension_numbers<[1], [0], [0], [1], [0, 0, 1, 1], [], []>} : vector<30x32xbf16>, vector<32x256xbf16>, vector<30x256xf32> -> vector<30x256xf32>
    %cst_117 = arith.constant 0.000000e+00 : f32
    %360 = vector.broadcast %cst_117 : f32 to vector<14x32xf32>
    %361 = vector.extract_strided_slice %359 {offsets = [4, 0], sizes = [14, 32], strides = [1, 1]} : vector<30x256xf32> to vector<14x32xf32>
    %362 = arith.addf %360, %361 : vector<14x32xf32>
    %363 = vector.extract_strided_slice %359 {offsets = [5, 32], sizes = [14, 32], strides = [1, 1]} : vector<30x256xf32> to vector<14x32xf32>
    %364 = arith.addf %362, %363 : vector<14x32xf32>
    %365 = vector.extract_strided_slice %359 {offsets = [6, 64], sizes = [14, 32], strides = [1, 1]} : vector<30x256xf32> to vector<14x32xf32>
    %366 = arith.addf %364, %365 : vector<14x32xf32>
    %367 = vector.extract_strided_slice %359 {offsets = [7, 96], sizes = [14, 32], strides = [1, 1]} : vector<30x256xf32> to vector<14x32xf32>
    %368 = arith.addf %366, %367 : vector<14x32xf32>
    %369 = vector.extract_strided_slice %359 {offsets = [8, 128], sizes = [14, 32], strides = [1, 1]} : vector<30x256xf32> to vector<14x32xf32>
    %370 = arith.addf %368, %369 : vector<14x32xf32>
    %371 = vector.extract_strided_slice %359 {offsets = [9, 160], sizes = [14, 32], strides = [1, 1]} : vector<30x256xf32> to vector<14x32xf32>
    %372 = arith.addf %370, %371 : vector<14x32xf32>
    %373 = vector.extract_strided_slice %359 {offsets = [10, 192], sizes = [14, 32], strides = [1, 1]} : vector<30x256xf32> to vector<14x32xf32>
    %374 = arith.addf %372, %373 : vector<14x32xf32>
    %375 = vector.extract_strided_slice %359 {offsets = [11, 224], sizes = [14, 32], strides = [1, 1]} : vector<30x256xf32> to vector<14x32xf32>
    %376 = arith.addf %374, %375 : vector<14x32xf32>
    %377 = vector.broadcast %11 : vector<1x32xf32> to vector<14x32xf32>
    %378 = arith.addf %376, %377 : vector<14x32xf32>
    %cst_118 = arith.constant 5.000000e-01 : f32
    %379 = vector.broadcast %cst_118 : f32 to vector<14x32xf32>
    %380 = arith.mulf %379, %378 : vector<14x32xf32>
    %cst_119 = arith.constant 4.471500e-02 : f32
    %381 = vector.broadcast %cst_119 : f32 to vector<14x32xf32>
    %382 = arith.mulf %381, %378 : vector<14x32xf32>
    %383 = arith.mulf %382, %378 : vector<14x32xf32>
    %384 = arith.mulf %383, %378 : vector<14x32xf32>
    %385 = arith.addf %378, %384 : vector<14x32xf32>
    %cst_120 = arith.constant 0.797884583 : f32
    %386 = vector.broadcast %cst_120 : f32 to vector<14x32xf32>
    %387 = arith.mulf %386, %385 : vector<14x32xf32>
    %388 = math.tanh %387 : vector<14x32xf32>
    %cst_121 = arith.constant 1.000000e+00 : f32
    %389 = vector.broadcast %cst_121 : f32 to vector<14x32xf32>
    %390 = arith.addf %389, %388 : vector<14x32xf32>
    %391 = arith.mulf %380, %390 : vector<14x32xf32>
    %392 = arith.addf %354, %391 : vector<14x32xf32>
    %cst_122 = arith.constant dense<0.000000e+00> : vector<14xf32>
    %393 = vector.multi_reduction <add>, %392, %cst_122 [1] : vector<14x32xf32> to vector<14xf32>
    %394 = vector.shape_cast %393 : vector<14xf32> to vector<14x1xf32>
    %cst_123 = arith.constant 3.200000e+01 : f32
    %395 = vector.broadcast %cst_123 : f32 to vector<14x1xf32>
    %396 = arith.divf %394, %395 : vector<14x1xf32>
    %397 = vector.broadcast %396 : vector<14x1xf32> to vector<14x32xf32>
    %398 = arith.subf %392, %397 : vector<14x32xf32>
    %399 = arith.mulf %398, %398 : vector<14x32xf32>
    %cst_124 = arith.constant dense<0.000000e+00> : vector<14xf32>
    %400 = vector.multi_reduction <add>, %399, %cst_124 [1] : vector<14x32xf32> to vector<14xf32>
    %401 = vector.shape_cast %400 : vector<14xf32> to vector<14x1xf32>
    %cst_125 = arith.constant 3.200000e+01 : f32
    %402 = vector.broadcast %cst_125 : f32 to vector<14x1xf32>
    %403 = arith.divf %401, %402 : vector<14x1xf32>
    %cst_126 = arith.constant 9.99999974E-6 : f32
    %404 = vector.broadcast %cst_126 : f32 to vector<14x1xf32>
    %405 = arith.addf %403, %404 : vector<14x1xf32>
    %406 = math.rsqrt %405 : vector<14x1xf32>
    %407 = vector.broadcast %406 : vector<14x1xf32> to vector<14x32xf32>
    %408 = arith.mulf %398, %407 : vector<14x32xf32>
    %409 = vector.broadcast %12 : vector<1x32xf32> to vector<14x32xf32>
    %410 = arith.mulf %408, %409 : vector<14x32xf32>
    %411 = vector.broadcast %13 : vector<1x32xf32> to vector<14x32xf32>
    %412 = arith.addf %410, %411 : vector<14x32xf32>
    %c14 = arith.constant 14 : index
    %c0_127 = arith.constant 0 : index
    %413 = vector.load %arg28[%c14, %c0_127] : memref<28x32xf32, #tpu.memory_space<vmem>>, vector<14x32xf32>
    tpu.vector_store %arg28[%c14, %c0_127], %412 {strides = array<i32>} : memref<28x32xf32, #tpu.memory_space<vmem>>, vector<14x32xf32>,
    %c0_128 = arith.constant 0 : index
    %c0_129 = arith.constant 0 : index
    %414 = vector.load %arg28[%c0_128, %c0_129] : memref<28x32xf32, #tpu.memory_space<vmem>>, vector<28x32xf32>
    %c0_130 = arith.constant 0 : index
    %c0_131 = arith.constant 0 : index
    %c0_132 = arith.constant 0 : index
    %415 = vector.load %arg14[%c0_130, %c0_131, %c0_132] : memref<2x32x192xf32, #tpu.memory_space<vmem>>, vector<2x32x192xf32>
    %c0_133 = arith.constant 0 : index
    %c0_134 = arith.constant 0 : index
    %c0_135 = arith.constant 0 : index
    %416 = vector.load %arg15[%c0_133, %c0_134, %c0_135] : memref<2x1x192xf32, #tpu.memory_space<vmem>>, vector<2x1x192xf32>
    %c0_136 = arith.constant 0 : index
    %c0_137 = arith.constant 0 : index
    %c0_138 = arith.constant 0 : index
    %417 = vector.load %arg16[%c0_136, %c0_137, %c0_138] : memref<2x1x32xf32, #tpu.memory_space<vmem>>, vector<2x1x32xf32>
    %c0_139 = arith.constant 0 : index
    %c0_140 = arith.constant 0 : index
    %c0_141 = arith.constant 0 : index
    %418 = vector.load %arg17[%c0_139, %c0_140, %c0_141] : memref<2x1x32xf32, #tpu.memory_space<vmem>>, vector<2x1x32xf32>
    %c0_142 = arith.constant 0 : index
    %c0_143 = arith.constant 0 : index
    %c0_144 = arith.constant 0 : index
    %419 = vector.load %arg18[%c0_142, %c0_143, %c0_144] : memref<2x1x32xf32, #tpu.memory_space<vmem>>, vector<2x1x32xf32>
    %c0_145 = arith.constant 0 : index
    %c0_146 = arith.constant 0 : index
    %c0_147 = arith.constant 0 : index
    %420 = vector.load %arg19[%c0_145, %c0_146, %c0_147] : memref<2x32x64xf32, #tpu.memory_space<vmem>>, vector<2x32x64xf32>
    %c0_148 = arith.constant 0 : index
    %c0_149 = arith.constant 0 : index
    %c0_150 = arith.constant 0 : index
    %421 = vector.load %arg20[%c0_148, %c0_149, %c0_150] : memref<2x1x64xf32, #tpu.memory_space<vmem>>, vector<2x1x64xf32>
    %c0_151 = arith.constant 0 : index
    %c0_152 = arith.constant 0 : index
    %c0_153 = arith.constant 0 : index
    %422 = vector.load %arg21[%c0_151, %c0_152, %c0_153] : memref<2x64x32xf32, #tpu.memory_space<vmem>>, vector<2x64x32xf32>
    %c0_154 = arith.constant 0 : index
    %c0_155 = arith.constant 0 : index
    %c0_156 = arith.constant 0 : index
    %423 = vector.load %arg22[%c0_154, %c0_155, %c0_156] : memref<2x1x32xf32, #tpu.memory_space<vmem>>, vector<2x1x32xf32>
    %c0_157 = arith.constant 0 : index
    %c0_158 = arith.constant 0 : index
    %c0_159 = arith.constant 0 : index
    %424 = vector.load %arg23[%c0_157, %c0_158, %c0_159] : memref<2x1x32xf32, #tpu.memory_space<vmem>>, vector<2x1x32xf32>
    %c0_160 = arith.constant 0 : index
    %c0_161 = arith.constant 0 : index
    %c0_162 = arith.constant 0 : index
    %425 = vector.load %arg24[%c0_160, %c0_161, %c0_162] : memref<2x1x32xf32, #tpu.memory_space<vmem>>, vector<2x1x32xf32>
    %426 = vector.extract_strided_slice %415 {offsets = [0, 0, 0], sizes = [1, 32, 192], strides = [1, 1, 1]} : vector<2x32x192xf32> to vector<1x32x192xf32>
    %427 = vector.shape_cast %426 : vector<1x32x192xf32> to vector<32x192xf32>
    %428 = arith.truncf %414 : vector<28x32xf32> to vector<28x32xbf16>
    %429 = arith.truncf %427 : vector<32x192xf32> to vector<32x192xbf16>
    %cst_163 = arith.constant dense<0.000000e+00> : vector<28x192xf32>
    %430 = tpu.matmul %428, %429, %cst_163 {dimension_numbers = #tpu.dot_dimension_numbers<[1], [0], [0], [1], [0, 0, 1, 1], [], []>} : vector<28x32xbf16>, vector<32x192xbf16>, vector<28x192xf32> -> vector<28x192xf32>
    %431 = vector.extract_strided_slice %416 {offsets = [0, 0, 0], sizes = [1, 1, 192], strides = [1, 1, 1]} : vector<2x1x192xf32> to vector<1x1x192xf32>
    %432 = vector.shape_cast %431 : vector<1x1x192xf32> to vector<1x192xf32>
    %433 = vector.broadcast %432 : vector<1x192xf32> to vector<28x192xf32>
    %434 = arith.addf %430, %433 : vector<28x192xf32>
    %435 = vector.extract_strided_slice %417 {offsets = [0, 0, 0], sizes = [1, 1, 32], strides = [1, 1, 1]} : vector<2x1x32xf32> to vector<1x1x32xf32>
    %436 = vector.shape_cast %435 : vector<1x1x32xf32> to vector<1x32xf32>
    %437 = vector.extract_strided_slice %434 {offsets = [0, 0], sizes = [14, 8], strides = [1, 1]} : vector<28x192xf32> to vector<14x8xf32>
    %438 = vector.extract_strided_slice %434 {offsets = [0, 32], sizes = [14, 8], strides = [1, 1]} : vector<28x192xf32> to vector<14x8xf32>
    %439 = arith.truncf %437 : vector<14x8xf32> to vector<14x8xbf16>
    %440 = arith.truncf %438 : vector<14x8xf32> to vector<14x8xbf16>
    %cst_164 = arith.constant dense<0.000000e+00> : vector<14x14xf32>
    %441 = tpu.matmul %439, %440, %cst_164 {dimension_numbers = #tpu.dot_dimension_numbers<[1], [1], [0], [0], [0, 0, 1, 0], [], []>} : vector<14x8xbf16>, vector<14x8xbf16>, vector<14x14xf32> -> vector<14x14xf32>
    %cst_165 = arith.constant dense<0xFF800000> : vector<14xf32>
    %442 = vector.multi_reduction <maximumf>, %441, %cst_165 [1] : vector<14x14xf32> to vector<14xf32>
    %443 = vector.shape_cast %442 : vector<14xf32> to vector<14x1xf32>
    %444 = vector.broadcast %443 : vector<14x1xf32> to vector<14x14xf32>
    %445 = arith.subf %441, %444 : vector<14x14xf32>
    %446 = math.exp %445 : vector<14x14xf32>
    %cst_166 = arith.constant dense<0.000000e+00> : vector<14xf32>
    %447 = vector.multi_reduction <add>, %446, %cst_166 [1] : vector<14x14xf32> to vector<14xf32>
    %448 = vector.shape_cast %447 : vector<14xf32> to vector<14x1xf32>
    %449 = tpu.reciprocal %448 {approx = true} : vector<14x1xf32> -> vector<14x1xf32>
    %450 = vector.broadcast %449 : vector<14x1xf32> to vector<14x14xf32>
    %451 = arith.mulf %446, %450 : vector<14x14xf32>
    %452 = vector.extract_strided_slice %434 {offsets = [0, 64], sizes = [14, 32], strides = [1, 1]} : vector<28x192xf32> to vector<14x32xf32>
    %453 = arith.truncf %451 : vector<14x14xf32> to vector<14x14xbf16>
    %454 = arith.truncf %452 : vector<14x32xf32> to vector<14x32xbf16>
    %cst_167 = arith.constant dense<0.000000e+00> : vector<14x32xf32>
    %455 = tpu.matmul %453, %454, %cst_167 {dimension_numbers = #tpu.dot_dimension_numbers<[1], [0], [0], [1], [0, 0, 1, 1], [], []>} : vector<14x14xbf16>, vector<14x32xbf16>, vector<14x32xf32> -> vector<14x32xf32>
    %456 = vector.broadcast %436 : vector<1x32xf32> to vector<14x32xf32>
    %457 = arith.addf %456, %455 : vector<14x32xf32>
    %458 = vector.extract_strided_slice %434 {offsets = [0, 8], sizes = [14, 8], strides = [1, 1]} : vector<28x192xf32> to vector<14x8xf32>
    %459 = vector.extract_strided_slice %434 {offsets = [0, 40], sizes = [14, 8], strides = [1, 1]} : vector<28x192xf32> to vector<14x8xf32>
    %460 = arith.truncf %458 : vector<14x8xf32> to vector<14x8xbf16>
    %461 = arith.truncf %459 : vector<14x8xf32> to vector<14x8xbf16>
    %cst_168 = arith.constant dense<0.000000e+00> : vector<14x14xf32>
    %462 = tpu.matmul %460, %461, %cst_168 {dimension_numbers = #tpu.dot_dimension_numbers<[1], [1], [0], [0], [0, 0, 1, 0], [], []>} : vector<14x8xbf16>, vector<14x8xbf16>, vector<14x14xf32> -> vector<14x14xf32>
    %cst_169 = arith.constant dense<0xFF800000> : vector<14xf32>
    %463 = vector.multi_reduction <maximumf>, %462, %cst_169 [1] : vector<14x14xf32> to vector<14xf32>
    %464 = vector.shape_cast %463 : vector<14xf32> to vector<14x1xf32>
    %465 = vector.broadcast %464 : vector<14x1xf32> to vector<14x14xf32>
    %466 = arith.subf %462, %465 : vector<14x14xf32>
    %467 = math.exp %466 : vector<14x14xf32>
    %cst_170 = arith.constant dense<0.000000e+00> : vector<14xf32>
    %468 = vector.multi_reduction <add>, %467, %cst_170 [1] : vector<14x14xf32> to vector<14xf32>
    %469 = vector.shape_cast %468 : vector<14xf32> to vector<14x1xf32>
    %470 = tpu.reciprocal %469 {approx = true} : vector<14x1xf32> -> vector<14x1xf32>
    %471 = vector.broadcast %470 : vector<14x1xf32> to vector<14x14xf32>
    %472 = arith.mulf %467, %471 : vector<14x14xf32>
    %473 = vector.extract_strided_slice %434 {offsets = [0, 96], sizes = [14, 32], strides = [1, 1]} : vector<28x192xf32> to vector<14x32xf32>
    %474 = arith.truncf %472 : vector<14x14xf32> to vector<14x14xbf16>
    %475 = arith.truncf %473 : vector<14x32xf32> to vector<14x32xbf16>
    %cst_171 = arith.constant dense<0.000000e+00> : vector<14x32xf32>
    %476 = tpu.matmul %474, %475, %cst_171 {dimension_numbers = #tpu.dot_dimension_numbers<[1], [0], [0], [1], [0, 0, 1, 1], [], []>} : vector<14x14xbf16>, vector<14x32xbf16>, vector<14x32xf32> -> vector<14x32xf32>
    %477 = arith.addf %457, %476 : vector<14x32xf32>
    %478 = vector.extract_strided_slice %434 {offsets = [0, 16], sizes = [14, 8], strides = [1, 1]} : vector<28x192xf32> to vector<14x8xf32>
    %479 = vector.extract_strided_slice %434 {offsets = [0, 48], sizes = [14, 8], strides = [1, 1]} : vector<28x192xf32> to vector<14x8xf32>
    %480 = arith.truncf %478 : vector<14x8xf32> to vector<14x8xbf16>
    %481 = arith.truncf %479 : vector<14x8xf32> to vector<14x8xbf16>
    %cst_172 = arith.constant dense<0.000000e+00> : vector<14x14xf32>
    %482 = tpu.matmul %480, %481, %cst_172 {dimension_numbers = #tpu.dot_dimension_numbers<[1], [1], [0], [0], [0, 0, 1, 0], [], []>} : vector<14x8xbf16>, vector<14x8xbf16>, vector<14x14xf32> -> vector<14x14xf32>
    %cst_173 = arith.constant dense<0xFF800000> : vector<14xf32>
    %483 = vector.multi_reduction <maximumf>, %482, %cst_173 [1] : vector<14x14xf32> to vector<14xf32>
    %484 = vector.shape_cast %483 : vector<14xf32> to vector<14x1xf32>
    %485 = vector.broadcast %484 : vector<14x1xf32> to vector<14x14xf32>
    %486 = arith.subf %482, %485 : vector<14x14xf32>
    %487 = math.exp %486 : vector<14x14xf32>
    %cst_174 = arith.constant dense<0.000000e+00> : vector<14xf32>
    %488 = vector.multi_reduction <add>, %487, %cst_174 [1] : vector<14x14xf32> to vector<14xf32>
    %489 = vector.shape_cast %488 : vector<14xf32> to vector<14x1xf32>
    %490 = tpu.reciprocal %489 {approx = true} : vector<14x1xf32> -> vector<14x1xf32>
    %491 = vector.broadcast %490 : vector<14x1xf32> to vector<14x14xf32>
    %492 = arith.mulf %487, %491 : vector<14x14xf32>
    %493 = vector.extract_strided_slice %434 {offsets = [0, 128], sizes = [14, 32], strides = [1, 1]} : vector<28x192xf32> to vector<14x32xf32>
    %494 = arith.truncf %492 : vector<14x14xf32> to vector<14x14xbf16>
    %495 = arith.truncf %493 : vector<14x32xf32> to vector<14x32xbf16>
    %cst_175 = arith.constant dense<0.000000e+00> : vector<14x32xf32>
    %496 = tpu.matmul %494, %495, %cst_175 {dimension_numbers = #tpu.dot_dimension_numbers<[1], [0], [0], [1], [0, 0, 1, 1], [], []>} : vector<14x14xbf16>, vector<14x32xbf16>, vector<14x32xf32> -> vector<14x32xf32>
    %497 = arith.addf %477, %496 : vector<14x32xf32>
    %498 = vector.extract_strided_slice %434 {offsets = [0, 24], sizes = [14, 8], strides = [1, 1]} : vector<28x192xf32> to vector<14x8xf32>
    %499 = vector.extract_strided_slice %434 {offsets = [0, 56], sizes = [14, 8], strides = [1, 1]} : vector<28x192xf32> to vector<14x8xf32>
    %500 = arith.truncf %498 : vector<14x8xf32> to vector<14x8xbf16>
    %501 = arith.truncf %499 : vector<14x8xf32> to vector<14x8xbf16>
    %cst_176 = arith.constant dense<0.000000e+00> : vector<14x14xf32>
    %502 = tpu.matmul %500, %501, %cst_176 {dimension_numbers = #tpu.dot_dimension_numbers<[1], [1], [0], [0], [0, 0, 1, 0], [], []>} : vector<14x8xbf16>, vector<14x8xbf16>, vector<14x14xf32> -> vector<14x14xf32>
    %cst_177 = arith.constant dense<0xFF800000> : vector<14xf32>
    %503 = vector.multi_reduction <maximumf>, %502, %cst_177 [1] : vector<14x14xf32> to vector<14xf32>
    %504 = vector.shape_cast %503 : vector<14xf32> to vector<14x1xf32>
    %505 = vector.broadcast %504 : vector<14x1xf32> to vector<14x14xf32>
    %506 = arith.subf %502, %505 : vector<14x14xf32>
    %507 = math.exp %506 : vector<14x14xf32>
    %cst_178 = arith.constant dense<0.000000e+00> : vector<14xf32>
    %508 = vector.multi_reduction <add>, %507, %cst_178 [1] : vector<14x14xf32> to vector<14xf32>
    %509 = vector.shape_cast %508 : vector<14xf32> to vector<14x1xf32>
    %510 = tpu.reciprocal %509 {approx = true} : vector<14x1xf32> -> vector<14x1xf32>
    %511 = vector.broadcast %510 : vector<14x1xf32> to vector<14x14xf32>
    %512 = arith.mulf %507, %511 : vector<14x14xf32>
    %513 = vector.extract_strided_slice %434 {offsets = [0, 160], sizes = [14, 32], strides = [1, 1]} : vector<28x192xf32> to vector<14x32xf32>
    %514 = arith.truncf %512 : vector<14x14xf32> to vector<14x14xbf16>
    %515 = arith.truncf %513 : vector<14x32xf32> to vector<14x32xbf16>
    %cst_179 = arith.constant dense<0.000000e+00> : vector<14x32xf32>
    %516 = tpu.matmul %514, %515, %cst_179 {dimension_numbers = #tpu.dot_dimension_numbers<[1], [0], [0], [1], [0, 0, 1, 1], [], []>} : vector<14x14xbf16>, vector<14x32xbf16>, vector<14x32xf32> -> vector<14x32xf32>
    %517 = arith.addf %497, %516 : vector<14x32xf32>
    %518 = vector.extract_strided_slice %414 {offsets = [0, 0], sizes = [14, 32], strides = [1, 1]} : vector<28x32xf32> to vector<14x32xf32>
    %519 = arith.addf %518, %517 : vector<14x32xf32>
    %520 = vector.extract_strided_slice %418 {offsets = [0, 0, 0], sizes = [1, 1, 32], strides = [1, 1, 1]} : vector<2x1x32xf32> to vector<1x1x32xf32>
    %521 = vector.shape_cast %520 : vector<1x1x32xf32> to vector<1x32xf32>
    %522 = vector.extract_strided_slice %419 {offsets = [0, 0, 0], sizes = [1, 1, 32], strides = [1, 1, 1]} : vector<2x1x32xf32> to vector<1x1x32xf32>
    %523 = vector.shape_cast %522 : vector<1x1x32xf32> to vector<1x32xf32>
    %cst_180 = arith.constant dense<0.000000e+00> : vector<14xf32>
    %524 = vector.multi_reduction <add>, %519, %cst_180 [1] : vector<14x32xf32> to vector<14xf32>
    %525 = vector.shape_cast %524 : vector<14xf32> to vector<14x1xf32>
    %cst_181 = arith.constant 3.200000e+01 : f32
    %526 = vector.broadcast %cst_181 : f32 to vector<14x1xf32>
    %527 = arith.divf %525, %526 : vector<14x1xf32>
    %528 = vector.broadcast %527 : vector<14x1xf32> to vector<14x32xf32>
    %529 = arith.subf %519, %528 : vector<14x32xf32>
    %530 = arith.mulf %529, %529 : vector<14x32xf32>
    %cst_182 = arith.constant dense<0.000000e+00> : vector<14xf32>
    %531 = vector.multi_reduction <add>, %530, %cst_182 [1] : vector<14x32xf32> to vector<14xf32>
    %532 = vector.shape_cast %531 : vector<14xf32> to vector<14x1xf32>
    %cst_183 = arith.constant 3.200000e+01 : f32
    %533 = vector.broadcast %cst_183 : f32 to vector<14x1xf32>
    %534 = arith.divf %532, %533 : vector<14x1xf32>
    %cst_184 = arith.constant 9.99999974E-6 : f32
    %535 = vector.broadcast %cst_184 : f32 to vector<14x1xf32>
    %536 = arith.addf %534, %535 : vector<14x1xf32>
    %537 = math.rsqrt %536 : vector<14x1xf32>
    %538 = vector.broadcast %537 : vector<14x1xf32> to vector<14x32xf32>
    %539 = arith.mulf %529, %538 : vector<14x32xf32>
    %540 = vector.broadcast %521 : vector<1x32xf32> to vector<14x32xf32>
    %541 = arith.mulf %539, %540 : vector<14x32xf32>
    %542 = vector.broadcast %523 : vector<1x32xf32> to vector<14x32xf32>
    %543 = arith.addf %541, %542 : vector<14x32xf32>
    %c0_185 = arith.constant 0 : index
    %c0_186 = arith.constant 0 : index
    %544 = vector.load %arg28[%c0_185, %c0_186] : memref<28x32xf32, #tpu.memory_space<vmem>>, vector<14x32xf32>
    tpu.vector_store %arg28[%c0_185, %c0_186], %543 {strides = array<i32>} : memref<28x32xf32, #tpu.memory_space<vmem>>, vector<14x32xf32>,
    %545 = vector.extract_strided_slice %417 {offsets = [0, 0, 0], sizes = [1, 1, 32], strides = [1, 1, 1]} : vector<2x1x32xf32> to vector<1x1x32xf32>
    %546 = vector.shape_cast %545 : vector<1x1x32xf32> to vector<1x32xf32>
    %547 = vector.extract_strided_slice %434 {offsets = [14, 0], sizes = [14, 8], strides = [1, 1]} : vector<28x192xf32> to vector<14x8xf32>
    %548 = vector.extract_strided_slice %434 {offsets = [14, 32], sizes = [14, 8], strides = [1, 1]} : vector<28x192xf32> to vector<14x8xf32>
    %549 = arith.truncf %547 : vector<14x8xf32> to vector<14x8xbf16>
    %550 = arith.truncf %548 : vector<14x8xf32> to vector<14x8xbf16>
    %cst_187 = arith.constant dense<0.000000e+00> : vector<14x14xf32>
    %551 = tpu.matmul %549, %550, %cst_187 {dimension_numbers = #tpu.dot_dimension_numbers<[1], [1], [0], [0], [0, 0, 1, 0], [], []>} : vector<14x8xbf16>, vector<14x8xbf16>, vector<14x14xf32> -> vector<14x14xf32>
    %cst_188 = arith.constant dense<0xFF800000> : vector<14xf32>
    %552 = vector.multi_reduction <maximumf>, %551, %cst_188 [1] : vector<14x14xf32> to vector<14xf32>
    %553 = vector.shape_cast %552 : vector<14xf32> to vector<14x1xf32>
    %554 = vector.broadcast %553 : vector<14x1xf32> to vector<14x14xf32>
    %555 = arith.subf %551, %554 : vector<14x14xf32>
    %556 = math.exp %555 : vector<14x14xf32>
    %cst_189 = arith.constant dense<0.000000e+00> : vector<14xf32>
    %557 = vector.multi_reduction <add>, %556, %cst_189 [1] : vector<14x14xf32> to vector<14xf32>
    %558 = vector.shape_cast %557 : vector<14xf32> to vector<14x1xf32>
    %559 = tpu.reciprocal %558 {approx = true} : vector<14x1xf32> -> vector<14x1xf32>
    %560 = vector.broadcast %559 : vector<14x1xf32> to vector<14x14xf32>
    %561 = arith.mulf %556, %560 : vector<14x14xf32>
    %562 = vector.extract_strided_slice %434 {offsets = [14, 64], sizes = [14, 32], strides = [1, 1]} : vector<28x192xf32> to vector<14x32xf32>
    %563 = arith.truncf %561 : vector<14x14xf32> to vector<14x14xbf16>
    %564 = arith.truncf %562 : vector<14x32xf32> to vector<14x32xbf16>
    %cst_190 = arith.constant dense<0.000000e+00> : vector<14x32xf32>
    %565 = tpu.matmul %563, %564, %cst_190 {dimension_numbers = #tpu.dot_dimension_numbers<[1], [0], [0], [1], [0, 0, 1, 1], [], []>} : vector<14x14xbf16>, vector<14x32xbf16>, vector<14x32xf32> -> vector<14x32xf32>
    %566 = vector.broadcast %546 : vector<1x32xf32> to vector<14x32xf32>
    %567 = arith.addf %566, %565 : vector<14x32xf32>
    %568 = vector.extract_strided_slice %434 {offsets = [14, 8], sizes = [14, 8], strides = [1, 1]} : vector<28x192xf32> to vector<14x8xf32>
    %569 = vector.extract_strided_slice %434 {offsets = [14, 40], sizes = [14, 8], strides = [1, 1]} : vector<28x192xf32> to vector<14x8xf32>
    %570 = arith.truncf %568 : vector<14x8xf32> to vector<14x8xbf16>
    %571 = arith.truncf %569 : vector<14x8xf32> to vector<14x8xbf16>
    %cst_191 = arith.constant dense<0.000000e+00> : vector<14x14xf32>
    %572 = tpu.matmul %570, %571, %cst_191 {dimension_numbers = #tpu.dot_dimension_numbers<[1], [1], [0], [0], [0, 0, 1, 0], [], []>} : vector<14x8xbf16>, vector<14x8xbf16>, vector<14x14xf32> -> vector<14x14xf32>
    %cst_192 = arith.constant dense<0xFF800000> : vector<14xf32>
    %573 = vector.multi_reduction <maximumf>, %572, %cst_192 [1] : vector<14x14xf32> to vector<14xf32>
    %574 = vector.shape_cast %573 : vector<14xf32> to vector<14x1xf32>
    %575 = vector.broadcast %574 : vector<14x1xf32> to vector<14x14xf32>
    %576 = arith.subf %572, %575 : vector<14x14xf32>
    %577 = math.exp %576 : vector<14x14xf32>
    %cst_193 = arith.constant dense<0.000000e+00> : vector<14xf32>
    %578 = vector.multi_reduction <add>, %577, %cst_193 [1] : vector<14x14xf32> to vector<14xf32>
    %579 = vector.shape_cast %578 : vector<14xf32> to vector<14x1xf32>
    %580 = tpu.reciprocal %579 {approx = true} : vector<14x1xf32> -> vector<14x1xf32>
    %581 = vector.broadcast %580 : vector<14x1xf32> to vector<14x14xf32>
    %582 = arith.mulf %577, %581 : vector<14x14xf32>
    %583 = vector.extract_strided_slice %434 {offsets = [14, 96], sizes = [14, 32], strides = [1, 1]} : vector<28x192xf32> to vector<14x32xf32>
    %584 = arith.truncf %582 : vector<14x14xf32> to vector<14x14xbf16>
    %585 = arith.truncf %583 : vector<14x32xf32> to vector<14x32xbf16>
    %cst_194 = arith.constant dense<0.000000e+00> : vector<14x32xf32>
    %586 = tpu.matmul %584, %585, %cst_194 {dimension_numbers = #tpu.dot_dimension_numbers<[1], [0], [0], [1], [0, 0, 1, 1], [], []>} : vector<14x14xbf16>, vector<14x32xbf16>, vector<14x32xf32> -> vector<14x32xf32>
    %587 = arith.addf %567, %586 : vector<14x32xf32>
    %588 = vector.extract_strided_slice %434 {offsets = [14, 16], sizes = [14, 8], strides = [1, 1]} : vector<28x192xf32> to vector<14x8xf32>
    %589 = vector.extract_strided_slice %434 {offsets = [14, 48], sizes = [14, 8], strides = [1, 1]} : vector<28x192xf32> to vector<14x8xf32>
    %590 = arith.truncf %588 : vector<14x8xf32> to vector<14x8xbf16>
    %591 = arith.truncf %589 : vector<14x8xf32> to vector<14x8xbf16>
    %cst_195 = arith.constant dense<0.000000e+00> : vector<14x14xf32>
    %592 = tpu.matmul %590, %591, %cst_195 {dimension_numbers = #tpu.dot_dimension_numbers<[1], [1], [0], [0], [0, 0, 1, 0], [], []>} : vector<14x8xbf16>, vector<14x8xbf16>, vector<14x14xf32> -> vector<14x14xf32>
    %cst_196 = arith.constant dense<0xFF800000> : vector<14xf32>
    %593 = vector.multi_reduction <maximumf>, %592, %cst_196 [1] : vector<14x14xf32> to vector<14xf32>
    %594 = vector.shape_cast %593 : vector<14xf32> to vector<14x1xf32>
    %595 = vector.broadcast %594 : vector<14x1xf32> to vector<14x14xf32>
    %596 = arith.subf %592, %595 : vector<14x14xf32>
    %597 = math.exp %596 : vector<14x14xf32>
    %cst_197 = arith.constant dense<0.000000e+00> : vector<14xf32>
    %598 = vector.multi_reduction <add>, %597, %cst_197 [1] : vector<14x14xf32> to vector<14xf32>
    %599 = vector.shape_cast %598 : vector<14xf32> to vector<14x1xf32>
    %600 = tpu.reciprocal %599 {approx = true} : vector<14x1xf32> -> vector<14x1xf32>
    %601 = vector.broadcast %600 : vector<14x1xf32> to vector<14x14xf32>
    %602 = arith.mulf %597, %601 : vector<14x14xf32>
    %603 = vector.extract_strided_slice %434 {offsets = [14, 128], sizes = [14, 32], strides = [1, 1]} : vector<28x192xf32> to vector<14x32xf32>
    %604 = arith.truncf %602 : vector<14x14xf32> to vector<14x14xbf16>
    %605 = arith.truncf %603 : vector<14x32xf32> to vector<14x32xbf16>
    %cst_198 = arith.constant dense<0.000000e+00> : vector<14x32xf32>
    %606 = tpu.matmul %604, %605, %cst_198 {dimension_numbers = #tpu.dot_dimension_numbers<[1], [0], [0], [1], [0, 0, 1, 1], [], []>} : vector<14x14xbf16>, vector<14x32xbf16>, vector<14x32xf32> -> vector<14x32xf32>
    %607 = arith.addf %587, %606 : vector<14x32xf32>
    %608 = vector.extract_strided_slice %434 {offsets = [14, 24], sizes = [14, 8], strides = [1, 1]} : vector<28x192xf32> to vector<14x8xf32>
    %609 = vector.extract_strided_slice %434 {offsets = [14, 56], sizes = [14, 8], strides = [1, 1]} : vector<28x192xf32> to vector<14x8xf32>
    %610 = arith.truncf %608 : vector<14x8xf32> to vector<14x8xbf16>
    %611 = arith.truncf %609 : vector<14x8xf32> to vector<14x8xbf16>
    %cst_199 = arith.constant dense<0.000000e+00> : vector<14x14xf32>
    %612 = tpu.matmul %610, %611, %cst_199 {dimension_numbers = #tpu.dot_dimension_numbers<[1], [1], [0], [0], [0, 0, 1, 0], [], []>} : vector<14x8xbf16>, vector<14x8xbf16>, vector<14x14xf32> -> vector<14x14xf32>
    %cst_200 = arith.constant dense<0xFF800000> : vector<14xf32>
    %613 = vector.multi_reduction <maximumf>, %612, %cst_200 [1] : vector<14x14xf32> to vector<14xf32>
    %614 = vector.shape_cast %613 : vector<14xf32> to vector<14x1xf32>
    %615 = vector.broadcast %614 : vector<14x1xf32> to vector<14x14xf32>
    %616 = arith.subf %612, %615 : vector<14x14xf32>
    %617 = math.exp %616 : vector<14x14xf32>
    %cst_201 = arith.constant dense<0.000000e+00> : vector<14xf32>
    %618 = vector.multi_reduction <add>, %617, %cst_201 [1] : vector<14x14xf32> to vector<14xf32>
    %619 = vector.shape_cast %618 : vector<14xf32> to vector<14x1xf32>
    %620 = tpu.reciprocal %619 {approx = true} : vector<14x1xf32> -> vector<14x1xf32>
    %621 = vector.broadcast %620 : vector<14x1xf32> to vector<14x14xf32>
    %622 = arith.mulf %617, %621 : vector<14x14xf32>
    %623 = vector.extract_strided_slice %434 {offsets = [14, 160], sizes = [14, 32], strides = [1, 1]} : vector<28x192xf32> to vector<14x32xf32>
    %624 = arith.truncf %622 : vector<14x14xf32> to vector<14x14xbf16>
    %625 = arith.truncf %623 : vector<14x32xf32> to vector<14x32xbf16>
    %cst_202 = arith.constant dense<0.000000e+00> : vector<14x32xf32>
    %626 = tpu.matmul %624, %625, %cst_202 {dimension_numbers = #tpu.dot_dimension_numbers<[1], [0], [0], [1], [0, 0, 1, 1], [], []>} : vector<14x14xbf16>, vector<14x32xbf16>, vector<14x32xf32> -> vector<14x32xf32>
    %627 = arith.addf %607, %626 : vector<14x32xf32>
    %628 = vector.extract_strided_slice %414 {offsets = [14, 0], sizes = [14, 32], strides = [1, 1]} : vector<28x32xf32> to vector<14x32xf32>
    %629 = arith.addf %628, %627 : vector<14x32xf32>
    %630 = vector.extract_strided_slice %418 {offsets = [0, 0, 0], sizes = [1, 1, 32], strides = [1, 1, 1]} : vector<2x1x32xf32> to vector<1x1x32xf32>
    %631 = vector.shape_cast %630 : vector<1x1x32xf32> to vector<1x32xf32>
    %632 = vector.extract_strided_slice %419 {offsets = [0, 0, 0], sizes = [1, 1, 32], strides = [1, 1, 1]} : vector<2x1x32xf32> to vector<1x1x32xf32>
    %633 = vector.shape_cast %632 : vector<1x1x32xf32> to vector<1x32xf32>
    %cst_203 = arith.constant dense<0.000000e+00> : vector<14xf32>
    %634 = vector.multi_reduction <add>, %629, %cst_203 [1] : vector<14x32xf32> to vector<14xf32>
    %635 = vector.shape_cast %634 : vector<14xf32> to vector<14x1xf32>
    %cst_204 = arith.constant 3.200000e+01 : f32
    %636 = vector.broadcast %cst_204 : f32 to vector<14x1xf32>
    %637 = arith.divf %635, %636 : vector<14x1xf32>
    %638 = vector.broadcast %637 : vector<14x1xf32> to vector<14x32xf32>
    %639 = arith.subf %629, %638 : vector<14x32xf32>
    %640 = arith.mulf %639, %639 : vector<14x32xf32>
    %cst_205 = arith.constant dense<0.000000e+00> : vector<14xf32>
    %641 = vector.multi_reduction <add>, %640, %cst_205 [1] : vector<14x32xf32> to vector<14xf32>
    %642 = vector.shape_cast %641 : vector<14xf32> to vector<14x1xf32>
    %cst_206 = arith.constant 3.200000e+01 : f32
    %643 = vector.broadcast %cst_206 : f32 to vector<14x1xf32>
    %644 = arith.divf %642, %643 : vector<14x1xf32>
    %cst_207 = arith.constant 9.99999974E-6 : f32
    %645 = vector.broadcast %cst_207 : f32 to vector<14x1xf32>
    %646 = arith.addf %644, %645 : vector<14x1xf32>
    %647 = math.rsqrt %646 : vector<14x1xf32>
    %648 = vector.broadcast %647 : vector<14x1xf32> to vector<14x32xf32>
    %649 = arith.mulf %639, %648 : vector<14x32xf32>
    %650 = vector.broadcast %631 : vector<1x32xf32> to vector<14x32xf32>
    %651 = arith.mulf %649, %650 : vector<14x32xf32>
    %652 = vector.broadcast %633 : vector<1x32xf32> to vector<14x32xf32>
    %653 = arith.addf %651, %652 : vector<14x32xf32>
    %c14_208 = arith.constant 14 : index
    %c0_209 = arith.constant 0 : index
    %654 = vector.load %arg28[%c14_208, %c0_209] : memref<28x32xf32, #tpu.memory_space<vmem>>, vector<14x32xf32>
    tpu.vector_store %arg28[%c14_208, %c0_209], %653 {strides = array<i32>} : memref<28x32xf32, #tpu.memory_space<vmem>>, vector<14x32xf32>,
    %c0_210 = arith.constant 0 : index
    %c0_211 = arith.constant 0 : index
    %655 = vector.load %arg28[%c0_210, %c0_211] : memref<28x32xf32, #tpu.memory_space<vmem>>, vector<28x32xf32>
    %656 = vector.extract_strided_slice %420 {offsets = [0, 0, 0], sizes = [1, 32, 64], strides = [1, 1, 1]} : vector<2x32x64xf32> to vector<1x32x64xf32>
    %657 = vector.shape_cast %656 : vector<1x32x64xf32> to vector<32x64xf32>
    %658 = arith.truncf %655 : vector<28x32xf32> to vector<28x32xbf16>
    %659 = arith.truncf %657 : vector<32x64xf32> to vector<32x64xbf16>
    %cst_212 = arith.constant dense<0.000000e+00> : vector<28x64xf32>
    %660 = tpu.matmul %658, %659, %cst_212 {dimension_numbers = #tpu.dot_dimension_numbers<[1], [0], [0], [1], [0, 0, 1, 1], [], []>} : vector<28x32xbf16>, vector<32x64xbf16>, vector<28x64xf32> -> vector<28x64xf32>
    %661 = vector.extract_strided_slice %421 {offsets = [0, 0, 0], sizes = [1, 1, 64], strides = [1, 1, 1]} : vector<2x1x64xf32> to vector<1x1x64xf32>
    %662 = vector.shape_cast %661 : vector<1x1x64xf32> to vector<1x64xf32>
    %663 = vector.broadcast %662 : vector<1x64xf32> to vector<28x64xf32>
    %664 = arith.addf %660, %663 : vector<28x64xf32>
    %cst_213 = arith.constant 5.000000e-01 : f32
    %665 = vector.broadcast %cst_213 : f32 to vector<28x64xf32>
    %666 = arith.mulf %665, %664 : vector<28x64xf32>
    %cst_214 = arith.constant 4.471500e-02 : f32
    %667 = vector.broadcast %cst_214 : f32 to vector<28x64xf32>
    %668 = arith.mulf %667, %664 : vector<28x64xf32>
    %669 = arith.mulf %668, %664 : vector<28x64xf32>
    %670 = arith.mulf %669, %664 : vector<28x64xf32>
    %671 = arith.addf %664, %670 : vector<28x64xf32>
    %cst_215 = arith.constant 0.797884583 : f32
    %672 = vector.broadcast %cst_215 : f32 to vector<28x64xf32>
    %673 = arith.mulf %672, %671 : vector<28x64xf32>
    %674 = math.tanh %673 : vector<28x64xf32>
    %cst_216 = arith.constant 1.000000e+00 : f32
    %675 = vector.broadcast %cst_216 : f32 to vector<28x64xf32>
    %676 = arith.addf %675, %674 : vector<28x64xf32>
    %677 = arith.mulf %666, %676 : vector<28x64xf32>
    %678 = vector.extract_strided_slice %422 {offsets = [0, 0, 0], sizes = [1, 64, 32], strides = [1, 1, 1]} : vector<2x64x32xf32> to vector<1x64x32xf32>
    %679 = vector.shape_cast %678 : vector<1x64x32xf32> to vector<64x32xf32>
    %680 = arith.truncf %677 : vector<28x64xf32> to vector<28x64xbf16>
    %681 = arith.truncf %679 : vector<64x32xf32> to vector<64x32xbf16>
    %cst_217 = arith.constant dense<0.000000e+00> : vector<28x32xf32>
    %682 = tpu.matmul %680, %681, %cst_217 {dimension_numbers = #tpu.dot_dimension_numbers<[1], [0], [0], [1], [0, 0, 1, 1], [], []>} : vector<28x64xbf16>, vector<64x32xbf16>, vector<28x32xf32> -> vector<28x32xf32>
    %683 = arith.addf %655, %682 : vector<28x32xf32>
    %684 = vector.extract_strided_slice %423 {offsets = [0, 0, 0], sizes = [1, 1, 32], strides = [1, 1, 1]} : vector<2x1x32xf32> to vector<1x1x32xf32>
    %685 = vector.shape_cast %684 : vector<1x1x32xf32> to vector<1x32xf32>
    %686 = vector.broadcast %685 : vector<1x32xf32> to vector<28x32xf32>
    %687 = arith.addf %683, %686 : vector<28x32xf32>
    %688 = vector.extract_strided_slice %424 {offsets = [0, 0, 0], sizes = [1, 1, 32], strides = [1, 1, 1]} : vector<2x1x32xf32> to vector<1x1x32xf32>
    %689 = vector.shape_cast %688 : vector<1x1x32xf32> to vector<1x32xf32>
    %690 = vector.extract_strided_slice %425 {offsets = [0, 0, 0], sizes = [1, 1, 32], strides = [1, 1, 1]} : vector<2x1x32xf32> to vector<1x1x32xf32>
    %691 = vector.shape_cast %690 : vector<1x1x32xf32> to vector<1x32xf32>
    %cst_218 = arith.constant dense<0.000000e+00> : vector<28xf32>
    %692 = vector.multi_reduction <add>, %687, %cst_218 [1] : vector<28x32xf32> to vector<28xf32>
    %693 = vector.shape_cast %692 : vector<28xf32> to vector<28x1xf32>
    %cst_219 = arith.constant 3.200000e+01 : f32
    %694 = vector.broadcast %cst_219 : f32 to vector<28x1xf32>
    %695 = arith.divf %693, %694 : vector<28x1xf32>
    %696 = vector.broadcast %695 : vector<28x1xf32> to vector<28x32xf32>
    %697 = arith.subf %687, %696 : vector<28x32xf32>
    %698 = arith.mulf %697, %697 : vector<28x32xf32>
    %cst_220 = arith.constant dense<0.000000e+00> : vector<28xf32>
    %699 = vector.multi_reduction <add>, %698, %cst_220 [1] : vector<28x32xf32> to vector<28xf32>
    %700 = vector.shape_cast %699 : vector<28xf32> to vector<28x1xf32>
    %cst_221 = arith.constant 3.200000e+01 : f32
    %701 = vector.broadcast %cst_221 : f32 to vector<28x1xf32>
    %702 = arith.divf %700, %701 : vector<28x1xf32>
    %cst_222 = arith.constant 9.99999974E-6 : f32
    %703 = vector.broadcast %cst_222 : f32 to vector<28x1xf32>
    %704 = arith.addf %702, %703 : vector<28x1xf32>
    %705 = math.rsqrt %704 : vector<28x1xf32>
    %706 = vector.broadcast %705 : vector<28x1xf32> to vector<28x32xf32>
    %707 = arith.mulf %697, %706 : vector<28x32xf32>
    %708 = vector.broadcast %689 : vector<1x32xf32> to vector<28x32xf32>
    %709 = arith.mulf %707, %708 : vector<28x32xf32>
    %710 = vector.broadcast %691 : vector<1x32xf32> to vector<28x32xf32>
    %711 = arith.addf %709, %710 : vector<28x32xf32>
    %712 = vector.extract_strided_slice %415 {offsets = [1, 0, 0], sizes = [1, 32, 192], strides = [1, 1, 1]} : vector<2x32x192xf32> to vector<1x32x192xf32>
    %713 = vector.shape_cast %712 : vector<1x32x192xf32> to vector<32x192xf32>
    %714 = arith.truncf %711 : vector<28x32xf32> to vector<28x32xbf16>
    %715 = arith.truncf %713 : vector<32x192xf32> to vector<32x192xbf16>
    %cst_223 = arith.constant dense<0.000000e+00> : vector<28x192xf32>
    %716 = tpu.matmul %714, %715, %cst_223 {dimension_numbers = #tpu.dot_dimension_numbers<[1], [0], [0], [1], [0, 0, 1, 1], [], []>} : vector<28x32xbf16>, vector<32x192xbf16>, vector<28x192xf32> -> vector<28x192xf32>
    %717 = vector.extract_strided_slice %416 {offsets = [1, 0, 0], sizes = [1, 1, 192], strides = [1, 1, 1]} : vector<2x1x192xf32> to vector<1x1x192xf32>
    %718 = vector.shape_cast %717 : vector<1x1x192xf32> to vector<1x192xf32>
    %719 = vector.broadcast %718 : vector<1x192xf32> to vector<28x192xf32>
    %720 = arith.addf %716, %719 : vector<28x192xf32>
    %721 = vector.extract_strided_slice %417 {offsets = [1, 0, 0], sizes = [1, 1, 32], strides = [1, 1, 1]} : vector<2x1x32xf32> to vector<1x1x32xf32>
    %722 = vector.shape_cast %721 : vector<1x1x32xf32> to vector<1x32xf32>
    %723 = vector.extract_strided_slice %720 {offsets = [0, 0], sizes = [14, 8], strides = [1, 1]} : vector<28x192xf32> to vector<14x8xf32>
    %724 = vector.extract_strided_slice %720 {offsets = [0, 32], sizes = [14, 8], strides = [1, 1]} : vector<28x192xf32> to vector<14x8xf32>
    %725 = arith.truncf %723 : vector<14x8xf32> to vector<14x8xbf16>
    %726 = arith.truncf %724 : vector<14x8xf32> to vector<14x8xbf16>
    %cst_224 = arith.constant dense<0.000000e+00> : vector<14x14xf32>
    %727 = tpu.matmul %725, %726, %cst_224 {dimension_numbers = #tpu.dot_dimension_numbers<[1], [1], [0], [0], [0, 0, 1, 0], [], []>} : vector<14x8xbf16>, vector<14x8xbf16>, vector<14x14xf32> -> vector<14x14xf32>
    %cst_225 = arith.constant dense<0xFF800000> : vector<14xf32>
    %728 = vector.multi_reduction <maximumf>, %727, %cst_225 [1] : vector<14x14xf32> to vector<14xf32>
    %729 = vector.shape_cast %728 : vector<14xf32> to vector<14x1xf32>
    %730 = vector.broadcast %729 : vector<14x1xf32> to vector<14x14xf32>
    %731 = arith.subf %727, %730 : vector<14x14xf32>
    %732 = math.exp %731 : vector<14x14xf32>
    %cst_226 = arith.constant dense<0.000000e+00> : vector<14xf32>
    %733 = vector.multi_reduction <add>, %732, %cst_226 [1] : vector<14x14xf32> to vector<14xf32>
    %734 = vector.shape_cast %733 : vector<14xf32> to vector<14x1xf32>
    %735 = tpu.reciprocal %734 {approx = true} : vector<14x1xf32> -> vector<14x1xf32>
    %736 = vector.broadcast %735 : vector<14x1xf32> to vector<14x14xf32>
    %737 = arith.mulf %732, %736 : vector<14x14xf32>
    %738 = vector.extract_strided_slice %720 {offsets = [0, 64], sizes = [14, 32], strides = [1, 1]} : vector<28x192xf32> to vector<14x32xf32>
    %739 = arith.truncf %737 : vector<14x14xf32> to vector<14x14xbf16>
    %740 = arith.truncf %738 : vector<14x32xf32> to vector<14x32xbf16>
    %cst_227 = arith.constant dense<0.000000e+00> : vector<14x32xf32>
    %741 = tpu.matmul %739, %740, %cst_227 {dimension_numbers = #tpu.dot_dimension_numbers<[1], [0], [0], [1], [0, 0, 1, 1], [], []>} : vector<14x14xbf16>, vector<14x32xbf16>, vector<14x32xf32> -> vector<14x32xf32>
    %742 = vector.broadcast %722 : vector<1x32xf32> to vector<14x32xf32>
    %743 = arith.addf %742, %741 : vector<14x32xf32>
    %744 = vector.extract_strided_slice %720 {offsets = [0, 8], sizes = [14, 8], strides = [1, 1]} : vector<28x192xf32> to vector<14x8xf32>
    %745 = vector.extract_strided_slice %720 {offsets = [0, 40], sizes = [14, 8], strides = [1, 1]} : vector<28x192xf32> to vector<14x8xf32>
    %746 = arith.truncf %744 : vector<14x8xf32> to vector<14x8xbf16>
    %747 = arith.truncf %745 : vector<14x8xf32> to vector<14x8xbf16>
    %cst_228 = arith.constant dense<0.000000e+00> : vector<14x14xf32>
    %748 = tpu.matmul %746, %747, %cst_228 {dimension_numbers = #tpu.dot_dimension_numbers<[1], [1], [0], [0], [0, 0, 1, 0], [], []>} : vector<14x8xbf16>, vector<14x8xbf16>, vector<14x14xf32> -> vector<14x14xf32>
    %cst_229 = arith.constant dense<0xFF800000> : vector<14xf32>
    %749 = vector.multi_reduction <maximumf>, %748, %cst_229 [1] : vector<14x14xf32> to vector<14xf32>
    %750 = vector.shape_cast %749 : vector<14xf32> to vector<14x1xf32>
    %751 = vector.broadcast %750 : vector<14x1xf32> to vector<14x14xf32>
    %752 = arith.subf %748, %751 : vector<14x14xf32>
    %753 = math.exp %752 : vector<14x14xf32>
    %cst_230 = arith.constant dense<0.000000e+00> : vector<14xf32>
    %754 = vector.multi_reduction <add>, %753, %cst_230 [1] : vector<14x14xf32> to vector<14xf32>
    %755 = vector.shape_cast %754 : vector<14xf32> to vector<14x1xf32>
    %756 = tpu.reciprocal %755 {approx = true} : vector<14x1xf32> -> vector<14x1xf32>
    %757 = vector.broadcast %756 : vector<14x1xf32> to vector<14x14xf32>
    %758 = arith.mulf %753, %757 : vector<14x14xf32>
    %759 = vector.extract_strided_slice %720 {offsets = [0, 96], sizes = [14, 32], strides = [1, 1]} : vector<28x192xf32> to vector<14x32xf32>
    %760 = arith.truncf %758 : vector<14x14xf32> to vector<14x14xbf16>
    %761 = arith.truncf %759 : vector<14x32xf32> to vector<14x32xbf16>
    %cst_231 = arith.constant dense<0.000000e+00> : vector<14x32xf32>
    %762 = tpu.matmul %760, %761, %cst_231 {dimension_numbers = #tpu.dot_dimension_numbers<[1], [0], [0], [1], [0, 0, 1, 1], [], []>} : vector<14x14xbf16>, vector<14x32xbf16>, vector<14x32xf32> -> vector<14x32xf32>
    %763 = arith.addf %743, %762 : vector<14x32xf32>
    %764 = vector.extract_strided_slice %720 {offsets = [0, 16], sizes = [14, 8], strides = [1, 1]} : vector<28x192xf32> to vector<14x8xf32>
    %765 = vector.extract_strided_slice %720 {offsets = [0, 48], sizes = [14, 8], strides = [1, 1]} : vector<28x192xf32> to vector<14x8xf32>
    %766 = arith.truncf %764 : vector<14x8xf32> to vector<14x8xbf16>
    %767 = arith.truncf %765 : vector<14x8xf32> to vector<14x8xbf16>
    %cst_232 = arith.constant dense<0.000000e+00> : vector<14x14xf32>
    %768 = tpu.matmul %766, %767, %cst_232 {dimension_numbers = #tpu.dot_dimension_numbers<[1], [1], [0], [0], [0, 0, 1, 0], [], []>} : vector<14x8xbf16>, vector<14x8xbf16>, vector<14x14xf32> -> vector<14x14xf32>
    %cst_233 = arith.constant dense<0xFF800000> : vector<14xf32>
    %769 = vector.multi_reduction <maximumf>, %768, %cst_233 [1] : vector<14x14xf32> to vector<14xf32>
    %770 = vector.shape_cast %769 : vector<14xf32> to vector<14x1xf32>
    %771 = vector.broadcast %770 : vector<14x1xf32> to vector<14x14xf32>
    %772 = arith.subf %768, %771 : vector<14x14xf32>
    %773 = math.exp %772 : vector<14x14xf32>
    %cst_234 = arith.constant dense<0.000000e+00> : vector<14xf32>
    %774 = vector.multi_reduction <add>, %773, %cst_234 [1] : vector<14x14xf32> to vector<14xf32>
    %775 = vector.shape_cast %774 : vector<14xf32> to vector<14x1xf32>
    %776 = tpu.reciprocal %775 {approx = true} : vector<14x1xf32> -> vector<14x1xf32>
    %777 = vector.broadcast %776 : vector<14x1xf32> to vector<14x14xf32>
    %778 = arith.mulf %773, %777 : vector<14x14xf32>
    %779 = vector.extract_strided_slice %720 {offsets = [0, 128], sizes = [14, 32], strides = [1, 1]} : vector<28x192xf32> to vector<14x32xf32>
    %780 = arith.truncf %778 : vector<14x14xf32> to vector<14x14xbf16>
    %781 = arith.truncf %779 : vector<14x32xf32> to vector<14x32xbf16>
    %cst_235 = arith.constant dense<0.000000e+00> : vector<14x32xf32>
    %782 = tpu.matmul %780, %781, %cst_235 {dimension_numbers = #tpu.dot_dimension_numbers<[1], [0], [0], [1], [0, 0, 1, 1], [], []>} : vector<14x14xbf16>, vector<14x32xbf16>, vector<14x32xf32> -> vector<14x32xf32>
    %783 = arith.addf %763, %782 : vector<14x32xf32>
    %784 = vector.extract_strided_slice %720 {offsets = [0, 24], sizes = [14, 8], strides = [1, 1]} : vector<28x192xf32> to vector<14x8xf32>
    %785 = vector.extract_strided_slice %720 {offsets = [0, 56], sizes = [14, 8], strides = [1, 1]} : vector<28x192xf32> to vector<14x8xf32>
    %786 = arith.truncf %784 : vector<14x8xf32> to vector<14x8xbf16>
    %787 = arith.truncf %785 : vector<14x8xf32> to vector<14x8xbf16>
    %cst_236 = arith.constant dense<0.000000e+00> : vector<14x14xf32>
    %788 = tpu.matmul %786, %787, %cst_236 {dimension_numbers = #tpu.dot_dimension_numbers<[1], [1], [0], [0], [0, 0, 1, 0], [], []>} : vector<14x8xbf16>, vector<14x8xbf16>, vector<14x14xf32> -> vector<14x14xf32>
    %cst_237 = arith.constant dense<0xFF800000> : vector<14xf32>
    %789 = vector.multi_reduction <maximumf>, %788, %cst_237 [1] : vector<14x14xf32> to vector<14xf32>
    %790 = vector.shape_cast %789 : vector<14xf32> to vector<14x1xf32>
    %791 = vector.broadcast %790 : vector<14x1xf32> to vector<14x14xf32>
    %792 = arith.subf %788, %791 : vector<14x14xf32>
    %793 = math.exp %792 : vector<14x14xf32>
    %cst_238 = arith.constant dense<0.000000e+00> : vector<14xf32>
    %794 = vector.multi_reduction <add>, %793, %cst_238 [1] : vector<14x14xf32> to vector<14xf32>
    %795 = vector.shape_cast %794 : vector<14xf32> to vector<14x1xf32>
    %796 = tpu.reciprocal %795 {approx = true} : vector<14x1xf32> -> vector<14x1xf32>
    %797 = vector.broadcast %796 : vector<14x1xf32> to vector<14x14xf32>
    %798 = arith.mulf %793, %797 : vector<14x14xf32>
    %799 = vector.extract_strided_slice %720 {offsets = [0, 160], sizes = [14, 32], strides = [1, 1]} : vector<28x192xf32> to vector<14x32xf32>
    %800 = arith.truncf %798 : vector<14x14xf32> to vector<14x14xbf16>
    %801 = arith.truncf %799 : vector<14x32xf32> to vector<14x32xbf16>
    %cst_239 = arith.constant dense<0.000000e+00> : vector<14x32xf32>
    %802 = tpu.matmul %800, %801, %cst_239 {dimension_numbers = #tpu.dot_dimension_numbers<[1], [0], [0], [1], [0, 0, 1, 1], [], []>} : vector<14x14xbf16>, vector<14x32xbf16>, vector<14x32xf32> -> vector<14x32xf32>
    %803 = arith.addf %783, %802 : vector<14x32xf32>
    %804 = vector.extract_strided_slice %711 {offsets = [0, 0], sizes = [14, 32], strides = [1, 1]} : vector<28x32xf32> to vector<14x32xf32>
    %805 = arith.addf %804, %803 : vector<14x32xf32>
    %806 = vector.extract_strided_slice %418 {offsets = [1, 0, 0], sizes = [1, 1, 32], strides = [1, 1, 1]} : vector<2x1x32xf32> to vector<1x1x32xf32>
    %807 = vector.shape_cast %806 : vector<1x1x32xf32> to vector<1x32xf32>
    %808 = vector.extract_strided_slice %419 {offsets = [1, 0, 0], sizes = [1, 1, 32], strides = [1, 1, 1]} : vector<2x1x32xf32> to vector<1x1x32xf32>
    %809 = vector.shape_cast %808 : vector<1x1x32xf32> to vector<1x32xf32>
    %cst_240 = arith.constant dense<0.000000e+00> : vector<14xf32>
    %810 = vector.multi_reduction <add>, %805, %cst_240 [1] : vector<14x32xf32> to vector<14xf32>
    %811 = vector.shape_cast %810 : vector<14xf32> to vector<14x1xf32>
    %cst_241 = arith.constant 3.200000e+01 : f32
    %812 = vector.broadcast %cst_241 : f32 to vector<14x1xf32>
    %813 = arith.divf %811, %812 : vector<14x1xf32>
    %814 = vector.broadcast %813 : vector<14x1xf32> to vector<14x32xf32>
    %815 = arith.subf %805, %814 : vector<14x32xf32>
    %816 = arith.mulf %815, %815 : vector<14x32xf32>
    %cst_242 = arith.constant dense<0.000000e+00> : vector<14xf32>
    %817 = vector.multi_reduction <add>, %816, %cst_242 [1] : vector<14x32xf32> to vector<14xf32>
    %818 = vector.shape_cast %817 : vector<14xf32> to vector<14x1xf32>
    %cst_243 = arith.constant 3.200000e+01 : f32
    %819 = vector.broadcast %cst_243 : f32 to vector<14x1xf32>
    %820 = arith.divf %818, %819 : vector<14x1xf32>
    %cst_244 = arith.constant 9.99999974E-6 : f32
    %821 = vector.broadcast %cst_244 : f32 to vector<14x1xf32>
    %822 = arith.addf %820, %821 : vector<14x1xf32>
    %823 = math.rsqrt %822 : vector<14x1xf32>
    %824 = vector.broadcast %823 : vector<14x1xf32> to vector<14x32xf32>
    %825 = arith.mulf %815, %824 : vector<14x32xf32>
    %826 = vector.broadcast %807 : vector<1x32xf32> to vector<14x32xf32>
    %827 = arith.mulf %825, %826 : vector<14x32xf32>
    %828 = vector.broadcast %809 : vector<1x32xf32> to vector<14x32xf32>
    %829 = arith.addf %827, %828 : vector<14x32xf32>
    %c0_245 = arith.constant 0 : index
    %c0_246 = arith.constant 0 : index
    %830 = vector.load %arg28[%c0_245, %c0_246] : memref<28x32xf32, #tpu.memory_space<vmem>>, vector<14x32xf32>
    tpu.vector_store %arg28[%c0_245, %c0_246], %829 {strides = array<i32>} : memref<28x32xf32, #tpu.memory_space<vmem>>, vector<14x32xf32>,
    %831 = vector.extract_strided_slice %417 {offsets = [1, 0, 0], sizes = [1, 1, 32], strides = [1, 1, 1]} : vector<2x1x32xf32> to vector<1x1x32xf32>
    %832 = vector.shape_cast %831 : vector<1x1x32xf32> to vector<1x32xf32>
    %833 = vector.extract_strided_slice %720 {offsets = [14, 0], sizes = [14, 8], strides = [1, 1]} : vector<28x192xf32> to vector<14x8xf32>
    %834 = vector.extract_strided_slice %720 {offsets = [14, 32], sizes = [14, 8], strides = [1, 1]} : vector<28x192xf32> to vector<14x8xf32>
    %835 = arith.truncf %833 : vector<14x8xf32> to vector<14x8xbf16>
    %836 = arith.truncf %834 : vector<14x8xf32> to vector<14x8xbf16>
    %cst_247 = arith.constant dense<0.000000e+00> : vector<14x14xf32>
    %837 = tpu.matmul %835, %836, %cst_247 {dimension_numbers = #tpu.dot_dimension_numbers<[1], [1], [0], [0], [0, 0, 1, 0], [], []>} : vector<14x8xbf16>, vector<14x8xbf16>, vector<14x14xf32> -> vector<14x14xf32>
    %cst_248 = arith.constant dense<0xFF800000> : vector<14xf32>
    %838 = vector.multi_reduction <maximumf>, %837, %cst_248 [1] : vector<14x14xf32> to vector<14xf32>
    %839 = vector.shape_cast %838 : vector<14xf32> to vector<14x1xf32>
    %840 = vector.broadcast %839 : vector<14x1xf32> to vector<14x14xf32>
    %841 = arith.subf %837, %840 : vector<14x14xf32>
    %842 = math.exp %841 : vector<14x14xf32>
    %cst_249 = arith.constant dense<0.000000e+00> : vector<14xf32>
    %843 = vector.multi_reduction <add>, %842, %cst_249 [1] : vector<14x14xf32> to vector<14xf32>
    %844 = vector.shape_cast %843 : vector<14xf32> to vector<14x1xf32>
    %845 = tpu.reciprocal %844 {approx = true} : vector<14x1xf32> -> vector<14x1xf32>
    %846 = vector.broadcast %845 : vector<14x1xf32> to vector<14x14xf32>
    %847 = arith.mulf %842, %846 : vector<14x14xf32>
    %848 = vector.extract_strided_slice %720 {offsets = [14, 64], sizes = [14, 32], strides = [1, 1]} : vector<28x192xf32> to vector<14x32xf32>
    %849 = arith.truncf %847 : vector<14x14xf32> to vector<14x14xbf16>
    %850 = arith.truncf %848 : vector<14x32xf32> to vector<14x32xbf16>
    %cst_250 = arith.constant dense<0.000000e+00> : vector<14x32xf32>
    %851 = tpu.matmul %849, %850, %cst_250 {dimension_numbers = #tpu.dot_dimension_numbers<[1], [0], [0], [1], [0, 0, 1, 1], [], []>} : vector<14x14xbf16>, vector<14x32xbf16>, vector<14x32xf32> -> vector<14x32xf32>
    %852 = vector.broadcast %832 : vector<1x32xf32> to vector<14x32xf32>
    %853 = arith.addf %852, %851 : vector<14x32xf32>
    %854 = vector.extract_strided_slice %720 {offsets = [14, 8], sizes = [14, 8], strides = [1, 1]} : vector<28x192xf32> to vector<14x8xf32>
    %855 = vector.extract_strided_slice %720 {offsets = [14, 40], sizes = [14, 8], strides = [1, 1]} : vector<28x192xf32> to vector<14x8xf32>
    %856 = arith.truncf %854 : vector<14x8xf32> to vector<14x8xbf16>
    %857 = arith.truncf %855 : vector<14x8xf32> to vector<14x8xbf16>
    %cst_251 = arith.constant dense<0.000000e+00> : vector<14x14xf32>
    %858 = tpu.matmul %856, %857, %cst_251 {dimension_numbers = #tpu.dot_dimension_numbers<[1], [1], [0], [0], [0, 0, 1, 0], [], []>} : vector<14x8xbf16>, vector<14x8xbf16>, vector<14x14xf32> -> vector<14x14xf32>
    %cst_252 = arith.constant dense<0xFF800000> : vector<14xf32>
    %859 = vector.multi_reduction <maximumf>, %858, %cst_252 [1] : vector<14x14xf32> to vector<14xf32>
    %860 = vector.shape_cast %859 : vector<14xf32> to vector<14x1xf32>
    %861 = vector.broadcast %860 : vector<14x1xf32> to vector<14x14xf32>
    %862 = arith.subf %858, %861 : vector<14x14xf32>
    %863 = math.exp %862 : vector<14x14xf32>
    %cst_253 = arith.constant dense<0.000000e+00> : vector<14xf32>
    %864 = vector.multi_reduction <add>, %863, %cst_253 [1] : vector<14x14xf32> to vector<14xf32>
    %865 = vector.shape_cast %864 : vector<14xf32> to vector<14x1xf32>
    %866 = tpu.reciprocal %865 {approx = true} : vector<14x1xf32> -> vector<14x1xf32>
    %867 = vector.broadcast %866 : vector<14x1xf32> to vector<14x14xf32>
    %868 = arith.mulf %863, %867 : vector<14x14xf32>
    %869 = vector.extract_strided_slice %720 {offsets = [14, 96], sizes = [14, 32], strides = [1, 1]} : vector<28x192xf32> to vector<14x32xf32>
    %870 = arith.truncf %868 : vector<14x14xf32> to vector<14x14xbf16>
    %871 = arith.truncf %869 : vector<14x32xf32> to vector<14x32xbf16>
    %cst_254 = arith.constant dense<0.000000e+00> : vector<14x32xf32>
    %872 = tpu.matmul %870, %871, %cst_254 {dimension_numbers = #tpu.dot_dimension_numbers<[1], [0], [0], [1], [0, 0, 1, 1], [], []>} : vector<14x14xbf16>, vector<14x32xbf16>, vector<14x32xf32> -> vector<14x32xf32>
    %873 = arith.addf %853, %872 : vector<14x32xf32>
    %874 = vector.extract_strided_slice %720 {offsets = [14, 16], sizes = [14, 8], strides = [1, 1]} : vector<28x192xf32> to vector<14x8xf32>
    %875 = vector.extract_strided_slice %720 {offsets = [14, 48], sizes = [14, 8], strides = [1, 1]} : vector<28x192xf32> to vector<14x8xf32>
    %876 = arith.truncf %874 : vector<14x8xf32> to vector<14x8xbf16>
    %877 = arith.truncf %875 : vector<14x8xf32> to vector<14x8xbf16>
    %cst_255 = arith.constant dense<0.000000e+00> : vector<14x14xf32>
    %878 = tpu.matmul %876, %877, %cst_255 {dimension_numbers = #tpu.dot_dimension_numbers<[1], [1], [0], [0], [0, 0, 1, 0], [], []>} : vector<14x8xbf16>, vector<14x8xbf16>, vector<14x14xf32> -> vector<14x14xf32>
    %cst_256 = arith.constant dense<0xFF800000> : vector<14xf32>
    %879 = vector.multi_reduction <maximumf>, %878, %cst_256 [1] : vector<14x14xf32> to vector<14xf32>
    %880 = vector.shape_cast %879 : vector<14xf32> to vector<14x1xf32>
    %881 = vector.broadcast %880 : vector<14x1xf32> to vector<14x14xf32>
    %882 = arith.subf %878, %881 : vector<14x14xf32>
    %883 = math.exp %882 : vector<14x14xf32>
    %cst_257 = arith.constant dense<0.000000e+00> : vector<14xf32>
    %884 = vector.multi_reduction <add>, %883, %cst_257 [1] : vector<14x14xf32> to vector<14xf32>
    %885 = vector.shape_cast %884 : vector<14xf32> to vector<14x1xf32>
    %886 = tpu.reciprocal %885 {approx = true} : vector<14x1xf32> -> vector<14x1xf32>
    %887 = vector.broadcast %886 : vector<14x1xf32> to vector<14x14xf32>
    %888 = arith.mulf %883, %887 : vector<14x14xf32>
    %889 = vector.extract_strided_slice %720 {offsets = [14, 128], sizes = [14, 32], strides = [1, 1]} : vector<28x192xf32> to vector<14x32xf32>
    %890 = arith.truncf %888 : vector<14x14xf32> to vector<14x14xbf16>
    %891 = arith.truncf %889 : vector<14x32xf32> to vector<14x32xbf16>
    %cst_258 = arith.constant dense<0.000000e+00> : vector<14x32xf32>
    %892 = tpu.matmul %890, %891, %cst_258 {dimension_numbers = #tpu.dot_dimension_numbers<[1], [0], [0], [1], [0, 0, 1, 1], [], []>} : vector<14x14xbf16>, vector<14x32xbf16>, vector<14x32xf32> -> vector<14x32xf32>
    %893 = arith.addf %873, %892 : vector<14x32xf32>
    %894 = vector.extract_strided_slice %720 {offsets = [14, 24], sizes = [14, 8], strides = [1, 1]} : vector<28x192xf32> to vector<14x8xf32>
    %895 = vector.extract_strided_slice %720 {offsets = [14, 56], sizes = [14, 8], strides = [1, 1]} : vector<28x192xf32> to vector<14x8xf32>
    %896 = arith.truncf %894 : vector<14x8xf32> to vector<14x8xbf16>
    %897 = arith.truncf %895 : vector<14x8xf32> to vector<14x8xbf16>
    %cst_259 = arith.constant dense<0.000000e+00> : vector<14x14xf32>
    %898 = tpu.matmul %896, %897, %cst_259 {dimension_numbers = #tpu.dot_dimension_numbers<[1], [1], [0], [0], [0, 0, 1, 0], [], []>} : vector<14x8xbf16>, vector<14x8xbf16>, vector<14x14xf32> -> vector<14x14xf32>
    %cst_260 = arith.constant dense<0xFF800000> : vector<14xf32>
    %899 = vector.multi_reduction <maximumf>, %898, %cst_260 [1] : vector<14x14xf32> to vector<14xf32>
    %900 = vector.shape_cast %899 : vector<14xf32> to vector<14x1xf32>
    %901 = vector.broadcast %900 : vector<14x1xf32> to vector<14x14xf32>
    %902 = arith.subf %898, %901 : vector<14x14xf32>
    %903 = math.exp %902 : vector<14x14xf32>
    %cst_261 = arith.constant dense<0.000000e+00> : vector<14xf32>
    %904 = vector.multi_reduction <add>, %903, %cst_261 [1] : vector<14x14xf32> to vector<14xf32>
    %905 = vector.shape_cast %904 : vector<14xf32> to vector<14x1xf32>
    %906 = tpu.reciprocal %905 {approx = true} : vector<14x1xf32> -> vector<14x1xf32>
    %907 = vector.broadcast %906 : vector<14x1xf32> to vector<14x14xf32>
    %908 = arith.mulf %903, %907 : vector<14x14xf32>
    %909 = vector.extract_strided_slice %720 {offsets = [14, 160], sizes = [14, 32], strides = [1, 1]} : vector<28x192xf32> to vector<14x32xf32>
    %910 = arith.truncf %908 : vector<14x14xf32> to vector<14x14xbf16>
    %911 = arith.truncf %909 : vector<14x32xf32> to vector<14x32xbf16>
    %cst_262 = arith.constant dense<0.000000e+00> : vector<14x32xf32>
    %912 = tpu.matmul %910, %911, %cst_262 {dimension_numbers = #tpu.dot_dimension_numbers<[1], [0], [0], [1], [0, 0, 1, 1], [], []>} : vector<14x14xbf16>, vector<14x32xbf16>, vector<14x32xf32> -> vector<14x32xf32>
    %913 = arith.addf %893, %912 : vector<14x32xf32>
    %914 = vector.extract_strided_slice %711 {offsets = [14, 0], sizes = [14, 32], strides = [1, 1]} : vector<28x32xf32> to vector<14x32xf32>
    %915 = arith.addf %914, %913 : vector<14x32xf32>
    %916 = vector.extract_strided_slice %418 {offsets = [1, 0, 0], sizes = [1, 1, 32], strides = [1, 1, 1]} : vector<2x1x32xf32> to vector<1x1x32xf32>
    %917 = vector.shape_cast %916 : vector<1x1x32xf32> to vector<1x32xf32>
    %918 = vector.extract_strided_slice %419 {offsets = [1, 0, 0], sizes = [1, 1, 32], strides = [1, 1, 1]} : vector<2x1x32xf32> to vector<1x1x32xf32>
    %919 = vector.shape_cast %918 : vector<1x1x32xf32> to vector<1x32xf32>
    %cst_263 = arith.constant dense<0.000000e+00> : vector<14xf32>
    %920 = vector.multi_reduction <add>, %915, %cst_263 [1] : vector<14x32xf32> to vector<14xf32>
    %921 = vector.shape_cast %920 : vector<14xf32> to vector<14x1xf32>
    %cst_264 = arith.constant 3.200000e+01 : f32
    %922 = vector.broadcast %cst_264 : f32 to vector<14x1xf32>
    %923 = arith.divf %921, %922 : vector<14x1xf32>
    %924 = vector.broadcast %923 : vector<14x1xf32> to vector<14x32xf32>
    %925 = arith.subf %915, %924 : vector<14x32xf32>
    %926 = arith.mulf %925, %925 : vector<14x32xf32>
    %cst_265 = arith.constant dense<0.000000e+00> : vector<14xf32>
    %927 = vector.multi_reduction <add>, %926, %cst_265 [1] : vector<14x32xf32> to vector<14xf32>
    %928 = vector.shape_cast %927 : vector<14xf32> to vector<14x1xf32>
    %cst_266 = arith.constant 3.200000e+01 : f32
    %929 = vector.broadcast %cst_266 : f32 to vector<14x1xf32>
    %930 = arith.divf %928, %929 : vector<14x1xf32>
    %cst_267 = arith.constant 9.99999974E-6 : f32
    %931 = vector.broadcast %cst_267 : f32 to vector<14x1xf32>
    %932 = arith.addf %930, %931 : vector<14x1xf32>
    %933 = math.rsqrt %932 : vector<14x1xf32>
    %934 = vector.broadcast %933 : vector<14x1xf32> to vector<14x32xf32>
    %935 = arith.mulf %925, %934 : vector<14x32xf32>
    %936 = vector.broadcast %917 : vector<1x32xf32> to vector<14x32xf32>
    %937 = arith.mulf %935, %936 : vector<14x32xf32>
    %938 = vector.broadcast %919 : vector<1x32xf32> to vector<14x32xf32>
    %939 = arith.addf %937, %938 : vector<14x32xf32>
    %c14_268 = arith.constant 14 : index
    %c0_269 = arith.constant 0 : index
    %940 = vector.load %arg28[%c14_268, %c0_269] : memref<28x32xf32, #tpu.memory_space<vmem>>, vector<14x32xf32>
    tpu.vector_store %arg28[%c14_268, %c0_269], %939 {strides = array<i32>} : memref<28x32xf32, #tpu.memory_space<vmem>>, vector<14x32xf32>,
    %c0_270 = arith.constant 0 : index
    %c0_271 = arith.constant 0 : index
    %941 = vector.load %arg28[%c0_270, %c0_271] : memref<28x32xf32, #tpu.memory_space<vmem>>, vector<28x32xf32>
    %942 = vector.extract_strided_slice %420 {offsets = [1, 0, 0], sizes = [1, 32, 64], strides = [1, 1, 1]} : vector<2x32x64xf32> to vector<1x32x64xf32>
    %943 = vector.shape_cast %942 : vector<1x32x64xf32> to vector<32x64xf32>
    %944 = arith.truncf %941 : vector<28x32xf32> to vector<28x32xbf16>
    %945 = arith.truncf %943 : vector<32x64xf32> to vector<32x64xbf16>
    %cst_272 = arith.constant dense<0.000000e+00> : vector<28x64xf32>
    %946 = tpu.matmul %944, %945, %cst_272 {dimension_numbers = #tpu.dot_dimension_numbers<[1], [0], [0], [1], [0, 0, 1, 1], [], []>} : vector<28x32xbf16>, vector<32x64xbf16>, vector<28x64xf32> -> vector<28x64xf32>
    %947 = vector.extract_strided_slice %421 {offsets = [1, 0, 0], sizes = [1, 1, 64], strides = [1, 1, 1]} : vector<2x1x64xf32> to vector<1x1x64xf32>
    %948 = vector.shape_cast %947 : vector<1x1x64xf32> to vector<1x64xf32>
    %949 = vector.broadcast %948 : vector<1x64xf32> to vector<28x64xf32>
    %950 = arith.addf %946, %949 : vector<28x64xf32>
    %cst_273 = arith.constant 5.000000e-01 : f32
    %951 = vector.broadcast %cst_273 : f32 to vector<28x64xf32>
    %952 = arith.mulf %951, %950 : vector<28x64xf32>
    %cst_274 = arith.constant 4.471500e-02 : f32
    %953 = vector.broadcast %cst_274 : f32 to vector<28x64xf32>
    %954 = arith.mulf %953, %950 : vector<28x64xf32>
    %955 = arith.mulf %954, %950 : vector<28x64xf32>
    %956 = arith.mulf %955, %950 : vector<28x64xf32>
    %957 = arith.addf %950, %956 : vector<28x64xf32>
    %cst_275 = arith.constant 0.797884583 : f32
    %958 = vector.broadcast %cst_275 : f32 to vector<28x64xf32>
    %959 = arith.mulf %958, %957 : vector<28x64xf32>
    %960 = math.tanh %959 : vector<28x64xf32>
    %cst_276 = arith.constant 1.000000e+00 : f32
    %961 = vector.broadcast %cst_276 : f32 to vector<28x64xf32>
    %962 = arith.addf %961, %960 : vector<28x64xf32>
    %963 = arith.mulf %952, %962 : vector<28x64xf32>
    %964 = vector.extract_strided_slice %422 {offsets = [1, 0, 0], sizes = [1, 64, 32], strides = [1, 1, 1]} : vector<2x64x32xf32> to vector<1x64x32xf32>
    %965 = vector.shape_cast %964 : vector<1x64x32xf32> to vector<64x32xf32>
    %966 = arith.truncf %963 : vector<28x64xf32> to vector<28x64xbf16>
    %967 = arith.truncf %965 : vector<64x32xf32> to vector<64x32xbf16>
    %cst_277 = arith.constant dense<0.000000e+00> : vector<28x32xf32>
    %968 = tpu.matmul %966, %967, %cst_277 {dimension_numbers = #tpu.dot_dimension_numbers<[1], [0], [0], [1], [0, 0, 1, 1], [], []>} : vector<28x64xbf16>, vector<64x32xbf16>, vector<28x32xf32> -> vector<28x32xf32>
    %969 = arith.addf %941, %968 : vector<28x32xf32>
    %970 = vector.extract_strided_slice %423 {offsets = [1, 0, 0], sizes = [1, 1, 32], strides = [1, 1, 1]} : vector<2x1x32xf32> to vector<1x1x32xf32>
    %971 = vector.shape_cast %970 : vector<1x1x32xf32> to vector<1x32xf32>
    %972 = vector.broadcast %971 : vector<1x32xf32> to vector<28x32xf32>
    %973 = arith.addf %969, %972 : vector<28x32xf32>
    %974 = vector.extract_strided_slice %424 {offsets = [1, 0, 0], sizes = [1, 1, 32], strides = [1, 1, 1]} : vector<2x1x32xf32> to vector<1x1x32xf32>
    %975 = vector.shape_cast %974 : vector<1x1x32xf32> to vector<1x32xf32>
    %976 = vector.extract_strided_slice %425 {offsets = [1, 0, 0], sizes = [1, 1, 32], strides = [1, 1, 1]} : vector<2x1x32xf32> to vector<1x1x32xf32>
    %977 = vector.shape_cast %976 : vector<1x1x32xf32> to vector<1x32xf32>
    %cst_278 = arith.constant dense<0.000000e+00> : vector<28xf32>
    %978 = vector.multi_reduction <add>, %973, %cst_278 [1] : vector<28x32xf32> to vector<28xf32>
    %979 = vector.shape_cast %978 : vector<28xf32> to vector<28x1xf32>
    %cst_279 = arith.constant 3.200000e+01 : f32
    %980 = vector.broadcast %cst_279 : f32 to vector<28x1xf32>
    %981 = arith.divf %979, %980 : vector<28x1xf32>
    %982 = vector.broadcast %981 : vector<28x1xf32> to vector<28x32xf32>
    %983 = arith.subf %973, %982 : vector<28x32xf32>
    %984 = arith.mulf %983, %983 : vector<28x32xf32>
    %cst_280 = arith.constant dense<0.000000e+00> : vector<28xf32>
    %985 = vector.multi_reduction <add>, %984, %cst_280 [1] : vector<28x32xf32> to vector<28xf32>
    %986 = vector.shape_cast %985 : vector<28xf32> to vector<28x1xf32>
    %cst_281 = arith.constant 3.200000e+01 : f32
    %987 = vector.broadcast %cst_281 : f32 to vector<28x1xf32>
    %988 = arith.divf %986, %987 : vector<28x1xf32>
    %cst_282 = arith.constant 9.99999974E-6 : f32
    %989 = vector.broadcast %cst_282 : f32 to vector<28x1xf32>
    %990 = arith.addf %988, %989 : vector<28x1xf32>
    %991 = math.rsqrt %990 : vector<28x1xf32>
    %992 = vector.broadcast %991 : vector<28x1xf32> to vector<28x32xf32>
    %993 = arith.mulf %983, %992 : vector<28x32xf32>
    %994 = vector.broadcast %975 : vector<1x32xf32> to vector<28x32xf32>
    %995 = arith.mulf %993, %994 : vector<28x32xf32>
    %996 = vector.broadcast %977 : vector<1x32xf32> to vector<28x32xf32>
    %997 = arith.addf %995, %996 : vector<28x32xf32>
    %c0_283 = arith.constant 0 : index
    %c0_284 = arith.constant 0 : index
    %998 = vector.load %arg25[%c0_283, %c0_284] : memref<1x32xf32, #tpu.memory_space<vmem>>, vector<1x32xf32>
    %c0_285 = arith.constant 0 : index
    %c0_286 = arith.constant 0 : index
    %999 = vector.load %arg26[%c0_285, %c0_286] : memref<1x1xf32, #tpu.memory_space<vmem>>, vector<1x1xf32>
    %1000 = vector.extract_strided_slice %997 {offsets = [0, 0], sizes = [14, 32], strides = [1, 1]} : vector<28x32xf32> to vector<14x32xf32>
    %cst_287 = arith.constant dense<0.000000e+00> : vector<32xf32>
    %1001 = vector.multi_reduction <add>, %1000, %cst_287 [0] : vector<14x32xf32> to vector<32xf32>
    %1002 = vector.shape_cast %1001 : vector<32xf32> to vector<1x32xf32>
    %cst_288 = arith.constant 1.400000e+01 : f32
    %1003 = vector.broadcast %cst_288 : f32 to vector<1x32xf32>
    %1004 = arith.divf %1002, %1003 : vector<1x32xf32>
    %1005 = arith.mulf %1004, %998 : vector<1x32xf32>
    %cst_289 = arith.constant dense<0.000000e+00> : vector<1xf32>
    %1006 = vector.multi_reduction <add>, %1005, %cst_289 [1] : vector<1x32xf32> to vector<1xf32>
    %1007 = vector.shape_cast %1006 : vector<1xf32> to vector<1x1xf32>
    %1008 = arith.addf %1007, %999 : vector<1x1xf32>
    %cst_290 = arith.constant 0.000000e+00 : f32
    %1009 = vector.broadcast %cst_290 : f32 to vector<1x1xf32>
    %1010 = arith.subf %1009, %1008 : vector<1x1xf32>
    %1011 = math.exp %1010 : vector<1x1xf32>
    %cst_291 = arith.constant 1.000000e+00 : f32
    %1012 = vector.broadcast %cst_291 : f32 to vector<1x1xf32>
    %1013 = arith.addf %1012, %1011 : vector<1x1xf32>
    %cst_292 = arith.constant 1.000000e+00 : f32
    %1014 = vector.broadcast %cst_292 : f32 to vector<1x1xf32>
    %1015 = arith.divf %1014, %1013 : vector<1x1xf32>
    %c0_293 = arith.constant 0 : index
    %c0_294 = arith.constant 0 : index
    %1016 = vector.load %arg27[%c0_293, %c0_294] : memref<2x1xf32, #tpu.memory_space<vmem>>, vector<1x1xf32>
    tpu.vector_store %arg27[%c0_293, %c0_294], %1015 {strides = array<i32>} : memref<2x1xf32, #tpu.memory_space<vmem>>, vector<1x1xf32>,
    %1017 = vector.extract_strided_slice %997 {offsets = [14, 0], sizes = [14, 32], strides = [1, 1]} : vector<28x32xf32> to vector<14x32xf32>
    %cst_295 = arith.constant dense<0.000000e+00> : vector<32xf32>
    %1018 = vector.multi_reduction <add>, %1017, %cst_295 [0] : vector<14x32xf32> to vector<32xf32>
    %1019 = vector.shape_cast %1018 : vector<32xf32> to vector<1x32xf32>
    %cst_296 = arith.constant 1.400000e+01 : f32
    %1020 = vector.broadcast %cst_296 : f32 to vector<1x32xf32>
    %1021 = arith.divf %1019, %1020 : vector<1x32xf32>
    %1022 = arith.mulf %1021, %998 : vector<1x32xf32>
    %cst_297 = arith.constant dense<0.000000e+00> : vector<1xf32>
    %1023 = vector.multi_reduction <add>, %1022, %cst_297 [1] : vector<1x32xf32> to vector<1xf32>
    %1024 = vector.shape_cast %1023 : vector<1xf32> to vector<1x1xf32>
    %1025 = arith.addf %1024, %999 : vector<1x1xf32>
    %cst_298 = arith.constant 0.000000e+00 : f32
    %1026 = vector.broadcast %cst_298 : f32 to vector<1x1xf32>
    %1027 = arith.subf %1026, %1025 : vector<1x1xf32>
    %1028 = math.exp %1027 : vector<1x1xf32>
    %cst_299 = arith.constant 1.000000e+00 : f32
    %1029 = vector.broadcast %cst_299 : f32 to vector<1x1xf32>
    %1030 = arith.addf %1029, %1028 : vector<1x1xf32>
    %cst_300 = arith.constant 1.000000e+00 : f32
    %1031 = vector.broadcast %cst_300 : f32 to vector<1x1xf32>
    %1032 = arith.divf %1031, %1030 : vector<1x1xf32>
    %c1 = arith.constant 1 : index
    %c0_301 = arith.constant 0 : index
    %1033 = vector.load %arg27[%c1, %c0_301] : memref<2x1xf32, #tpu.memory_space<vmem>>, vector<1x1xf32>
    tpu.vector_store %arg27[%c1, %c0_301], %1032 {strides = array<i32>} : memref<2x1xf32, #tpu.memory_space<vmem>>, vector<1x1xf32>,
    return
  }
}

</mosaic_0001>

<bundles_post_ra>
// kernel: trigger_word_wav2vec2.1
= control target key start
LH: loop header
LB: loop body
LE: loop exit
PB: predicated region body
PF: predicated region fallthrough
CT: control target
= control target key end

     0   :  { %s7845_s0 = inlined_call_operand.vmem [shape: f32[2,16,4], index: 0, kind: input, shape index: {}]   ;;  %s7846_s1 = inlined_call_operand.vmem [shape: f32[5,16], index: 1, kind: input, shape index: {}]   ;;  %s7847_s2 = inlined_call_operand.vmem [shape: f32[1,16], index: 2, kind: input, shape index: {}]   ;;  %s7848_s3 = inlined_call_operand.hbm [shape: f32[1,16], index: 3, kind: input, shape index: {}]   ;;  %s7849_s4 = inlined_call_operand.vmem [shape: f32[16,32], index: 4, kind: input, shape index: {}]   ;;  %s7850_s5 = inlined_call_operand.vmem [shape: f32[16,16], index: 5, kind: input, shape index: {}]   ;;  %s7851_s6 = inlined_call_operand.hbm [shape: f32[1,16], index: 6, kind: input, shape index: {}]   ;;  %s7852_s7 = inlined_call_operand.hbm [shape: f32[1,16], index: 7, kind: input, shape index: {}]   ;;  %s7853_s8 = inlined_call_operand.hbm [shape: f32[16,32], index: 8, kind: input, shape index: {}]   ;;  %s7854_s9 = inlined_call_operand.hbm [shape: f32[1,32], index: 9, kind: input, shape index: {}]   ;;  %s7855_s10 = inlined_call_operand.vmem [shape: f32[32,256], index: 10, kind: input, shape index: {}]   ;;  %s7856_s11 = inlined_call_operand.vmem [shape: f32[1,32], index: 11, kind: input, shape index: {}]   ;;  %s7857_s12 = inlined_call_operand.hbm [shape: f32[1,32], index: 12, kind: input, shape index: {}]   ;;  %s7858_s13 = inlined_call_operand.hbm [shape: f32[1,32], index: 13, kind: input, shape index: {}]   ;;  %s7859_s14 = inlined_call_operand.vmem [shape: f32[2,32,192], index: 14, kind: input, shape index: {}]   ;;  %s7860_s15 = inlined_call_operand.hbm [shape: f32[2,1,192], index: 15, kind: input, shape index: {}]   ;;  %s7861_s16 = inlined_call_operand.hbm [shape: f32[2,1,32], index: 16, kind: input, shape index: {}]   ;;  %s7862_s17 = inlined_call_operand.vmem [shape: f32[2,1,32], index: 17, kind: input, shape index: {}]   ;;  %s7863_s18 = inlined_call_operand.hbm [shape: f32[2,1,32], index: 18, kind: input, shape index: {}]   ;;  %s7864_s19 = inlined_call_operand.hbm [shape: f32[2,32,64], index: 19, kind: input, shape index: {}]   ;;  %s7865_s20 = inlined_call_operand.hbm [shape: f32[2,1,64], index: 20, kind: input, shape index: {}]   ;;  %s7866_s21 = inlined_call_operand.vmem [shape: f32[2,64,32], index: 21, kind: input, shape index: {}]   ;;  %s7867_s22 = inlined_call_operand.hbm [shape: f32[2,1,32], index: 22, kind: input, shape index: {}]   ;;  %s7868_s23 = inlined_call_operand.hbm [shape: f32[2,1,32], index: 23, kind: input, shape index: {}]   ;;  %s7869_s24 = inlined_call_operand.hbm [shape: f32[2,1,32], index: 24, kind: input, shape index: {}]   ;;  %s7870_s25 = inlined_call_operand.hbm [shape: f32[1,32], index: 25, kind: input, shape index: {}]   ;;  %s7871_s26 = inlined_call_operand.<no memory space> [shape: f32[1,1], index: 26, kind: input, shape index: {}]   ;;  %s7872_s27 = inlined_call_operand.vmem [shape: f32[2,1], index: 27, kind: output, shape index: {}]  }
   0x1   :  { %7883 = sst [smem:[#allocation39_spill]] %s7845_s0  ;;  %v32_v0 = vstv %s7871_s26 }
   0x2   :  { %7884 = sst [smem:[#allocation40_spill]] %s7846_s1  ;;  %33 = vst [vmem:[#allocation4] sm:$0x1] %v32_v0 }
   0x3   :  { %7885 = sst [smem:[#allocation41_spill]] %s7847_s2 }
   0x4   :  { %7886 = sst [smem:[#allocation42_spill]] %s7848_s3 }
   0x5   :  { %7887 = sst [smem:[#allocation43_spill]] %s7849_s4 }
   0x6   :  { %7888 = sst [smem:[#allocation44_spill]] %s7850_s5 }
   0x7   :  { %7889 = sst [smem:[#allocation45_spill]] %s7851_s6 }
   0x8   :  { %7890 = sst [smem:[#allocation46_spill]] %s7852_s7 }
   0x9   :  { %7891 = sst [smem:[#allocation47_spill]] %s7853_s8 }
   0xa   :  { %7892 = sst [smem:[#allocation48_spill]] %s7854_s9 }
   0xb   :  { %7893 = sst [smem:[#allocation49_spill]] %s7855_s10 }
   0xc   :  { %7894 = sst [smem:[#allocation50_spill]] %s7856_s11 }
   0xd   :  { %7895 = sst [smem:[#allocation51_spill]] %s7872_s27 }
   0xe   :  { %34 = vsyncpa [#allocation6], 0 }
   0xf   :  { %35 = vsyncpa [#allocation8], 0 }
  0x10   :  { %36 = vsyncpa [#allocation11], 0 }
  0x11   :  { %37 = vsyncpa [#allocation14], 0 }
  0x12   :  { %38 = vsyncpa [#allocation17], 0 }
  0x13   :  { %39 = vsyncpa [#allocation20], 0 }
  0x14   :  { %40 = vsyncpa [#allocation23], 0 }
  0x15   :  { %41 = vsyncpa [#allocation26], 0 }
  0x16   :  { %42 = vsyncpa [#allocation29], 0  ;;  %s6059_s8 = smov [#allocation7]   ;;  %s6060_s9 = smov [#allocation10]  }
  0x17   :  { %s69_s30 = sshll.u32 %s6059_s8, 4  ;;  %s88_s5 = sshll.u32 %s6060_s9, 4  ;;  %s70_s30 = int_to_ptr.vmem [resolvable:$true] %s69_s30  ;;  %s6237_s5 = int_to_ptr.vmem [resolvable:$true] %s88_s5 }
  0x18   :  { %s7896_s26 = sld [smem:[#allocation45_spill]] }
  0x1e   :  { %s5689_s10 = scalar_lea.hbm %s7896_s26, 16 }
  0x1f   :  { %p5690_p0 = scmp.ne.s32.totalorder %s7896_s26, %s5689_s10  ;;  %p5693_p1 = scmp.lt.u32.totalorder %s5689_s10, %s7896_s26 }
  0x21   :  { %p5695_p2 = pnand %p5693_p1, %p5690_p0 }
  0x23   :  { %5698 = shalt.err (!%p5695_p2)
}
  0x24   :  { %s5699_s2 = scalar_lea.vmem %s70_s30, 16  ;;  %s5703_s3 = scalar_lea.vmem %s70_s30, 32 }
  0x25   :  { %p5700_p3 = scmp.ne.s32.totalorder %s70_s30, %s5699_s2  ;;  %p5704_p4 = scmp.lt.s32.totalorder %s70_s30, %s70_s30 }
  0x26   :  { %p5705_p5 = scmp.lt.s32.totalorder %s5703_s3, %s5699_s2 }
  0x28   :  { %p5706_p6 = por %p5705_p5, %p5704_p4 }
  0x2a   :  { %p5707_p7 = pnand %p5706_p6, %p5700_p3 }
  0x2c   :  { %5710 = shalt.err (!%p5707_p7)
}
  0x2d   :  { %72 = dma.hbm_to_vmem [thread:$0]  %s7896_s26, 16, %s70_s30, [#allocation8]  }
  0x2e   :  { %s7897_s28 = sld [smem:[#allocation47_spill]] }
  0x34   :  { %s5711_s0 = scalar_lea.hbm %s7897_s28, 256 }
  0x35   :  { %p5712_p8 = scmp.ne.s32.totalorder %s7897_s28, %s5711_s0  ;;  %p5715_p9 = scmp.lt.u32.totalorder %s5711_s0, %s7897_s28 }
  0x37   :  { %p5717_p10 = pnand %p5715_p9, %p5712_p8 }
  0x39   :  { %5720 = shalt.err (!%p5717_p10)
}
  0x3a   :  { %s5721_s11 = scalar_lea.vmem %s6237_s5, 256  ;;  %p5726_p12 = scmp.lt.s32.totalorder %s6237_s5, %s6237_s5 }
  0x3b   :  { %p5722_p11 = scmp.ne.s32.totalorder %s6237_s5, %s5721_s11  ;;  %p5727_p13 = scmp.lt.s32.totalorder %s5721_s11, %s5721_s11 }
  0x3d   :  { %p5728_p0 = por %p5727_p13, %p5726_p12 }
  0x3f   :  { %p5729_p1 = pnand %p5728_p0, %p5722_p11 }
  0x41   :  { %5732 = shalt.err (!%p5729_p1)
}
  0x42   :  { %s6061_s30 = smov 128   ;;  %s6062_s26 = smov 8  }
  0x43   :  { %94 = dma.hbm_to_vmem [thread:$0]  %s7897_s28, 256, %s6237_s5, [#allocation11], %s6061_s30, %s6061_s30, %s6062_s26  }
  0x44   :  { %s6063_s7 = smov [#allocation13]   ;;  %s6064_s8 = smov [#allocation16]  }
  0x45   :  { %s115_s4 = sshll.u32 %s6063_s7, 4  ;;  %s136_s9 = sshll.u32 %s6064_s8, 4  ;;  %s116_s4 = int_to_ptr.vmem [resolvable:$true] %s115_s4  ;;  %s6271_s9 = int_to_ptr.vmem [resolvable:$true] %s136_s9 }
  0x46   :  { %s5733_s10 = scalar_lea.hbm %s7857_s12, 16 }
  0x47   :  { %p5734_p2 = scmp.ne.s32.totalorder %s7857_s12, %s5733_s10  ;;  %p5737_p3 = scmp.lt.u32.totalorder %s5733_s10, %s7857_s12 }
  0x49   :  { %p5739_p4 = pnand %p5737_p3, %p5734_p2 }
  0x4b   :  { %5742 = shalt.err (!%p5739_p4)
}
  0x4c   :  { %s5743_s5 = scalar_lea.vmem %s116_s4, 16  ;;  %s5747_s28 = scalar_lea.vmem %s116_s4, 32 }
  0x4d   :  { %p5744_p5 = scmp.ne.s32.totalorder %s116_s4, %s5743_s5  ;;  %p5748_p6 = scmp.lt.s32.totalorder %s116_s4, %s116_s4 }
  0x4e   :  { %p5749_p7 = scmp.lt.s32.totalorder %s5747_s28, %s5743_s5 }
  0x50   :  { %p5750_p8 = por %p5749_p7, %p5748_p6 }
  0x52   :  { %p5751_p9 = pnand %p5750_p8, %p5744_p5 }
  0x54   :  { %5754 = shalt.err (!%p5751_p9)
}
  0x55   :  { %118 = dma.hbm_to_vmem [thread:$0]  %s7857_s12, 16, %s116_s4, [#allocation14]  }
  0x56   :  { %s5755_s0 = scalar_lea.hbm %s7860_s15, 64 }
  0x57   :  { %p5756_p10 = scmp.ne.s32.totalorder %s7860_s15, %s5755_s0  ;;  %p5759_p11 = scmp.lt.u32.totalorder %s5755_s0, %s7860_s15 }
  0x59   :  { %p5761_p12 = pnand %p5759_p11, %p5756_p10 }
  0x5b   :  { %5764 = shalt.err (!%p5761_p12)
}
  0x5c   :  { %s5765_s6 = scalar_lea.vmem %s6271_s9, 64  ;;  %p5770_p0 = scmp.lt.s32.totalorder %s6271_s9, %s6271_s9 }
  0x5d   :  { %p5766_p13 = scmp.ne.s32.totalorder %s6271_s9, %s5765_s6  ;;  %p5771_p1 = scmp.lt.s32.totalorder %s5765_s6, %s5765_s6 }
  0x5f   :  { %p5772_p2 = por %p5771_p1, %p5770_p0 }
  0x61   :  { %p5773_p3 = pnand %p5772_p2, %p5766_p13 }
  0x63   :  { %5776 = shalt.err (!%p5773_p3)
}
  0x64   :  { %s6065_s12 = smov 32   ;;  %s6066_s4 = smov 2  }
  0x65   :  { %142 = dma.hbm_to_vmem [thread:$0]  %s7860_s15, 64, %s6271_s9, [#allocation17], %s6065_s12, %s6065_s12, %s6066_s4  }
  0x66   :  { %s6067_s28 = smov [#allocation19]   ;;  %s6068_s3 = smov [#allocation22]  }
  0x67   :  { %s162_s2 = sshll.u32 %s6067_s28, 4  ;;  %s186_s7 = sshll.u32 %s6068_s3, 4  ;;  %s163_s2 = int_to_ptr.vmem [resolvable:$true] %s162_s2  ;;  %s6304_s7 = int_to_ptr.vmem [resolvable:$true] %s186_s7 }
  0x68   :  { %s5777_s27 = scalar_lea.hbm %s7863_s18, 32 }
  0x69   :  { %p5778_p4 = scmp.ne.s32.totalorder %s7863_s18, %s5777_s27  ;;  %p5781_p5 = scmp.lt.u32.totalorder %s5777_s27, %s7863_s18 }
  0x6b   :  { %p5783_p6 = pnand %p5781_p5, %p5778_p4 }
  0x6d   :  { %5786 = shalt.err (!%p5783_p6)
}
  0x6e   :  { %s5787_s15 = scalar_lea.vmem %s163_s2, 32  ;;  %p5792_p8 = scmp.lt.s32.totalorder %s163_s2, %s163_s2 }
  0x6f   :  { %p5788_p7 = scmp.ne.s32.totalorder %s163_s2, %s5787_s15  ;;  %p5793_p9 = scmp.lt.s32.totalorder %s5787_s15, %s5787_s15 }
  0x71   :  { %p5794_p10 = por %p5793_p9, %p5792_p8 }
  0x73   :  { %p5795_p11 = pnand %p5794_p10, %p5788_p7 }
  0x75   :  { %5798 = shalt.err (!%p5795_p11)
}
  0x76   :  { %s6069_s9 = smov 16   ;;  %s6070_s4 = smov 1  }
  0x77   :  { %168 = dma.hbm_to_vmem [thread:$0]  %s7863_s18, 32, %s163_s2, [#allocation20], %s6069_s9, %s6069_s9, %s6070_s4  }
  0x78   :  { %s5799_s8 = scalar_lea.hbm %s7865_s20, 32 }
  0x79   :  { %p5800_p12 = scmp.ne.s32.totalorder %s7865_s20, %s5799_s8  ;;  %p5803_p13 = scmp.lt.u32.totalorder %s5799_s8, %s7865_s20 }
  0x7b   :  { %p5805_p0 = pnand %p5803_p13, %p5800_p12 }
  0x7d   :  { %5808 = shalt.err (!%p5805_p0)
}
  0x7e   :  { %s5809_s1 = scalar_lea.vmem %s6304_s7, 32  ;;  %p5814_p2 = scmp.lt.s32.totalorder %s6304_s7, %s6304_s7 }
  0x7f   :  { %p5810_p1 = scmp.ne.s32.totalorder %s6304_s7, %s5809_s1  ;;  %p5815_p3 = scmp.lt.s32.totalorder %s5809_s1, %s5809_s1 }
  0x81   :  { %p5816_p4 = por %p5815_p3, %p5814_p2 }
  0x83   :  { %p5817_p5 = pnand %p5816_p4, %p5810_p1 }
  0x85   :  { %5820 = shalt.err (!%p5817_p5)
}
  0x86   :  { %192 = dma.hbm_to_vmem [thread:$0]  %s7865_s20, 32, %s6304_s7, [#allocation23], %s6069_s9, %s6069_s9, %s6070_s4  }
  0x87   :  { %s6071_s6 = smov [#allocation25]   ;;  %s6072_s11 = smov [#allocation5]  }
  0x88   :  { %s212_s15 = sshll.u32 %s6071_s6, 4  ;;  %s55_s5 = sshll.u32 %s6072_s11, 4  ;;  %s213_s15 = int_to_ptr.vmem [resolvable:$true] %s212_s15  ;;  %s56_s5 = int_to_ptr.vmem [resolvable:$true] %s55_s5 }
  0x89   :  { %s5821_s8 = scalar_lea.hbm %s7868_s23, 32 }
  0x8a   :  { %p5822_p6 = scmp.ne.s32.totalorder %s7868_s23, %s5821_s8  ;;  %p5825_p7 = scmp.lt.u32.totalorder %s5821_s8, %s7868_s23 }
  0x8c   :  { %p5827_p8 = pnand %p5825_p7, %p5822_p6 }
  0x8e   :  { %5830 = shalt.err (!%p5827_p8)
}
  0x8f   :  { %s5831_s20 = scalar_lea.vmem %s213_s15, 32  ;;  %p5836_p10 = scmp.lt.s32.totalorder %s213_s15, %s213_s15 }
  0x90   :  { %p5832_p9 = scmp.ne.s32.totalorder %s213_s15, %s5831_s20  ;;  %p5837_p11 = scmp.lt.s32.totalorder %s5831_s20, %s5831_s20 }
  0x92   :  { %p5838_p12 = por %p5837_p11, %p5836_p10 }
  0x94   :  { %p5839_p13 = pnand %p5838_p12, %p5832_p9 }
  0x96   :  { %5842 = shalt.err (!%p5839_p13)
}
  0x97   :  { %218 = dma.hbm_to_vmem [thread:$0]  %s7868_s23, 32, %s213_s15, [#allocation26], %s6069_s9, %s6069_s9, %s6070_s4  }
  0x98   :  { %s7898_s6 = sld [smem:[#allocation42_spill]] }
  0x9e   :  { %s5843_s11 = scalar_lea.hbm %s7898_s6, 16 }
  0x9f   :  { %p5844_p0 = scmp.ne.s32.totalorder %s7898_s6, %s5843_s11  ;;  %p5847_p1 = scmp.lt.u32.totalorder %s5843_s11, %s7898_s6 }
  0xa1   :  { %p5849_p2 = pnand %p5847_p1, %p5844_p0 }
  0xa3   :  { %5852 = shalt.err (!%p5849_p2)
}
  0xa4   :  { %s5853_s27 = scalar_lea.vmem %s56_s5, 16  ;;  %s5857_s29 = scalar_lea.vmem %s56_s5, 32 }
  0xa5   :  { %p5854_p3 = scmp.ne.s32.totalorder %s56_s5, %s5853_s27  ;;  %p5858_p4 = scmp.lt.s32.totalorder %s56_s5, %s56_s5 }
  0xa6   :  { %p5859_p5 = scmp.lt.s32.totalorder %s5857_s29, %s5853_s27 }
  0xa8   :  { %p5860_p6 = por %p5859_p5, %p5858_p4 }
  0xaa   :  { %p5861_p7 = pnand %p5860_p6, %p5854_p3 }
  0xac   :  { %5864 = shalt.err (!%p5861_p7)
}
  0xad   :  { %58 = dma.hbm_to_vmem [thread:$0]  %s7898_s6, 16, %s56_s5, [#allocation6]  }
  0xae   :  { %s6073_s10 = smov [#allocation9]   ;;  %s6074_s7 = smov [#allocation12]  }
  0xaf   :  { %s79_s20 = sshll.u32 %s6073_s10, 4  ;;  %s101_s1 = sshll.u32 %s6074_s7, 4  ;;  %s80_s20 = int_to_ptr.vmem [resolvable:$true] %s79_s20  ;;  %s102_s1 = int_to_ptr.vmem [resolvable:$true] %s101_s1 }
  0xb0   :  { %s7899_s11 = sld [smem:[#allocation46_spill]] }
  0xb6   :  { %s5865_s28 = scalar_lea.hbm %s7899_s11, 16 }
  0xb7   :  { %p5866_p8 = scmp.ne.s32.totalorder %s7899_s11, %s5865_s28  ;;  %p5869_p9 = scmp.lt.u32.totalorder %s5865_s28, %s7899_s11 }
  0xb9   :  { %p5871_p10 = pnand %p5869_p9, %p5866_p8 }
  0xbb   :  { %5874 = shalt.err (!%p5871_p10)
}
  0xbc   :  { %s5875_s5 = scalar_lea.vmem %s80_s20, 16  ;;  %s5879_s6 = scalar_lea.vmem %s80_s20, 32 }
  0xbd   :  { %p5876_p11 = scmp.ne.s32.totalorder %s80_s20, %s5875_s5  ;;  %p5880_p12 = scmp.lt.s32.totalorder %s80_s20, %s80_s20 }
  0xbe   :  { %p5881_p13 = scmp.lt.s32.totalorder %s5879_s6, %s5875_s5 }
  0xc0   :  { %p5882_p0 = por %p5881_p13, %p5880_p12 }
  0xc2   :  { %p5883_p1 = pnand %p5882_p0, %p5876_p11 }
  0xc4   :  { %5886 = shalt.err (!%p5883_p1)
}
  0xc5   :  { %82 = dma.hbm_to_vmem [thread:$0]  %s7899_s11, 16, %s80_s20, [#allocation8]  }
  0xc6   :  { %s7900_s7 = sld [smem:[#allocation48_spill]] }
  0xcc   :  { %s5887_s18 = scalar_lea.hbm %s7900_s7, 16 }
  0xcd   :  { %p5888_p2 = scmp.ne.s32.totalorder %s7900_s7, %s5887_s18  ;;  %p5891_p3 = scmp.lt.u32.totalorder %s5887_s18, %s7900_s7 }
  0xcf   :  { %p5893_p4 = pnand %p5891_p3, %p5888_p2 }
  0xd1   :  { %5896 = shalt.err (!%p5893_p4)
}
  0xd2   :  { %s5897_s0 = scalar_lea.vmem %s102_s1, 16  ;;  %s5901_s27 = scalar_lea.vmem %s102_s1, 32 }
  0xd3   :  { %p5898_p5 = scmp.ne.s32.totalorder %s102_s1, %s5897_s0  ;;  %p5902_p6 = scmp.lt.s32.totalorder %s102_s1, %s102_s1 }
  0xd4   :  { %p5903_p7 = scmp.lt.s32.totalorder %s5901_s27, %s5897_s0 }
  0xd6   :  { %p5904_p8 = por %p5903_p7, %p5902_p6 }
  0xd8   :  { %p5905_p9 = pnand %p5904_p8, %p5898_p5 }
  0xda   :  { %5908 = shalt.err (!%p5905_p9)
}
  0xdb   :  { %104 = dma.hbm_to_vmem [thread:$0]  %s7900_s7, 16, %s102_s1, [#allocation11]  }
  0xdc   :  { %s6075_s5 = smov [#allocation15]   ;;  %s6076_s29 = smov [#allocation18]  }
  0xdd   :  { %s125_s6 = sshll.u32 %s6075_s5, 4  ;;  %s148_s23 = sshll.u32 %s6076_s29, 4  ;;  %s126_s6 = int_to_ptr.vmem [resolvable:$true] %s125_s6  ;;  %s6392_s23 = int_to_ptr.vmem [resolvable:$true] %s148_s23 }
  0xde   :  { %s5909_s18 = scalar_lea.hbm %s7858_s13, 16 }
  0xdf   :  { %p5910_p10 = scmp.ne.s32.totalorder %s7858_s13, %s5909_s18  ;;  %p5913_p11 = scmp.lt.u32.totalorder %s5909_s18, %s7858_s13 }
  0xe1   :  { %p5915_p12 = pnand %p5913_p11, %p5910_p10 }
  0xe3   :  { %5918 = shalt.err (!%p5915_p12)
}
  0xe4   :  { %s5919_s1 = scalar_lea.vmem %s126_s6, 16  ;;  %s5923_s7 = scalar_lea.vmem %s126_s6, 32 }
  0xe5   :  { %p5920_p13 = scmp.ne.s32.totalorder %s126_s6, %s5919_s1  ;;  %p5924_p0 = scmp.lt.s32.totalorder %s126_s6, %s126_s6 }
  0xe6   :  { %p5925_p1 = scmp.lt.s32.totalorder %s5923_s7, %s5919_s1 }
  0xe8   :  { %p5926_p2 = por %p5925_p1, %p5924_p0 }
  0xea   :  { %p5927_p3 = pnand %p5926_p2, %p5920_p13 }
  0xec   :  { %5930 = shalt.err (!%p5927_p3)
}
  0xed   :  { %128 = dma.hbm_to_vmem [thread:$0]  %s7858_s13, 16, %s126_s6, [#allocation14]  }
  0xee   :  { %s5931_s5 = scalar_lea.hbm %s7861_s16, 32 }
  0xef   :  { %p5932_p4 = scmp.ne.s32.totalorder %s7861_s16, %s5931_s5  ;;  %p5935_p5 = scmp.lt.u32.totalorder %s5931_s5, %s7861_s16 }
  0xf1   :  { %p5937_p6 = pnand %p5935_p5, %p5932_p4 }
  0xf3   :  { %5940 = shalt.err (!%p5937_p6)
}
  0xf4   :  { %s5941_s2 = scalar_lea.vmem %s6392_s23, 32  ;;  %p5946_p8 = scmp.lt.s32.totalorder %s6392_s23, %s6392_s23 }
  0xf5   :  { %p5942_p7 = scmp.ne.s32.totalorder %s6392_s23, %s5941_s2  ;;  %p5947_p9 = scmp.lt.s32.totalorder %s5941_s2, %s5941_s2 }
  0xf7   :  { %p5948_p10 = por %p5947_p9, %p5946_p8 }
  0xf9   :  { %p5949_p11 = pnand %p5948_p10, %p5942_p7 }
  0xfb   :  { %5952 = shalt.err (!%p5949_p11)
}
  0xfc   :  { %154 = dma.hbm_to_vmem [thread:$0]  %s7861_s16, 32, %s6392_s23, [#allocation17], %s6069_s9, %s6069_s9, %s6070_s4  }
  0xfd   :  { %s6077_s28 = smov [#allocation21]   ;;  %s6078_s8 = smov [#allocation24]  }
  0xfe   :  { %s174_s3 = sshll.u32 %s6077_s28, 4  ;;  %s200_s1 = sshll.u32 %s6078_s8, 4  ;;  %s175_s3 = int_to_ptr.vmem [resolvable:$true] %s174_s3  ;;  %s6426_s1 = int_to_ptr.vmem [resolvable:$true] %s200_s1 }
  0xff   :  { %s5953_s27 = scalar_lea.hbm %s7864_s19, 1024 }
 0x100   :  { %p5954_p12 = scmp.ne.s32.totalorder %s7864_s19, %s5953_s27  ;;  %p5957_p13 = scmp.lt.u32.totalorder %s5953_s27, %s7864_s19 }
 0x102   :  { %p5959_p0 = pnand %p5957_p13, %p5954_p12 }
 0x104   :  { %5962 = shalt.err (!%p5959_p0)
}
 0x105   :  { %s5963_s16 = scalar_lea.vmem %s175_s3, 1024  ;;  %p5968_p2 = scmp.lt.s32.totalorder %s175_s3, %s175_s3 }
 0x106   :  { %p5964_p1 = scmp.ne.s32.totalorder %s175_s3, %s5963_s16  ;;  %p5969_p3 = scmp.lt.s32.totalorder %s5963_s16, %s5963_s16 }
 0x108   :  { %p5970_p4 = por %p5969_p3, %p5968_p2 }
 0x10a   :  { %p5971_p5 = pnand %p5970_p4, %p5964_p1 }
 0x10c   :  { %5974 = shalt.err (!%p5971_p5)
}
 0x10d   :  { %180 = dma.hbm_to_vmem [thread:$0]  %s7864_s19, 1024, %s175_s3, [#allocation20], %s6061_s30, %s6061_s30, %s6062_s26  }
 0x10e   :  { %s5975_s2 = scalar_lea.hbm %s7867_s22, 32 }
 0x10f   :  { %p5976_p6 = scmp.ne.s32.totalorder %s7867_s22, %s5975_s2  ;;  %p5979_p7 = scmp.lt.u32.totalorder %s5975_s2, %s7867_s22 }
 0x111   :  { %p5981_p8 = pnand %p5979_p7, %p5976_p6 }
 0x113   :  { %5984 = shalt.err (!%p5981_p8)
}
 0x114   :  { %s5985_s7 = scalar_lea.vmem %s6426_s1, 32  ;;  %p5990_p10 = scmp.lt.s32.totalorder %s6426_s1, %s6426_s1 }
 0x115   :  { %p5986_p9 = scmp.ne.s32.totalorder %s6426_s1, %s5985_s7  ;;  %p5991_p11 = scmp.lt.s32.totalorder %s5985_s7, %s5985_s7 }
 0x117   :  { %p5992_p12 = por %p5991_p11, %p5990_p10 }
 0x119   :  { %p5993_p13 = pnand %p5992_p12, %p5986_p9 }
 0x11b   :  { %5996 = shalt.err (!%p5993_p13)
}
 0x11c   :  { %206 = dma.hbm_to_vmem [thread:$0]  %s7867_s22, 32, %s6426_s1, [#allocation23], %s6069_s9, %s6069_s9, %s6070_s4  }
 0x11d   :  { %s6079_s26 = smov [#allocation27]   ;;  %s6080_s0 = smov [#allocation28]  }
 0x11e   :  { %s224_s3 = sshll.u32 %s6079_s26, 4  ;;  %s237_s27 = sshll.u32 %s6080_s0, 4  ;;  %s225_s3 = int_to_ptr.vmem [resolvable:$true] %s224_s3  ;;  %s238_s27 = int_to_ptr.vmem [resolvable:$true] %s237_s27 }
 0x11f   :  { %s5997_s5 = scalar_lea.hbm %s7869_s24, 32 }
 0x120   :  { %p5998_p0 = scmp.ne.s32.totalorder %s7869_s24, %s5997_s5  ;;  %p6001_p1 = scmp.lt.u32.totalorder %s5997_s5, %s7869_s24 }
 0x122   :  { %p6003_p2 = pnand %p6001_p1, %p5998_p0 }
 0x124   :  { %6006 = shalt.err (!%p6003_p2)
}
 0x125   :  { %s6007_s22 = scalar_lea.vmem %s225_s3, 32  ;;  %p6012_p4 = scmp.lt.s32.totalorder %s225_s3, %s225_s3 }
 0x126   :  { %p6008_p3 = scmp.ne.s32.totalorder %s225_s3, %s6007_s22  ;;  %p6013_p5 = scmp.lt.s32.totalorder %s6007_s22, %s6007_s22 }
 0x128   :  { %p6014_p6 = por %p6013_p5, %p6012_p4 }
 0x12a   :  { %p6015_p7 = pnand %p6014_p6, %p6008_p3 }
 0x12c   :  { %6018 = shalt.err (!%p6015_p7)
}
 0x12d   :  { %230 = dma.hbm_to_vmem [thread:$0]  %s7869_s24, 32, %s225_s3, [#allocation26], %s6069_s9, %s6069_s9, %s6070_s4  }
 0x12e   :  { %s6019_s13 = scalar_lea.hbm %s7870_s25, 16 }
 0x12f   :  { %p6020_p8 = scmp.ne.s32.totalorder %s7870_s25, %s6019_s13  ;;  %p6023_p9 = scmp.lt.u32.totalorder %s6019_s13, %s7870_s25 }
 0x131   :  { %p6025_p10 = pnand %p6023_p9, %p6020_p8 }
 0x133   :  { %6028 = shalt.err (!%p6025_p10)
}
 0x134   :  { %s6029_s19 = scalar_lea.vmem %s238_s27, 16  ;;  %s6033_s30 = scalar_lea.vmem %s238_s27, 32 }
 0x135   :  { %p6030_p11 = scmp.ne.s32.totalorder %s238_s27, %s6029_s19  ;;  %p6034_p12 = scmp.lt.s32.totalorder %s238_s27, %s238_s27 }
 0x136   :  { %p6035_p13 = scmp.lt.s32.totalorder %s6033_s30, %s6029_s19 }
 0x138   :  { %p6036_p0 = por %p6035_p13, %p6034_p12 }
 0x13a   :  { %p6037_p1 = pnand %p6036_p0, %p6030_p11 }
 0x13c   :  { %6040 = shalt.err (!%p6037_p1)
}
 0x13d   :  { %240 = dma.hbm_to_vmem [thread:$0]  %s7870_s25, 16, %s238_s27, [#allocation29]  }
 0x13e   :  { %6041 = dma.done.wait [#allocation6], 16  }
 0x13f   :  { %6042 = vsyncadd [#allocation6], 4294967280 }
 0x140   :  { %6043 = dma.done.wait [#allocation8], 32  }
 0x141   :  { %6044 = vsyncadd [#allocation8], 4294967264 }
 0x142   :  { %6045 = dma.done.wait [#allocation11], 272  }
 0x143   :  { %6046 = vsyncadd [#allocation11], 4294967024 }
 0x144   :  { %6047 = dma.done.wait [#allocation14], 32  }
 0x145   :  { %6048 = vsyncadd [#allocation14], 4294967264 }
 0x146   :  { %6049 = dma.done.wait [#allocation17], 96  }
 0x147   :  { %6050 = vsyncadd [#allocation17], 4294967200 }
 0x148   :  { %6051 = dma.done.wait [#allocation20], 1056  }
 0x149   :  { %6052 = vsyncadd [#allocation20], 4294966240 }
 0x14a   :  { %6053 = dma.done.wait [#allocation23], 64  }
 0x14b   :  { %6054 = vsyncadd [#allocation23], 4294967232 }
 0x14c   :  { %6055 = dma.done.wait [#allocation26], 64  }
 0x14d   :  { %6056 = vsyncadd [#allocation26], 4294967232 }
 0x14e   :  { %6057 = dma.done.wait [#allocation29], 16  }
 0x14f   :  { %6058 = vsyncadd [#allocation29], 4294967280  ;;  %v6081_v1 = vmov 0.0   ;;  %vm6082_vm0 = vmmov 0   ;;  %vm412_vm1 = vcmask 1040384   ;;  %v6083_v2 = vmov 0  }
 0x150   :  { %5068 = vmatprep.subr.bf16.mxu1 %v6081_v1  ;;  %5070 = vmatprep.mubr.msk.bf16.mxu1 %vm6082_vm0, %v6081_v1  ;;  %v6084_v3 = vmov 65535   ;;  %s7901_s26 = sld [smem:[#allocation39_spill]]  ;;  %s7902_s11 = sld [smem:[#allocation40_spill]]  ;;  %vm355_vm2 = vcmask 1041408   ;;  %vm351_vm3 = vcmask 31744   ;;  %vm408_vm4 = vcmask 23552  }
 0x151   :  { %5086 = vmatprep.subr.bf16.mxu0 %v6081_v1  ;;  %5088 = vmatprep.mubr.msk.bf16.mxu0 %vm6082_vm0, %v6081_v1  ;;  %v413_v4 = vsel %vm412_vm1, 4294967295, %v6084_v3  ;;  %s6085_s5 = smov 126   ;;  %vm462_vm5 = vcmask 15360   ;;  %v337_v20 = vlaneseq  ;;  %vm345_vm6 = vcmask 1046528   ;;  %s7903_s23 = sld [smem:[#allocation43_spill]] }
 0x152   :  { %5444 = vset.pattern.permute.xlu1 %v6083_v2  ;;  %5443 = vset.pattern.permute.xlu0 %v6083_v2  ;;  %v414_v10 = vsel %vm355_vm2, %v413_v4, 0  ;;  %vm509_vm7 = vcmask 130048   ;;  %vm511_vm8 = vcmask 129024   ;;  %s7904_s18 = sld [smem:[#allocation41_spill]]  ;;  %s7905_s6 = sld [smem:[#allocation44_spill]]  ;;  %vm752_vm9 = vcmask 128000  }
 0x153   :  { %v6533_v21 = vshrl.u32 %v337_v20, 7  ;;  %s6086_s7 = smov 112   ;;  %vm319_vm10 = vcmask 261120   ;;  %vm323_vm11 = vcmask 259072   ;;  %vm937_vm12 = vcmask 1045504   ;;  %s6087_s2 = smov 96  }
 0x154   :  { %321 = vst.msk [vmem:[#allocation3 + $0x8] sm:$0xff] %vm319_vm10, %v6081_v1  ;;  %320 = vst.msk [vmem:[#allocation3] sm:$0xff] %vm319_vm10, %v6081_v1  ;;  %vm955_vm13 = vcmask 1044480   ;;  %vm985_vm14 = vcmask 1042432   ;;  %s6088_s13 = smov 64   ;;  %vm975_vm15 = vcmask 1043456  }
 0x155   :  { %v339_v22 = vsub.s32 4, %v6533_v21  ;;  %322 = vst.msk [vmem:[#allocation3 + $0x10] sm:$0xff] %vm319_vm10, %v6081_v1  ;;  %s7907_s8 = sld [smem:[#allocation50_spill]]  ;;  %s6089_s15 = smov 88  }
 0x156   :  { %v292_v5 = vld [vmem:[%s7901_s26] sm:$0xff]  ;;  %v293_v6 = vld [vmem:[%s7901_s26 + $0x8] sm:$0xff]  ;;  %324 = vst.msk [vmem:[#allocation3 + $0x18] sm:$0x3f] %vm323_vm11, %v6081_v1  ;;  %s6090_s22 = smov 120   ;;  %s6091_s1 = smov 80  }
 0x157   :  { %v296_v7 = vld [vmem:[%s7902_s11] sm:$0x1f]  ;;  %v325_v8 = vpack.c.bf16 %v293_v6, %v292_v5  ;;  %334 = vperm.xlu1 %5444, %v293_v6   ;;  %v300_v41 = vld [vmem:[%s7903_s23 + $0x8] sm:$0xff]  ;;  %s6092_s10 = smov 72   ;;  %s7908_s30 = sld [smem:[#allocation51_spill]] }
 0x158   :  { %v326_v9 = vpack.c.bf16 %v296_v7, %v296_v7  ;;  %v6536_v23 = vrot.slane %v296_v7, %v339_v22  ;;  %v299_v40 = vld [vmem:[%s7903_s23] sm:$0xff] }
 0x159   :  { %460 = vrot.lane.b32.xlu0 %v325_v8, %s6085_s5  ;;  %v402_v13 = vshll.u32 %v325_v8, 16  ;;  %v400_v15 = vshrl.u32 %v325_v8, 16  ;;  %v6549_v42 = vpack.c.bf16 %v300_v41, %v299_v40 }
 0x15a   :  { %v6511_v11 = vsel %vm355_vm2, %v326_v9, 0  ;;  %v407_v12 = vrot.slane %v326_v9, 1  ;;  %v6523_v18 = vsel %vm412_vm1, %v326_v9, 0 }
 0x15b   :  { %5069 = vmatpush3.bf16.msra.mxu1 %v6511_v11  ;;  %v404_v16 = vrot.slane %v402_v13, 1  ;;  %5087 = vmatpush3.bf16.msra.mxu0 %v6549_v42 }
 0x15c   :  { %5074 = vmatprep.subr.bf16.mxu1 %v6081_v1  ;;  %v6515_v14 = vand.u32 %v414_v10, %v407_v12  ;;  %5092 = vmatprep.subr.bf16.mxu0 %v6081_v1 }
 0x15d   :  { %329 = vperm.xlu0 %5443, %v292_v5   ;;  %v405_v17 = vor.u32 %v404_v16, %v400_v15 }
 0x15e   :  { %5071 = vmatmul.mubr.msk.bf16.vlgmr.msra.gmra.mrb[0].mxu1 %vm351_vm3, %v325_v8 }
 0x15f   :  { %5075 = vmatpush3.bf16.msra.mxu1 %v6515_v14  ;;  %5076 = vmatprep.mubr.msk.bf16.mxu1 %vm6082_vm0, %v6081_v1 }
 0x160   :  { %5080 = vmatprep.subr.bf16.mxu1 %v6081_v1 }
 0x166   :  { %5077 = vmatmul.mubr.msk.bf16.vlgmr.msra.gmra.mrb[4].mxu1 %vm408_vm4, %v405_v17 }
 0x167   :  { %5081 = vmatpush3.bf16.msra.mxu1 %v6523_v18  ;;  %5082 = vmatprep.mubr.msk.bf16.mxu1 %vm6082_vm0, %v6081_v1 }
 0x168   :  { %5098 = vmatprep.subr.bf16.mxu1 %v6081_v1 }
 0x1cb   :  { %v461_v19 = vpop.permute.xlu0 %460 }
 0x1cc   :  { %5083 = vmatmul.mubr.msk.bf16.vlgmr.msra.gmra.mrb[4].mxu1 %vm462_vm5, %v461_v19 }
 0x1cd   :  { %5100 = vmatprep.mubr.msk.bf16.mxu1 %vm6082_vm0, %v6081_v1 }
 0x1d6   :  { %v335_v24 = vpop.permute.xlu1 %334 }
 0x1d7   :  { %v342_v26 = vmul.f32 %v6536_v23, %v335_v24 }
 0x1d9   :  { %v347_v28 = vrot.slane %v342_v26, 1 }
 0x1dc   :  { %v330_v25 = vpop.permute.xlu0 %329 }
 0x1dd   :  { %v341_v27 = vmul.f32 %v6536_v23, %v330_v25 }
 0x1df   :  { %v346_v29 = vrot.slane %v341_v27, 1 }
 0x1e1   :  { %v348_v30 = vsel %vm345_vm6, %v346_v29, %v347_v28 }
 0x231   :  { %v393_v31 = vpop.f32.mrb[0].mxu1 }
 0x232   :  { %v394_v32 = vadd.f32 %v393_v31, %v348_v30  ;;  %v5072_v33 = vpop.f32.mrb[1].mxu1 }
 0x233   :  { %v396_v34 = vpop.f32.mrb[2].mxu1 }
 0x234   :  { %v510_v35 = vsel %vm509_vm7, %v394_v32, 0.0  ;;  %v397_v36 = vadd.f32 %v396_v34, %v347_v28  ;;  %v5073_v37 = vpop.f32.mrb[3].mxu1 }
 0x235   :  { %v6562_v37 = vld [vmem:[%s7904_s18] ss:$0 sm:$0xff]  ;;  %s6093_s18 = smov 104  }
 0x236   :  { %v512_v38 = vsel %vm511_vm8, %v397_v36, 0.0 }
 0x237   :  { %v513_v39 = vadd.f32 %v512_v38, %v510_v35 }
 0x239   :  { %v514_v43 = vrot.slane %v513_v39, 4 }
 0x23b   :  { %v515_v44 = vadd.f32 %v514_v43, %v513_v39  ;;  %v6564_v43 = vld [vmem:[#allocation5] ss:$0 sm:$0xff] }
 0x23d   :  { %v516_v51 = vrot.slane %v515_v44, 2 }
 0x23f   :  { %v517_v54 = vadd.f32 %v516_v51, %v515_v44 }
 0x241   :  { %v518_v57 = vrot.slane %v517_v54, 1 }
 0x243   :  { %v519_v60 = vadd.f32 %v518_v57, %v517_v54 }
 0x29f   :  { %v502_v45 = vpop.f32.mrb[4].mxu1 }
 0x2a0   :  { %v5084_v46 = vpop.f32.mrb[5].mxu1  ;;  %v520_v48 = vsel %vm509_vm7, %v502_v45, 0.0 }
 0x2a1   :  { %v505_v47 = vpop.f32.mrb[6].mxu1 }
 0x2a2   :  { %v521_v49 = vsel %vm511_vm8, %v505_v47, 0.0  ;;  %v5085_v50 = vpop.f32.mrb[7].mxu1 }
 0x2a3   :  { %v522_v52 = vadd.f32 %v521_v49, %v520_v48 }
 0x2a5   :  { %v523_v53 = vrot.slane %v522_v52, 4 }
 0x2a7   :  { %v524_v55 = vadd.f32 %v523_v53, %v522_v52 }
 0x2a9   :  { %v525_v56 = vrot.slane %v524_v55, 2 }
 0x2ab   :  { %v526_v58 = vadd.f32 %v525_v56, %v524_v55 }
 0x2ad   :  { %v527_v59 = vrot.slane %v526_v58, 1 }
 0x2af   :  { %v528_v61 = vadd.f32 %v527_v59, %v526_v58 }
 0x2b1   :  { %v529_v62 = vadd.f32 %v528_v61, %v519_v60 }
 0x2b3   :  { %v531_v63 = vmul.f32 0.033333335, %v529_v62 }
 0x2b5   :  { %v532_v0 = vsub.f32 %v394_v32, %v531_v63  ;;  %v533_v3 = vsub.f32 %v397_v36, %v531_v63  ;;  %v534_v4 = vsub.f32 %v502_v45, %v531_v63  ;;  %v535_v5 = vsub.f32 %v505_v47, %v531_v63 }
 0x2b7   :  { %v536_v6 = vmul.f32 %v532_v0, %v532_v0  ;;  %v537_v7 = vmul.f32 %v533_v3, %v533_v3  ;;  %v547_v8 = vmul.f32 %v534_v4, %v534_v4  ;;  %v548_v9 = vmul.f32 %v535_v5, %v535_v5 }
 0x2b9   :  { %v538_v10 = vsel %vm509_vm7, %v536_v6, 0.0  ;;  %v539_v12 = vsel %vm511_vm8, %v537_v7, 0.0  ;;  %v549_v13 = vsel %vm509_vm7, %v547_v8, 0.0  ;;  %v550_v15 = vsel %vm511_vm8, %v548_v9, 0.0 }
 0x2ba   :  { %v540_v16 = vadd.f32 %v539_v12, %v538_v10  ;;  %v551_v17 = vadd.f32 %v550_v15, %v549_v13 }
 0x2bc   :  { %v541_v19 = vrot.slane %v540_v16, 4  ;;  %v552_v20 = vrot.slane %v551_v17, 4 }
 0x2be   :  { %v542_v22 = vadd.f32 %v541_v19, %v540_v16  ;;  %v553_v24 = vadd.f32 %v552_v20, %v551_v17  ;;  %v301_v20 = vld [vmem:[%s7905_s6] sm:$0xff] }
 0x2c0   :  { %v543_v25 = vrot.slane %v542_v22, 2  ;;  %v554_v26 = vrot.slane %v553_v24, 2 }
 0x2c2   :  { %v544_v27 = vadd.f32 %v543_v25, %v542_v22  ;;  %v555_v28 = vadd.f32 %v554_v26, %v553_v24  ;;  %v302_v22 = vld [vmem:[%s7905_s6 + $0x8] sm:$0xff] }
 0x2c4   :  { %v545_v29 = vrot.slane %v544_v27, 1  ;;  %v556_v30 = vrot.slane %v555_v28, 1 }
 0x2c6   :  { %v546_v31 = vadd.f32 %v545_v29, %v544_v27  ;;  %v557_v32 = vadd.f32 %v556_v30, %v555_v28 }
 0x2c8   :  { %v558_v33 = vadd.f32 %v557_v32, %v546_v31  ;;  %v6580_v31 = vpack.c.bf16 %v302_v22, %v301_v20 }
 0x2ca   :  { %v559_v34 = vmul.f32 0.033333335, %v558_v33 }
 0x2cc   :  { %v560_v35 = vadd.f32 1e-05, %v559_v34 }
 0x2ce   :  { %5445 = vrsqrt.f32 %v560_v35 }
 0x2d8   :  { %v5446_v36 = vpop.eup %5445 }
 0x2d9   :  { %v562_v38 = vmul.f32 %v5446_v36, %v532_v0  ;;  %v563_v39 = vmul.f32 %v5446_v36, %v533_v3  ;;  %v598_v40 = vmul.f32 %v5446_v36, %v534_v4  ;;  %v599_v41 = vmul.f32 %v5446_v36, %v535_v5 }
 0x2db   :  { %v570_v44 = vmul.f32 %v6562_v37, %v562_v38  ;;  %v571_v45 = vmul.f32 %v6562_v37, %v563_v39  ;;  %v600_v46 = vmul.f32 %v6562_v37, %v598_v40  ;;  %v601_v47 = vmul.f32 %v6562_v37, %v599_v41 }
 0x2dd   :  { %v578_v48 = vadd.f32 %v6564_v43, %v570_v44  ;;  %v579_v49 = vadd.f32 %v6564_v43, %v571_v45  ;;  %v602_v50 = vadd.f32 %v6564_v43, %v600_v46  ;;  %v603_v51 = vadd.f32 %v6564_v43, %v601_v47 }
 0x2df   :  { %v607_v52 = vmul.f32 0.044715, %v603_v51  ;;  %v582_v53 = vmul.f32 0.044715, %v578_v48  ;;  %v583_v54 = vmul.f32 0.044715, %v579_v49 }
 0x2e0   :  { %v606_v55 = vmul.f32 0.044715, %v602_v50  ;;  %v580_v13 = vmul.f32 0.5, %v578_v48  ;;  %v581_v17 = vmul.f32 0.5, %v579_v49  ;;  %v604_v26 = vmul.f32 0.5, %v602_v50 }
 0x2e1   :  { %v609_v56 = vmul.f32 %v607_v52, %v603_v51  ;;  %v584_v57 = vmul.f32 %v582_v53, %v578_v48  ;;  %v585_v58 = vmul.f32 %v583_v54, %v579_v49  ;;  %v605_v29 = vmul.f32 0.5, %v603_v51 }
 0x2e2   :  { %v608_v59 = vmul.f32 %v606_v55, %v602_v50 }
 0x2e3   :  { %v611_v60 = vmul.f32 %v609_v56, %v603_v51  ;;  %v586_v61 = vmul.f32 %v584_v57, %v578_v48  ;;  %v587_v62 = vmul.f32 %v585_v58, %v579_v49 }
 0x2e4   :  { %v610_v63 = vmul.f32 %v608_v59, %v602_v50 }
 0x2e5   :  { %v588_v0 = vadd.f32 %v586_v61, %v578_v48  ;;  %v613_v3 = vadd.f32 %v611_v60, %v603_v51  ;;  %v589_v4 = vadd.f32 %v587_v62, %v579_v49 }
 0x2e6   :  { %v612_v5 = vadd.f32 %v610_v63, %v602_v50 }
 0x2e7   :  { %v590_v6 = vmul.f32 0.7978846, %v588_v0  ;;  %v591_v7 = vmul.f32 0.7978846, %v589_v4  ;;  %v615_v9 = vmul.f32 0.7978846, %v613_v3 }
 0x2e8   :  { %v614_v8 = vmul.f32 0.7978846, %v612_v5 }
 0x2e9   :  { %5447 = vtanh.f32 %v590_v6 }
 0x2ea   :  { %5449 = vtanh.f32 %v591_v7 }
 0x2eb   :  { %5451 = vtanh.f32 %v614_v8 }
 0x2ec   :  { %5453 = vtanh.f32 %v615_v9 }
 0x2f3   :  { %v5448_v10 = vpop.eup %5447 }
 0x2f4   :  { %v5450_v12 = vpop.eup %5449  ;;  %v594_v15 = vadd.f32 1.0, %v5448_v10 }
 0x2f5   :  { %v5452_v16 = vpop.eup %5451  ;;  %v595_v19 = vadd.f32 1.0, %v5450_v12 }
 0x2f6   :  { %v5454_v24 = vpop.eup %5453  ;;  %v596_v25 = vmul.f32 %v594_v15, %v580_v13  ;;  %v618_v27 = vadd.f32 1.0, %v5452_v16  ;;  %v294_v16 = vld [vmem:[%s7901_s26 + $0x10] sm:$0xff] }
 0x2f7   :  { %v597_v28 = vmul.f32 %v595_v19, %v581_v17  ;;  %v619_v30 = vadd.f32 1.0, %v5454_v24  ;;  %v295_v17 = vld [vmem:[%s7901_s26 + $0x18] sm:$0xff]  ;;  %s7906_s26 = sld [smem:[#allocation49_spill]] }
 0x2f8   :  { %v620_v32 = vmul.f32 %v618_v27, %v604_v26  ;;  %v1127_v19 = vpack.c.bf16 %v295_v17, %v294_v16 }
 0x2f9   :  { %v622_v33 = vpack.c.bf16 %v597_v28, %v596_v25  ;;  %v621_v34 = vmul.f32 %v619_v30, %v605_v29 }
 0x2fb   :  { %5089 = vmatmul.mubr.msk.bf16.vlgmr.msra.gmra.mrb[0].mxu0 %vm509_vm7, %v622_v33  ;;  %v668_v35 = vpack.c.bf16 %v621_v34, %v620_v32  ;;  %v305_v33 = vld [vmem:[#allocation10] sm:$0xff]  ;;  %v306_v34 = vld [vmem:[#allocation10 + $0x8] sm:$0xff] }
 0x2fc   :  { %5093 = vmatpush3.bf16.msra.mxu0 %v6580_v31  ;;  %5094 = vmatprep.mubr.msk.bf16.mxu0 %vm6082_vm0, %v6081_v1 }
 0x303   :  { %5095 = vmatmul.mubr.msk.bf16.vlgmr.msra.gmra.mrb[4].mxu0 %vm509_vm7, %v668_v35  ;;  %v794_v35 = vpack.c.bf16 %v306_v34, %v305_v33 }
 0x304   :  { %895 = vmatprep.mubr.bf16.mxu0 %v6083_v2 }
 0x305   :  { %5099 = vmatpush3.bf16.msra.mxu1 %v794_v35 }
 0x306   :  { %5104 = vmatprep.subr.bf16.mxu1 %v6081_v1 }
 0x3ce   :  { %v661_v36 = vpop.f32.mrb[0].mxu0 }
 0x3cf   :  { %v5090_v38 = vpop.f32.mrb[1].mxu0  ;;  %v718_v40 = vrot.slane %v661_v36, 1 }
 0x3d0   :  { %v664_v39 = vpop.f32.mrb[2].mxu0 }
 0x3d1   :  { %v719_v41 = vrot.slane %v664_v39, 1  ;;  %v5091_v44 = vpop.f32.mrb[3].mxu0 }
 0x3d3   :  { %v720_v45 = vsel %vm345_vm6, %v718_v40, %v719_v41 }
 0x3d4   :  { %721 = vrot.lane.b32.xlu1 %v720_v45, %s6086_s7 }
 0x3d6   :  { %v707_v46 = vpop.f32.mrb[4].mxu0 }
 0x3d7   :  { %v5096_v47 = vpop.f32.mrb[5].mxu0 }
 0x3d8   :  { %723 = vrot.lane.b32.xlu1 %v719_v41, %s6086_s7  ;;  %v710_v48 = vpop.f32.mrb[6].mxu0  ;;  %v6609_v47 = vld [vmem:[#allocation7] ss:$0 sm:$0xff] }
 0x3d9   :  { %v5097_v49 = vpop.f32.mrb[7].mxu0 }
 0x446   :  { %v722_v50 = vpop.permute.xlu1 %721 }
 0x447   :  { %v727_v51 = vadd.f32 %v722_v50, %v661_v36 }
 0x449   :  { %v729_v52 = vadd.f32 %v727_v51, %v707_v46  ;;  %v6612_v51 = vld [vmem:[#allocation9] ss:$0 sm:$0xff] }
 0x44a   :  { %v724_v53 = vpop.permute.xlu1 %723 }
 0x44b   :  { %v728_v54 = vadd.f32 %v724_v53, %v664_v39  ;;  %v733_v55 = vmul.f32 0.044715, %v729_v52  ;;  %v731_v5 = vmul.f32 0.5, %v729_v52 }
 0x44d   :  { %v730_v56 = vadd.f32 %v728_v54, %v710_v48  ;;  %v735_v57 = vmul.f32 %v733_v55, %v729_v52 }
 0x44f   :  { %v737_v58 = vmul.f32 %v735_v57, %v729_v52  ;;  %v734_v59 = vmul.f32 0.044715, %v730_v56  ;;  %v732_v10 = vmul.f32 0.5, %v730_v56  ;;  %v1191_v57 = vshrl.u32 %v1127_v19, 16 }
 0x451   :  { %v739_v60 = vadd.f32 %v737_v58, %v729_v52  ;;  %v736_v61 = vmul.f32 %v734_v59, %v730_v56 }
 0x453   :  { %v741_v62 = vmul.f32 0.7978846, %v739_v60  ;;  %v738_v63 = vmul.f32 %v736_v61, %v730_v56  ;;  %v308_v61 = vld [vmem:[%s7906_s26] sm:$0xff] }
 0x455   :  { %5455 = vtanh.f32 %v741_v62  ;;  %v740_v0 = vadd.f32 %v738_v63, %v730_v56  ;;  %v1193_v56 = vshll.u32 %v1127_v19, 16  ;;  %v310_v62 = vld [vmem:[%s7906_s26 + $0x10] sm:$0xff] }
 0x456   :  { %v6651_v63 = vpack.c.bf16 %v310_v62, %v308_v61 }
 0x457   :  { %v742_v3 = vmul.f32 0.7978846, %v740_v0  ;;  %v1195_v58 = vrot.slane %v1193_v56, 1  ;;  %v313_v0 = vld [vmem:[%s7906_s26 + $0x28] sm:$0xff] }
 0x459   :  { %5457 = vtanh.f32 %v742_v3  ;;  %v1196_v59 = vor.u32 %v1195_v58, %v1191_v57  ;;  %v315_v3 = vld [vmem:[%s7906_s26 + $0x38] sm:$0xff] }
 0x45f   :  { %v5456_v4 = vpop.eup %5455 }
 0x460   :  { %v745_v6 = vadd.f32 1.0, %v5456_v4  ;;  %v6661_v4 = vpack.c.bf16 %v315_v3, %v313_v0 }
 0x462   :  { %v747_v7 = vmul.f32 %v745_v6, %v731_v5  ;;  %v312_v5 = vld [vmem:[%s7906_s26 + $0x20] sm:$0xff]  ;;  %v314_v6 = vld [vmem:[%s7906_s26 + $0x30] sm:$0xff] }
 0x463   :  { %v5458_v8 = vpop.eup %5457 }
 0x464   :  { %v749_v9 = vsel %vm509_vm7, %v747_v7, 0.0  ;;  %v746_v12 = vadd.f32 1.0, %v5458_v8 }
 0x465   :  { %750 = vadd.xlane.f32.xlu0 %v749_v9  ;;  %v6674_v9 = vld [vmem:[#allocation12] ss:$0 sm:$0xff] }
 0x466   :  { %v748_v13 = vmul.f32 %v746_v12, %v732_v10 }
 0x468   :  { %v753_v15 = vsel %vm752_vm9, %v748_v13, 0.0 }
 0x469   :  { %754 = vadd.xlane.f32.xlu1 %v753_v15 }
 0x47a   :  { %1242 = vrot.lane.b32.xlu1 %v1127_v19, %s6085_s5 }
 0x47e   :  { %1135 = vperm.xlu1 %5444, %v295_v17  }
 0x4f2   :  { %v751_v20 = vpop.xlane.xlu0 %750 }
 0x4f3   :  { %v757_v22 = vmul.f32 0.0625, %v751_v20 }
 0x4f5   :  { %v759_v24 = vsub.f32 %v747_v7, %v757_v22  ;;  %v6669_v7 = vpack.c.bf16 %v314_v6, %v312_v5 }
 0x4f6   :  { %v755_v25 = vpop.xlane.xlu1 %754 }
 0x4f7   :  { %v758_v26 = vmul.f32 0.0625, %v755_v25  ;;  %v761_v27 = vmul.f32 %v759_v24, %v759_v24 }
 0x4f9   :  { %v760_v28 = vsub.f32 %v748_v13, %v758_v26  ;;  %v763_v29 = vsel %vm509_vm7, %v761_v27, 0.0 }
 0x4fa   :  { %764 = vadd.xlane.f32.xlu0 %v763_v29 }
 0x4fb   :  { %v762_v30 = vmul.f32 %v760_v28, %v760_v28 }
 0x4fd   :  { %v766_v32 = vsel %vm752_vm9, %v762_v30, 0.0 }
 0x4fe   :  { %767 = vadd.xlane.f32.xlu0 %v766_v32 }
 0x514   :  { %1130 = vperm.xlu0 %5443, %v294_v16  }
 0x587   :  { %v765_v36 = vpop.xlane.xlu0 %764 }
 0x588   :  { %v769_v38 = vmul.f32 0.0625, %v765_v36 }
 0x58a   :  { %v771_v39 = vadd.f32 1e-05, %v769_v38 }
 0x58b   :  { %v768_v40 = vpop.xlane.xlu0 %767 }
 0x58c   :  { %5459 = vrsqrt.f32 %v771_v39  ;;  %v770_v41 = vmul.f32 0.0625, %v768_v40 }
 0x58e   :  { %v772_v44 = vadd.f32 1e-05, %v770_v41  ;;  %v850_v41 = vld [vmem:[#allocation3 + $0x18] sm:$0x3f] }
 0x590   :  { %5461 = vrsqrt.f32 %v772_v44 }
 0x593   :  { %v1131_v8 = vpop.permute.xlu0 %1130 }
 0x594   :  { %v1138_v12 = vmul.f32 %v1131_v8, %v6536_v23 }
 0x596   :  { %v5460_v45 = vpop.eup %5459 }
 0x597   :  { %v775_v46 = vmul.f32 %v5460_v45, %v759_v24  ;;  %v1142_v24 = vrot.slane %v1138_v12, 1 }
 0x599   :  { %v783_v49 = vmul.f32 %v6609_v47, %v775_v46 }
 0x59a   :  { %v5462_v48 = vpop.eup %5461 }
 0x59b   :  { %v776_v50 = vmul.f32 %v5462_v48, %v760_v28  ;;  %v791_v53 = vadd.f32 %v6612_v51, %v783_v49  ;;  %v6689_v28 = vld [vmem:[#allocation3] sm:$0xff] }
 0x59d   :  { %v784_v52 = vmul.f32 %v6609_v47, %v776_v50 }
 0x59f   :  { %v792_v54 = vadd.f32 %v6612_v51, %v784_v52 }
 0x5a1   :  { %v793_v55 = vpack.c.bf16 %v792_v54, %v791_v53 }
 0x5a3   :  { %5101 = vmatmul.mubr.msk.bf16.vlgmr.msra.gmra.mrb[8].mxu1 %vm509_vm7, %v793_v55 }
 0x5a4   :  { %5105 = vmatpush3.bf16.msra.mxu1 %v6511_v11  ;;  %5106 = vmatprep.mubr.msk.bf16.mxu1 %vm6082_vm0, %v6081_v1  ;;  %v1243_v11 = vpop.permute.xlu1 %1242 }
 0x5a5   :  { %5110 = vmatprep.subr.bf16.mxu1 %v6081_v1 }
 0x5a8   :  { %v1136_v10 = vpop.permute.xlu1 %1135 }
 0x5a9   :  { %v1139_v17 = vmul.f32 %v1136_v10, %v6536_v23 }
 0x5ab   :  { %5107 = vmatmul.mubr.msk.bf16.vlgmr.msra.gmra.mrb[12].mxu1 %vm351_vm3, %v1127_v19  ;;  %v1143_v25 = vrot.slane %v1139_v17, 1  ;;  %vm2029_vm3 = vcmask 113664  }
 0x5ac   :  { %5111 = vmatpush3.bf16.msra.mxu1 %v6515_v14  ;;  %5112 = vmatprep.mubr.msk.bf16.mxu1 %vm6082_vm0, %v6081_v1  ;;  %v309_v14 = vld [vmem:[%s7906_s26 + $0x8] sm:$0xff] }
 0x5ad   :  { %5116 = vmatprep.subr.bf16.mxu1 %v6081_v1  ;;  %v1144_v26 = vsel %vm345_vm6, %v1142_v24, %v1143_v25 }
 0x5b3   :  { %5113 = vmatmul.mubr.msk.bf16.vlgmr.msra.gmra.mrb[16].mxu1 %vm408_vm4, %v1196_v59  ;;  %vm2033_vm4 = vcmask 111616  }
 0x5b4   :  { %5117 = vmatpush3.bf16.msra.mxu1 %v6523_v18  ;;  %5118 = vmatprep.mubr.msk.bf16.mxu1 %vm6082_vm0, %v6081_v1  ;;  %v311_v18 = vld [vmem:[%s7906_s26 + $0x18] sm:$0xff] }
 0x5b5   :  { %5134 = vmatprep.subr.bf16.mxu1 %v6081_v1  ;;  %v6643_v60 = vpack.c.bf16 %v311_v18, %v309_v14 }
 0x5b7   :  { %863 = vmatprep.subr.bf16.mxu0 %v6643_v60 }
 0x5b8   :  { %864 = vmatpush1.bf16.msra.mxu0 %v6651_v63 }
 0x5b9   :  { %865 = vmatprep.subr.bf16.mxu0 %v6661_v4 }
 0x5bc   :  { %866 = vmatpush1.bf16.msra.mxu0 %v6669_v7 }
 0x5bd   :  { %5122 = vmatprep.subr.bf16.mxu0 %v6081_v1 }
 0x5bf   :  { %5119 = vmatmul.mubr.msk.bf16.vlgmr.msra.gmra.mrb[16].mxu1 %vm462_vm5, %v1243_v11  ;;  %vm3054_vm5 = vcmask 261126  }
 0x5c0   :  { %5135 = vmatpush3.bf16.msra.mxu1 %v794_v35  ;;  %5136 = vmatprep.mubr.msk.bf16.mxu1 %vm6082_vm0, %v6081_v1 }
 0x676   :  { %v838_v13 = vpop.f32.mrb[8].mxu1 }
 0x677   :  { %v6678_v15 = vadd.f32 %v6674_v9, %v838_v13  ;;  %v5102_v16 = vpop.f32.mrb[9].mxu1 }
 0x678   :  { %v841_v19 = vpop.f32.mrb[10].mxu1 }
 0x679   :  { %845 = vst.msk [vmem:[#allocation3 + $0x8] sm:$0xff] %vm319_vm10, %v6678_v15  ;;  %v6684_v20 = vadd.f32 %v6674_v9, %v841_v19  ;;  %v5103_v22 = vpop.f32.mrb[11].mxu1 }
 0x67b   :  { %846 = vst.msk [vmem:[#allocation3 + $0x10] sm:$0x3f] %vm323_vm11, %v6684_v20 }
 0x67e   :  { %v1184_v27 = vpop.f32.mrb[12].mxu1 }
 0x67f   :  { %v1185_v29 = vadd.f32 %v1184_v27, %v1144_v26  ;;  %v5108_v23 = vpop.f32.mrb[13].mxu1 }
 0x680   :  { %v1187_v30 = vpop.f32.mrb[14].mxu1  ;;  %v848_v32 = vld [vmem:[#allocation3 + $0x8] sm:$0xff] }
 0x681   :  { %v1188_v33 = vadd.f32 %v1187_v30, %v1143_v25  ;;  %v5109_v34 = vpop.f32.mrb[15].mxu1  ;;  %v851_v35 = vpack.c.bf16 %v848_v32, %v6689_v28  ;;  %v1288_v36 = vsel %vm509_vm7, %v1185_v29, 0.0 }
 0x682   :  { %v849_v40 = vld [vmem:[#allocation3 + $0x10] sm:$0xff] }
 0x683   :  { %v1289_v38 = vsel %vm511_vm8, %v1188_v33, 0.0  ;;  %4889 = vmatmul.mubr.msk.bf16.vlgmr.msra.gmra.mrb[8].mxu0 %vm319_vm10, %v851_v35  ;;  %v852_v44 = vpack.c.bf16 %v850_v41, %v849_v40 }
 0x684   :  { %v1290_v39 = vadd.f32 %v1289_v38, %v1288_v36  ;;  %904 = vmatprep.mubr.bf16.mxu0 %v6083_v2  ;;  %5123 = vmatpush3.bf16.msra.mxu0 %v6549_v42 }
 0x685   :  { %5128 = vmatprep.subr.bf16.mxu0 %v6081_v1 }
 0x686   :  { %v1291_v45 = vrot.slane %v1290_v39, 4 }
 0x688   :  { %v1292_v46 = vadd.f32 %v1291_v45, %v1290_v39 }
 0x68a   :  { %v1293_v54 = vrot.slane %v1292_v46, 2 }
 0x68b   :  { %4890 = vmatmul.mubr.msk.bf16.gmra.mrb[12].mxu0 %vm319_vm10, %v852_v44 }
 0x68c   :  { %5124 = vmatprep.mubr.msk.bf16.mxu0 %vm6082_vm0, %v6081_v1  ;;  %v1294_v57 = vadd.f32 %v1293_v54, %v1292_v46 }
 0x68e   :  { %v1295_v11 = vrot.slane %v1294_v57, 1 }
 0x690   :  { %v1296_v61 = vadd.f32 %v1295_v11, %v1294_v57 }
 0x692   :  { %v1281_v48 = vpop.f32.mrb[16].mxu1 }
 0x693   :  { %v5120_v49 = vpop.f32.mrb[17].mxu1  ;;  %v1297_v52 = vsel %vm509_vm7, %v1281_v48, 0.0 }
 0x694   :  { %v1284_v50 = vpop.f32.mrb[18].mxu1 }
 0x695   :  { %v1298_v53 = vsel %vm511_vm8, %v1284_v50, 0.0  ;;  %v5121_v42 = vpop.f32.mrb[19].mxu1 }
 0x696   :  { %v1299_v55 = vadd.f32 %v1298_v53, %v1297_v52 }
 0x698   :  { %v1300_v56 = vrot.slane %v1299_v55, 4 }
 0x69a   :  { %v1301_v58 = vadd.f32 %v1300_v56, %v1299_v55 }
 0x69c   :  { %v1302_v59 = vrot.slane %v1301_v58, 2 }
 0x69e   :  { %v1303_v14 = vadd.f32 %v1302_v59, %v1301_v58 }
 0x6a0   :  { %v1304_v18 = vrot.slane %v1303_v14, 1 }
 0x6a2   :  { %v1305_v62 = vadd.f32 %v1304_v18, %v1303_v14 }
 0x6a4   :  { %v1306_v0 = vadd.f32 %v1305_v62, %v1296_v61 }
 0x6a6   :  { %v1307_v3 = vmul.f32 0.033333335, %v1306_v0 }
 0x6a8   :  { %v1308_v5 = vsub.f32 %v1185_v29, %v1307_v3  ;;  %v1309_v6 = vsub.f32 %v1188_v33, %v1307_v3  ;;  %v1310_v8 = vsub.f32 %v1281_v48, %v1307_v3  ;;  %v1311_v10 = vsub.f32 %v1284_v50, %v1307_v3 }
 0x6aa   :  { %v1312_v12 = vmul.f32 %v1308_v5, %v1308_v5  ;;  %v1313_v13 = vmul.f32 %v1309_v6, %v1309_v6  ;;  %v1323_v16 = vmul.f32 %v1310_v8, %v1310_v8  ;;  %v1324_v17 = vmul.f32 %v1311_v10, %v1311_v10 }
 0x6ac   :  { %v1314_v19 = vsel %vm509_vm7, %v1312_v12, 0.0  ;;  %v1315_v22 = vsel %vm511_vm8, %v1313_v13, 0.0  ;;  %v1325_v24 = vsel %vm509_vm7, %v1323_v16, 0.0  ;;  %v1326_v25 = vsel %vm511_vm8, %v1324_v17, 0.0 }
 0x6ad   :  { %v1316_v26 = vadd.f32 %v1315_v22, %v1314_v19  ;;  %v1327_v27 = vadd.f32 %v1326_v25, %v1325_v24  ;;  %vm3215_vm8 = vcmask 523264  }
 0x6af   :  { %v1317_v23 = vrot.slane %v1316_v26, 4  ;;  %v1328_v30 = vrot.slane %v1327_v27, 4 }
 0x6b1   :  { %v1318_v29 = vadd.f32 %v1317_v23, %v1316_v26  ;;  %v1329_v32 = vadd.f32 %v1328_v30, %v1327_v27 }
 0x6b3   :  { %v1319_v33 = vrot.slane %v1318_v29, 2  ;;  %v1330_v34 = vrot.slane %v1329_v32, 2 }
 0x6b5   :  { %v1320_v35 = vadd.f32 %v1319_v33, %v1318_v29  ;;  %v1331_v36 = vadd.f32 %v1330_v34, %v1329_v32 }
 0x6b7   :  { %v1321_v38 = vrot.slane %v1320_v35, 1  ;;  %v1332_v39 = vrot.slane %v1331_v36, 1 }
 0x6b9   :  { %v1322_v40 = vadd.f32 %v1321_v38, %v1320_v35  ;;  %v1333_v41 = vadd.f32 %v1332_v39, %v1331_v36 }
 0x6bb   :  { %v1334_v44 = vadd.f32 %v1333_v41, %v1322_v40 }
 0x6bd   :  { %v1335_v45 = vmul.f32 0.033333335, %v1334_v44 }
 0x6bf   :  { %v1336_v46 = vadd.f32 1e-05, %v1335_v45 }
 0x6c1   :  { %5463 = vrsqrt.f32 %v1336_v46 }
 0x6cb   :  { %v5464_v48 = vpop.eup %5463 }
 0x6cc   :  { %v1338_v49 = vmul.f32 %v5464_v48, %v1308_v5  ;;  %v1339_v50 = vmul.f32 %v5464_v48, %v1309_v6  ;;  %v1362_v52 = vmul.f32 %v5464_v48, %v1310_v8  ;;  %v1363_v53 = vmul.f32 %v5464_v48, %v1311_v10 }
 0x6ce   :  { %v1340_v42 = vmul.f32 %v6562_v37, %v1338_v49  ;;  %v1341_v54 = vmul.f32 %v6562_v37, %v1339_v50  ;;  %v1364_v55 = vmul.f32 %v6562_v37, %v1362_v52  ;;  %v1365_v56 = vmul.f32 %v6562_v37, %v1363_v53 }
 0x6d0   :  { %v1342_v57 = vadd.f32 %v6564_v43, %v1340_v42  ;;  %v1343_v58 = vadd.f32 %v6564_v43, %v1341_v54  ;;  %v1366_v59 = vadd.f32 %v6564_v43, %v1364_v55  ;;  %v1367_v11 = vadd.f32 %v6564_v43, %v1365_v56 }
 0x6d2   :  { %v1371_v14 = vmul.f32 0.044715, %v1367_v11  ;;  %v1346_v18 = vmul.f32 0.044715, %v1342_v57  ;;  %v1347_v61 = vmul.f32 0.044715, %v1343_v58 }
 0x6d3   :  { %v1370_v62 = vmul.f32 0.044715, %v1366_v59  ;;  %v1344_v23 = vmul.f32 0.5, %v1342_v57  ;;  %v1345_v32 = vmul.f32 0.5, %v1343_v58  ;;  %v1368_v36 = vmul.f32 0.5, %v1366_v59 }
 0x6d4   :  { %v1373_v0 = vmul.f32 %v1371_v14, %v1367_v11  ;;  %v1348_v3 = vmul.f32 %v1346_v18, %v1342_v57  ;;  %v1349_v5 = vmul.f32 %v1347_v61, %v1343_v58  ;;  %v1369_v40 = vmul.f32 0.5, %v1367_v11 }
 0x6d5   :  { %v1372_v6 = vmul.f32 %v1370_v62, %v1366_v59 }
 0x6d6   :  { %v1375_v8 = vmul.f32 %v1373_v0, %v1367_v11  ;;  %v1350_v10 = vmul.f32 %v1348_v3, %v1342_v57  ;;  %v1351_v12 = vmul.f32 %v1349_v5, %v1343_v58 }
 0x6d7   :  { %v1374_v37 = vmul.f32 %v1372_v6, %v1366_v59 }
 0x6d8   :  { %v1352_v13 = vadd.f32 %v1350_v10, %v1342_v57  ;;  %v1377_v16 = vadd.f32 %v1375_v8, %v1367_v11  ;;  %v1353_v17 = vadd.f32 %v1351_v12, %v1343_v58 }
 0x6d9   :  { %v1376_v19 = vadd.f32 %v1374_v37, %v1366_v59 }
 0x6da   :  { %v1354_v22 = vmul.f32 0.7978846, %v1352_v13  ;;  %v1355_v24 = vmul.f32 0.7978846, %v1353_v17  ;;  %v1379_v43 = vmul.f32 0.7978846, %v1377_v16 }
 0x6db   :  { %v1378_v25 = vmul.f32 0.7978846, %v1376_v19 }
 0x6dc   :  { %5465 = vtanh.f32 %v1354_v22 }
 0x6dd   :  { %5467 = vtanh.f32 %v1355_v24 }
 0x6de   :  { %5469 = vtanh.f32 %v1378_v25 }
 0x6df   :  { %5471 = vtanh.f32 %v1379_v43 }
 0x6e6   :  { %v5466_v26 = vpop.eup %5465 }
 0x6e7   :  { %v5468_v27 = vpop.eup %5467  ;;  %v1358_v30 = vadd.f32 1.0, %v5466_v26 }
 0x6e8   :  { %v5470_v29 = vpop.eup %5469  ;;  %v1359_v33 = vadd.f32 1.0, %v5468_v27 }
 0x6e9   :  { %v5472_v34 = vpop.eup %5471  ;;  %v1360_v35 = vmul.f32 %v1358_v30, %v1344_v23  ;;  %v1382_v38 = vadd.f32 1.0, %v5470_v29 }
 0x6ea   :  { %v1361_v39 = vmul.f32 %v1359_v33, %v1345_v32  ;;  %v1383_v41 = vadd.f32 1.0, %v5472_v34 }
 0x6eb   :  { %v1384_v44 = vmul.f32 %v1382_v38, %v1368_v36 }
 0x6ec   :  { %v1386_v45 = vpack.c.bf16 %v1361_v39, %v1360_v35  ;;  %v1385_v46 = vmul.f32 %v1383_v41, %v1369_v40 }
 0x6ee   :  { %5125 = vmatmul.mubr.msk.bf16.vlgmr.msra.gmra.mrb[16].mxu0 %vm509_vm7, %v1386_v45  ;;  %v1431_v48 = vpack.c.bf16 %v1385_v46, %v1384_v44 }
 0x6ef   :  { %5129 = vmatpush3.bf16.msra.mxu0 %v6580_v31  ;;  %5130 = vmatprep.mubr.msk.bf16.mxu0 %vm6082_vm0, %v6081_v1 }
 0x6f0   :  { %1600 = vmatprep.subr.bf16.mxu0 %v6643_v60 }
 0x6f6   :  { %5131 = vmatmul.mubr.msk.bf16.vlgmr.msra.gmra.mrb[20].mxu0 %vm509_vm7, %v1431_v48 }
 0x6f7   :  { %1601 = vmatpush1.bf16.msra.mxu0 %v6651_v63  ;;  %1632 = vmatprep.mubr.bf16.mxu0 %v6083_v2 }
 0x6f8   :  { %1602 = vmatprep.subr.bf16.mxu0 %v6661_v4 }
 0x6fb   :  { %1603 = vmatpush1.bf16.msra.mxu0 %v6669_v7 }
 0x6fc   :  { %5140 = vmatprep.subr.bf16.mxu0 %v6081_v1 }
 0x756   :  { %v6726_v49 = vpop.f32.mrb[8].mxu0 }
 0x757   :  { %v899_v31 = vpop.f32.mrb[9].mxu0  ;;  %v920_v50 = vrot.slane %v6726_v49, 1  ;;  %v938_v52 = vrot.slane %v6726_v49, 2  ;;  %v956_v7 = vrot.slane %v6726_v49, 3 }
 0x758   :  { %v6730_v60 = vpop.f32.mrb[10].mxu0 }
 0x759   :  { %v921_v63 = vrot.slane %v6730_v60, 1  ;;  %v939_v53 = vrot.slane %v6730_v60, 2  ;;  %v6734_v4 = vpop.f32.mrb[11].mxu0  ;;  %v957_v42 = vrot.slane %v6730_v60, 3 }
 0x75a   :  { %v986_v57 = vrot.slane %v6734_v4, 5  ;;  %v1001_v61 = vrot.slane %v6734_v4, 6  ;;  %v1017_v5 = vrot.slane %v6734_v4, 7 }
 0x75b   :  { %v6739_v54 = vsel %vm345_vm6, %v920_v50, %v921_v63  ;;  %v6742_v55 = vsel %vm937_vm12, %v938_v52, %v939_v53  ;;  %v6745_v56 = vsel %vm955_vm13, %v956_v7, %v957_v42 }
 0x75e   :  { %v6748_v58 = vpop.f32.mrb[12].mxu0 }
 0x75f   :  { %v923_v59 = vrot.slane %v6748_v58, 1  ;;  %v941_v11 = vrot.slane %v6748_v58, 2  ;;  %v6752_v14 = vpop.f32.mrb[13].mxu0  ;;  %v959_v18 = vrot.slane %v6748_v58, 3 }
 0x760   :  { %v987_v62 = vrot.slane %v6752_v14, 5  ;;  %v910_v0 = vpop.f32.mrb[14].mxu0  ;;  %v1002_v3 = vrot.slane %v6752_v14, 6  ;;  %v1018_v6 = vrot.slane %v6752_v14, 7 }
 0x761   :  { %v911_v8 = vpop.f32.mrb[15].mxu0  ;;  %v6763_v10 = vsel %vm345_vm6, %v921_v63, %v923_v59  ;;  %v6768_v12 = vsel %vm937_vm12, %v939_v53, %v941_v11  ;;  %v6773_v37 = vsel %vm955_vm13, %v957_v42, %v959_v18 }
 0x762   :  { %v1020_v13 = vrot.slane %v911_v8, 7  ;;  %v6780_v16 = vsel %vm985_vm14, %v986_v57, %v987_v62  ;;  %v6787_v17 = vsel %vm355_vm2, %v1001_v61, %v1002_v3  ;;  %v6792_v19 = vsel %vm412_vm1, %v1017_v5, %v1018_v6 }
 0x764   :  { %v6795_v22 = vsel %vm412_vm1, %v1018_v6, %v1020_v13 }
 0x7c1   :  { %v1424_v24 = vpop.f32.mrb[16].mxu0 }
 0x7c2   :  { %v5126_v25 = vpop.f32.mrb[17].mxu0  ;;  %v1480_v26 = vrot.slane %v1424_v24, 1 }
 0x7c3   :  { %v1427_v43 = vpop.f32.mrb[18].mxu0 }
 0x7c4   :  { %v1481_v27 = vrot.slane %v1427_v43, 1  ;;  %v5127_v23 = vpop.f32.mrb[19].mxu0 }
 0x7c6   :  { %1485 = vrot.lane.b32.xlu0 %v1481_v27, %s6086_s7  ;;  %v1482_v30 = vsel %vm345_vm6, %v1480_v26, %v1481_v27 }
 0x7c7   :  { %1483 = vrot.lane.b32.xlu1 %v1482_v30, %s6086_s7 }
 0x7c9   :  { %v1469_v29 = vpop.f32.mrb[20].mxu0 }
 0x7ca   :  { %v5132_v32 = vpop.f32.mrb[21].mxu0 }
 0x7cb   :  { %v1472_v33 = vpop.f32.mrb[22].mxu0 }
 0x7cc   :  { %v5133_v34 = vpop.f32.mrb[23].mxu0 }
 0x838   :  { %v1486_v35 = vpop.permute.xlu0 %1485 }
 0x839   :  { %v1490_v36 = vadd.f32 %v1486_v35, %v1427_v43  ;;  %v1484_v38 = vpop.permute.xlu1 %1483 }
 0x83a   :  { %v1489_v39 = vadd.f32 %v1484_v38, %v1424_v24 }
 0x83b   :  { %v1492_v40 = vadd.f32 %v1490_v36, %v1472_v33 }
 0x83c   :  { %v1491_v41 = vadd.f32 %v1489_v39, %v1469_v29 }
 0x83d   :  { %v1496_v44 = vmul.f32 0.044715, %v1492_v40  ;;  %v1494_v6 = vmul.f32 0.5, %v1492_v40 }
 0x83e   :  { %v1495_v45 = vmul.f32 0.044715, %v1491_v41  ;;  %v1493_v13 = vmul.f32 0.5, %v1491_v41 }
 0x83f   :  { %v1498_v46 = vmul.f32 %v1496_v44, %v1492_v40 }
 0x840   :  { %v1497_v48 = vmul.f32 %v1495_v45, %v1491_v41 }
 0x841   :  { %v1500_v31 = vmul.f32 %v1498_v46, %v1492_v40 }
 0x842   :  { %v1499_v50 = vmul.f32 %v1497_v48, %v1491_v41 }
 0x843   :  { %v1502_v52 = vadd.f32 %v1500_v31, %v1492_v40 }
 0x844   :  { %v1501_v63 = vadd.f32 %v1499_v50, %v1491_v41  ;;  %v976_v50 = vrot.slane %v6734_v4, 4 }
 0x845   :  { %v1504_v53 = vmul.f32 0.7978846, %v1502_v52 }
 0x846   :  { %v1503_v7 = vmul.f32 0.7978846, %v1501_v63 }
 0x847   :  { %5473 = vtanh.f32 %v1504_v53 }
 0x848   :  { %5475 = vtanh.f32 %v1503_v7 }
 0x851   :  { %v5474_v42 = vpop.eup %5473 }
 0x852   :  { %v5476_v0 = vpop.eup %5475  ;;  %v1508_v8 = vadd.f32 1.0, %v5474_v42 }
 0x853   :  { %v1507_v24 = vadd.f32 1.0, %v5476_v0 }
 0x854   :  { %v1510_v25 = vmul.f32 %v1508_v8, %v1494_v6 }
 0x855   :  { %v1509_v43 = vmul.f32 %v1507_v24, %v1493_v13 }
 0x856   :  { %v1514_v26 = vsel %vm752_vm9, %v1510_v25, 0.0 }
 0x857   :  { %1515 = vadd.xlane.f32.xlu0 %v1514_v26  ;;  %v1511_v27 = vsel %vm509_vm7, %v1509_v43, 0.0 }
 0x858   :  { %1512 = vadd.xlane.f32.xlu1 %v1511_v27  ;;  %v1591_v27 = vld [vmem:[#allocation3 + $0x18] sm:$0x3f] }
 0x8e4   :  { %v1516_v23 = vpop.xlane.xlu0 %1515 }
 0x8e5   :  { %v1518_v30 = vmul.f32 0.0625, %v1516_v23  ;;  %v1513_v29 = vpop.xlane.xlu1 %1512 }
 0x8e6   :  { %v1517_v32 = vmul.f32 0.0625, %v1513_v29 }
 0x8e7   :  { %v1520_v33 = vsub.f32 %v1510_v25, %v1518_v30 }
 0x8e8   :  { %v1519_v34 = vsub.f32 %v1509_v43, %v1517_v32 }
 0x8e9   :  { %v1522_v35 = vmul.f32 %v1520_v33, %v1520_v33 }
 0x8ea   :  { %v1521_v36 = vmul.f32 %v1519_v34, %v1519_v34 }
 0x8eb   :  { %v1526_v38 = vsel %vm752_vm9, %v1522_v35, 0.0 }
 0x8ec   :  { %1527 = vadd.xlane.f32.xlu1 %v1526_v38  ;;  %v1523_v39 = vsel %vm509_vm7, %v1521_v36, 0.0 }
 0x8ed   :  { %1524 = vadd.xlane.f32.xlu0 %v1523_v39 }
 0x8fd   :  { %927 = vrot.lane.b32.xlu1 %v6763_v10, %s6087_s2 }
 0x901   :  { %929 = vrot.lane.b32.xlu1 %v923_v59, %s6087_s2 }
 0x903   :  { %925 = vrot.lane.b32.xlu0 %v6739_v54, %s6087_s2 }
 0x905   :  { %945 = vrot.lane.b32.xlu1 %v6768_v12, %s6088_s13 }
 0x907   :  { %943 = vrot.lane.b32.xlu0 %v6742_v55, %s6088_s13 }
 0x909   :  { %961 = vrot.lane.b32.xlu1 %v6745_v56, %s6065_s12 }
 0x90b   :  { %947 = vrot.lane.b32.xlu0 %v941_v11, %s6088_s13 }
 0x90d   :  { %965 = vrot.lane.b32.xlu1 %v959_v18, %s6065_s12 }
 0x90f   :  { %963 = vrot.lane.b32.xlu0 %v6773_v37, %s6065_s12 }
 0x911   :  { %991 = vrot.lane.b32.xlu1 %v6780_v16, %s6087_s2 }
 0x913   :  { %989 = vrot.lane.b32.xlu0 %v986_v57, %s6087_s2 }
 0x915   :  { %1004 = vrot.lane.b32.xlu1 %v1001_v61, %s6088_s13 }
 0x917   :  { %993 = vrot.lane.b32.xlu0 %v987_v62, %s6087_s2 }
 0x919   :  { %1008 = vrot.lane.b32.xlu1 %v1002_v3, %s6088_s13 }
 0x91b   :  { %1006 = vrot.lane.b32.xlu0 %v6787_v17, %s6088_s13  ;;  %v977_v17 = vrot.slane %v6752_v14, 4 }
 0x91d   :  { %1024 = vrot.lane.b32.xlu1 %v6792_v19, %s6065_s12  ;;  %v978_v53 = vsel %vm975_vm15, %v976_v50, %v977_v17 }
 0x91f   :  { %1022 = vrot.lane.b32.xlu0 %v1017_v5, %s6065_s12 }
 0x979   :  { %v1528_v54 = vpop.xlane.xlu1 %1527 }
 0x97a   :  { %v1530_v55 = vmul.f32 0.0625, %v1528_v54  ;;  %v1525_v56 = vpop.xlane.xlu0 %1524 }
 0x97b   :  { %v1529_v57 = vmul.f32 0.0625, %v1525_v56 }
 0x97c   :  { %v1532_v59 = vadd.f32 1e-05, %v1530_v55 }
 0x97d   :  { %v1531_v11 = vadd.f32 1e-05, %v1529_v57  ;;  %v928_v18 = vpop.permute.xlu1 %927 }
 0x97e   :  { %5477 = vrsqrt.f32 %v1532_v59  ;;  %v926_v61 = vpop.permute.xlu0 %925  ;;  %v935_v5 = vadd.f32 %v928_v18, %v6730_v60 }
 0x97f   :  { %5479 = vrsqrt.f32 %v1531_v11  ;;  %v934_v12 = vadd.f32 %v926_v61, %v6726_v49 }
 0x981   :  { %v6846_v62 = vpop.permute.xlu1 %929 }
 0x982   :  { %v944_v3 = vpop.permute.xlu0 %943 }
 0x983   :  { %v952_v19 = vadd.f32 %v944_v3, %v934_v12 }
 0x985   :  { %v946_v10 = vpop.permute.xlu1 %945 }
 0x986   :  { %v6849_v37 = vpop.permute.xlu0 %947  ;;  %v953_v44 = vadd.f32 %v946_v10, %v935_v5 }
 0x988   :  { %v5478_v16 = vpop.eup %5477 }
 0x989   :  { %v5480_v40 = vpop.eup %5479  ;;  %v1536_v41 = vmul.f32 %v5478_v16, %v1520_v33  ;;  %v962_v45 = vpop.permute.xlu1 %961 }
 0x98a   :  { %v1535_v46 = vmul.f32 %v5480_v40, %v1519_v34  ;;  %v970_v48 = vadd.f32 %v962_v45, %v952_v19  ;;  %v964_v31 = vpop.permute.xlu0 %963 }
 0x98b   :  { %v1538_v49 = vmul.f32 %v6609_v47, %v1536_v41  ;;  %v971_v52 = vadd.f32 %v964_v31, %v953_v44 }
 0x98c   :  { %v1537_v63 = vmul.f32 %v6609_v47, %v1535_v46  ;;  %v982_v60 = vadd.f32 %v976_v50, %v970_v48 }
 0x98d   :  { %v983_v7 = vadd.f32 %v978_v53, %v971_v52  ;;  %v1540_v42 = vadd.f32 %v6612_v51, %v1538_v49 }
 0x98e   :  { %v1539_v0 = vadd.f32 %v6612_v51, %v1537_v63  ;;  %v990_v29 = vpop.permute.xlu0 %989 }
 0x98f   :  { %v998_v12 = vadd.f32 %v990_v29, %v982_v60  ;;  %v6938_v29 = vld [vmem:[%s7907_s8] ss:$0 sm:$0xff] }
 0x990   :  { %v1541_v6 = vpack.c.bf16 %v1540_v42, %v1539_v0 }
 0x992   :  { %5137 = vmatmul.mubr.msk.bf16.vlgmr.msra.gmra.mrb[20].mxu1 %vm509_vm7, %v1541_v6  ;;  %v6881_v33 = vpop.permute.xlu0 %993  ;;  %vm3061_vm7 = vcmask 257024  }
 0x993   :  { %1956 = vmatprep.mubr.bf16.mxu1 %v6083_v2 }
 0x996   :  { %v1007_v11 = vpop.permute.xlu0 %1006 }
 0xa65   :  { %v1579_v4 = vpop.f32.mrb[20].mxu1 }
 0xa66   :  { %v6864_v8 = vadd.f32 %v6674_v9, %v1579_v4  ;;  %v5138_v47 = vpop.f32.mrb[21].mxu1  ;;  %v1023_v4 = vpop.permute.xlu0 %1022 }
 0xa67   :  { %v1582_v13 = vpop.f32.mrb[22].mxu1 }
 0xa68   :  { %1586 = vst.msk [vmem:[#allocation3 + $0x8] sm:$0xff] %vm319_vm10, %v6864_v8  ;;  %v6869_v24 = vadd.f32 %v6674_v9, %v1582_v13  ;;  %v5139_v25 = vpop.f32.mrb[23].mxu1  ;;  %v6879_v9 = vpop.permute.xlu1 %965 }
 0xa6a   :  { %1587 = vst.msk [vmem:[#allocation3 + $0x10] sm:$0x3f] %vm323_vm11, %v6869_v24 }
 0xa6c   :  { %v992_v30 = vpop.permute.xlu1 %991 }
 0xa6d   :  { %v999_v10 = vadd.f32 %v992_v30, %v983_v7 }
 0xa6f   :  { %v1589_v51 = vld [vmem:[#allocation3 + $0x8] sm:$0xff]  ;;  %v1014_v5 = vadd.f32 %v1007_v11, %v999_v10 }
 0xa70   :  { %v1592_v43 = vpack.c.bf16 %v1589_v51, %v6689_v28  ;;  %v1005_v32 = vpop.permute.xlu1 %1004 }
 0xa71   :  { %v1590_v26 = vld [vmem:[#allocation3 + $0x10] sm:$0xff] }
 0xa72   :  { %4900 = vmatmul.mubr.msk.bf16.vlgmr.msra.gmra.mrb[24].mxu0 %vm319_vm10, %v1592_v43  ;;  %v1593_v23 = vpack.c.bf16 %v1591_v27, %v1590_v26  ;;  %v1013_v43 = vadd.f32 %v1005_v32, %v998_v12 }
 0xa73   :  { %1641 = vmatprep.mubr.bf16.mxu0 %v6083_v2 }
 0xa74   :  { %v6895_v59 = vpop.permute.xlu1 %1008  ;;  %v1031_v30 = vadd.f32 %v1023_v4, %v1013_v43 }
 0xa78   :  { %v1025_v31 = vpop.permute.xlu1 %1024 }
 0xa79   :  { %v1032_v26 = vadd.f32 %v1025_v31, %v1014_v5 }
 0xa7a   :  { %4901 = vmatmul.mubr.msk.bf16.gmra.mrb[28].mxu0 %vm319_vm10, %v1593_v23 }
 0xa7b   :  { %5142 = vmatprep.mubr.msk.bf16.mxu0 %vm6082_vm0, %v6081_v1  ;;  %v1041_v32 = vadd.f32 %v6938_v29, %v1032_v26 }
 0xa7d   :  { %v1044_v5 = vmul.f32 0.5, %v1041_v32 }
 0xb45   :  { %v6883_v28 = vpop.f32.mrb[24].mxu0 }
 0xb46   :  { %v1636_v34 = vpop.f32.mrb[25].mxu0  ;;  %v1657_v35 = vrot.slane %v6883_v28, 1  ;;  %v1674_v36 = vrot.slane %v6883_v28, 2  ;;  %v1691_v56 = vrot.slane %v6883_v28, 3 }
 0xb47   :  { %v6887_v38 = vpop.f32.mrb[26].mxu0  ;;  %v1040_v34 = vadd.f32 %v6938_v29, %v1031_v30 }
 0xb48   :  { %v1658_v39 = vrot.slane %v6887_v38, 1  ;;  %v1675_v54 = vrot.slane %v6887_v38, 2  ;;  %v6891_v55 = vpop.f32.mrb[27].mxu0  ;;  %v1692_v57 = vrot.slane %v6887_v38, 3 }
 0xb49   :  { %v1719_v19 = vrot.slane %v6891_v55, 5  ;;  %v1734_v40 = vrot.slane %v6891_v55, 6  ;;  %v1750_v48 = vrot.slane %v6891_v55, 7  ;;  %v1710_v6 = vrot.slane %v6891_v55, 4 }
 0xb4a   :  { %v1676_v18 = vsel %vm937_vm12, %v1674_v36, %v1675_v54  ;;  %v1659_v61 = vsel %vm345_vm6, %v1657_v35, %v1658_v39  ;;  %v1693_v3 = vsel %vm955_vm13, %v1691_v56, %v1692_v57  ;;  %v1047_v35 = vmul.f32 0.044715, %v1041_v32 }
 0xb4b   :  { %1679 = vrot.lane.b32.xlu1 %v1676_v18, %s6088_s13  ;;  %1662 = vrot.lane.b32.xlu0 %v1659_v61, %s6087_s2  ;;  %v1046_v36 = vmul.f32 0.044715, %v1040_v34 }
 0xb4d   :  { %v6902_v16 = vpop.f32.mrb[28].mxu0 }
 0xb4e   :  { %v1660_v41 = vrot.slane %v6902_v16, 1  ;;  %v1677_v44 = vrot.slane %v6902_v16, 2  ;;  %v6908_v45 = vpop.f32.mrb[29].mxu0  ;;  %v1694_v46 = vrot.slane %v6902_v16, 3 }
 0xb4f   :  { %v1711_v50 = vrot.slane %v6908_v45, 4  ;;  %v1720_v49 = vrot.slane %v6908_v45, 5  ;;  %v1735_v52 = vrot.slane %v6908_v45, 6  ;;  %1696 = vrot.lane.b32.xlu0 %v1693_v3, %s6065_s12  ;;  %1722 = vrot.lane.b32.xlu1 %v1719_v19, %s6087_s2  ;;  %v1647_v63 = vpop.f32.mrb[30].mxu0  ;;  %v1751_v60 = vrot.slane %v6908_v45, 7 }
 0xb50   :  { %v1648_v53 = vpop.f32.mrb[31].mxu0  ;;  %v1661_v7 = vsel %vm345_vm6, %v1658_v39, %v1660_v41  ;;  %v1678_v42 = vsel %vm937_vm12, %v1675_v54, %v1677_v44  ;;  %v1695_v0 = vsel %vm955_vm13, %v1692_v57, %v1694_v46  ;;  %v1050_v39 = vmul.f32 %v1047_v35, %v1041_v32 }
 0xb51   :  { %v1753_v47 = vrot.slane %v1648_v53, 7  ;;  %v1736_v13 = vsel %vm355_vm2, %v1734_v40, %v1735_v52  ;;  %v1721_v25 = vsel %vm985_vm14, %v1719_v19, %v1720_v49  ;;  %v1752_v51 = vsel %vm412_vm1, %v1750_v48, %v1751_v60 }
 0xb52   :  { %v6930_v27 = vsel %vm975_vm15, %v1710_v6, %v1711_v50  ;;  %v1049_v54 = vmul.f32 %v1046_v36, %v1040_v34  ;;  %v1053_v56 = vmul.f32 %v1050_v39, %v1041_v32  ;;  %v936_v53 = vadd.f32 %v6846_v62, %v6748_v58 }
 0xb53   :  { %1737 = vrot.lane.b32.xlu0 %v1734_v40, %s6088_s13  ;;  %1664 = vrot.lane.b32.xlu1 %v1661_v7, %s6087_s2  ;;  %v1754_v23 = vsel %vm412_vm1, %v1751_v60, %v1753_v47  ;;  %v1043_v40 = vmul.f32 0.5, %v1040_v34  ;;  %vm1981_vm1 = vcmask 64512  }
 0xb54   :  { %v1052_v57 = vmul.f32 %v1049_v54, %v1040_v34  ;;  %v1056_v11 = vadd.f32 %v1053_v56, %v1041_v32 }
 0xb56   :  { %v1059_v18 = vmul.f32 0.7978846, %v1056_v11 }
 0xb57   :  { %1681 = vrot.lane.b32.xlu0 %v1678_v42, %s6088_s13  ;;  %1698 = vrot.lane.b32.xlu1 %v1695_v0, %s6065_s12  ;;  %v954_v42 = vadd.f32 %v6849_v37, %v936_v53 }
 0xb58   :  { %5481 = vtanh.f32 %v1059_v18 }
 0xb5b   :  { %1026 = vrot.lane.b32.xlu0 %v6795_v22, %s6065_s12  ;;  %1739 = vrot.lane.b32.xlu1 %v1736_v13, %s6088_s13  ;;  %v1055_v22 = vadd.f32 %v1052_v57, %v1040_v34  ;;  %v972_v13 = vadd.f32 %v6879_v9, %v954_v42 }
 0xb5d   :  { %v1058_v61 = vmul.f32 0.7978846, %v1055_v22  ;;  %v984_v26 = vadd.f32 %v977_v17, %v972_v13 }
 0xb5f   :  { %1755 = vrot.lane.b32.xlu1 %v1750_v48, %s6065_s12  ;;  %1724 = vrot.lane.b32.xlu0 %v1721_v25, %s6087_s2  ;;  %5483 = vtanh.f32 %v1058_v61  ;;  %v1000_v37 = vadd.f32 %v6881_v33, %v984_v26 }
 0xb61   :  { %v1015_v30 = vadd.f32 %v6895_v59, %v1000_v37 }
 0xb62   :  { %v5482_v3 = vpop.eup %5481 }
 0xb63   :  { %1666 = vrot.lane.b32.xlu1 %v1660_v41, %s6087_s2  ;;  %1757 = vrot.lane.b32.xlu0 %v1752_v51, %s6065_s12  ;;  %v1065_v12 = vadd.f32 1.0, %v5482_v3 }
 0xb65   :  { %v6956_v41 = vmul.f32 %v1065_v12, %v1044_v5 }
 0xb67   :  { %1700 = vrot.lane.b32.xlu1 %v1694_v46, %s6065_s12  ;;  %1683 = vrot.lane.b32.xlu0 %v1677_v44, %s6088_s13  ;;  %v1074_v46 = vrot.slane %v6956_v41, 4 }
 0xb69   :  { %v5484_v10 = vpop.eup %5483 }
 0xb6a   :  { %v1064_v19 = vadd.f32 1.0, %v5484_v10 }
 0xb6b   :  { %1741 = vrot.lane.b32.xlu1 %v1735_v52, %s6088_s13  ;;  %1726 = vrot.lane.b32.xlu0 %v1720_v49, %s6087_s2 }
 0xb6c   :  { %v1067_v44 = vmul.f32 %v1064_v19, %v1043_v40 }
 0xb6e   :  { %v1073_v48 = vrot.slane %v1067_v44, 4 }
 0xb6f   :  { %1759 = vrot.lane.b32.xlu0 %v1754_v23, %s6065_s12 }
 0xb70   :  { %v1075_v31 = vsel %vm975_vm15, %v1073_v48, %v1074_v46 }
 0xb71   :  { %v6963_v49 = vadd.f32 %v1075_v31, %v6678_v15 }
 0xb73   :  { %v1082_v52 = vsel %vm319_vm10, %v6963_v49, 0.0 }
 0xb8f   :  { %1083 = vadd.xlane.f32.xlu1 %v1082_v52 }
 0xbbd   :  { %v1680_v63 = vpop.permute.xlu1 %1679  ;;  %v1663_v60 = vpop.permute.xlu0 %1662 }
 0xbbe   :  { %v1671_v7 = vadd.f32 %v1663_v60, %v6883_v28 }
 0xbc0   :  { %v1688_v0 = vadd.f32 %v1680_v63, %v1671_v7 }
 0xbc1   :  { %v1697_v4 = vpop.permute.xlu0 %1696  ;;  %v1723_v47 = vpop.permute.xlu1 %1722 }
 0xbc2   :  { %v1705_v15 = vadd.f32 %v1697_v4, %v1688_v0 }
 0xbc4   :  { %v1716_v25 = vadd.f32 %v1710_v6, %v1705_v15 }
 0xbc5   :  { %v1738_v51 = vpop.permute.xlu0 %1737  ;;  %v1665_v43 = vpop.permute.xlu1 %1664 }
 0xbc6   :  { %v1672_v58 = vadd.f32 %v1665_v43, %v6887_v38  ;;  %v1731_v32 = vadd.f32 %v1723_v47, %v1716_v25 }
 0xbc8   :  { %v1746_v36 = vadd.f32 %v1738_v51, %v1731_v32 }
 0xbc9   :  { %v1682_v62 = vpop.permute.xlu0 %1681  ;;  %v1699_v28 = vpop.permute.xlu1 %1698 }
 0xbca   :  { %v1689_v23 = vadd.f32 %v1682_v62, %v1672_v58 }
 0xbcc   :  { %v1706_v9 = vadd.f32 %v1699_v28, %v1689_v23 }
 0xbcd   :  { %v1027_v34 = vpop.permute.xlu0 %1026  ;;  %v1740_v35 = vpop.permute.xlu1 %1739 }
 0xbce   :  { %v1033_v55 = vadd.f32 %v1027_v34, %v1015_v30  ;;  %v1717_v6 = vadd.f32 %v6930_v27, %v1706_v9 }
 0xbd0   :  { %v1042_v14 = vadd.f32 %v6938_v29, %v1033_v55 }
 0xbd1   :  { %v1756_v17 = vpop.permute.xlu1 %1755  ;;  %v1725_v39 = vpop.permute.xlu0 %1724 }
 0xbd2   :  { %v1048_v38 = vmul.f32 0.044715, %v1042_v14  ;;  %v1764_v54 = vadd.f32 %v1756_v17, %v1746_v36  ;;  %v1732_v56 = vadd.f32 %v1725_v39, %v1717_v6  ;;  %v1045_v62 = vmul.f32 0.5, %v1042_v14 }
 0xbd4   :  { %v1051_v57 = vmul.f32 %v1048_v38, %v1042_v14  ;;  %v1767_v33 = vadd.f32 %v6938_v29, %v1764_v54  ;;  %v1747_v11 = vadd.f32 %v1740_v35, %v1732_v56 }
 0xbd5   :  { %v1667_v59 = vpop.permute.xlu1 %1666  ;;  %v1758_v22 = vpop.permute.xlu0 %1757 }
 0xbd6   :  { %v1773_v18 = vmul.f32 0.044715, %v1767_v33  ;;  %v1765_v61 = vadd.f32 %v1758_v22, %v1747_v11  ;;  %v1054_v3 = vmul.f32 %v1051_v57, %v1042_v14  ;;  %v1673_v27 = vadd.f32 %v1667_v59, %v6902_v16 }
 0xbd7   :  { %v1770_v35 = vmul.f32 0.5, %v1767_v33 }
 0xbd8   :  { %v1776_v10 = vmul.f32 %v1773_v18, %v1767_v33  ;;  %v1768_v12 = vadd.f32 %v6938_v29, %v1765_v61  ;;  %v1057_v5 = vadd.f32 %v1054_v3, %v1042_v14 }
 0xbd9   :  { %v1684_v19 = vpop.permute.xlu0 %1683  ;;  %v1701_v31 = vpop.permute.xlu1 %1700 }
 0xbda   :  { %v1774_v40 = vmul.f32 0.044715, %v1768_v12  ;;  %v1690_v44 = vadd.f32 %v1684_v19, %v1673_v27  ;;  %v1060_v48 = vmul.f32 0.7978846, %v1057_v5  ;;  %v1779_v52 = vmul.f32 %v1776_v10, %v1767_v33 }
 0xbdb   :  { %v1771_v17 = vmul.f32 0.5, %v1768_v12 }
 0xbdc   :  { %v1777_v63 = vmul.f32 %v1774_v40, %v1768_v12  ;;  %v1707_v60 = vadd.f32 %v1701_v31, %v1690_v44  ;;  %5485 = vtanh.f32 %v1060_v48  ;;  %v1782_v7 = vadd.f32 %v1779_v52, %v1767_v33 }
 0xbdd   :  { %v1727_v53 = vpop.permute.xlu0 %1726  ;;  %v1742_v13 = vpop.permute.xlu1 %1741 }
 0xbde   :  { %v1718_v42 = vadd.f32 %v1711_v50, %v1707_v60  ;;  %v1780_v0 = vmul.f32 %v1777_v63, %v1768_v12  ;;  %v1785_v4 = vmul.f32 0.7978846, %v1782_v7 }
 0xbe0   :  { %v1733_v16 = vadd.f32 %v1727_v53, %v1718_v42  ;;  %v1783_v47 = vadd.f32 %v1780_v0, %v1768_v12  ;;  %5487 = vtanh.f32 %v1785_v4 }
 0xbe1   :  { %v1760_v51 = vpop.permute.xlu0 %1759 }
 0xbe2   :  { %v1748_v15 = vadd.f32 %v1742_v13, %v1733_v16  ;;  %v1786_v25 = vmul.f32 0.7978846, %v1783_v47 }
 0xbe4   :  { %v1766_v43 = vadd.f32 %v1760_v51, %v1748_v15  ;;  %5489 = vtanh.f32 %v1786_v25  ;;  %v1846_v15 = vld [vmem:[%s7859_s14 + $0x8] sm:$0xff]  ;;  %v1848_v25 = vld [vmem:[%s7859_s14 + $0x18] sm:$0xff] }
 0xbe5   :  { %v1904_v51 = vpack.c.bf16 %v1848_v25, %v1846_v15 }
 0xbe6   :  { %v5486_v26 = vpop.eup %5485  ;;  %v1769_v58 = vadd.f32 %v6938_v29, %v1766_v43  ;;  %v1845_v43 = vld [vmem:[%s7859_s14] sm:$0xff] }
 0xbe7   :  { %v1066_v28 = vadd.f32 1.0, %v5486_v26  ;;  %v1847_v26 = vld [vmem:[%s7859_s14 + $0x10] sm:$0xff]  ;;  %1924 = vmatprep.subr.bf16.mxu1 %v1904_v51 }
 0xbe8   :  { %v1775_v37 = vmul.f32 0.044715, %v1769_v58  ;;  %v1772_v11 = vmul.f32 0.5, %v1769_v58 }
 0xbe9   :  { %v1069_v23 = vmul.f32 %v1066_v28, %v1045_v62  ;;  %v1903_v62 = vpack.c.bf16 %v1847_v26, %v1845_v43  ;;  %v1850_v28 = vld [vmem:[%s7859_s14 + $0x28] sm:$0xff] }
 0xbea   :  { %v1778_v45 = vmul.f32 %v1775_v37, %v1769_v58  ;;  %v5488_v50 = vpop.eup %5487  ;;  %v1852_v37 = vld [vmem:[%s7859_s14 + $0x38] sm:$0xff] }
 0xbeb   :  { %v1076_v30 = vrot.slane %v1069_v23, 4  ;;  %v1791_v32 = vadd.f32 1.0, %v5488_v50  ;;  %1925 = vmatpush1.bf16.msra.mxu1 %v1903_v62  ;;  %v1906_v23 = vpack.c.bf16 %v1852_v37, %v1850_v28  ;;  %v1851_v50 = vld [vmem:[%s7859_s14 + $0x30] sm:$0xff] }
 0xbec   :  { %v1781_v9 = vmul.f32 %v1778_v45, %v1769_v58  ;;  %v1849_v45 = vld [vmem:[%s7859_s14 + $0x20] sm:$0xff] }
 0xbed   :  { %v1077_v34 = vsel %vm975_vm15, %v1074_v46, %v1076_v30  ;;  %v1794_v14 = vmul.f32 %v1791_v32, %v1770_v35  ;;  %v1905_v30 = vpack.c.bf16 %v1851_v50, %v1849_v45  ;;  %1926 = vmatprep.subr.bf16.mxu1 %v1906_v23  ;;  %v4893_v35 = vld [vmem:[#allocation15] ss:$0 sm:$0xff] }
 0xbee   :  { %v5490_v55 = vpop.eup %5489  ;;  %v1081_v6 = vadd.f32 %v1077_v34, %v6684_v20  ;;  %v1784_v36 = vadd.f32 %v1781_v9, %v1769_v58  ;;  %v4892_v9 = vld [vmem:[#allocation13] ss:$0 sm:$0xff] }
 0xbef   :  { %v1792_v29 = vadd.f32 1.0, %v5490_v55  ;;  %v1800_v56 = vrot.slane %v1794_v14, 4  ;;  %1927 = vmatpush1.bf16.msra.mxu1 %v1905_v30 }
 0xbf0   :  { %v1085_v39 = vsel %vm323_vm11, %v1081_v6, 0.0  ;;  %v1787_v38 = vmul.f32 0.7978846, %v1784_v36  ;;  %5146 = vmatprep.subr.bf16.mxu1 %v6081_v1 }
 0xbf1   :  { %1086 = vadd.xlane.f32.xlu0 %v1085_v39  ;;  %v1795_v54 = vmul.f32 %v1792_v29, %v1771_v17 }
 0xbf2   :  { %5491 = vtanh.f32 %v1787_v38 }
 0xbf3   :  { %v1801_v57 = vrot.slane %v1795_v54, 4 }
 0xbf5   :  { %v1802_v41 = vsel %vm975_vm15, %v1800_v56, %v1801_v57 }
 0xbf6   :  { %v1807_v46 = vadd.f32 %v1802_v41, %v6864_v8 }
 0xbf8   :  { %v1809_v33 = vsel %vm319_vm10, %v1807_v46, 0.0 }
 0xbf9   :  { %1810 = vadd.xlane.f32.xlu0 %v1809_v33 }
 0xbfc   :  { %v5492_v20 = vpop.eup %5491 }
 0xbfd   :  { %v1793_v59 = vadd.f32 1.0, %v5492_v20 }
 0xbff   :  { %v1796_v22 = vmul.f32 %v1793_v59, %v1772_v11 }
 0xc01   :  { %v1803_v18 = vrot.slane %v1796_v22, 4 }
 0xc03   :  { %v1804_v61 = vsel %vm975_vm15, %v1801_v57, %v1803_v18 }
 0xc04   :  { %v1808_v3 = vadd.f32 %v1804_v61, %v6869_v24 }
 0xc06   :  { %v1812_v10 = vsel %vm323_vm11, %v1808_v3, 0.0 }
 0xc07   :  { %1813 = vadd.xlane.f32.xlu1 %v1812_v10 }
 0xc1c   :  { %v1084_v27 = vpop.xlane.xlu1 %1083 }
 0xc1d   :  { %v1089_v12 = vmul.f32 0.03125, %v1084_v27 }
 0xc1f   :  { %v1091_v5 = vsub.f32 %v6963_v49, %v1089_v12 }
 0xc21   :  { %v1093_v8 = vmul.f32 %v1091_v5, %v1091_v5 }
 0xc23   :  { %v1095_v19 = vsel %vm319_vm10, %v1093_v8, 0.0 }
 0xc24   :  { %1096 = vadd.xlane.f32.xlu0 %v1095_v19 }
 0xc7e   :  { %v1087_v40 = vpop.xlane.xlu0 %1086 }
 0xc7f   :  { %v1090_v44 = vmul.f32 0.03125, %v1087_v40 }
 0xc81   :  { %v1092_v48 = vsub.f32 %v1081_v6, %v1090_v44 }
 0xc83   :  { %v1094_v31 = vmul.f32 %v1092_v48, %v1092_v48 }
 0xc85   :  { %v1098_v52 = vsel %vm323_vm11, %v1094_v31, 0.0  ;;  %v1861_v31 = vld [vmem:[#allocation16] sm:$0x3] }
 0xc86   :  { %1099 = vadd.xlane.f32.xlu1 %v1098_v52  ;;  %v1811_v63 = vpop.xlane.xlu0 %1810  ;;  %v1914_v52 = vsub.s32 1, %v6533_v21 }
 0xc87   :  { %v1815_v24 = vmul.f32 0.03125, %v1811_v63 }
 0xc89   :  { %v1817_v60 = vsub.f32 %v1807_v46, %v1815_v24 }
 0xc8b   :  { %v1819_v53 = vmul.f32 %v1817_v60, %v1817_v60 }
 0xc8d   :  { %v1821_v7 = vsel %vm319_vm10, %v1819_v53, 0.0 }
 0xc8e   :  { %1822 = vadd.xlane.f32.xlu0 %v1821_v7 }
 0xc94   :  { %v1814_v42 = vpop.xlane.xlu1 %1813 }
 0xc95   :  { %v1816_v49 = vmul.f32 0.03125, %v1814_v42 }
 0xc97   :  { %v1818_v0 = vsub.f32 %v1808_v3, %v1816_v49 }
 0xc99   :  { %v1820_v4 = vmul.f32 %v1818_v0, %v1818_v0 }
 0xc9b   :  { %v1824_v16 = vsel %vm323_vm11, %v1820_v4, 0.0 }
 0xc9c   :  { %1825 = vadd.xlane.f32.xlu1 %v1824_v16 }
 0xcb1   :  { %v1097_v47 = vpop.xlane.xlu0 %1096 }
 0xcb2   :  { %v1101_v13 = vmul.f32 0.03125, %v1097_v47 }
 0xcb4   :  { %v1103_v58 = vadd.f32 1e-05, %v1101_v13 }
 0xcb6   :  { %5493 = vrsqrt.f32 %v1103_v58 }
 0xcc0   :  { %v5494_v32 = vpop.eup %5493 }
 0xcc1   :  { %v1107_v34 = vmul.f32 %v5494_v32, %v1091_v5 }
 0xcc3   :  { %v1115_v55 = vmul.f32 %v4892_v9, %v1107_v34 }
 0xcc5   :  { %v1123_v6 = vadd.f32 %v4893_v35, %v1115_v55 }
 0xcc7   :  { %1125 = vst.msk [vmem:[#allocation2] sm:$0xff] %vm319_vm10, %v1123_v6 }
 0xcce   :  { %v7031_v3 = vld [vmem:[#allocation2] sm:$0xff] }
 0xd13   :  { %v1100_v36 = vpop.xlane.xlu1 %1099 }
 0xd14   :  { %v1102_v17 = vmul.f32 0.03125, %v1100_v36 }
 0xd16   :  { %v1104_v29 = vadd.f32 1e-05, %v1102_v17 }
 0xd18   :  { %5495 = vrsqrt.f32 %v1104_v29 }
 0xd1b   :  { %v1823_v14 = vpop.xlane.xlu0 %1822 }
 0xd1c   :  { %v1827_v39 = vmul.f32 0.03125, %v1823_v14 }
 0xd1e   :  { %v1829_v38 = vadd.f32 1e-05, %v1827_v39 }
 0xd20   :  { %5497 = vrsqrt.f32 %v1829_v38 }
 0xd22   :  { %v5496_v54 = vpop.eup %5495 }
 0xd23   :  { %v1108_v56 = vmul.f32 %v5496_v54, %v1092_v48  ;;  %v1910_v48 = vsub.s32 0, %v6533_v21 }
 0xd25   :  { %v1116_v57 = vmul.f32 %v4892_v9, %v1108_v56  ;;  %v1911_v63 = vrot.slane %v1861_v31, %v1910_v48 }
 0xd27   :  { %v1124_v41 = vadd.f32 %v4893_v35, %v1116_v57 }
 0xd29   :  { %1126 = vst.msk [vmem:[#allocation2 + $0x8] sm:$0x3f] %vm323_vm11, %v1124_v41  ;;  %v1826_v46 = vpop.xlane.xlu1 %1825 }
 0xd2a   :  { %v5498_v33 = vpop.eup %5497  ;;  %v1828_v20 = vmul.f32 0.03125, %v1826_v46 }
 0xd2b   :  { %v1833_v11 = vmul.f32 %v5498_v33, %v1817_v60  ;;  %v1915_v60 = vrot.slane %v1861_v31, %v1914_v52 }
 0xd2c   :  { %v1830_v59 = vadd.f32 1e-05, %v1828_v20 }
 0xd2d   :  { %v1835_v22 = vmul.f32 %v4892_v9, %v1833_v11 }
 0xd2e   :  { %5499 = vrsqrt.f32 %v1830_v59 }
 0xd2f   :  { %v1837_v18 = vadd.f32 %v4893_v35, %v1835_v22 }
 0xd31   :  { %1839 = vst.msk [vmem:[#allocation2 + $0xe] sm:$0xff] %vm319_vm10, %v1837_v18 }
 0xd38   :  { %v5500_v61 = vpop.eup %5499  ;;  %v7033_v10 = vld [vmem:[#allocation2 + $0x8] sm:$0xff] }
 0xd39   :  { %v1834_v27 = vmul.f32 %v5500_v61, %v1818_v0  ;;  %v1901_v12 = vpack.c.bf16 %v7033_v10, %v7031_v3 }
 0xd3b   :  { %v1836_v5 = vmul.f32 %v4892_v9, %v1834_v27  ;;  %4902 = vmatmul.mubr.msk.bf16.vlgmr.msra.gmra.mrb[24].mxu1 %vm319_vm10, %v1901_v12 }
 0xd3c   :  { %1966 = vmatprep.mubr.bf16.mxu1 %v6083_v2 }
 0xd3d   :  { %v1838_v8 = vadd.f32 %v4893_v35, %v1836_v5 }
 0xd3f   :  { %1840 = vst.msk [vmem:[#allocation2 + $0x16] sm:$0x3f] %vm323_vm11, %v1838_v8 }
 0xd46   :  { %v7040_v19 = vld [vmem:[#allocation2 + $0x10] sm:$0xff]  ;;  %v7042_v40 = vld [vmem:[#allocation2 + $0x18] sm:$0xf] }
 0xd47   :  { %v1902_v44 = vpack.c.bf16 %v7042_v40, %v7040_v19 }
 0xd49   :  { %4903 = vmatmul.mubr.msk.bf16.gmra.mrb[28].mxu1 %vm319_vm10, %v1902_v44 }
 0xd4a   :  { %5148 = vmatprep.mubr.msk.bf16.mxu1 %vm6082_vm0, %v6081_v1 }
 0xe0e   :  { %v1958_v24 = vpop.f32.mrb[24].mxu1 }
 0xe0f   :  { %v1960_v53 = vpop.f32.mrb[25].mxu1  ;;  %v1959_v42 = vadd.f32 %v1958_v24, %v1911_v63 }
 0xe10   :  { %v1962_v7 = vpop.f32.mrb[26].mxu1  ;;  %v1961_v4 = vadd.f32 %v1960_v53, %v1915_v60 }
 0xe11   :  { %v1963_v49 = vadd.f32 %v1962_v7, %v1911_v63  ;;  %v1964_v0 = vpop.f32.mrb[27].mxu1 }
 0xe12   :  { %v1965_v16 = vadd.f32 %v1964_v0, %v1915_v60 }
 0xe13   :  { %v7055_v47 = vpack.c.bf16 %v1963_v49, %v1959_v42 }
 0xe14   :  { %v7057_v13 = vpack.c.bf16 %v1965_v16, %v1961_v4 }
 0xe15   :  { %2113 = vrot.lane.b32.xlu1 %v7055_v47, %s6089_s15  ;;  %1979 = vrot.lane.b32.xlu0 %v7055_v47, %s6087_s2 }
 0xe19   :  { %2111 = vrot.lane.b32.xlu1 %v7055_v47, %s6090_s22  ;;  %2238 = vrot.lane.b32.xlu0 %v7055_v47, %s6091_s1 }
 0xe1c   :  { %v1968_v15 = vpop.f32.mrb[28].mxu1 }
 0xe1d   :  { %v1969_v25 = vadd.f32 %v1968_v15, %v1911_v63  ;;  %v1970_v51 = vpop.f32.mrb[29].mxu1  ;;  %2236 = vrot.lane.b32.xlu1 %v7055_v47, %s6086_s7  ;;  %2362 = vrot.lane.b32.xlu0 %v7055_v47, %s6092_s10 }
 0xe1e   :  { %v1971_v43 = vadd.f32 %v1970_v51, %v1915_v60  ;;  %v1972_v26 = vpop.f32.mrb[30].mxu1 }
 0xe1f   :  { %v2532_v58 = vpack.c.bf16 %v1969_v25, %v1963_v49  ;;  %v1973_v62 = vadd.f32 %v1972_v26, %v1911_v63  ;;  %v1974_v28 = vpop.f32.mrb[31].mxu1 }
 0xe20   :  { %v2862_v37 = vpack.c.bf16 %v1971_v43, %v1965_v16  ;;  %v1975_v23 = vadd.f32 %v1974_v28, %v1915_v60 }
 0xe21   :  { %v2533_v45 = vpack.c.bf16 %v1973_v62, %v1973_v62  ;;  %2360 = vrot.lane.b32.xlu1 %v7055_v47, %s6093_s18  ;;  %v2537_v30 = vrot.slane %v2532_v58, 3 }
 0xe22   :  { %v2863_v50 = vpack.c.bf16 %v1975_v23, %v1975_v23  ;;  %v2866_v9 = vrot.slane %v2862_v37, 3 }
 0xe23   :  { %v2538_v32 = vrot.slane %v2533_v45, 3 }
 0xe24   :  { %v2867_v34 = vrot.slane %v2863_v50, 3 }
 0xe25   :  { %v7074_v35 = vsel %vm955_vm13, %v2537_v30, %v2538_v32 }
 0xe26   :  { %2665 = vrot.lane.b32.xlu1 %v7074_v35, %s6089_s15  ;;  %2540 = vrot.lane.b32.xlu0 %v7074_v35, %s6087_s2  ;;  %v7081_v55 = vsel %vm955_vm13, %v2866_v9, %v2867_v34 }
 0xe2a   :  { %2790 = vrot.lane.b32.xlu1 %v7074_v35, %s6091_s1  ;;  %2663 = vrot.lane.b32.xlu0 %v7074_v35, %s6090_s22 }
 0xe2e   :  { %2920 = vrot.lane.b32.xlu1 %v7074_v35, %s6092_s10  ;;  %2788 = vrot.lane.b32.xlu0 %v7074_v35, %s6086_s7 }
 0xe32   :  { %2918 = vrot.lane.b32.xlu0 %v7074_v35, %s6093_s18 }
 0xe87   :  { %v1980_v6 = vpop.permute.xlu0 %1979  ;;  %v2114_v17 = vpop.permute.xlu1 %2113 }
 0xe88   :  { %v1986_v36 = vsel %vm1981_vm1, %v1980_v6, 0  ;;  %v2119_v29 = vsel %vm1981_vm1, %v2114_v17, 0 }
 0xe89   :  { %5141 = vmatpush3.bf16.xpose.msra.mxu0 %v1986_v36 }
 0xe8a   :  { %5152 = vmatprep.subr.bf16.mxu0 %v6081_v1 }
 0xe8b   :  { %v2239_v14 = vpop.permute.xlu0 %2238  ;;  %v2112_v39 = vpop.permute.xlu1 %2111 }
 0xe8c   :  { %v2244_v38 = vsel %vm1981_vm1, %v2239_v14, 0 }
 0xe8f   :  { %v2363_v54 = vpop.permute.xlu0 %2362  ;;  %v2237_v56 = vpop.permute.xlu1 %2236 }
 0xe90   :  { %5143 = vmatmul.mubr.msk.bf16.vlgmr.msra.gmra.mrb[32].mxu0 %vm1981_vm1, %v7055_v47  ;;  %v2368_v57 = vsel %vm1981_vm1, %v2363_v54, 0 }
 0xe91   :  { %5153 = vmatpush3.bf16.xpose.msra.mxu0 %v2119_v29  ;;  %5154 = vmatprep.mubr.msk.bf16.mxu0 %vm6082_vm0, %v6081_v1 }
 0xe92   :  { %5164 = vmatprep.subr.bf16.mxu0 %v6081_v1 }
 0xe93   :  { %v2361_v46 = vpop.permute.xlu1 %2360 }
 0xe98   :  { %5155 = vmatmul.mubr.msk.bf16.vlgmr.msra.gmra.mrb[36].mxu0 %vm1981_vm1, %v2112_v39  ;;  %v2541_v41 = vpop.permute.xlu0 %2540  ;;  %v2666_v20 = vpop.permute.xlu1 %2665 }
 0xe99   :  { %5165 = vmatpush3.bf16.xpose.msra.mxu0 %v2244_v38  ;;  %5166 = vmatprep.mubr.msk.bf16.mxu0 %vm6082_vm0, %v6081_v1  ;;  %v2546_v33 = vsel %vm1981_vm1, %v2541_v41, 0  ;;  %v2671_v11 = vsel %vm1981_vm1, %v2666_v20, 0 }
 0xe9a   :  { %5176 = vmatprep.subr.bf16.mxu0 %v6081_v1 }
 0xe9c   :  { %v2791_v59 = vpop.permute.xlu1 %2790  ;;  %v2664_v22 = vpop.permute.xlu0 %2663 }
 0xe9d   :  { %v2796_v18 = vsel %vm1981_vm1, %v2791_v59, 0 }
 0xea0   :  { %5167 = vmatmul.mubr.msk.bf16.vlgmr.msra.gmra.mrb[40].mxu0 %vm1981_vm1, %v2237_v56  ;;  %v2921_v61 = vpop.permute.xlu1 %2920  ;;  %v2789_v27 = vpop.permute.xlu0 %2788 }
 0xea1   :  { %5177 = vmatpush3.bf16.xpose.msra.mxu0 %v2368_v57  ;;  %5178 = vmatprep.mubr.msk.bf16.mxu0 %vm6082_vm0, %v6081_v1  ;;  %v2926_v12 = vsel %vm1981_vm1, %v2921_v61, 0 }
 0xea2   :  { %5188 = vmatprep.subr.bf16.mxu0 %v6081_v1 }
 0xea4   :  { %v2919_v5 = vpop.permute.xlu0 %2918 }
 0xea8   :  { %5179 = vmatmul.mubr.msk.bf16.vlgmr.msra.gmra.mrb[44].mxu0 %vm1981_vm1, %v2361_v46 }
 0xea9   :  { %5189 = vmatpush3.bf16.xpose.msra.mxu0 %v2546_v33  ;;  %5190 = vmatprep.mubr.msk.bf16.mxu0 %vm6082_vm0, %v6081_v1 }
 0xeaa   :  { %5200 = vmatprep.subr.bf16.mxu0 %v6081_v1 }
 0xeb0   :  { %5191 = vmatmul.mubr.msk.bf16.vlgmr.msra.gmra.mrb[48].mxu0 %vm1981_vm1, %v7074_v35 }
 0xeb1   :  { %5201 = vmatpush3.bf16.xpose.msra.mxu0 %v2671_v11  ;;  %5202 = vmatprep.mubr.msk.bf16.mxu0 %vm6082_vm0, %v6081_v1 }
 0xeb2   :  { %5212 = vmatprep.subr.bf16.mxu0 %v6081_v1 }
 0xeb8   :  { %5203 = vmatmul.mubr.msk.bf16.vlgmr.msra.gmra.mrb[52].mxu0 %vm1981_vm1, %v2664_v22 }
 0xeb9   :  { %5213 = vmatpush3.bf16.xpose.msra.mxu0 %v2796_v18  ;;  %5214 = vmatprep.mubr.msk.bf16.mxu0 %vm6082_vm0, %v6081_v1 }
 0xeba   :  { %5224 = vmatprep.subr.bf16.mxu0 %v6081_v1 }
 0xec0   :  { %5215 = vmatmul.mubr.msk.bf16.vlgmr.msra.gmra.mrb[56].mxu0 %vm1981_vm1, %v2789_v27 }
 0xec1   :  { %5225 = vmatpush3.bf16.xpose.msra.mxu0 %v2926_v12  ;;  %5226 = vmatprep.mubr.msk.bf16.mxu0 %vm6082_vm0, %v6081_v1 }
 0xec8   :  { %5227 = vmatmul.mubr.msk.bf16.vlgmr.msra.gmra.mrb[60].mxu0 %vm1981_vm1, %v2919_v5 }
 0xf63   :  { %v7132_v8 = vpop.f32.mrb[32].mxu0 }
 0xf64   :  { %v5144_v44 = vpop.f32.mrb[33].mxu0  ;;  %v2030_v31 = vsel %vm2029_vm3, %v7132_v8, -inf }
 0xf65   :  { %2031 = vmax.xlane.f32.xlu1 %v2030_v31  ;;  %v7136_v63 = vpop.f32.mrb[34].mxu0 }
 0xf66   :  { %v5145_v24 = vpop.f32.mrb[35].mxu0  ;;  %v2034_v60 = vsel %vm2033_vm4, %v7136_v63, -inf }
 0xf67   :  { %2035 = vmax.xlane.f32.xlu0 %v2034_v60 }
 0xf6b   :  { %v7140_v53 = vpop.f32.mrb[36].mxu0 }
 0xf6c   :  { %v5156_v7 = vpop.f32.mrb[37].mxu0  ;;  %v2162_v42 = vsel %vm2029_vm3, %v7140_v53, -inf }
 0xf6d   :  { %2163 = vmax.xlane.f32.xlu0 %v2162_v42  ;;  %v7144_v49 = vpop.f32.mrb[38].mxu0 }
 0xf6e   :  { %v5157_v0 = vpop.f32.mrb[39].mxu0  ;;  %v2165_v4 = vsel %vm2033_vm4, %v7144_v49, -inf }
 0xf6f   :  { %2166 = vmax.xlane.f32.xlu1 %v2165_v4 }
 0xf73   :  { %v7148_v16 = vpop.f32.mrb[40].mxu0 }
 0xf74   :  { %v5168_v15 = vpop.f32.mrb[41].mxu0  ;;  %v2287_v25 = vsel %vm2029_vm3, %v7148_v16, -inf }
 0xf75   :  { %2288 = vmax.xlane.f32.xlu0 %v2287_v25  ;;  %v7152_v51 = vpop.f32.mrb[42].mxu0 }
 0xf76   :  { %v5169_v43 = vpop.f32.mrb[43].mxu0  ;;  %v2290_v26 = vsel %vm2033_vm4, %v7152_v51, -inf }
 0xf77   :  { %2291 = vmax.xlane.f32.xlu1 %v2290_v26 }
 0xf7b   :  { %v7156_v58 = vpop.f32.mrb[44].mxu0 }
 0xf7c   :  { %v5180_v62 = vpop.f32.mrb[45].mxu0  ;;  %v2411_v28 = vsel %vm2029_vm3, %v7156_v58, -inf }
 0xf7d   :  { %2412 = vmax.xlane.f32.xlu0 %v2411_v28  ;;  %v7160_v37 = vpop.f32.mrb[46].mxu0 }
 0xf7e   :  { %v5181_v23 = vpop.f32.mrb[47].mxu0  ;;  %v2414_v45 = vsel %vm2033_vm4, %v7160_v37, -inf }
 0xf7f   :  { %2415 = vmax.xlane.f32.xlu1 %v2414_v45 }
 0xf83   :  { %v7164_v50 = vpop.f32.mrb[48].mxu0 }
 0xf84   :  { %v5192_v30 = vpop.f32.mrb[49].mxu0  ;;  %v2589_v32 = vsel %vm2029_vm3, %v7164_v50, -inf }
 0xf85   :  { %2590 = vmax.xlane.f32.xlu0 %v2589_v32  ;;  %v7168_v9 = vpop.f32.mrb[50].mxu0 }
 0xf86   :  { %v5193_v34 = vpop.f32.mrb[51].mxu0  ;;  %v2592_v6 = vsel %vm2033_vm4, %v7168_v9, -inf }
 0xf87   :  { %2593 = vmax.xlane.f32.xlu1 %v2592_v6 }
 0xf8b   :  { %v7172_v36 = vpop.f32.mrb[52].mxu0 }
 0xf8c   :  { %v5204_v17 = vpop.f32.mrb[53].mxu0  ;;  %v2714_v29 = vsel %vm2029_vm3, %v7172_v36, -inf }
 0xf8d   :  { %2715 = vmax.xlane.f32.xlu0 %v2714_v29  ;;  %v7176_v14 = vpop.f32.mrb[54].mxu0 }
 0xf8e   :  { %v5205_v39 = vpop.f32.mrb[55].mxu0  ;;  %v2717_v38 = vsel %vm2033_vm4, %v7176_v14, -inf }
 0xf8f   :  { %2718 = vmax.xlane.f32.xlu1 %v2717_v38 }
 0xf93   :  { %v7180_v54 = vpop.f32.mrb[56].mxu0 }
 0xf94   :  { %v5216_v56 = vpop.f32.mrb[57].mxu0  ;;  %v2839_v59 = vsel %vm2029_vm3, %v7180_v54, -inf }
 0xf95   :  { %v7182_v57 = vpop.f32.mrb[58].mxu0 }
 0xf96   :  { %v5217_v41 = vpop.f32.mrb[59].mxu0  ;;  %v2842_v22 = vsel %vm2033_vm4, %v7182_v57, -inf }
 0xf9b   :  { %v7184_v46 = vpop.f32.mrb[60].mxu0 }
 0xf9c   :  { %v5228_v33 = vpop.f32.mrb[61].mxu0  ;;  %v2969_v18 = vsel %vm2029_vm3, %v7184_v46, -inf }
 0xf9d   :  { %v7186_v20 = vpop.f32.mrb[62].mxu0 }
 0xf9e   :  { %v5229_v11 = vpop.f32.mrb[63].mxu0  ;;  %v2972_v61 = vsel %vm2033_vm4, %v7186_v20, -inf }
 0xfa0   :  { %2185 = vrot.lane.b32.xlu1 %v7055_v47, %s6065_s12 }
 0xfa3   :  { %2054 = vrot.lane.b32.xlu0 %v7055_v47, %s6088_s13 }
 0xfc2   :  { %2840 = vmax.xlane.f32.xlu0 %v2839_v59 }
 0xfc4   :  { %2843 = vmax.xlane.f32.xlu1 %v2842_v22 }
 0xfc6   :  { %2970 = vmax.xlane.f32.xlu0 %v2969_v18 }
 0xfc8   :  { %2973 = vmax.xlane.f32.xlu1 %v2972_v61 }
 0xff2   :  { %v2032_v27 = vpop.xlane.xlu1 %2031 }
 0xff3   :  { %v2037_v12 = vsub.f32 %v7132_v8, %v2032_v27 }
 0xff4   :  { %v2036_v47 = vpop.xlane.xlu0 %2035 }
 0xff5   :  { %v2039_v5 = vmul.f32 1.442695, %v2037_v12  ;;  %v2038_v44 = vsub.f32 %v7136_v63, %v2036_v47 }
 0xff7   :  { %5501 = vpow2.f32 %v2039_v5  ;;  %v2041_v31 = vmul.f32 1.442695, %v2038_v44 }
 0xff9   :  { %5503 = vpow2.f32 %v2041_v31 }
 0xffa   :  { %v2164_v24 = vpop.xlane.xlu0 %2163 }
 0xffb   :  { %v2168_v60 = vsub.f32 %v7140_v53, %v2164_v24 }
 0xffc   :  { %v2167_v7 = vpop.xlane.xlu1 %2166 }
 0xffd   :  { %v2170_v42 = vmul.f32 1.442695, %v2168_v60  ;;  %v2169_v0 = vsub.f32 %v7144_v49, %v2167_v7 }
 0xfff   :  { %5505 = vpow2.f32 %v2170_v42  ;;  %v2172_v4 = vmul.f32 1.442695, %v2169_v0 }
0x1001   :  { %v7204_v15 = vpop.eup %5501  ;;  %5507 = vpow2.f32 %v2172_v4 }
0x1002   :  { %v2289_v8 = vpop.xlane.xlu0 %2288  ;;  %v2043_v25 = vsel %vm2029_vm3, %v7204_v15, 0.0 }
0x1003   :  { %v7208_v63 = vpop.eup %5503  ;;  %v2293_v43 = vsub.f32 %v7148_v16, %v2289_v8  ;;  %2044 = vadd.xlane.f32.xlu0 %v2043_v25 }
0x1004   :  { %v2292_v26 = vpop.xlane.xlu1 %2291  ;;  %v2046_v53 = vsel %vm2033_vm4, %v7208_v63, 0.0 }
0x1005   :  { %v2295_v62 = vmul.f32 1.442695, %v2293_v43  ;;  %v2294_v49 = vsub.f32 %v7152_v51, %v2292_v26  ;;  %2047 = vadd.xlane.f32.xlu1 %v2046_v53 }
0x1007   :  { %5509 = vpow2.f32 %v2295_v62  ;;  %v2297_v28 = vmul.f32 1.442695, %v2294_v49 }
0x1009   :  { %v7214_v23 = vpop.eup %5505  ;;  %5511 = vpow2.f32 %v2297_v28 }
0x100a   :  { %v2413_v45 = vpop.xlane.xlu0 %2412  ;;  %v2174_v30 = vsel %vm2029_vm3, %v7214_v23, 0.0 }
0x100b   :  { %v7218_v32 = vpop.eup %5507  ;;  %v2417_v16 = vsub.f32 %v7156_v58, %v2413_v45  ;;  %2175 = vadd.xlane.f32.xlu0 %v2174_v30 }
0x100c   :  { %v2416_v34 = vpop.xlane.xlu1 %2415  ;;  %v2177_v6 = vsel %vm2033_vm4, %v7218_v32, 0.0 }
0x100d   :  { %v2419_v51 = vmul.f32 1.442695, %v2417_v16  ;;  %v2418_v17 = vsub.f32 %v7160_v37, %v2416_v34  ;;  %2178 = vadd.xlane.f32.xlu1 %v2177_v6 }
0x100f   :  { %5513 = vpow2.f32 %v2419_v51  ;;  %v2421_v29 = vmul.f32 1.442695, %v2418_v17 }
0x1011   :  { %v7224_v39 = vpop.eup %5509  ;;  %5515 = vpow2.f32 %v2421_v29 }
0x1012   :  { %v2591_v38 = vpop.xlane.xlu0 %2590  ;;  %v2299_v56 = vsel %vm2029_vm3, %v7224_v39, 0.0 }
0x1013   :  { %v7228_v41 = vpop.eup %5511  ;;  %v2595_v58 = vsub.f32 %v7164_v50, %v2591_v38  ;;  %2300 = vadd.xlane.f32.xlu0 %v2299_v56 }
0x1014   :  { %v2594_v33 = vpop.xlane.xlu1 %2593  ;;  %v2302_v11 = vsel %vm2033_vm4, %v7228_v41, 0.0 }
0x1015   :  { %v2597_v37 = vmul.f32 1.442695, %v2595_v58  ;;  %v2596_v59 = vsub.f32 %v7168_v9, %v2594_v33  ;;  %2303 = vadd.xlane.f32.xlu1 %v2302_v11 }
0x1017   :  { %5517 = vpow2.f32 %v2597_v37  ;;  %v2599_v22 = vmul.f32 1.442695, %v2596_v59 }
0x1019   :  { %v7234_v18 = vpop.eup %5513  ;;  %5519 = vpow2.f32 %v2599_v22 }
0x101a   :  { %v2716_v61 = vpop.xlane.xlu0 %2715  ;;  %v2423_v27 = vsel %vm2029_vm3, %v7234_v18, 0.0 }
0x101b   :  { %v7238_v12 = vpop.eup %5515  ;;  %2424 = vadd.xlane.f32.xlu0 %v2423_v27  ;;  %v2720_v4 = vsub.f32 %v7172_v36, %v2716_v61 }
0x101c   :  { %v2719_v50 = vpop.xlane.xlu1 %2718  ;;  %v2426_v47 = vsel %vm2033_vm4, %v7238_v12, 0.0 }
0x101d   :  { %v2721_v5 = vsub.f32 %v7176_v14, %v2719_v50  ;;  %2427 = vadd.xlane.f32.xlu1 %v2426_v47  ;;  %v2722_v8 = vmul.f32 1.442695, %v2720_v4  ;;  %v2315_v4 = vsel %vm345_vm6, %v7057_v13, 0 }
0x101e   :  { %v2055_v9 = vpop.permute.xlu0 %2054 }
0x101f   :  { %v2724_v44 = vmul.f32 1.442695, %v2721_v5  ;;  %v2060_v31 = vsel %vm345_vm6, %v2055_v9, 0 }
0x1020   :  { %5147 = vmatpush3.bf16.msra.mxu1 %v2060_v31  ;;  %v2186_v43 = vpop.permute.xlu1 %2185 }
0x1021   :  { %v7244_v24 = vpop.eup %5517  ;;  %5521 = vpow2.f32 %v2724_v44  ;;  %5158 = vmatprep.subr.bf16.mxu1 %v6081_v1 }
0x1022   :  { %v2601_v60 = vsel %vm2029_vm3, %v7244_v24, 0.0  ;;  %5523 = vpow2.f32 %v2722_v8 }
0x1023   :  { %v7249_v7 = vpop.eup %5519  ;;  %2602 = vadd.xlane.f32.xlu1 %v2601_v60 }
0x1024   :  { %v2604_v14 = vsel %vm2033_vm4, %v7249_v7, 0.0 }
0x1027   :  { %2605 = vadd.xlane.f32.xlu1 %v2604_v14 }
0x102b   :  { %v7253_v42 = vpop.eup %5521 }
0x102c   :  { %v2729_v0 = vsel %vm2033_vm4, %v7253_v42, 0.0  ;;  %v7262_v25 = vpop.eup %5523 }
0x102d   :  { %2730 = vadd.xlane.f32.xlu1 %v2729_v0  ;;  %v2726_v53 = vsel %vm2029_vm3, %v7262_v25, 0.0 }
0x1031   :  { %2435 = vrot.lane.b32.xlu0 %v7057_v13, %s6087_s2 }
0x103e   :  { %2612 = vrot.lane.b32.xlu1 %v7074_v35, %s6088_s13 }
0x104f   :  { %v2841_v26 = vpop.xlane.xlu0 %2840 }
0x1050   :  { %v2845_v62 = vsub.f32 %v7180_v54, %v2841_v26  ;;  %2727 = vadd.xlane.f32.xlu0 %v2726_v53 }
0x1051   :  { %v2844_v49 = vpop.xlane.xlu1 %2843 }
0x1052   :  { %v2847_v28 = vmul.f32 1.442695, %v2845_v62  ;;  %v2846_v45 = vsub.f32 %v7182_v57, %v2844_v49 }
0x1053   :  { %v2971_v36 = vpop.xlane.xlu0 %2970 }
0x1054   :  { %5525 = vpow2.f32 %v2847_v28  ;;  %v2849_v30 = vmul.f32 1.442695, %v2846_v45  ;;  %v2975_v16 = vsub.f32 %v7184_v46, %v2971_v36 }
0x1055   :  { %v2974_v34 = vpop.xlane.xlu1 %2973 }
0x1056   :  { %v2977_v6 = vmul.f32 1.442695, %v2975_v16  ;;  %v2976_v51 = vsub.f32 %v7186_v20, %v2974_v34  ;;  %5527 = vpow2.f32 %v2849_v30 }
0x1058   :  { %5529 = vpow2.f32 %v2977_v6  ;;  %v2979_v17 = vmul.f32 1.442695, %v2976_v51 }
0x105a   :  { %5531 = vpow2.f32 %v2979_v17 }
0x105e   :  { %v7270_v29 = vpop.eup %5525 }
0x105f   :  { %v2851_v57 = vsel %vm2029_vm3, %v7270_v29, 0.0 }
0x1060   :  { %v7272_v54 = vpop.eup %5527 }
0x1061   :  { %v2854_v20 = vsel %vm2033_vm4, %v7272_v54, 0.0 }
0x1062   :  { %v7276_v38 = vpop.eup %5529  ;;  %2852 = vadd.xlane.f32.xlu1 %v2851_v57 }
0x1063   :  { %v2981_v46 = vsel %vm2029_vm3, %v7276_v38, 0.0 }
0x1064   :  { %2982 = vadd.xlane.f32.xlu0 %v2981_v46  ;;  %v7282_v56 = vpop.eup %5531 }
0x1065   :  { %v2984_v58 = vsel %vm2033_vm4, %v7282_v56, 0.0 }
0x1066   :  { %2855 = vadd.xlane.f32.xlu1 %v2854_v20 }
0x106a   :  { %2985 = vadd.xlane.f32.xlu1 %v2984_v58 }
0x107a   :  { %2737 = vrot.lane.b32.xlu0 %v7074_v35, %s6065_s12  ;;  %v2191_v35 = vsel %vm345_vm6, %v2186_v43, 0 }
0x107b   :  { %2992 = vrot.lane.b32.xlu1 %v7081_v55, %s6087_s2 }
0x1090   :  { %v2045_v33 = vpop.xlane.xlu0 %2044 }
0x1091   :  { %5533 = vrcp.f32 %v2045_v33 }
0x1092   :  { %v2048_v11 = vpop.xlane.xlu1 %2047 }
0x1093   :  { %5535 = vrcp.f32 %v2048_v11 }
0x1098   :  { %v2176_v37 = vpop.xlane.xlu0 %2175 }
0x1099   :  { %5537 = vrcp.f32 %v2176_v37 }
0x109a   :  { %v2179_v59 = vpop.xlane.xlu1 %2178 }
0x109b   :  { %v5534_v22 = vpop.eup %5533  ;;  %5539 = vrcp.f32 %v2179_v59 }
0x109c   :  { %v2051_v27 = vmul.f32 %v5534_v22, %v7204_v15 }
0x109d   :  { %v5536_v61 = vpop.eup %5535 }
0x109e   :  { %v2052_v50 = vmul.f32 %v5536_v61, %v7208_v63  ;;  %v2873_v61 = vsel %vm345_vm6, %v7081_v55, 0 }
0x10a0   :  { %v2053_v47 = vpack.c.bf16 %v2052_v50, %v2051_v27  ;;  %v2301_v5 = vpop.xlane.xlu0 %2300 }
0x10a1   :  { %5541 = vrcp.f32 %v2301_v5 }
0x10a2   :  { %v2304_v9 = vpop.xlane.xlu1 %2303  ;;  %5149 = vmatmul.mubr.msk.bf16.vlgmr.msra.gmra.mrb[32].mxu1 %vm2029_vm3, %v2053_v47 }
0x10a3   :  { %v5538_v44 = vpop.eup %5537  ;;  %5543 = vrcp.f32 %v2304_v9  ;;  %5159 = vmatpush3.bf16.msra.mxu1 %v2191_v35  ;;  %5160 = vmatprep.mubr.msk.bf16.mxu1 %vm6082_vm0, %v6081_v1 }
0x10a4   :  { %5170 = vmatprep.subr.bf16.mxu1 %v6081_v1  ;;  %v2182_v15 = vmul.f32 %v5538_v44, %v7214_v23 }
0x10a5   :  { %v5540_v31 = vpop.eup %5539 }
0x10a6   :  { %v2183_v63 = vmul.f32 %v5540_v31, %v7218_v32 }
0x10a8   :  { %v2425_v60 = vpop.xlane.xlu0 %2424  ;;  %v2184_v14 = vpack.c.bf16 %v2183_v63, %v2182_v15 }
0x10a9   :  { %5545 = vrcp.f32 %v2425_v60 }
0x10aa   :  { %v2428_v0 = vpop.xlane.xlu1 %2427  ;;  %5161 = vmatmul.mubr.msk.bf16.vlgmr.msra.gmra.mrb[36].mxu1 %vm2029_vm3, %v2184_v14 }
0x10ab   :  { %v5542_v8 = vpop.eup %5541  ;;  %5547 = vrcp.f32 %v2428_v0  ;;  %5171 = vmatpush3.bf16.msra.mxu1 %v2315_v4  ;;  %5172 = vmatprep.mubr.msk.bf16.mxu1 %vm6082_vm0, %v6081_v1  ;;  %v4906_v0 = vld [vmem:[#allocation18] ss:$0 sm:$0xff] }
0x10ac   :  { %5182 = vmatprep.subr.bf16.mxu1 %v6081_v1  ;;  %v2307_v32 = vmul.f32 %v5542_v8, %v7224_v39  ;;  %v2436_v26 = vpop.permute.xlu0 %2435 }
0x10ad   :  { %v5544_v23 = vpop.eup %5543  ;;  %v2441_v49 = vsel %vm345_vm6, %v2436_v26, 0 }
0x10ae   :  { %v2308_v43 = vmul.f32 %v5544_v23, %v7228_v41 }
0x10b0   :  { %v2603_v53 = vpop.xlane.xlu1 %2602  ;;  %v2309_v62 = vpack.c.bf16 %v2308_v43, %v2307_v32 }
0x10b1   :  { %5549 = vrcp.f32 %v2603_v53 }
0x10b2   :  { %5173 = vmatmul.mubr.msk.bf16.vlgmr.msra.gmra.mrb[40].mxu1 %vm2029_vm3, %v2309_v62 }
0x10b3   :  { %v5546_v13 = vpop.eup %5545  ;;  %5183 = vmatpush3.bf16.msra.mxu1 %v2441_v49  ;;  %5184 = vmatprep.mubr.msk.bf16.mxu1 %vm6082_vm0, %v6081_v1 }
0x10b4   :  { %v2606_v28 = vpop.xlane.xlu1 %2605  ;;  %5194 = vmatprep.subr.bf16.mxu1 %v6081_v1  ;;  %v2431_v39 = vmul.f32 %v5546_v13, %v7234_v18 }
0x10b5   :  { %v5548_v45 = vpop.eup %5547  ;;  %5551 = vrcp.f32 %v2606_v28 }
0x10b6   :  { %v2432_v41 = vmul.f32 %v5548_v45, %v7238_v12 }
0x10b8   :  { %v2433_v36 = vpack.c.bf16 %v2432_v41, %v2431_v39 }
0x10ba   :  { %v2731_v30 = vpop.xlane.xlu1 %2730  ;;  %5185 = vmatmul.mubr.msk.bf16.vlgmr.msra.gmra.mrb[44].mxu1 %vm2029_vm3, %v2433_v36 }
0x10bb   :  { %5196 = vmatprep.mubr.msk.bf16.mxu1 %vm6082_vm0, %v6081_v1  ;;  %v5550_v16 = vpop.eup %5549 }
0x10bc   :  { %v2609_v17 = vmul.f32 %v5550_v16, %v7244_v24 }
0x10be   :  { %v2613_v34 = vpop.permute.xlu1 %2612 }
0x10bf   :  { %v5552_v6 = vpop.eup %5551  ;;  %v2618_v51 = vsel %vm345_vm6, %v2613_v34, 0 }
0x10c0   :  { %v2610_v57 = vmul.f32 %v5552_v6, %v7249_v7  ;;  %5195 = vmatpush3.bf16.msra.mxu1 %v2618_v51 }
0x10c1   :  { %5206 = vmatprep.subr.bf16.mxu1 %v6081_v1 }
0x10c2   :  { %v2611_v18 = vpack.c.bf16 %v2610_v57, %v2609_v17 }
0x10c4   :  { %5197 = vmatmul.mubr.msk.bf16.vlgmr.msra.gmra.mrb[48].mxu1 %vm2029_vm3, %v2611_v18 }
0x10c5   :  { %5208 = vmatprep.mubr.msk.bf16.mxu1 %vm6082_vm0, %v6081_v1 }
0x10dd   :  { %v2728_v12 = vpop.xlane.xlu0 %2727 }
0x10de   :  { %5553 = vrcp.f32 %v2728_v12 }
0x10df   :  { %5555 = vrcp.f32 %v2731_v30 }
0x10e8   :  { %v5554_v20 = vpop.eup %5553 }
0x10e9   :  { %v5556_v33 = vpop.eup %5555  ;;  %v2734_v24 = vmul.f32 %v5554_v20, %v7262_v25 }
0x10ea   :  { %v2735_v37 = vmul.f32 %v5556_v33, %v7253_v42 }
0x10ec   :  { %v2736_v22 = vpack.c.bf16 %v2735_v37, %v2734_v24 }
0x10ef   :  { %v2853_v46 = vpop.xlane.xlu1 %2852 }
0x10f1   :  { %v2983_v58 = vpop.xlane.xlu0 %2982 }
0x10f3   :  { %v2856_v11 = vpop.xlane.xlu1 %2855 }
0x10f4   :  { %5557 = vrcp.f32 %v2856_v11 }
0x10f5   :  { %5559 = vrcp.f32 %v2853_v46  ;;  %v2738_v7 = vpop.permute.xlu0 %2737 }
0x10f6   :  { %v2743_v59 = vsel %vm345_vm6, %v2738_v7, 0 }
0x10f7   :  { %5207 = vmatpush3.bf16.msra.mxu1 %v2743_v59  ;;  %v2986_v25 = vpop.xlane.xlu1 %2985 }
0x10f8   :  { %5218 = vmatprep.subr.bf16.mxu1 %v6081_v1  ;;  %5561 = vrcp.f32 %v2986_v25 }
0x10f9   :  { %5563 = vrcp.f32 %v2983_v58 }
0x10fa   :  { %5209 = vmatmul.mubr.msk.bf16.vlgmr.msra.gmra.mrb[48].mxu1 %vm2029_vm3, %v2736_v22 }
0x10fb   :  { %5219 = vmatpush3.bf16.msra.mxu1 %v2873_v61  ;;  %5220 = vmatprep.mubr.msk.bf16.mxu1 %vm6082_vm0, %v6081_v1  ;;  %v2993_v5 = vpop.permute.xlu1 %2992 }
0x10fc   :  { %5230 = vmatprep.subr.bf16.mxu1 %v6081_v1  ;;  %v2998_v9 = vsel %vm345_vm6, %v2993_v5, 0 }
0x10fe   :  { %v5558_v27 = vpop.eup %5557 }
0x10ff   :  { %v5560_v42 = vpop.eup %5559  ;;  %v2860_v50 = vmul.f32 %v5558_v27, %v7272_v54 }
0x1100   :  { %v2859_v47 = vmul.f32 %v5560_v42, %v7270_v29 }
0x1102   :  { %v2861_v35 = vpack.c.bf16 %v2860_v50, %v2859_v47  ;;  %v5562_v55 = vpop.eup %5561 }
0x1103   :  { %v5564_v44 = vpop.eup %5563  ;;  %v2990_v31 = vmul.f32 %v5562_v55, %v7282_v56 }
0x1104   :  { %v2989_v15 = vmul.f32 %v5564_v44, %v7276_v38 }
0x1106   :  { %5221 = vmatmul.mubr.msk.bf16.vlgmr.msra.gmra.mrb[48].mxu1 %vm2029_vm3, %v2861_v35  ;;  %v2991_v54 = vpack.c.bf16 %v2990_v31, %v2989_v15 }
0x1107   :  { %5231 = vmatpush3.bf16.msra.mxu1 %v2998_v9  ;;  %5232 = vmatprep.mubr.msk.bf16.mxu1 %vm6082_vm0, %v6081_v1 }
0x1112   :  { %5233 = vmatmul.mubr.msk.bf16.vlgmr.msra.gmra.mrb[48].mxu1 %vm2029_vm3, %v2991_v54 }
0x1175   :  { %v2096_v29 = vpop.f32.mrb[32].mxu1 }
0x1176   :  { %v5150_v63 = vpop.f32.mrb[33].mxu1  ;;  %v2109_v4 = vadd.f32 %v4906_v0, %v2096_v29 }
0x1177   :  { %v2099_v60 = vpop.f32.mrb[34].mxu1 }
0x1178   :  { %v5151_v14 = vpop.f32.mrb[35].mxu1  ;;  %v2110_v23 = vadd.f32 %v4906_v0, %v2099_v60 }
0x117d   :  { %v2227_v8 = vpop.f32.mrb[36].mxu1 }
0x117e   :  { %v2234_v32 = vadd.f32 %v2227_v8, %v2109_v4  ;;  %v5162_v43 = vpop.f32.mrb[37].mxu1 }
0x117f   :  { %v2230_v26 = vpop.f32.mrb[38].mxu1 }
0x1180   :  { %v2235_v53 = vadd.f32 %v2230_v26, %v2110_v23  ;;  %v5163_v62 = vpop.f32.mrb[39].mxu1  ;;  %v1869_v26 = vld [vmem:[#allocation21] sm:$0xff] }
0x1185   :  { %v2351_v49 = vpop.f32.mrb[40].mxu1 }
0x1186   :  { %v2358_v56 = vadd.f32 %v2351_v49, %v2234_v32  ;;  %v5174_v13 = vpop.f32.mrb[41].mxu1  ;;  %v1871_v49 = vld [vmem:[#allocation21 + $0x10] sm:$0xff] }
0x1187   :  { %v2354_v38 = vpop.f32.mrb[42].mxu1 }
0x1188   :  { %v2359_v28 = vadd.f32 %v2354_v38, %v2235_v53  ;;  %v5175_v45 = vpop.f32.mrb[43].mxu1  ;;  %v1870_v53 = vld [vmem:[#allocation21 + $0x8] sm:$0xff] }
0x1189   :  { %v3110_v62 = vpack.c.bf16 %v1870_v53, %v1869_v26  ;;  %v1886_v26 = vld [vmem:[%s7866_s21 + $0x38] sm:$0xff] }
0x118b   :  { %5236 = vmatprep.subr.bf16.mxu0 %v3110_v62 }
0x118c   :  { %5237 = vmatpush3.bf16.msra.mxu0 %v3110_v62  ;;  %v4923_v62 = vld [vmem:[#allocation22] ss:$0 sm:$0xff] }
0x118d   :  { %v2477_v39 = vpop.f32.mrb[44].mxu1 }
0x118e   :  { %v2484_v41 = vadd.f32 %v2477_v39, %v2358_v56  ;;  %v5186_v36 = vpop.f32.mrb[45].mxu1  ;;  %v1872_v56 = vld [vmem:[#allocation21 + $0x18] sm:$0xff] }
0x118f   :  { %v2480_v30 = vpop.f32.mrb[46].mxu1  ;;  %v3111_v13 = vpack.c.bf16 %v1872_v56, %v1871_v49 }
0x1190   :  { %v2486_v16 = vadd.f32 %v2484_v41, %v7031_v3  ;;  %v2485_v34 = vadd.f32 %v2480_v30, %v2359_v28  ;;  %v5187_v6 = vpop.f32.mrb[47].mxu1 }
0x1191   :  { %5238 = vmatprep.subr.bf16.mxu0 %v3111_v13  ;;  %v4914_v6 = vld [vmem:[#allocation19] ss:$0 sm:$0xff] }
0x1192   :  { %v2487_v51 = vadd.f32 %v2485_v34, %v7033_v10  ;;  %v2488_v17 = vsel %vm319_vm10, %v2486_v16, 0.0  ;;  %5239 = vmatpush3.bf16.msra.mxu0 %v3111_v13 }
0x1193   :  { %2489 = vadd.xlane.f32.xlu0 %v2488_v17 }
0x1194   :  { %v2491_v57 = vsel %vm323_vm11, %v2487_v51, 0.0 }
0x1195   :  { %2492 = vadd.xlane.f32.xlu1 %v2491_v57 }
0x11e5   :  { %v3034_v18 = vpop.f32.mrb[48].mxu1 }
0x11e6   :  { %v5372_v12 = vadd.f32 %v4906_v0, %v3034_v18  ;;  %v5234_v46 = vpop.f32.mrb[49].mxu1 }
0x11e7   :  { %v3037_v20 = vpop.f32.mrb[50].mxu1 }
0x11e8   :  { %v3045_v58 = vrot.slane %v5372_v12, 2  ;;  %v5373_v33 = vadd.f32 %v4906_v0, %v3037_v20  ;;  %v5235_v11 = vpop.f32.mrb[51].mxu1 }
0x11ea   :  { %v3051_v3 = vadd.f32 %v3045_v58, %v7033_v10  ;;  %v3046_v24 = vrot.slane %v5373_v33, 2 }
0x11ec   :  { %v3055_v7 = vsel %vm3054_vm5, %v3051_v3, 0.0  ;;  %v3047_v37 = vsel %vm937_vm12, %v3045_v58, %v3046_v24  ;;  %v3053_v61 = vadd.f32 %v3046_v24, %v7042_v40 }
0x11ed   :  { %3056 = vadd.xlane.f32.xlu0 %v3055_v7  ;;  %v3052_v59 = vadd.f32 %v3047_v37, %v7040_v19 }
0x11ee   :  { %v3062_v25 = vsel %vm3061_vm7, %v3053_v61, 0.0 }
0x11ef   :  { %v3058_v22 = vsel %vm319_vm10, %v3052_v59, 0.0 }
0x11f1   :  { %3059 = vadd.xlane.f32.xlu0 %v3058_v22 }
0x11f5   :  { %3063 = vadd.xlane.f32.xlu0 %v3062_v25 }
0x1220   :  { %v2490_v27 = vpop.xlane.xlu0 %2489 }
0x1221   :  { %v2494_v42 = vmul.f32 0.03125, %v2490_v27 }
0x1222   :  { %v2493_v10 = vpop.xlane.xlu1 %2492 }
0x1223   :  { %v2496_v50 = vsub.f32 %v2486_v16, %v2494_v42  ;;  %v2495_v47 = vmul.f32 0.03125, %v2493_v10  ;;  %v4913_v16 = vld [vmem:[%s7862_s17] ss:$0 sm:$0xff] }
0x1225   :  { %v2497_v5 = vsub.f32 %v2487_v51, %v2495_v47  ;;  %v2498_v35 = vmul.f32 %v2496_v50, %v2496_v50 }
0x1227   :  { %v2500_v9 = vsel %vm319_vm10, %v2498_v35, 0.0  ;;  %v2499_v55 = vmul.f32 %v2497_v5, %v2497_v5 }
0x1228   :  { %2501 = vadd.xlane.f32.xlu0 %v2500_v9 }
0x1229   :  { %v2503_v19 = vsel %vm323_vm11, %v2499_v55, 0.0 }
0x122c   :  { %2504 = vadd.xlane.f32.xlu0 %v2503_v19 }
0x127a   :  { %v3057_v40 = vpop.xlane.xlu0 %3056 }
0x127b   :  { %v3065_v44 = vmul.f32 0.03125, %v3057_v40 }
0x127d   :  { %v3068_v31 = vsub.f32 %v3051_v3, %v3065_v44 }
0x127e   :  { %v3060_v15 = vpop.xlane.xlu0 %3059 }
0x127f   :  { %v3066_v54 = vmul.f32 0.03125, %v3060_v15  ;;  %v3071_v29 = vmul.f32 %v3068_v31, %v3068_v31 }
0x1281   :  { %v3069_v63 = vsub.f32 %v3052_v59, %v3066_v54  ;;  %v3074_v60 = vsel %vm3054_vm5, %v3071_v29, 0.0  ;;  %v1879_v29 = vld [vmem:[%s7866_s21] sm:$0xff] }
0x1282   :  { %3075 = vadd.xlane.f32.xlu1 %v3074_v60  ;;  %v3064_v14 = vpop.xlane.xlu0 %3063  ;;  %v1881_v60 = vld [vmem:[%s7866_s21 + $0x10] sm:$0xff] }
0x1283   :  { %v3067_v0 = vmul.f32 0.03125, %v3064_v14  ;;  %v3072_v4 = vmul.f32 %v3069_v63, %v3069_v63 }
0x1285   :  { %v3070_v8 = vsub.f32 %v3053_v61, %v3067_v0  ;;  %v3077_v23 = vsel %vm319_vm10, %v3072_v4, 0.0  ;;  %v1882_v0 = vld [vmem:[%s7866_s21 + $0x18] sm:$0xff] }
0x1286   :  { %3078 = vadd.xlane.f32.xlu0 %v3077_v23  ;;  %v3212_v4 = vpack.c.bf16 %v1882_v0, %v1881_v60  ;;  %v1884_v23 = vld [vmem:[%s7866_s21 + $0x28] sm:$0xff] }
0x1287   :  { %v3073_v32 = vmul.f32 %v3070_v8, %v3070_v8 }
0x1289   :  { %v3080_v43 = vsel %vm3061_vm7, %v3073_v32, 0.0 }
0x128a   :  { %3081 = vadd.xlane.f32.xlu1 %v3080_v43  ;;  %v1885_v43 = vld [vmem:[%s7866_s21 + $0x30] sm:$0xff] }
0x128b   :  { %v3214_v53 = vpack.c.bf16 %v1886_v26, %v1885_v43 }
0x12b5   :  { %v2502_v38 = vpop.xlane.xlu0 %2501 }
0x12b6   :  { %v2506_v28 = vmul.f32 0.03125, %v2502_v38 }
0x12b8   :  { %v2508_v45 = vadd.f32 1e-05, %v2506_v28 }
0x12b9   :  { %v2505_v39 = vpop.xlane.xlu0 %2504 }
0x12ba   :  { %5565 = vrsqrt.f32 %v2508_v45  ;;  %v2507_v41 = vmul.f32 0.03125, %v2505_v39 }
0x12bc   :  { %v2509_v36 = vadd.f32 1e-05, %v2507_v41 }
0x12be   :  { %5567 = vrsqrt.f32 %v2509_v36 }
0x12c4   :  { %v5566_v30 = vpop.eup %5565 }
0x12c5   :  { %v2512_v34 = vmul.f32 %v5566_v30, %v2496_v50 }
0x12c7   :  { %v2520_v51 = vmul.f32 %v4913_v16, %v2512_v34 }
0x12c8   :  { %v5568_v17 = vpop.eup %5567 }
0x12c9   :  { %v2528_v57 = vadd.f32 %v4914_v6, %v2520_v51  ;;  %v2513_v18 = vmul.f32 %v5568_v17, %v2497_v5 }
0x12cb   :  { %2530 = vst.msk [vmem:[#allocation2] sm:$0xff] %vm319_vm10, %v2528_v57  ;;  %v2521_v12 = vmul.f32 %v4913_v16, %v2513_v18 }
0x12cd   :  { %v2529_v46 = vadd.f32 %v4914_v6, %v2521_v12 }
0x12cf   :  { %2531 = vst.msk [vmem:[#allocation2 + $0x8] sm:$0x3f] %vm323_vm11, %v2529_v46 }
0x12d2   :  { %v7366_v19 = vld [vmem:[#allocation2] sm:$0xff] }
0x130f   :  { %v3076_v20 = vpop.xlane.xlu1 %3075 }
0x1310   :  { %v3083_v58 = vmul.f32 0.03125, %v3076_v20 }
0x1312   :  { %v3086_v33 = vadd.f32 1e-05, %v3083_v58 }
0x1313   :  { %v3079_v11 = vpop.xlane.xlu0 %3078 }
0x1314   :  { %5569 = vrsqrt.f32 %v3086_v33  ;;  %v3084_v3 = vmul.f32 0.03125, %v3079_v11 }
0x1316   :  { %v3087_v24 = vadd.f32 1e-05, %v3084_v3 }
0x1317   :  { %v3082_v7 = vpop.xlane.xlu1 %3081 }
0x1318   :  { %5571 = vrsqrt.f32 %v3087_v24  ;;  %v3085_v37 = vmul.f32 0.03125, %v3082_v7 }
0x131a   :  { %v3088_v59 = vadd.f32 1e-05, %v3085_v37 }
0x131c   :  { %5573 = vrsqrt.f32 %v3088_v59 }
0x131e   :  { %v5570_v22 = vpop.eup %5569 }
0x131f   :  { %v3092_v61 = vmul.f32 %v5570_v22, %v3068_v31 }
0x1321   :  { %v3095_v25 = vmul.f32 %v4913_v16, %v3092_v61 }
0x1322   :  { %v5572_v27 = vpop.eup %5571 }
0x1323   :  { %v3098_v42 = vadd.f32 %v4914_v6, %v3095_v25  ;;  %v3093_v10 = vmul.f32 %v5572_v27, %v3069_v63  ;;  %v1880_v63 = vld [vmem:[%s7866_s21 + $0x8] sm:$0xff] }
0x1324   :  { %v3211_v14 = vpack.c.bf16 %v1880_v63, %v1879_v29 }
0x1325   :  { %3101 = vst.msk [vmem:[#allocation2 + $0x8] sm:$0xc0] %vm3054_vm5, %v3098_v42  ;;  %v3096_v50 = vmul.f32 %v4913_v16, %v3093_v10 }
0x1326   :  { %v5574_v47 = vpop.eup %5573  ;;  %5244 = vmatprep.subr.bf16.mxu1 %v3211_v14 }
0x1327   :  { %v3099_v5 = vadd.f32 %v4914_v6, %v3096_v50  ;;  %v3094_v35 = vmul.f32 %v5574_v47, %v3070_v8  ;;  %v1883_v8 = vld [vmem:[%s7866_s21 + $0x20] sm:$0xff]  ;;  %5245 = vmatpush3.bf16.msra.mxu1 %v3211_v14 }
0x1328   :  { %5246 = vmatprep.subr.bf16.mxu1 %v3212_v4  ;;  %v3213_v32 = vpack.c.bf16 %v1884_v23, %v1883_v8 }
0x1329   :  { %3102 = vst.msk [vmem:[#allocation2 + $0x10] sm:$0xff] %vm319_vm10, %v3099_v5  ;;  %v3097_v9 = vmul.f32 %v4913_v16, %v3094_v35 }
0x132b   :  { %v3100_v55 = vadd.f32 %v4914_v6, %v3097_v9  ;;  %5247 = vmatpush3.bf16.msra.mxu1 %v3212_v4  ;;  %v4928_v4 = vld [vmem:[#allocation24] ss:$0 sm:$0xff] }
0x132c   :  { %v7368_v40 = vld [vmem:[#allocation2 + $0x8] sm:$0xff]  ;;  %5248 = vmatprep.subr.bf16.mxu1 %v3213_v32 }
0x132d   :  { %3103 = vst.msk [vmem:[#allocation2 + $0x18] sm:$0xf] %vm3061_vm7, %v3100_v55  ;;  %v3108_v44 = vpack.c.bf16 %v7368_v40, %v7366_v19 }
0x132f   :  { %5240 = vmatprep.mubr.msk.bf16.mxu0 %vm319_vm10, %v3108_v44  ;;  %5249 = vmatpush3.bf16.msra.mxu1 %v3213_v32 }
0x1330   :  { %v7374_v31 = vld [vmem:[#allocation2 + $0x10] sm:$0xff]  ;;  %5250 = vmatprep.subr.bf16.mxu1 %v3214_v53 }
0x1333   :  { %5251 = vmatpush3.bf16.msra.mxu1 %v3214_v53 }
0x1334   :  { %v7376_v15 = vld [vmem:[#allocation2 + $0x18] sm:$0xf]  ;;  %5256 = vmatprep.subr.bf16.mxu1 %v6081_v1 }
0x1335   :  { %v3109_v54 = vpack.c.bf16 %v7376_v15, %v7374_v31 }
0x1337   :  { %5241 = vmatmul.mubr.msk.bf16.vlgmr.msra.gmra.mrb[64].mxu0 %vm319_vm10, %v3109_v54 }
0x1338   :  { %3412 = vmatprep.mubr.bf16.mxu0 %v6083_v2 }
0x140a   :  { %v5242_v49 = vpop.f32.mrb[64].mxu0 }
0x140b   :  { %v3167_v56 = vadd.f32 %v5242_v49, %v4923_v62  ;;  %v3158_v13 = vpop.f32.mrb[65].mxu0 }
0x140c   :  { %v3159_v38 = vadd.f32 %v4923_v62, %v3158_v13  ;;  %v5243_v28 = vpop.f32.mrb[66].mxu0 }
0x140d   :  { %v3179_v45 = vmul.f32 0.044715, %v3167_v56  ;;  %v3170_v39 = vadd.f32 %v5243_v28, %v4923_v62  ;;  %v3161_v41 = vpop.f32.mrb[67].mxu0  ;;  %v3175_v50 = vmul.f32 0.5, %v3167_v56 }
0x140e   :  { %v3177_v36 = vmul.f32 0.044715, %v3159_v38  ;;  %v3162_v30 = vadd.f32 %v4923_v62, %v3161_v41  ;;  %v3173_v35 = vmul.f32 0.5, %v3159_v38 }
0x140f   :  { %v3183_v16 = vmul.f32 %v3179_v45, %v3167_v56  ;;  %v3180_v34 = vmul.f32 0.044715, %v3170_v39  ;;  %v3176_v47 = vmul.f32 0.5, %v3170_v39 }
0x1410   :  { %v3181_v6 = vmul.f32 %v3177_v36, %v3159_v38  ;;  %v3178_v51 = vmul.f32 0.044715, %v3162_v30  ;;  %v3174_v9 = vmul.f32 0.5, %v3162_v30 }
0x1411   :  { %v3187_v17 = vmul.f32 %v3183_v16, %v3167_v56  ;;  %v3184_v57 = vmul.f32 %v3180_v34, %v3170_v39 }
0x1412   :  { %v3185_v18 = vmul.f32 %v3181_v6, %v3159_v38  ;;  %v3182_v12 = vmul.f32 %v3178_v51, %v3162_v30 }
0x1413   :  { %v3191_v46 = vadd.f32 %v3187_v17, %v3167_v56  ;;  %v3188_v20 = vmul.f32 %v3184_v57, %v3170_v39 }
0x1414   :  { %v3189_v58 = vadd.f32 %v3185_v18, %v3159_v38  ;;  %v3186_v33 = vmul.f32 %v3182_v12, %v3162_v30 }
0x1415   :  { %v3195_v11 = vmul.f32 0.7978846, %v3191_v46  ;;  %v3192_v3 = vadd.f32 %v3188_v20, %v3170_v39 }
0x1416   :  { %v3193_v24 = vmul.f32 0.7978846, %v3189_v58  ;;  %v3190_v7 = vadd.f32 %v3186_v33, %v3162_v30 }
0x1417   :  { %5575 = vtanh.f32 %v3195_v11  ;;  %v3196_v37 = vmul.f32 0.7978846, %v3192_v3 }
0x1418   :  { %5577 = vtanh.f32 %v3193_v24  ;;  %v3194_v59 = vmul.f32 0.7978846, %v3190_v7  ;;  %v1854_v24 = vld [vmem:[%s7859_s14 + $0x48] sm:$0xff]  ;;  %v1856_v7 = vld [vmem:[%s7859_s14 + $0x58] sm:$0xff] }
0x1419   :  { %5579 = vtanh.f32 %v3196_v37  ;;  %v3360_v37 = vpack.c.bf16 %v1856_v7, %v1854_v24 }
0x141a   :  { %5581 = vtanh.f32 %v3194_v59  ;;  %v1853_v59 = vld [vmem:[%s7859_s14 + $0x40] sm:$0xff] }
0x141b   :  { %3380 = vmatprep.subr.bf16.mxu0 %v3360_v37 }
0x1421   :  { %v5576_v22 = vpop.eup %5575 }
0x1422   :  { %v5578_v61 = vpop.eup %5577  ;;  %v3203_v25 = vadd.f32 1.0, %v5576_v22  ;;  %v1855_v22 = vld [vmem:[%s7859_s14 + $0x50] sm:$0xff] }
0x1423   :  { %v5580_v27 = vpop.eup %5579  ;;  %v3201_v42 = vadd.f32 1.0, %v5578_v61  ;;  %v3359_v61 = vpack.c.bf16 %v1855_v22, %v1853_v59 }
0x1424   :  { %v5582_v10 = vpop.eup %5581  ;;  %v3204_v5 = vadd.f32 1.0, %v5580_v27  ;;  %v3207_v44 = vmul.f32 %v3203_v25, %v3175_v50  ;;  %v1858_v25 = vld [vmem:[%s7859_s14 + $0x68] sm:$0xff]  ;;  %v1860_v27 = vld [vmem:[%s7859_s14 + $0x78] sm:$0xff]  ;;  %v1859_v50 = vld [vmem:[%s7859_s14 + $0x70] sm:$0xff] }
0x1425   :  { %v3202_v55 = vadd.f32 1.0, %v5582_v10  ;;  %v3205_v29 = vmul.f32 %v3201_v42, %v3173_v35  ;;  %3381 = vmatpush1.bf16.msra.mxu0 %v3359_v61  ;;  %v3362_v42 = vpack.c.bf16 %v1860_v27, %v1858_v25  ;;  %v1857_v10 = vld [vmem:[%s7859_s14 + $0x60] sm:$0xff] }
0x1426   :  { %v3208_v54 = vmul.f32 %v3204_v5, %v3176_v47  ;;  %v3361_v47 = vpack.c.bf16 %v1859_v50, %v1857_v10 }
0x1427   :  { %v3206_v63 = vmul.f32 %v3202_v55, %v3174_v9  ;;  %3382 = vmatprep.subr.bf16.mxu0 %v3362_v42 }
0x1428   :  { %v3210_v60 = vpack.c.bf16 %v3208_v54, %v3207_v44 }
0x1429   :  { %v3209_v14 = vpack.c.bf16 %v3206_v63, %v3205_v29  ;;  %3383 = vmatpush1.bf16.msra.mxu0 %v3361_v47 }
0x142a   :  { %5262 = vmatprep.subr.bf16.mxu0 %v6081_v1 }
0x142b   :  { %5252 = vmatprep.mubr.msk.bf16.mxu1 %vm3215_vm8, %v3209_v14 }
0x142c   :  { %5253 = vmatmul.mubr.msk.bf16.vlgmr.msra.gmra.mrb[52].mxu1 %vm3215_vm8, %v3210_v60 }
0x142d   :  { %5258 = vmatprep.mubr.msk.bf16.mxu1 %vm6082_vm0, %v6081_v1 }
0x14ff   :  { %v5254_v0 = vpop.f32.mrb[52].mxu1 }
0x1500   :  { %v3256_v8 = vpop.f32.mrb[53].mxu1  ;;  %v3273_v23 = vadd.f32 %v5254_v0, %v7374_v31 }
0x1501   :  { %v3271_v32 = vadd.f32 %v3256_v8, %v7366_v19  ;;  %v5255_v43 = vpop.f32.mrb[54].mxu1 }
0x1502   :  { %v3259_v26 = vpop.f32.mrb[55].mxu1  ;;  %v3274_v62 = vadd.f32 %v5255_v43, %v7376_v15  ;;  %v3283_v56 = vadd.f32 %v4928_v4, %v3273_v23  ;;  %v4929_v23 = vld [vmem:[#allocation25] ss:$0 sm:$0xff] }
0x1503   :  { %v3281_v53 = vadd.f32 %v4928_v4, %v3271_v32  ;;  %v3272_v49 = vadd.f32 %v3259_v26, %v7368_v40 }
0x1504   :  { %v3284_v28 = vadd.f32 %v4928_v4, %v3274_v62  ;;  %v3291_v31 = vsel %vm319_vm10, %v3283_v56, 0.0 }
0x1505   :  { %v3282_v13 = vadd.f32 %v4928_v4, %v3272_v49  ;;  %v3285_v38 = vsel %vm319_vm10, %v3281_v53, 0.0  ;;  %v4930_v49 = vld [vmem:[#allocation27] ss:$0 sm:$0xff] }
0x1506   :  { %3286 = vadd.xlane.f32.xlu0 %v3285_v38  ;;  %v3294_v19 = vsel %vm3061_vm7, %v3284_v28, 0.0 }
0x1507   :  { %v3288_v45 = vsel %vm319_vm10, %v3282_v13, 0.0 }
0x1508   :  { %3289 = vadd.xlane.f32.xlu1 %v3288_v45 }
0x150a   :  { %3292 = vadd.xlane.f32.xlu0 %v3291_v31 }
0x150c   :  { %3295 = vadd.xlane.f32.xlu1 %v3294_v19 }
0x1593   :  { %v3287_v39 = vpop.xlane.xlu0 %3286 }
0x1594   :  { %v3297_v41 = vmul.f32 0.03125, %v3287_v39 }
0x1595   :  { %v3290_v15 = vpop.xlane.xlu1 %3289 }
0x1596   :  { %v3301_v36 = vsub.f32 %v3281_v53, %v3297_v41  ;;  %v3298_v40 = vmul.f32 0.03125, %v3290_v15 }
0x1597   :  { %v3293_v30 = vpop.xlane.xlu0 %3292 }
0x1598   :  { %v3302_v16 = vsub.f32 %v3282_v13, %v3298_v40  ;;  %v3299_v34 = vmul.f32 0.03125, %v3293_v30  ;;  %v3305_v6 = vmul.f32 %v3301_v36, %v3301_v36  ;;  %v1862_v30 = vld [vmem:[#allocation16 + $0x2] sm:$0x3] }
0x1599   :  { %v3296_v51 = vpop.xlane.xlu1 %3295 }
0x159a   :  { %v3303_v17 = vsub.f32 %v3283_v56, %v3299_v34  ;;  %v3300_v57 = vmul.f32 0.03125, %v3296_v51  ;;  %v3309_v18 = vsel %vm319_vm10, %v3305_v6, 0.0  ;;  %v3306_v12 = vmul.f32 %v3302_v16, %v3302_v16 }
0x159b   :  { %3310 = vadd.xlane.f32.xlu0 %v3309_v18 }
0x159c   :  { %v3304_v46 = vsub.f32 %v3284_v28, %v3300_v57  ;;  %v3312_v20 = vsel %vm319_vm10, %v3306_v12, 0.0  ;;  %v3307_v58 = vmul.f32 %v3303_v17, %v3303_v17 }
0x159d   :  { %3313 = vadd.xlane.f32.xlu1 %v3312_v20 }
0x159e   :  { %v3315_v33 = vsel %vm319_vm10, %v3307_v58, 0.0  ;;  %v3308_v11 = vmul.f32 %v3304_v46, %v3304_v46 }
0x159f   :  { %3316 = vadd.xlane.f32.xlu0 %v3315_v33 }
0x15a0   :  { %v3318_v3 = vsel %vm3061_vm7, %v3308_v11, 0.0 }
0x15a1   :  { %3319 = vadd.xlane.f32.xlu1 %v3318_v3 }
0x1628   :  { %v3311_v5 = vpop.xlane.xlu0 %3310 }
0x1629   :  { %v3321_v35 = vmul.f32 0.03125, %v3311_v5 }
0x162a   :  { %v3314_v9 = vpop.xlane.xlu1 %3313 }
0x162b   :  { %v3325_v55 = vadd.f32 1e-05, %v3321_v35  ;;  %v3322_v44 = vmul.f32 0.03125, %v3314_v9 }
0x162c   :  { %v3317_v54 = vpop.xlane.xlu0 %3316 }
0x162d   :  { %5583 = vrsqrt.f32 %v3325_v55  ;;  %v3326_v29 = vadd.f32 1e-05, %v3322_v44  ;;  %v3323_v63 = vmul.f32 0.03125, %v3317_v54 }
0x162e   :  { %v3320_v60 = vpop.xlane.xlu1 %3319 }
0x162f   :  { %5585 = vrsqrt.f32 %v3326_v29  ;;  %v3327_v14 = vadd.f32 1e-05, %v3323_v63  ;;  %v3324_v0 = vmul.f32 0.03125, %v3320_v60 }
0x1631   :  { %5587 = vrsqrt.f32 %v3327_v14  ;;  %v3328_v4 = vadd.f32 1e-05, %v3324_v0 }
0x1633   :  { %5589 = vrsqrt.f32 %v3328_v4 }
0x1637   :  { %v5584_v8 = vpop.eup %5583 }
0x1638   :  { %v3333_v32 = vmul.f32 %v5584_v8, %v3301_v36 }
0x1639   :  { %v5586_v43 = vpop.eup %5585 }
0x163a   :  { %v3343_v26 = vmul.f32 %v4929_v23, %v3333_v32  ;;  %v3334_v53 = vmul.f32 %v5586_v43, %v3302_v16  ;;  %v3367_v16 = vrot.slane %v1862_v30, %v1910_v48 }
0x163b   :  { %v5588_v62 = vpop.eup %5587 }
0x163c   :  { %v3344_v56 = vmul.f32 %v4929_v23, %v3334_v53  ;;  %v3335_v38 = vmul.f32 %v5588_v62, %v3303_v17  ;;  %v7448_v45 = vadd.f32 %v4930_v49, %v3343_v26 }
0x163d   :  { %v5590_v13 = vpop.eup %5589 }
0x163e   :  { %v3336_v28 = vmul.f32 %v5590_v13, %v3304_v46  ;;  %v7450_v31 = vadd.f32 %v4930_v49, %v3344_v56  ;;  %v3345_v41 = vmul.f32 %v4929_v23, %v3335_v38 }
0x1640   :  { %v3357_v19 = vpack.c.bf16 %v7450_v31, %v7448_v45  ;;  %v3346_v39 = vmul.f32 %v4929_v23, %v3336_v28  ;;  %v7458_v36 = vadd.f32 %v4930_v49, %v3345_v41 }
0x1642   :  { %4931 = vmatmul.mubr.msk.bf16.vlgmr.msra.gmra.mrb[68].mxu0 %vm319_vm10, %v3357_v19  ;;  %v7456_v15 = vadd.f32 %v4930_v49, %v3346_v39 }
0x1643   :  { %3422 = vmatprep.mubr.bf16.mxu0 %v6083_v2  ;;  %v3371_v2 = vrot.slane %v1862_v30, %v1914_v52 }
0x1644   :  { %v3358_v40 = vpack.c.bf16 %v7456_v15, %v7458_v36 }
0x164a   :  { %4932 = vmatmul.mubr.msk.bf16.gmra.mrb[72].mxu0 %vm319_vm10, %v3358_v40 }
0x164b   :  { %5264 = vmatprep.mubr.msk.bf16.mxu0 %vm6082_vm0, %v6081_v1 }
0x1715   :  { %v3414_v34 = vpop.f32.mrb[68].mxu0 }
0x1716   :  { %v3416_v6 = vpop.f32.mrb[69].mxu0  ;;  %v3415_v17 = vadd.f32 %v3414_v34, %v3367_v16 }
0x1717   :  { %v3418_v51 = vpop.f32.mrb[70].mxu0  ;;  %v3417_v12 = vadd.f32 %v3416_v6, %v3371_v2 }
0x1718   :  { %v3419_v57 = vadd.f32 %v3418_v51, %v3367_v16  ;;  %v3420_v18 = vpop.f32.mrb[71].mxu0 }
0x1719   :  { %v3421_v46 = vadd.f32 %v3420_v18, %v3371_v2 }
0x171a   :  { %v7469_v20 = vpack.c.bf16 %v3419_v57, %v3415_v17 }
0x171b   :  { %v7471_v58 = vpack.c.bf16 %v3421_v46, %v3417_v12 }
0x171c   :  { %3566 = vrot.lane.b32.xlu1 %v7469_v20, %s6089_s15  ;;  %3435 = vrot.lane.b32.xlu0 %v7469_v20, %s6087_s2 }
0x171d   :  { %v3424_v48 = vpop.f32.mrb[72].mxu0 }
0x171e   :  { %v3425_v21 = vadd.f32 %v3424_v48, %v3367_v16  ;;  %v3426_v52 = vpop.f32.mrb[73].mxu0 }
0x171f   :  { %v3427_v33 = vadd.f32 %v3426_v52, %v3371_v2  ;;  %v3428_v11 = vpop.f32.mrb[74].mxu0 }
0x1720   :  { %v3985_v3 = vpack.c.bf16 %v3425_v21, %v3419_v57  ;;  %v3429_v24 = vadd.f32 %v3428_v11, %v3367_v16  ;;  %3564 = vrot.lane.b32.xlu1 %v7469_v20, %s6090_s22  ;;  %3691 = vrot.lane.b32.xlu0 %v7469_v20, %s6091_s1  ;;  %v3430_v7 = vpop.f32.mrb[75].mxu0 }
0x1721   :  { %v4314_v37 = vpack.c.bf16 %v3427_v33, %v3421_v46  ;;  %v3431_v59 = vadd.f32 %v3430_v7, %v3371_v2 }
0x1722   :  { %v3986_v22 = vpack.c.bf16 %v3429_v24, %v3429_v24  ;;  %v3989_v25 = vrot.slane %v3985_v3, 3 }
0x1723   :  { %v4315_v61 = vpack.c.bf16 %v3431_v59, %v3431_v59  ;;  %v4318_v42 = vrot.slane %v4314_v37, 3 }
0x1724   :  { %v3990_v27 = vrot.slane %v3986_v22, 3  ;;  %3689 = vrot.lane.b32.xlu1 %v7469_v20, %s6086_s7  ;;  %3815 = vrot.lane.b32.xlu0 %v7469_v20, %s6092_s10 }
0x1725   :  { %v4319_v10 = vrot.slane %v4315_v61, 3 }
0x1726   :  { %v7486_v50 = vsel %vm955_vm13, %v3989_v25, %v3990_v27 }
0x1727   :  { %v7489_v47 = vsel %vm955_vm13, %v4318_v42, %v4319_v10 }
0x1728   :  { %3813 = vrot.lane.b32.xlu1 %v7469_v20, %s6093_s18  ;;  %3992 = vrot.lane.b32.xlu0 %v7486_v50, %s6087_s2 }
0x172c   :  { %4117 = vrot.lane.b32.xlu1 %v7486_v50, %s6089_s15  ;;  %4115 = vrot.lane.b32.xlu0 %v7486_v50, %s6090_s22 }
0x1730   :  { %4242 = vrot.lane.b32.xlu1 %v7486_v50, %s6091_s1  ;;  %4240 = vrot.lane.b32.xlu0 %v7486_v50, %s6086_s7 }
0x1734   :  { %4372 = vrot.lane.b32.xlu1 %v7486_v50, %s6092_s10  ;;  %4370 = vrot.lane.b32.xlu0 %v7486_v50, %s6093_s18 }
0x178e   :  { %v3436_v5 = vpop.permute.xlu0 %3435  ;;  %v3567_v9 = vpop.permute.xlu1 %3566 }
0x178f   :  { %v3441_v35 = vsel %vm1981_vm1, %v3436_v5, 0  ;;  %v3572_v55 = vsel %vm1981_vm1, %v3567_v9, 0 }
0x1790   :  { %5257 = vmatpush3.bf16.xpose.msra.mxu1 %v3441_v35 }
0x1791   :  { %5268 = vmatprep.subr.bf16.mxu1 %v6081_v1 }
0x1792   :  { %v3692_v44 = vpop.permute.xlu0 %3691  ;;  %v3565_v54 = vpop.permute.xlu1 %3564 }
0x1793   :  { %v3697_v29 = vsel %vm1981_vm1, %v3692_v44, 0 }
0x1796   :  { %v3816_v63 = vpop.permute.xlu0 %3815  ;;  %v3690_v60 = vpop.permute.xlu1 %3689 }
0x1797   :  { %5259 = vmatmul.mubr.msk.bf16.vlgmr.msra.gmra.mrb[56].mxu1 %vm1981_vm1, %v7469_v20  ;;  %v3821_v14 = vsel %vm1981_vm1, %v3816_v63, 0 }
0x1798   :  { %5269 = vmatpush3.bf16.xpose.msra.mxu1 %v3572_v55  ;;  %5270 = vmatprep.mubr.msk.bf16.mxu1 %vm6082_vm0, %v6081_v1 }
0x1799   :  { %5280 = vmatprep.subr.bf16.mxu1 %v6081_v1 }
0x179a   :  { %v3993_v0 = vpop.permute.xlu0 %3992  ;;  %v3814_v4 = vpop.permute.xlu1 %3813 }
0x179b   :  { %v3998_v8 = vsel %vm1981_vm1, %v3993_v0, 0 }
0x179e   :  { %v4118_v23 = vpop.permute.xlu1 %4117  ;;  %v4116_v26 = vpop.permute.xlu0 %4115 }
0x179f   :  { %5271 = vmatmul.mubr.msk.bf16.vlgmr.msra.gmra.mrb[60].mxu1 %vm1981_vm1, %v3565_v54  ;;  %v4123_v32 = vsel %vm1981_vm1, %v4118_v23, 0 }
0x17a0   :  { %5281 = vmatpush3.bf16.xpose.msra.mxu1 %v3697_v29  ;;  %5282 = vmatprep.mubr.msk.bf16.mxu1 %vm6082_vm0, %v6081_v1 }
0x17a1   :  { %5292 = vmatprep.subr.bf16.mxu1 %v6081_v1 }
0x17a2   :  { %v4243_v43 = vpop.permute.xlu1 %4242  ;;  %v4241_v49 = vpop.permute.xlu0 %4240 }
0x17a3   :  { %v4248_v53 = vsel %vm1981_vm1, %v4243_v43, 0 }
0x17a6   :  { %v4373_v62 = vpop.permute.xlu1 %4372  ;;  %v4371_v13 = vpop.permute.xlu0 %4370 }
0x17a7   :  { %5283 = vmatmul.mubr.msk.bf16.vlgmr.msra.gmra.mrb[64].mxu1 %vm1981_vm1, %v3690_v60  ;;  %v4378_v56 = vsel %vm1981_vm1, %v4373_v62, 0 }
0x17a8   :  { %5293 = vmatpush3.bf16.xpose.msra.mxu1 %v3821_v14  ;;  %5294 = vmatprep.mubr.msk.bf16.mxu1 %vm6082_vm0, %v6081_v1 }
0x17a9   :  { %5304 = vmatprep.subr.bf16.mxu1 %v6081_v1 }
0x17af   :  { %5295 = vmatmul.mubr.msk.bf16.vlgmr.msra.gmra.mrb[68].mxu1 %vm1981_vm1, %v3814_v4 }
0x17b0   :  { %5305 = vmatpush3.bf16.xpose.msra.mxu1 %v3998_v8  ;;  %5306 = vmatprep.mubr.msk.bf16.mxu1 %vm6082_vm0, %v6081_v1 }
0x17b1   :  { %5316 = vmatprep.subr.bf16.mxu1 %v6081_v1 }
0x17b7   :  { %5307 = vmatmul.mubr.msk.bf16.vlgmr.msra.gmra.mrb[72].mxu1 %vm1981_vm1, %v7486_v50 }
0x17b8   :  { %5317 = vmatpush3.bf16.xpose.msra.mxu1 %v4123_v32  ;;  %5318 = vmatprep.mubr.msk.bf16.mxu1 %vm6082_vm0, %v6081_v1 }
0x17b9   :  { %5328 = vmatprep.subr.bf16.mxu1 %v6081_v1 }
0x17bf   :  { %5319 = vmatmul.mubr.msk.bf16.vlgmr.msra.gmra.mrb[76].mxu1 %vm1981_vm1, %v4116_v26 }
0x17c0   :  { %5329 = vmatpush3.bf16.xpose.msra.mxu1 %v4248_v53  ;;  %5330 = vmatprep.mubr.msk.bf16.mxu1 %vm6082_vm0, %v6081_v1 }
0x17c1   :  { %5340 = vmatprep.subr.bf16.mxu1 %v6081_v1 }
0x17c7   :  { %5331 = vmatmul.mubr.msk.bf16.vlgmr.msra.gmra.mrb[80].mxu1 %vm1981_vm1, %v4241_v49 }
0x17c8   :  { %5341 = vmatpush3.bf16.xpose.msra.mxu1 %v4378_v56  ;;  %5342 = vmatprep.mubr.msk.bf16.mxu1 %vm6082_vm0, %v6081_v1 }
0x17cf   :  { %5343 = vmatmul.mubr.msk.bf16.vlgmr.msra.gmra.mrb[84].mxu1 %vm1981_vm1, %v4371_v13 }
0x186a   :  { %v7546_v38 = vpop.f32.mrb[56].mxu1 }
0x186b   :  { %v5260_v28 = vpop.f32.mrb[57].mxu1  ;;  %v3484_v19 = vsel %vm2029_vm3, %v7546_v38, -inf }
0x186c   :  { %v7550_v39 = vpop.f32.mrb[58].mxu1  ;;  %3485 = vmax.xlane.f32.xlu1 %v3484_v19 }
0x186d   :  { %v5261_v41 = vpop.f32.mrb[59].mxu1  ;;  %v3487_v40 = vsel %vm2033_vm4, %v7550_v39, -inf }
0x186e   :  { %3488 = vmax.xlane.f32.xlu0 %v3487_v40 }
0x1872   :  { %v7554_v30 = vpop.f32.mrb[60].mxu1 }
0x1873   :  { %v5272_v16 = vpop.f32.mrb[61].mxu1  ;;  %v3615_v34 = vsel %vm2029_vm3, %v7554_v30, -inf }
0x1874   :  { %3616 = vmax.xlane.f32.xlu0 %v3615_v34  ;;  %v7558_v2 = vpop.f32.mrb[62].mxu1 }
0x1875   :  { %v5273_v6 = vpop.f32.mrb[63].mxu1  ;;  %v3618_v51 = vsel %vm2033_vm4, %v7558_v2, -inf }
0x1876   :  { %3619 = vmax.xlane.f32.xlu1 %v3618_v51 }
0x187a   :  { %v7562_v17 = vpop.f32.mrb[64].mxu1 }
0x187b   :  { %v5284_v57 = vpop.f32.mrb[65].mxu1  ;;  %v3740_v18 = vsel %vm2029_vm3, %v7562_v17, -inf }
0x187c   :  { %3741 = vmax.xlane.f32.xlu0 %v3740_v18  ;;  %v7566_v12 = vpop.f32.mrb[66].mxu1 }
0x187d   :  { %v5285_v46 = vpop.f32.mrb[67].mxu1  ;;  %v3743_v48 = vsel %vm2033_vm4, %v7566_v12, -inf }
0x187e   :  { %3744 = vmax.xlane.f32.xlu1 %v3743_v48 }
0x1882   :  { %v7570_v21 = vpop.f32.mrb[68].mxu1 }
0x1883   :  { %v5296_v52 = vpop.f32.mrb[69].mxu1  ;;  %v3864_v33 = vsel %vm2029_vm3, %v7570_v21, -inf }
0x1884   :  { %3865 = vmax.xlane.f32.xlu0 %v3864_v33  ;;  %v7574_v11 = vpop.f32.mrb[70].mxu1 }
0x1885   :  { %v5297_v3 = vpop.f32.mrb[71].mxu1  ;;  %v3867_v24 = vsel %vm2033_vm4, %v7574_v11, -inf }
0x1886   :  { %3868 = vmax.xlane.f32.xlu1 %v3867_v24 }
0x188a   :  { %v7578_v7 = vpop.f32.mrb[72].mxu1 }
0x188b   :  { %v5308_v37 = vpop.f32.mrb[73].mxu1  ;;  %v4041_v59 = vsel %vm2029_vm3, %v7578_v7, -inf }
0x188c   :  { %4042 = vmax.xlane.f32.xlu0 %v4041_v59  ;;  %v7582_v22 = vpop.f32.mrb[74].mxu1 }
0x188d   :  { %v5309_v61 = vpop.f32.mrb[75].mxu1  ;;  %v4044_v25 = vsel %vm2033_vm4, %v7582_v22, -inf }
0x188e   :  { %4045 = vmax.xlane.f32.xlu1 %v4044_v25 }
0x1892   :  { %v7586_v27 = vpop.f32.mrb[76].mxu1 }
0x1893   :  { %v5320_v42 = vpop.f32.mrb[77].mxu1  ;;  %v4166_v10 = vsel %vm2029_vm3, %v7586_v27, -inf }
0x1894   :  { %4167 = vmax.xlane.f32.xlu0 %v4166_v10  ;;  %v7590_v5 = vpop.f32.mrb[78].mxu1 }
0x1895   :  { %v5321_v35 = vpop.f32.mrb[79].mxu1  ;;  %v4169_v9 = vsel %vm2033_vm4, %v7590_v5, -inf }
0x1896   :  { %4170 = vmax.xlane.f32.xlu1 %v4169_v9 }
0x189a   :  { %v7594_v55 = vpop.f32.mrb[80].mxu1 }
0x189b   :  { %v5332_v44 = vpop.f32.mrb[81].mxu1  ;;  %v4291_v4 = vsel %vm2029_vm3, %v7594_v55, -inf }
0x189c   :  { %v7596_v54 = vpop.f32.mrb[82].mxu1 }
0x189d   :  { %v5333_v29 = vpop.f32.mrb[83].mxu1  ;;  %v4294_v8 = vsel %vm2033_vm4, %v7596_v54, -inf }
0x18a2   :  { %v7598_v63 = vpop.f32.mrb[84].mxu1 }
0x18a3   :  { %v5344_v60 = vpop.f32.mrb[85].mxu1  ;;  %v4421_v23 = vsel %vm2029_vm3, %v7598_v63, -inf }
0x18a4   :  { %v7600_v14 = vpop.f32.mrb[86].mxu1 }
0x18a5   :  { %v5345_v0 = vpop.f32.mrb[87].mxu1  ;;  %v4424_v32 = vsel %vm2033_vm4, %v7600_v14, -inf }
0x18a7   :  { %3638 = vrot.lane.b32.xlu1 %v7469_v20, %s6065_s12 }
0x18aa   :  { %3507 = vrot.lane.b32.xlu0 %v7469_v20, %s6088_s13 }
0x18c9   :  { %4292 = vmax.xlane.f32.xlu0 %v4291_v4 }
0x18cb   :  { %4295 = vmax.xlane.f32.xlu1 %v4294_v8 }
0x18cd   :  { %4422 = vmax.xlane.f32.xlu0 %v4421_v23 }
0x18cf   :  { %4425 = vmax.xlane.f32.xlu1 %v4424_v32 }
0x18f9   :  { %v3486_v43 = vpop.xlane.xlu1 %3485 }
0x18fa   :  { %v3490_v26 = vsub.f32 %v7546_v38, %v3486_v43 }
0x18fb   :  { %v3489_v20 = vpop.xlane.xlu0 %3488 }
0x18fc   :  { %v3492_v53 = vmul.f32 1.442695, %v3490_v26  ;;  %v3491_v62 = vsub.f32 %v7550_v39, %v3489_v20 }
0x18fe   :  { %5591 = vpow2.f32 %v3492_v53  ;;  %v3494_v49 = vmul.f32 1.442695, %v3491_v62 }
0x1900   :  { %5593 = vpow2.f32 %v3494_v49 }
0x1901   :  { %v3617_v56 = vpop.xlane.xlu0 %3616 }
0x1902   :  { %v3621_v13 = vsub.f32 %v7554_v30, %v3617_v56 }
0x1903   :  { %v3620_v28 = vpop.xlane.xlu1 %3619 }
0x1904   :  { %v3623_v19 = vmul.f32 1.442695, %v3621_v13  ;;  %v3622_v41 = vsub.f32 %v7558_v2, %v3620_v28 }
0x1906   :  { %5595 = vpow2.f32 %v3623_v19  ;;  %v3625_v40 = vmul.f32 1.442695, %v3622_v41 }
0x1908   :  { %v7618_v16 = vpop.eup %5591  ;;  %5597 = vpow2.f32 %v3625_v40 }
0x1909   :  { %v3742_v38 = vpop.xlane.xlu0 %3741  ;;  %v3496_v34 = vsel %vm2029_vm3, %v7618_v16, 0.0 }
0x190a   :  { %v7622_v39 = vpop.eup %5593  ;;  %v3746_v6 = vsub.f32 %v7562_v17, %v3742_v38  ;;  %3497 = vadd.xlane.f32.xlu0 %v3496_v34 }
0x190b   :  { %v3745_v51 = vpop.xlane.xlu1 %3744  ;;  %v3499_v30 = vsel %vm2033_vm4, %v7622_v39, 0.0 }
0x190c   :  { %v3748_v57 = vmul.f32 1.442695, %v3746_v6  ;;  %v3747_v2 = vsub.f32 %v7566_v12, %v3745_v51  ;;  %3500 = vadd.xlane.f32.xlu1 %v3499_v30 }
0x190e   :  { %5599 = vpow2.f32 %v3748_v57  ;;  %v3750_v18 = vmul.f32 1.442695, %v3747_v2 }
0x1910   :  { %v7628_v46 = vpop.eup %5595  ;;  %5601 = vpow2.f32 %v3750_v18 }
0x1911   :  { %v3866_v48 = vpop.xlane.xlu0 %3865  ;;  %v3627_v52 = vsel %vm2029_vm3, %v7628_v46, 0.0 }
0x1912   :  { %v7632_v33 = vpop.eup %5597  ;;  %v3870_v17 = vsub.f32 %v7570_v21, %v3866_v48  ;;  %3628 = vadd.xlane.f32.xlu0 %v3627_v52 }
0x1913   :  { %v3869_v3 = vpop.xlane.xlu1 %3868  ;;  %v3630_v24 = vsel %vm2033_vm4, %v7632_v33, 0.0 }
0x1914   :  { %v3872_v12 = vmul.f32 1.442695, %v3870_v17  ;;  %v3871_v37 = vsub.f32 %v7574_v11, %v3869_v3  ;;  %3631 = vadd.xlane.f32.xlu1 %v3630_v24 }
0x1916   :  { %5603 = vpow2.f32 %v3872_v12  ;;  %v3874_v59 = vmul.f32 1.442695, %v3871_v37 }
0x1918   :  { %v7638_v61 = vpop.eup %5599  ;;  %5605 = vpow2.f32 %v3874_v59 }
0x1919   :  { %v4043_v25 = vpop.xlane.xlu0 %4042  ;;  %v3752_v42 = vsel %vm2029_vm3, %v7638_v61, 0.0 }
0x191a   :  { %v7642_v10 = vpop.eup %5601  ;;  %v4047_v21 = vsub.f32 %v7578_v7, %v4043_v25  ;;  %3753 = vadd.xlane.f32.xlu0 %v3752_v42 }
0x191b   :  { %v4046_v35 = vpop.xlane.xlu1 %4045  ;;  %v3755_v9 = vsel %vm2033_vm4, %v7642_v10, 0.0 }
0x191c   :  { %v4049_v11 = vmul.f32 1.442695, %v4047_v21  ;;  %v4048_v44 = vsub.f32 %v7582_v22, %v4046_v35  ;;  %3756 = vadd.xlane.f32.xlu1 %v3755_v9 }
0x191e   :  { %5607 = vpow2.f32 %v4049_v11  ;;  %v4051_v29 = vmul.f32 1.442695, %v4048_v44 }
0x1920   :  { %v7648_v60 = vpop.eup %5603  ;;  %5609 = vpow2.f32 %v4051_v29 }
0x1921   :  { %v4168_v0 = vpop.xlane.xlu0 %4167  ;;  %v3876_v4 = vsel %vm2029_vm3, %v7648_v60, 0.0 }
0x1922   :  { %v7652_v8 = vpop.eup %5605  ;;  %3877 = vadd.xlane.f32.xlu0 %v3876_v4  ;;  %v4172_v13 = vsub.f32 %v7586_v27, %v4168_v0 }
0x1923   :  { %v4171_v7 = vpop.xlane.xlu1 %4170  ;;  %v3879_v23 = vsel %vm2033_vm4, %v7652_v8, 0.0 }
0x1924   :  { %v4173_v32 = vsub.f32 %v7590_v5, %v4171_v7  ;;  %3880 = vadd.xlane.f32.xlu1 %v3879_v23  ;;  %v4174_v28 = vmul.f32 1.442695, %v4172_v13 }
0x1925   :  { %v3508_v22 = vpop.permute.xlu0 %3507 }
0x1926   :  { %v4176_v43 = vmul.f32 1.442695, %v4173_v32  ;;  %v3513_v26 = vsel %vm345_vm6, %v3508_v22, 0 }
0x1927   :  { %5263 = vmatpush3.bf16.msra.mxu0 %v3513_v26  ;;  %v3639_v41 = vpop.permute.xlu1 %3638 }
0x1928   :  { %v7658_v20 = vpop.eup %5607  ;;  %5611 = vpow2.f32 %v4176_v43  ;;  %5274 = vmatprep.subr.bf16.mxu0 %v6081_v1  ;;  %v3768_v43 = vsel %vm345_vm6, %v7471_v58, 0 }
0x1929   :  { %v4053_v53 = vsel %vm2029_vm3, %v7658_v20, 0.0  ;;  %5613 = vpow2.f32 %v4174_v28 }
0x192a   :  { %v7663_v62 = vpop.eup %5609  ;;  %4054 = vadd.xlane.f32.xlu1 %v4053_v53 }
0x192b   :  { %v4056_v5 = vsel %vm2033_vm4, %v7663_v62, 0.0 }
0x192e   :  { %4057 = vadd.xlane.f32.xlu1 %v4056_v5 }
0x1932   :  { %v7667_v49 = vpop.eup %5611 }
0x1933   :  { %v4181_v56 = vsel %vm2033_vm4, %v7667_v49, 0.0  ;;  %v7676_v19 = vpop.eup %5613 }
0x1934   :  { %4182 = vadd.xlane.f32.xlu1 %v4181_v56  ;;  %v4178_v38 = vsel %vm2029_vm3, %v7676_v19, 0.0 }
0x1938   :  { %3888 = vrot.lane.b32.xlu0 %v7471_v58, %s6087_s2 }
0x1945   :  { %4064 = vrot.lane.b32.xlu1 %v7486_v50, %s6088_s13 }
0x1956   :  { %v4293_v40 = vpop.xlane.xlu0 %4292 }
0x1957   :  { %v4297_v34 = vsub.f32 %v7594_v55, %v4293_v40  ;;  %4179 = vadd.xlane.f32.xlu0 %v4178_v38 }
0x1958   :  { %v4296_v6 = vpop.xlane.xlu1 %4295 }
0x1959   :  { %v4299_v51 = vmul.f32 1.442695, %v4297_v34  ;;  %v4298_v30 = vsub.f32 %v7596_v54, %v4296_v6 }
0x195a   :  { %v4423_v27 = vpop.xlane.xlu0 %4422 }
0x195b   :  { %5615 = vpow2.f32 %v4299_v51  ;;  %v4301_v57 = vmul.f32 1.442695, %v4298_v30  ;;  %v4427_v2 = vsub.f32 %v7598_v63, %v4423_v27 }
0x195c   :  { %v4426_v18 = vpop.xlane.xlu1 %4425 }
0x195d   :  { %v4429_v48 = vmul.f32 1.442695, %v4427_v2  ;;  %v4428_v52 = vsub.f32 %v7600_v14, %v4426_v18  ;;  %5617 = vpow2.f32 %v4301_v57 }
0x195f   :  { %5619 = vpow2.f32 %v4429_v48  ;;  %v4431_v17 = vmul.f32 1.442695, %v4428_v52 }
0x1961   :  { %5621 = vpow2.f32 %v4431_v17 }
0x1965   :  { %v7684_v3 = vpop.eup %5615 }
0x1966   :  { %v4303_v54 = vsel %vm2029_vm3, %v7684_v3, 0.0 }
0x1967   :  { %v7686_v55 = vpop.eup %5617 }
0x1968   :  { %v4306_v14 = vsel %vm2033_vm4, %v7686_v55, 0.0 }
0x1969   :  { %v7690_v24 = vpop.eup %5619  ;;  %4304 = vadd.xlane.f32.xlu1 %v4303_v54 }
0x196a   :  { %v4433_v63 = vsel %vm2029_vm3, %v7690_v24, 0.0 }
0x196b   :  { %4434 = vadd.xlane.f32.xlu0 %v4433_v63  ;;  %v7696_v12 = vpop.eup %5621 }
0x196c   :  { %v4436_v37 = vsel %vm2033_vm4, %v7696_v12, 0.0 }
0x196d   :  { %4307 = vadd.xlane.f32.xlu1 %v4306_v14 }
0x1971   :  { %4437 = vadd.xlane.f32.xlu1 %v4436_v37 }
0x1981   :  { %4189 = vrot.lane.b32.xlu0 %v7486_v50, %s6065_s12  ;;  %v3644_v50 = vsel %vm345_vm6, %v3639_v41, 0 }
0x1982   :  { %4444 = vrot.lane.b32.xlu1 %v7489_v47, %s6087_s2 }
0x1997   :  { %v3498_v59 = vpop.xlane.xlu0 %3497 }
0x1998   :  { %5623 = vrcp.f32 %v3498_v59 }
0x1999   :  { %v3501_v25 = vpop.xlane.xlu1 %3500 }
0x199a   :  { %5625 = vrcp.f32 %v3501_v25  ;;  %v4325_v25 = vsel %vm345_vm6, %v7489_v47, 0 }
0x199f   :  { %v3629_v42 = vpop.xlane.xlu0 %3628 }
0x19a0   :  { %5627 = vrcp.f32 %v3629_v42 }
0x19a1   :  { %v3632_v21 = vpop.xlane.xlu1 %3631 }
0x19a2   :  { %v5624_v35 = vpop.eup %5623  ;;  %5629 = vrcp.f32 %v3632_v21 }
0x19a3   :  { %v3504_v11 = vmul.f32 %v5624_v35, %v7618_v16 }
0x19a4   :  { %v5626_v9 = vpop.eup %5625 }
0x19a5   :  { %v3505_v44 = vmul.f32 %v5626_v9, %v7622_v39 }
0x19a7   :  { %v3506_v29 = vpack.c.bf16 %v3505_v44, %v3504_v11  ;;  %v3754_v0 = vpop.xlane.xlu0 %3753 }
0x19a8   :  { %5631 = vrcp.f32 %v3754_v0 }
0x19a9   :  { %5265 = vmatmul.mubr.msk.bf16.vlgmr.msra.gmra.mrb[76].mxu0 %vm2029_vm3, %v3506_v29  ;;  %v3757_v4 = vpop.xlane.xlu1 %3756 }
0x19aa   :  { %v5628_v7 = vpop.eup %5627  ;;  %5275 = vmatpush3.bf16.msra.mxu0 %v3644_v50  ;;  %5633 = vrcp.f32 %v3757_v4  ;;  %5276 = vmatprep.mubr.msk.bf16.mxu0 %vm6082_vm0, %v6081_v1 }
0x19ab   :  { %5286 = vmatprep.subr.bf16.mxu0 %v6081_v1  ;;  %v3635_v16 = vmul.f32 %v5628_v7, %v7628_v46 }
0x19ac   :  { %v5630_v23 = vpop.eup %5629 }
0x19ad   :  { %v3636_v39 = vmul.f32 %v5630_v23, %v7632_v33 }
0x19af   :  { %v3878_v32 = vpop.xlane.xlu0 %3877  ;;  %v3637_v22 = vpack.c.bf16 %v3636_v39, %v3635_v16  ;;  %v4935_v16 = vld [vmem:[#allocation18 + $0x1] ss:$0 sm:$0xff] }
0x19b0   :  { %5635 = vrcp.f32 %v3878_v32 }
0x19b1   :  { %5277 = vmatmul.mubr.msk.bf16.vlgmr.msra.gmra.mrb[80].mxu0 %vm2029_vm3, %v3637_v22  ;;  %v3881_v26 = vpop.xlane.xlu1 %3880 }
0x19b2   :  { %v5632_v53 = vpop.eup %5631  ;;  %5287 = vmatpush3.bf16.msra.mxu0 %v3768_v43  ;;  %5637 = vrcp.f32 %v3881_v26  ;;  %5288 = vmatprep.mubr.msk.bf16.mxu0 %vm6082_vm0, %v6081_v1 }
0x19b3   :  { %5298 = vmatprep.subr.bf16.mxu0 %v6081_v1  ;;  %v3760_v33 = vmul.f32 %v5632_v53, %v7638_v61  ;;  %v3889_v56 = vpop.permute.xlu0 %3888 }
0x19b4   :  { %v5634_v46 = vpop.eup %5633  ;;  %v3894_v41 = vsel %vm345_vm6, %v3889_v56, 0 }
0x19b5   :  { %v3761_v5 = vmul.f32 %v5634_v46, %v7642_v10 }
0x19b7   :  { %v4055_v13 = vpop.xlane.xlu1 %4054  ;;  %v3762_v28 = vpack.c.bf16 %v3761_v5, %v3760_v33 }
0x19b8   :  { %5639 = vrcp.f32 %v4055_v13 }
0x19b9   :  { %5289 = vmatmul.mubr.msk.bf16.vlgmr.msra.gmra.mrb[84].mxu0 %vm2029_vm3, %v3762_v28 }
0x19ba   :  { %v5636_v58 = vpop.eup %5635  ;;  %5299 = vmatpush3.bf16.msra.mxu0 %v3894_v41  ;;  %5300 = vmatprep.mubr.msk.bf16.mxu0 %vm6082_vm0, %v6081_v1 }
0x19bb   :  { %v4058_v40 = vpop.xlane.xlu1 %4057  ;;  %5310 = vmatprep.subr.bf16.mxu0 %v6081_v1  ;;  %v3884_v61 = vmul.f32 %v5636_v58, %v7648_v60 }
0x19bc   :  { %v5638_v38 = vpop.eup %5637  ;;  %5641 = vrcp.f32 %v4058_v40 }
0x19bd   :  { %v3885_v10 = vmul.f32 %v5638_v38, %v7652_v8 }
0x19bf   :  { %v3886_v34 = vpack.c.bf16 %v3885_v10, %v3884_v61 }
0x19c1   :  { %5301 = vmatmul.mubr.msk.bf16.vlgmr.msra.gmra.mrb[88].mxu0 %vm2029_vm3, %v3886_v34  ;;  %v4183_v6 = vpop.xlane.xlu1 %4182 }
0x19c2   :  { %5312 = vmatprep.mubr.msk.bf16.mxu0 %vm6082_vm0, %v6081_v1  ;;  %v5640_v51 = vpop.eup %5639 }
0x19c3   :  { %v4061_v2 = vmul.f32 %v5640_v51, %v7658_v20 }
0x19c5   :  { %v4065_v30 = vpop.permute.xlu1 %4064 }
0x19c6   :  { %v5642_v27 = vpop.eup %5641  ;;  %v4070_v57 = vsel %vm345_vm6, %v4065_v30, 0 }
0x19c7   :  { %v4062_v18 = vmul.f32 %v5642_v27, %v7663_v62  ;;  %5311 = vmatpush3.bf16.msra.mxu0 %v4070_v57 }
0x19c8   :  { %5322 = vmatprep.subr.bf16.mxu0 %v6081_v1 }
0x19c9   :  { %v4063_v60 = vpack.c.bf16 %v4062_v18, %v4061_v2 }
0x19cb   :  { %5313 = vmatmul.mubr.msk.bf16.vlgmr.msra.gmra.mrb[92].mxu0 %vm2029_vm3, %v4063_v60 }
0x19cc   :  { %5324 = vmatprep.mubr.msk.bf16.mxu0 %vm6082_vm0, %v6081_v1 }
0x19e4   :  { %v4180_v8 = vpop.xlane.xlu0 %4179 }
0x19e5   :  { %5643 = vrcp.f32 %v4180_v8 }
0x19e6   :  { %5645 = vrcp.f32 %v4183_v6 }
0x19ef   :  { %v5644_v52 = vpop.eup %5643 }
0x19f0   :  { %v5646_v54 = vpop.eup %5645  ;;  %v4186_v20 = vmul.f32 %v5644_v52, %v7676_v19 }
0x19f1   :  { %v4187_v14 = vmul.f32 %v5646_v54, %v7667_v49 }
0x19f3   :  { %v4188_v59 = vpack.c.bf16 %v4187_v14, %v4186_v20 }
0x19f6   :  { %v4305_v48 = vpop.xlane.xlu1 %4304 }
0x19f8   :  { %v4435_v17 = vpop.xlane.xlu0 %4434 }
0x19fa   :  { %v4308_v63 = vpop.xlane.xlu1 %4307 }
0x19fb   :  { %5647 = vrcp.f32 %v4308_v63 }
0x19fc   :  { %5649 = vrcp.f32 %v4305_v48  ;;  %v4190_v62 = vpop.permute.xlu0 %4189 }
0x19fd   :  { %v4195_v37 = vsel %vm345_vm6, %v4190_v62, 0 }
0x19fe   :  { %5323 = vmatpush3.bf16.msra.mxu0 %v4195_v37  ;;  %v4438_v19 = vpop.xlane.xlu1 %4437 }
0x19ff   :  { %5334 = vmatprep.subr.bf16.mxu0 %v6081_v1  ;;  %5651 = vrcp.f32 %v4438_v19 }
0x1a00   :  { %5653 = vrcp.f32 %v4435_v17 }
0x1a01   :  { %5325 = vmatmul.mubr.msk.bf16.vlgmr.msra.gmra.mrb[92].mxu0 %vm2029_vm3, %v4188_v59 }
0x1a02   :  { %5335 = vmatpush3.bf16.msra.mxu0 %v4325_v25  ;;  %5336 = vmatprep.mubr.msk.bf16.mxu0 %vm6082_vm0, %v6081_v1  ;;  %v4445_v9 = vpop.permute.xlu1 %4444 }
0x1a03   :  { %5346 = vmatprep.subr.bf16.mxu0 %v6081_v1  ;;  %v4450_v44 = vsel %vm345_vm6, %v4445_v9, 0 }
0x1a05   :  { %v5648_v42 = vpop.eup %5647 }
0x1a06   :  { %v5650_v49 = vpop.eup %5649  ;;  %v4312_v21 = vmul.f32 %v5648_v42, %v7686_v55 }
0x1a07   :  { %v4311_v35 = vmul.f32 %v5650_v49, %v7684_v3 }
0x1a09   :  { %v4313_v11 = vpack.c.bf16 %v4312_v21, %v4311_v35  ;;  %v5652_v47 = vpop.eup %5651 }
0x1a0a   :  { %v5654_v29 = vpop.eup %5653  ;;  %v4442_v0 = vmul.f32 %v5652_v47, %v7696_v12 }
0x1a0b   :  { %v4441_v50 = vmul.f32 %v5654_v29, %v7690_v24 }
0x1a0d   :  { %5337 = vmatmul.mubr.msk.bf16.vlgmr.msra.gmra.mrb[92].mxu0 %vm2029_vm3, %v4313_v11  ;;  %v4443_v55 = vpack.c.bf16 %v4442_v0, %v4441_v50 }
0x1a0e   :  { %5347 = vmatpush3.bf16.msra.mxu0 %v4450_v44  ;;  %5348 = vmatprep.mubr.msk.bf16.mxu0 %vm6082_vm0, %v6081_v1  ;;  %vm4820_vm0 = vcmask 253952  }
0x1a19   :  { %5349 = vmatmul.mubr.msk.bf16.vlgmr.msra.gmra.mrb[92].mxu0 %vm2029_vm3, %v4443_v55 }
0x1a7c   :  { %v3549_v3 = vpop.f32.mrb[76].mxu0 }
0x1a7d   :  { %v5266_v4 = vpop.f32.mrb[77].mxu0  ;;  %v3562_v39 = vadd.f32 %v4935_v16, %v3549_v3 }
0x1a7e   :  { %v3552_v7 = vpop.f32.mrb[78].mxu0 }
0x1a7f   :  { %v5267_v23 = vpop.f32.mrb[79].mxu0  ;;  %v3563_v22 = vadd.f32 %v4935_v16, %v3552_v7 }
0x1a84   :  { %v3680_v32 = vpop.f32.mrb[80].mxu0 }
0x1a85   :  { %v3687_v43 = vadd.f32 %v3680_v32, %v3562_v39  ;;  %v5278_v26 = vpop.f32.mrb[81].mxu0  ;;  %v1873_v39 = vld [vmem:[#allocation21 + $0x20] sm:$0xff]  ;;  %v1874_v32 = vld [vmem:[#allocation21 + $0x28] sm:$0xff] }
0x1a86   :  { %v3683_v1 = vpop.f32.mrb[82].mxu0  ;;  %v1876_v26 = vld [vmem:[#allocation21 + $0x38] sm:$0xff] }
0x1a87   :  { %v3688_v53 = vadd.f32 %v3683_v1, %v3563_v22  ;;  %v5279_v46 = vpop.f32.mrb[83].mxu0  ;;  %v4560_v22 = vpack.c.bf16 %v1874_v32, %v1873_v39 }
0x1a89   :  { %5352 = vmatprep.subr.bf16.mxu1 %v4560_v22 }
0x1a8a   :  { %5353 = vmatpush3.bf16.msra.mxu1 %v4560_v22 }
0x1a8c   :  { %v3804_v33 = vpop.f32.mrb[84].mxu0 }
0x1a8d   :  { %v3811_v12 = vadd.f32 %v3804_v33, %v3687_v43  ;;  %v5290_v5 = vpop.f32.mrb[85].mxu0  ;;  %v1875_v43 = vld [vmem:[#allocation21 + $0x30] sm:$0xff] }
0x1a8e   :  { %v3807_v24 = vpop.f32.mrb[86].mxu0  ;;  %v4561_v1 = vpack.c.bf16 %v1876_v26, %v1875_v43 }
0x1a8f   :  { %v3812_v56 = vadd.f32 %v3807_v24, %v3688_v53  ;;  %v5291_v13 = vpop.f32.mrb[87].mxu0 }
0x1a90   :  { %5354 = vmatprep.subr.bf16.mxu1 %v4561_v1  ;;  %v4942_v13 = vld [vmem:[%s7862_s17 + $0x1] ss:$0 sm:$0xff] }
0x1a91   :  { %5355 = vmatpush3.bf16.msra.mxu1 %v4561_v1 }
0x1a94   :  { %v3930_v28 = vpop.f32.mrb[88].mxu0 }
0x1a95   :  { %v3937_v41 = vadd.f32 %v3930_v28, %v3811_v12  ;;  %v5302_v58 = vpop.f32.mrb[89].mxu0 }
0x1a96   :  { %v3933_v40 = vpop.f32.mrb[90].mxu0 }
0x1a97   :  { %v3939_v38 = vadd.f32 %v3937_v41, %v7448_v45  ;;  %v3938_v61 = vadd.f32 %v3933_v40, %v3812_v56  ;;  %v5303_v10 = vpop.f32.mrb[91].mxu0  ;;  %v4943_v41 = vld [vmem:[#allocation19 + $0x1] ss:$0 sm:$0xff] }
0x1a99   :  { %v3940_v34 = vadd.f32 %v3938_v61, %v7450_v31  ;;  %v3941_v6 = vsel %vm319_vm10, %v3939_v38, 0.0 }
0x1a9a   :  { %3942 = vadd.xlane.f32.xlu0 %v3941_v6 }
0x1a9b   :  { %v3944_v51 = vsel %vm323_vm11, %v3940_v34, 0.0 }
0x1a9c   :  { %3945 = vadd.xlane.f32.xlu1 %v3944_v51 }
0x1aec   :  { %v4486_v30 = vpop.f32.mrb[92].mxu0 }
0x1aed   :  { %v5374_v27 = vadd.f32 %v4935_v16, %v4486_v30  ;;  %v5350_v57 = vpop.f32.mrb[93].mxu0 }
0x1aee   :  { %v4489_v2 = vpop.f32.mrb[94].mxu0 }
0x1aef   :  { %v4497_v18 = vrot.slane %v5374_v27, 2  ;;  %v5375_v60 = vadd.f32 %v4935_v16, %v4489_v2  ;;  %v5351_v8 = vpop.f32.mrb[95].mxu0 }
0x1af1   :  { %v4503_v48 = vadd.f32 %v4497_v18, %v7450_v31  ;;  %v4498_v45 = vrot.slane %v5375_v60, 2 }
0x1af3   :  { %v4506_v52 = vsel %vm3054_vm5, %v4503_v48, 0.0  ;;  %v4499_v17 = vsel %vm937_vm12, %v4497_v18, %v4498_v45  ;;  %v4505_v20 = vadd.f32 %v4498_v45, %v7456_v15 }
0x1af4   :  { %4507 = vadd.xlane.f32.xlu0 %v4506_v52  ;;  %v4504_v54 = vadd.f32 %v4499_v17, %v7458_v36 }
0x1af5   :  { %v4512_v62 = vsel %vm3061_vm7, %v4505_v20, 0.0 }
0x1af6   :  { %v4509_v63 = vsel %vm319_vm10, %v4504_v54, 0.0 }
0x1af8   :  { %4510 = vadd.xlane.f32.xlu0 %v4509_v63 }
0x1afc   :  { %4513 = vadd.xlane.f32.xlu0 %v4512_v62 }
0x1b27   :  { %v3943_v14 = vpop.xlane.xlu0 %3942 }
0x1b28   :  { %v3947_v37 = vmul.f32 0.03125, %v3943_v14 }
0x1b29   :  { %v3946_v59 = vpop.xlane.xlu1 %3945 }
0x1b2a   :  { %v3949_v31 = vsub.f32 %v3939_v38, %v3947_v37  ;;  %v3948_v25 = vmul.f32 0.03125, %v3946_v59 }
0x1b2c   :  { %v3950_v19 = vsub.f32 %v3940_v34, %v3948_v25  ;;  %v3951_v42 = vmul.f32 %v3949_v31, %v3949_v31 }
0x1b2e   :  { %v3953_v49 = vsel %vm319_vm10, %v3951_v42, 0.0  ;;  %v3952_v21 = vmul.f32 %v3950_v19, %v3950_v19 }
0x1b2f   :  { %3954 = vadd.xlane.f32.xlu0 %v3953_v49 }
0x1b30   :  { %v3956_v36 = vsel %vm323_vm11, %v3952_v21, 0.0 }
0x1b33   :  { %3957 = vadd.xlane.f32.xlu0 %v3956_v36 }
0x1b81   :  { %v4508_v35 = vpop.xlane.xlu0 %4507 }
0x1b82   :  { %v4515_v15 = vmul.f32 0.03125, %v4508_v35  ;;  %v1887_v35 = vld [vmem:[%s7866_s21 + $0x40] sm:$0xff] }
0x1b84   :  { %v4518_v9 = vsub.f32 %v4503_v48, %v4515_v15  ;;  %v1888_v15 = vld [vmem:[%s7866_s21 + $0x48] sm:$0xff] }
0x1b85   :  { %v4511_v11 = vpop.xlane.xlu0 %4510 }
0x1b86   :  { %v4516_v44 = vmul.f32 0.03125, %v4511_v11  ;;  %v4521_v47 = vmul.f32 %v4518_v9, %v4518_v9  ;;  %v4661_v11 = vpack.c.bf16 %v1888_v15, %v1887_v35 }
0x1b88   :  { %v4519_v29 = vsub.f32 %v4504_v54, %v4516_v44  ;;  %v4524_v0 = vsel %vm3054_vm5, %v4521_v47, 0.0  ;;  %v1890_v44 = vld [vmem:[%s7866_s21 + $0x58] sm:$0xff]  ;;  %5360 = vmatprep.subr.bf16.mxu0 %v4661_v11 }
0x1b89   :  { %4525 = vadd.xlane.f32.xlu1 %v4524_v0  ;;  %v4514_v50 = vpop.xlane.xlu0 %4513  ;;  %v1892_v0 = vld [vmem:[%s7866_s21 + $0x68] sm:$0xff]  ;;  %5361 = vmatpush3.bf16.msra.mxu0 %v4661_v11 }
0x1b8a   :  { %v4517_v55 = vmul.f32 0.03125, %v4514_v50  ;;  %v4522_v3 = vmul.f32 %v4519_v29, %v4519_v29 }
0x1b8c   :  { %v4520_v4 = vsub.f32 %v4505_v20, %v4517_v55  ;;  %v4527_v7 = vsel %vm319_vm10, %v4522_v3, 0.0  ;;  %v1893_v55 = vld [vmem:[%s7866_s21 + $0x70] sm:$0xff]  ;;  %v1894_v3 = vld [vmem:[%s7866_s21 + $0x78] sm:$0xff] }
0x1b8d   :  { %4528 = vadd.xlane.f32.xlu0 %v4527_v7  ;;  %v4952_v7 = vld [vmem:[#allocation22 + $0x1] ss:$0 sm:$0xff] }
0x1b8e   :  { %v4523_v23 = vmul.f32 %v4520_v4, %v4520_v4 }
0x1b90   :  { %v4530_v16 = vsel %vm3061_vm7, %v4523_v23, 0.0 }
0x1b91   :  { %4531 = vadd.xlane.f32.xlu1 %v4530_v16 }
0x1bbc   :  { %v3955_v53 = vpop.xlane.xlu0 %3954 }
0x1bbd   :  { %v3959_v46 = vmul.f32 0.03125, %v3955_v53 }
0x1bbf   :  { %v3961_v33 = vadd.f32 1e-05, %v3959_v46 }
0x1bc0   :  { %v3958_v12 = vpop.xlane.xlu0 %3957 }
0x1bc1   :  { %5655 = vrsqrt.f32 %v3961_v33  ;;  %v3960_v5 = vmul.f32 0.03125, %v3958_v12 }
0x1bc3   :  { %v3962_v24 = vadd.f32 1e-05, %v3960_v5 }
0x1bc5   :  { %5657 = vrsqrt.f32 %v3962_v24 }
0x1bcb   :  { %v5656_v56 = vpop.eup %5655 }
0x1bcc   :  { %v3965_v28 = vmul.f32 %v5656_v56, %v3949_v31 }
0x1bce   :  { %v3973_v58 = vmul.f32 %v4942_v13, %v3965_v28 }
0x1bcf   :  { %v5658_v40 = vpop.eup %5657 }
0x1bd0   :  { %v3981_v38 = vadd.f32 %v4943_v41, %v3973_v58  ;;  %v3966_v61 = vmul.f32 %v5658_v40, %v3950_v19 }
0x1bd2   :  { %3983 = vst.msk [vmem:[#allocation2] sm:$0xff] %vm319_vm10, %v3981_v38  ;;  %v3974_v10 = vmul.f32 %v4942_v13, %v3966_v61 }
0x1bd4   :  { %v3982_v34 = vadd.f32 %v4943_v41, %v3974_v10 }
0x1bd6   :  { %3984 = vst.msk [vmem:[#allocation2 + $0x8] sm:$0x3f] %vm323_vm11, %v3982_v34 }
0x1bd9   :  { %v7780_v25 = vld [vmem:[#allocation2] sm:$0xff] }
0x1c16   :  { %v4526_v6 = vpop.xlane.xlu1 %4525 }
0x1c17   :  { %v4533_v51 = vmul.f32 0.03125, %v4526_v6 }
0x1c19   :  { %v4536_v30 = vadd.f32 1e-05, %v4533_v51 }
0x1c1a   :  { %v4529_v27 = vpop.xlane.xlu0 %4528 }
0x1c1b   :  { %5659 = vrsqrt.f32 %v4536_v30  ;;  %v4534_v57 = vmul.f32 0.03125, %v4529_v27 }
0x1c1d   :  { %v4537_v2 = vadd.f32 1e-05, %v4534_v57 }
0x1c1e   :  { %v4532_v18 = vpop.xlane.xlu1 %4531 }
0x1c1f   :  { %5661 = vrsqrt.f32 %v4537_v2  ;;  %v4535_v60 = vmul.f32 0.03125, %v4532_v18 }
0x1c21   :  { %v4538_v8 = vadd.f32 1e-05, %v4535_v60 }
0x1c23   :  { %5663 = vrsqrt.f32 %v4538_v8 }
0x1c25   :  { %v5660_v48 = vpop.eup %5659 }
0x1c26   :  { %v4542_v45 = vmul.f32 %v5660_v48, %v4518_v9  ;;  %v1889_v9 = vld [vmem:[%s7866_s21 + $0x50] sm:$0xff] }
0x1c27   :  { %v4662_v47 = vpack.c.bf16 %v1890_v44, %v1889_v9 }
0x1c28   :  { %v4545_v52 = vmul.f32 %v4942_v13, %v4542_v45 }
0x1c29   :  { %v5662_v17 = vpop.eup %5661  ;;  %5362 = vmatprep.subr.bf16.mxu0 %v4662_v47 }
0x1c2a   :  { %v4548_v54 = vadd.f32 %v4943_v41, %v4545_v52  ;;  %v4543_v63 = vmul.f32 %v5662_v17, %v4519_v29  ;;  %v1891_v29 = vld [vmem:[%s7866_s21 + $0x60] sm:$0xff]  ;;  %5363 = vmatpush3.bf16.msra.mxu0 %v4662_v47 }
0x1c2b   :  { %v4663_v50 = vpack.c.bf16 %v1892_v0, %v1891_v29 }
0x1c2c   :  { %4551 = vst.msk [vmem:[#allocation2 + $0x8] sm:$0xc0] %vm3054_vm5, %v4548_v54  ;;  %v4546_v20 = vmul.f32 %v4942_v13, %v4543_v63 }
0x1c2d   :  { %v5664_v62 = vpop.eup %5663  ;;  %5364 = vmatprep.subr.bf16.mxu0 %v4663_v50 }
0x1c2e   :  { %v4549_v14 = vadd.f32 %v4943_v41, %v4546_v20  ;;  %v4544_v37 = vmul.f32 %v5664_v62, %v4520_v4  ;;  %v4664_v4 = vpack.c.bf16 %v1894_v3, %v1893_v55  ;;  %5365 = vmatpush3.bf16.msra.mxu0 %v4663_v50 }
0x1c30   :  { %4552 = vst.msk [vmem:[#allocation2 + $0x10] sm:$0xff] %vm319_vm10, %v4549_v14  ;;  %v4547_v59 = vmul.f32 %v4942_v13, %v4544_v37  ;;  %5366 = vmatprep.subr.bf16.mxu0 %v4664_v4 }
0x1c32   :  { %v4550_v31 = vadd.f32 %v4943_v41, %v4547_v59  ;;  %5367 = vmatpush3.bf16.msra.mxu0 %v4664_v4 }
0x1c33   :  { %v7782_v19 = vld [vmem:[#allocation2 + $0x8] sm:$0xff] }
0x1c34   :  { %4553 = vst.msk [vmem:[#allocation2 + $0x18] sm:$0xf] %vm3061_vm7, %v4550_v31  ;;  %v4558_v42 = vpack.c.bf16 %v7782_v19, %v7780_v25 }
0x1c36   :  { %5356 = vmatprep.mubr.msk.bf16.mxu1 %vm319_vm10, %v4558_v42 }
0x1c37   :  { %v7788_v49 = vld [vmem:[#allocation2 + $0x10] sm:$0xff] }
0x1c3b   :  { %v7790_v21 = vld [vmem:[#allocation2 + $0x18] sm:$0xf] }
0x1c3c   :  { %v4559_v36 = vpack.c.bf16 %v7790_v21, %v7788_v49 }
0x1c3e   :  { %5357 = vmatmul.mubr.msk.bf16.vlgmr.msra.gmra.mrb[88].mxu1 %vm319_vm10, %v4559_v36  ;;  %v4957_v36 = vld [vmem:[#allocation24 + $0x1] ss:$0 sm:$0xff] }
0x1d11   :  { %v5358_v23 = vpop.f32.mrb[88].mxu1 }
0x1d12   :  { %v4617_v16 = vadd.f32 %v5358_v23, %v4952_v7  ;;  %v4608_v39 = vpop.f32.mrb[89].mxu1 }
0x1d13   :  { %v4609_v32 = vadd.f32 %v4952_v7, %v4608_v39  ;;  %v5359_v22 = vpop.f32.mrb[90].mxu1 }
0x1d14   :  { %v4629_v43 = vmul.f32 0.044715, %v4617_v16  ;;  %v4620_v26 = vadd.f32 %v5359_v22, %v4952_v7  ;;  %v4611_v1 = vpop.f32.mrb[91].mxu1  ;;  %v4625_v45 = vmul.f32 0.5, %v4617_v16 }
0x1d15   :  { %v4627_v53 = vmul.f32 0.044715, %v4609_v32  ;;  %v4612_v46 = vadd.f32 %v4952_v7, %v4611_v1  ;;  %v4623_v54 = vmul.f32 0.5, %v4609_v32 }
0x1d16   :  { %v4633_v33 = vmul.f32 %v4629_v43, %v4617_v16  ;;  %v4630_v12 = vmul.f32 0.044715, %v4620_v26  ;;  %v4626_v52 = vmul.f32 0.5, %v4620_v26 }
0x1d17   :  { %v4631_v5 = vmul.f32 %v4627_v53, %v4609_v32  ;;  %v4628_v24 = vmul.f32 0.044715, %v4612_v46  ;;  %v4624_v63 = vmul.f32 0.5, %v4612_v46 }
0x1d18   :  { %v4637_v56 = vmul.f32 %v4633_v33, %v4617_v16  ;;  %v4634_v13 = vmul.f32 %v4630_v12, %v4620_v26 }
0x1d19   :  { %v4635_v28 = vmul.f32 %v4631_v5, %v4609_v32  ;;  %v4632_v41 = vmul.f32 %v4628_v24, %v4612_v46 }
0x1d1a   :  { %v4641_v58 = vadd.f32 %v4637_v56, %v4617_v16  ;;  %v4638_v40 = vmul.f32 %v4634_v13, %v4620_v26 }
0x1d1b   :  { %v4639_v38 = vadd.f32 %v4635_v28, %v4609_v32  ;;  %v4636_v61 = vmul.f32 %v4632_v41, %v4612_v46 }
0x1d1c   :  { %v4645_v10 = vmul.f32 0.7978846, %v4641_v58  ;;  %v4642_v34 = vadd.f32 %v4638_v40, %v4620_v26 }
0x1d1d   :  { %v4643_v6 = vmul.f32 0.7978846, %v4639_v38  ;;  %v4640_v51 = vadd.f32 %v4636_v61, %v4612_v46 }
0x1d1e   :  { %5665 = vtanh.f32 %v4645_v10  ;;  %v4646_v30 = vmul.f32 0.7978846, %v4642_v34 }
0x1d1f   :  { %5667 = vtanh.f32 %v4643_v6  ;;  %v4644_v27 = vmul.f32 0.7978846, %v4640_v51 }
0x1d20   :  { %5669 = vtanh.f32 %v4646_v30 }
0x1d21   :  { %5671 = vtanh.f32 %v4644_v27 }
0x1d28   :  { %v5666_v57 = vpop.eup %5665 }
0x1d29   :  { %v5668_v2 = vpop.eup %5667  ;;  %v4653_v18 = vadd.f32 1.0, %v5666_v57 }
0x1d2a   :  { %v5670_v60 = vpop.eup %5669  ;;  %v4651_v8 = vadd.f32 1.0, %v5668_v2 }
0x1d2b   :  { %v5672_v48 = vpop.eup %5671  ;;  %v4654_v17 = vadd.f32 1.0, %v5670_v60  ;;  %v4657_v62 = vmul.f32 %v4653_v18, %v4625_v45 }
0x1d2c   :  { %v4652_v20 = vadd.f32 1.0, %v5672_v48  ;;  %v4655_v37 = vmul.f32 %v4651_v8, %v4623_v54  ;;  %v4958_v8 = vld [vmem:[#allocation25 + $0x1] ss:$0 sm:$0xff] }
0x1d2d   :  { %v4658_v14 = vmul.f32 %v4654_v17, %v4626_v52  ;;  %v4959_v17 = vld [vmem:[#allocation27 + $0x1] ss:$0 sm:$0xff] }
0x1d2e   :  { %v4656_v59 = vmul.f32 %v4652_v20, %v4624_v63 }
0x1d2f   :  { %v4660_v31 = vpack.c.bf16 %v4658_v14, %v4657_v62 }
0x1d30   :  { %v4659_v42 = vpack.c.bf16 %v4656_v59, %v4655_v37 }
0x1d32   :  { %5368 = vmatprep.mubr.msk.bf16.mxu0 %vm3215_vm8, %v4659_v42 }
0x1d33   :  { %5369 = vmatmul.mubr.msk.bf16.vlgmr.msra.gmra.mrb[96].mxu0 %vm3215_vm8, %v4660_v31 }
0x1e06   :  { %v5370_v35 = vpop.f32.mrb[96].mxu0 }
0x1e07   :  { %v4722_v15 = vadd.f32 %v5370_v35, %v7788_v49  ;;  %v4705_v9 = vpop.f32.mrb[97].mxu0 }
0x1e08   :  { %v4720_v11 = vadd.f32 %v4705_v9, %v7780_v25  ;;  %v5371_v44 = vpop.f32.mrb[98].mxu0 }
0x1e09   :  { %v4732_v47 = vadd.f32 %v4957_v36, %v4722_v15  ;;  %v4708_v29 = vpop.f32.mrb[99].mxu0  ;;  %v4723_v0 = vadd.f32 %v5371_v44, %v7790_v21 }
0x1e0a   :  { %v4721_v50 = vadd.f32 %v4708_v29, %v7782_v19  ;;  %v4730_v55 = vadd.f32 %v4957_v36, %v4720_v11 }
0x1e0b   :  { %v4740_v3 = vsel %vm319_vm10, %v4732_v47, 0.0  ;;  %v4733_v7 = vadd.f32 %v4957_v36, %v4723_v0 }
0x1e0c   :  { %v4731_v4 = vadd.f32 %v4957_v36, %v4721_v50  ;;  %4741 = vadd.xlane.f32.xlu1 %v4740_v3  ;;  %v4734_v49 = vsel %vm319_vm10, %v4730_v55, 0.0 }
0x1e0d   :  { %v4743_v25 = vsel %vm3061_vm7, %v4733_v7, 0.0 }
0x1e0e   :  { %v4737_v23 = vsel %vm319_vm10, %v4731_v4, 0.0 }
0x1e0f   :  { %4738 = vadd.xlane.f32.xlu0 %v4737_v23 }
0x1e10   :  { %4735 = vadd.xlane.f32.xlu1 %v4734_v49 }
0x1e13   :  { %4744 = vadd.xlane.f32.xlu0 %v4743_v25 }
0x1e99   :  { %v4742_v16 = vpop.xlane.xlu1 %4741 }
0x1e9a   :  { %v4748_v39 = vmul.f32 0.03125, %v4742_v16 }
0x1e9c   :  { %v4739_v21 = vpop.xlane.xlu0 %4738  ;;  %v4752_v26 = vsub.f32 %v4732_v47, %v4748_v39 }
0x1e9d   :  { %v4747_v32 = vmul.f32 0.03125, %v4739_v21  ;;  %v4736_v19 = vpop.xlane.xlu1 %4735 }
0x1e9e   :  { %v4746_v22 = vmul.f32 0.03125, %v4736_v19  ;;  %v4756_v13 = vmul.f32 %v4752_v26, %v4752_v26 }
0x1e9f   :  { %v4751_v43 = vsub.f32 %v4731_v4, %v4747_v32 }
0x1ea0   :  { %v4750_v1 = vsub.f32 %v4730_v55, %v4746_v22  ;;  %v4745_v53 = vpop.xlane.xlu0 %4744  ;;  %v4764_v58 = vsel %vm319_vm10, %v4756_v13, 0.0  ;;  %v4806_v22 = vld [vmem:[#allocation28] sm:$0x1]  ;;  %v4807_v13 = vld [vmem:[#allocation4] sm:$0x1] }
0x1ea1   :  { %v4749_v46 = vmul.f32 0.03125, %v4745_v53  ;;  %v4755_v33 = vmul.f32 %v4751_v43, %v4751_v43 }
0x1ea2   :  { %v4754_v12 = vmul.f32 %v4750_v1, %v4750_v1 }
0x1ea3   :  { %v4753_v5 = vsub.f32 %v4733_v7, %v4749_v46  ;;  %v4761_v24 = vsel %vm319_vm10, %v4755_v33, 0.0 }
0x1ea4   :  { %4762 = vadd.xlane.f32.xlu1 %v4761_v24  ;;  %v4758_v56 = vsel %vm319_vm10, %v4754_v12, 0.0 }
0x1ea5   :  { %4759 = vadd.xlane.f32.xlu0 %v4758_v56  ;;  %v4757_v28 = vmul.f32 %v4753_v5, %v4753_v5 }
0x1ea7   :  { %v4767_v41 = vsel %vm3061_vm7, %v4757_v28, 0.0 }
0x1ea8   :  { %4768 = vadd.xlane.f32.xlu1 %v4767_v41 }
0x1ea9   :  { %4765 = vadd.xlane.f32.xlu0 %v4764_v58 }
0x1f31   :  { %v4763_v40 = vpop.xlane.xlu1 %4762 }
0x1f32   :  { %v4771_v38 = vmul.f32 0.03125, %v4763_v40  ;;  %v4760_v61 = vpop.xlane.xlu0 %4759 }
0x1f33   :  { %v4770_v10 = vmul.f32 0.03125, %v4760_v61 }
0x1f34   :  { %v4775_v34 = vadd.f32 1e-05, %v4771_v38 }
0x1f35   :  { %v4774_v6 = vadd.f32 1e-05, %v4770_v10  ;;  %v4769_v51 = vpop.xlane.xlu1 %4768 }
0x1f36   :  { %5673 = vrsqrt.f32 %v4775_v34  ;;  %v4773_v30 = vmul.f32 0.03125, %v4769_v51  ;;  %v4766_v27 = vpop.xlane.xlu0 %4765 }
0x1f37   :  { %5675 = vrsqrt.f32 %v4774_v6  ;;  %v4772_v57 = vmul.f32 0.03125, %v4766_v27 }
0x1f38   :  { %v4777_v2 = vadd.f32 1e-05, %v4773_v30 }
0x1f39   :  { %v4776_v18 = vadd.f32 1e-05, %v4772_v57 }
0x1f3a   :  { %5677 = vrsqrt.f32 %v4777_v2 }
0x1f3b   :  { %5679 = vrsqrt.f32 %v4776_v18 }
0x1f40   :  { %v5674_v60 = vpop.eup %5673 }
0x1f41   :  { %v5676_v48 = vpop.eup %5675  ;;  %v4783_v45 = vmul.f32 %v5674_v60, %v4751_v43 }
0x1f42   :  { %v4782_v52 = vmul.f32 %v5676_v48, %v4750_v1 }
0x1f43   :  { %v4793_v54 = vmul.f32 %v4958_v8, %v4783_v45 }
0x1f44   :  { %v5678_v63 = vpop.eup %5677  ;;  %v4792_v20 = vmul.f32 %v4958_v8, %v4782_v52 }
0x1f45   :  { %v5680_v62 = vpop.eup %5679  ;;  %v4785_v14 = vmul.f32 %v5678_v63, %v4753_v5  ;;  %v4803_v37 = vadd.f32 %v4959_v17, %v4793_v54 }
0x1f46   :  { %v4784_v59 = vmul.f32 %v5680_v62, %v4752_v26  ;;  %v4802_v31 = vadd.f32 %v4959_v17, %v4792_v20 }
0x1f47   :  { %v4795_v42 = vmul.f32 %v4958_v8, %v4785_v14  ;;  %v4809_v36 = vsel %vm323_vm11, %v4803_v37, 0.0  ;;  %v4836_v50 = vrot.slane %v4803_v37, 6 }
0x1f48   :  { %v4794_v35 = vmul.f32 %v4958_v8, %v4784_v59  ;;  %v4808_v15 = vsel %vm319_vm10, %v4802_v31, 0.0 }
0x1f49   :  { %v4805_v9 = vadd.f32 %v4959_v17, %v4795_v42  ;;  %v4810_v11 = vadd.f32 %v4809_v36, %v4808_v15 }
0x1f4a   :  { %v4804_v44 = vadd.f32 %v4959_v17, %v4794_v35 }
0x1f4b   :  { %v4839_v47 = vrot.slane %v4805_v9, 6  ;;  %v4811_v29 = vrot.slane %v4810_v11, 4 }
0x1f4c   :  { %v4837_v0 = vrot.slane %v4804_v44, 6 }
0x1f4d   :  { %v4812_v55 = vadd.f32 %v4811_v29, %v4810_v11 }
0x1f4e   :  { %v4838_v3 = vsel %vm355_vm2, %v4836_v50, %v4837_v0  ;;  %v4840_v4 = vsel %vm355_vm2, %v4837_v0, %v4839_v47  ;;  %vm4831_vm2 = vcmask 0  }
0x1f4f   :  { %v4813_v7 = vrot.slane %v4812_v55, 2  ;;  %v4843_v23 = vsel %vm319_vm10, %v4838_v3, 0.0  ;;  %v4844_v49 = vsel %vm323_vm11, %v4840_v4, 0.0 }
0x1f50   :  { %v4845_v25 = vadd.f32 %v4844_v49, %v4843_v23 }
0x1f51   :  { %v4814_v16 = vadd.f32 %v4813_v7, %v4812_v55 }
0x1f52   :  { %v4846_v39 = vrot.slane %v4845_v25, 4 }
0x1f53   :  { %v4815_v21 = vrot.slane %v4814_v16, 1 }
0x1f54   :  { %v4847_v32 = vadd.f32 %v4846_v39, %v4845_v25 }
0x1f55   :  { %v4816_v19 = vadd.f32 %v4815_v21, %v4814_v16 }
0x1f56   :  { %v4848_v43 = vrot.slane %v4847_v32, 2 }
0x1f57   :  { %v4818_v26 = vmul.f32 0.071428575, %v4816_v19 }
0x1f58   :  { %v4849_v1 = vadd.f32 %v4848_v43, %v4847_v32 }
0x1f59   :  { %v4819_v53 = vmul.f32 %v4818_v26, %v4806_v22 }
0x1f5a   :  { %v4850_v46 = vrot.slane %v4849_v1, 1 }
0x1f5b   :  { %v4821_v33 = vsel %vm4820_vm0, %v4819_v53, 0.0 }
0x1f5c   :  { %4822 = vadd.xlane.f32.xlu0 %v4821_v33  ;;  %v4851_v12 = vadd.f32 %v4850_v46, %v4849_v1 }
0x1f5e   :  { %v4852_v5 = vmul.f32 0.071428575, %v4851_v12 }
0x1f60   :  { %v4853_v24 = vmul.f32 %v4852_v5, %v4806_v22 }
0x1f62   :  { %v4854_v56 = vsel %vm4820_vm0, %v4853_v24, 0.0 }
0x1f63   :  { %4855 = vadd.xlane.f32.xlu1 %v4854_v56 }
0x1fe9   :  { %v4823_v28 = vpop.xlane.xlu0 %4822 }
0x1fea   :  { %v4824_v41 = vadd.f32 %v4823_v28, %v4807_v13 }
0x1fec   :  { %v4825_v58 = vsub.f32 0.0, %v4824_v41 }
0x1fee   :  { %v4826_v40 = vmul.f32 1.442695, %v4825_v58 }
0x1ff0   :  { %5681 = vpow2.f32 %v4826_v40  ;;  %v4856_v38 = vpop.xlane.xlu1 %4855 }
0x1ff1   :  { %v4857_v61 = vadd.f32 %v4856_v38, %v4807_v13 }
0x1ff3   :  { %v4858_v10 = vsub.f32 0.0, %v4857_v61 }
0x1ff5   :  { %v4859_v34 = vmul.f32 1.442695, %v4858_v10 }
0x1ff7   :  { %5683 = vpow2.f32 %v4859_v34 }
0x1ffa   :  { %v5682_v6 = vpop.eup %5681 }
0x1ffb   :  { %v4828_v51 = vadd.f32 1.0, %v5682_v6 }
0x1ffd   :  { %5685 = vrcp.f32 %v4828_v51 }
0x2001   :  { %v5684_v30 = vpop.eup %5683 }
0x2002   :  { %v4861_v27 = vadd.f32 1.0, %v5684_v30 }
0x2004   :  { %5687 = vrcp.f32 %v4861_v27 }
0x2007   :  { %v5686_v57 = vpop.eup %5685 }
0x2008   :  { %4832 = vst.msk [vmem:[%s7908_s30] sm:$0x1] %vm4831_vm2, %v5686_v57 }
0x200e   :  { %v5688_v2 = vpop.eup %5687 }
0x200f   :  { %4864 = vst.msk [vmem:[%s7908_s30 + $0x1] sm:$0x1] %vm4831_vm2, %v5688_v2 }
0x2010   :  { %4869 = vsyncpa [#allocation6], 1 }
0x2011   :  { %4870 = vsyncpa [#allocation8], 1 }
0x2012   :  { %4871 = vsyncpa [#allocation11], 1 }
0x2013   :  { %4872 = vsyncpa [#allocation14], 1 }
0x2014   :  { %4873 = vsyncpa [#allocation17], 1 }
0x2015   :  { %4874 = vsyncpa [#allocation20], 1 }
0x2016   :  { %4875 = vsyncpa [#allocation23], 1 }
0x2017   :  { %4876 = vsyncpa [#allocation26], 1 }
0x2018   :  { %4877 = vsyncpa [#allocation29], 1 }

</bundles_post_ra>
